<compile_context>
chip_gen: v6e
topology: v6e:2x2x1
jax: 0.10.0
libtpu: 0.0.40
codegen_flags: <defaults>
</compile_context>

<pallas_src>
import functools

import jax
import jax.numpy as jnp
import numpy as np
from jax.experimental import pallas as pl
from jax.experimental.pallas import tpu as pltpu


# --------------------------------------------------------------------------
# chip-aware configuration
# --------------------------------------------------------------------------
def _tpu_config():
    kind = ""
    try:
        kind = jax.devices()[0].device_kind.lower()
    except Exception:
        pass
    is_v7 = any(s in kind for s in ("v7", "tpu7", "7x"))
    is_v6 = ("v6" in kind) or ("trillium" in kind)
    try:
        vmem_phys = int(pltpu.get_tpu_info().vmem_capacity_bytes)
    except Exception:
        vmem_phys = (64 if is_v7 else 128) * 1024 * 1024
    vmem_limit = int(vmem_phys * 0.75)      # ~25% headroom for compiler scratch
    tile_budget = int(vmem_limit * 0.75)    # extra slack for pipeline buffers
    return {
        "kind": kind,
        "vmem_limit": vmem_limit,
        "tile_budget": tile_budget,
        "bf16_ew": is_v6 or is_v7,          # bf16 VPU/EUP only on v6e / v7x
        "two_cores": is_v7,                 # v7x: 2 TensorCores per chip
    }


# --------------------------------------------------------------------------
# kernel
# --------------------------------------------------------------------------
def _mva_lstm_kernel(x_ref, w0t_ref, w0s_ref, b0t_ref, wrt_ref, brt_ref,
                     fcw_ref, fcb_ref, y_ref, attn_ref, imp_ref,
                     *, num_layers, hidden, n_timepoint, ew_dtype):
    H = hidden
    f32 = jnp.float32
    ew = ew_dtype

    x = x_ref[...]                                   # (G, tb) f32
    G, tb = x.shape

    # ------------- full-input encoding (1/G of the work) -> h_all (H, tb), f32
    def fused_cols(g):                               # g: (3H, tb) packed [i|g|o]
        gi, gg, go = g[0:H, :], g[H:2 * H, :], g[2 * H:3 * H, :]
        return jax.nn.sigmoid(go) * jnp.tanh(jax.nn.sigmoid(gi) * jnp.tanh(gg))

    g_all = (jnp.dot(w0t_ref[...].astype(f32), x, preferred_element_type=f32)
             + b0t_ref[...].astype(f32))
    h_all = fused_cols(g_all)
    for l in range(num_layers - 1):
        g_all = (jnp.dot(wrt_ref[l].astype(f32), h_all, preferred_element_type=f32)
                 + brt_ref[l].astype(f32))
        h_all = fused_cols(g_all)

    # ------------- per-gene masked encodings, vectorised over genes ----------
    # Masked input keeps only gene g, so the layer-0 pre-activation is the
    # rank-1 contribution  gate[g, :, t] = x[g, t] * W0_gate[g, :] + b_gate.
    # Layout (G, H, tb): tb on lanes -> lane-dense EUP/VPU work.
    x_ew = x.astype(ew)
    b0t = b0t_ref[...].astype(ew)                    # (3H, 1)

    def gate0(k):                                    # (G, H, tb), ew dtype
        w = w0s_ref[k]                               # (G, H)
        b = b0t[k * H:(k + 1) * H, :]                # (H, 1)
        return w[:, :, None] * x_ew[:, None, :] + b[None, :, :]

    c = jax.nn.sigmoid(gate0(0)) * jnp.tanh(gate0(1))
    h = jax.nn.sigmoid(gate0(2)) * jnp.tanh(c)       # (G, H, tb) ew

    for l in range(num_layers - 1):
        wl = wrt_ref[l]                              # (3H, H) ew
        bl = brt_ref[l]                              # (3H, 1) ew

        def gmm(k, wl=wl, bl=bl, h=h):               # one gate at a time ->
            wb = jnp.broadcast_to(wl[k * H:(k + 1) * H, :], (G, H, H))
            g = jnp.einsum("gkh,ght->gkt", wb, h,
                           preferred_element_type=f32)        # batched MXU, f32 acc
            g = g + bl[k * H:(k + 1) * H, :][None, :, :].astype(f32)
            return g.astype(ew)                       # cast after bias add

        c = jax.nn.sigmoid(gmm(0)) * jnp.tanh(gmm(1))
        h = jax.nn.sigmoid(gmm(2)) * jnp.tanh(c)      # (G, H, tb) ew

    # ------------- attention over genes per timepoint (f32) ------------------
    ph = h.astype(f32)                                           # (G, H, tb)
    scores = jnp.sum(ph * h_all[None, :, :], axis=1)             # (G, tb)
    scores = scores - jnp.max(scores, axis=0, keepdims=True)
    e = jnp.exp(scores)
    a = e / jnp.sum(e, axis=0, keepdims=True)                    # softmax over genes

    # width-1 fc folded into the attention-weighted sum (VPU + sublane reduce)
    proj = jnp.sum(ph * fcw_ref[...][None, :, :], axis=1)        # (G, tb)
    y = jnp.sum(a * proj, axis=0, keepdims=True) + fcb_ref[...]  # (1, tb)

    y_ref[...] = y
    attn_ref[...] = a

    # per-block partial sums for imp_score; mask padded tail columns so that
    # garbage in the last (T % tb) columns never leaks into the reduction.
    t0 = pl.program_id(0) * tb
    cols = jax.lax.broadcasted_iota(jnp.int32, (G, tb), 1) + t0
    a_valid = jnp.where(cols < n_timepoint, a, 0.0)
    imp_ref[...] = jnp.sum(a_valid, axis=1, keepdims=True)       # (G, 1)


# --------------------------------------------------------------------------
# tiling
# --------------------------------------------------------------------------
def _pick_t_block(T, G, H, L, ew_bytes, budget_bytes, two_cores):
    """Largest lane-dense timepoint tile whose resident state fits the budget."""
    # single-buffered weights + broadcast weight slab for the batched matmul
    fixed = (8 * G * H + max(L - 1, 1) * 3 * H * H + 2 * G * H * H + 16 * H) * 4
    # peak bytes per timepoint column: a handful of (G, H) slabs in the
    # element-wise dtype plus f32 score/attention rows and pipeline buffers.
    per_t = G * H * (14 if ew_bytes == 2 else 22) + (12 * G + 10 * H) * 4
    avail = max(budget_bytes - fixed, 0)
    tb = avail // max(per_t, 1)
    if tb >= T:
        tb = T
    else:
        tb = (tb // 128) * 128
        if tb == 0:
            # Even a 128-wide tile busts the budget (very large n_gene).
            # TODO(synk): gene-blocked online-softmax variant so resident state
            # is O(G_tile * tb * H); until then take the smallest lane-dense
            # tile and rely on the raised vmem limit.
            tb = min(T, 128)
    if two_cores and T >= 256:
        # give the "parallel" grid axis >= 2 blocks so both v7x cores get work
        half = ((T + 1) // 2 + 127) // 128 * 128
        tb = min(tb, max(half, 128))
    return max(tb, 1)


# --------------------------------------------------------------------------
# pallas_call wrapper
# --------------------------------------------------------------------------
def _run(x, params, ew_dtype, single_buffer_weights, cfg, max_timepoint_block):
    G, T = x.shape
    H = params["fcw"].shape[0]
    L = params["num_layers"]
    Lm1 = max(L - 1, 1)
    ew_bytes = 2 if ew_dtype == jnp.bfloat16 else 4

    tb = _pick_t_block(T, G, H, L, ew_bytes, cfg["tile_budget"], cfg["two_cores"])
    if max_timepoint_block is not None:
        tb = min(tb, max(int(max_timepoint_block), 1))
    if tb >= T:
        tb = T
    else:
        tb = max((tb // 128) * 128, min(128, T))    # multiple of 128 or full T
        if tb >= T:
            tb = T
    nblk = pl.cdiv(T, tb)

    w0t = params["w0t"].astype(ew_dtype)
    w0s = params["w0s"].astype(ew_dtype)
    b0t = params["b0t"].astype(ew_dtype)
    wrt = params["wrt"].astype(ew_dtype)
    brt = params["brt"].astype(ew_dtype)
    fcw = params["fcw"]            # stays f32 (used in the f32 attention epilogue)
    fcb = params["fcb"]

    def const_spec(shape, index_map):
        # Constant-index weights: single buffer them (no re-DMA ever needed).
        if single_buffer_weights:
            return pl.BlockSpec(shape, index_map, pipeline_mode=pl.Buffered(1))
        return pl.BlockSpec(shape, index_map)

    kernel = functools.partial(_mva_lstm_kernel, num_layers=L, hidden=H,
                               n_timepoint=T, ew_dtype=ew_dtype)
    grid_spec = pltpu.PrefetchScalarGridSpec(
        num_scalar_prefetch=0,
        grid=(nblk,),
        in_specs=[
            pl.BlockSpec((G, tb), lambda i: (0, i)),               # x (G, T)
            const_spec((3 * H, G), lambda i: (0, 0)),              # W0^T  [i|g|o]
            const_spec((3, G, H), lambda i: (0, 0, 0)),            # W0 per gate
            const_spec((3 * H, 1), lambda i: (0, 0)),              # b0 column
            const_spec((Lm1, 3 * H, H), lambda i: (0, 0, 0)),      # upper-layer W
            const_spec((Lm1, 3 * H, 1), lambda i: (0, 0, 0)),      # upper-layer b
            const_spec((H, 1), lambda i: (0, 0)),                  # fc weight col
            const_spec((1, 1), lambda i: (0, 0)),                  # fc bias
        ],
        out_specs=(
            pl.BlockSpec((1, tb), lambda i: (0, i)),               # y    (lane-dense)
            pl.BlockSpec((G, tb), lambda i: (0, i)),               # attn (lane-dense)
            pl.BlockSpec((G, 1), lambda i: (0, i)),                # imp partial sums
        ),
    )
    return pl.pallas_call(
        kernel,
        grid_spec=grid_spec,
        out_shape=(
            jax.ShapeDtypeStruct((1, T), jnp.float32),
            jax.ShapeDtypeStruct((G, T), jnp.float32),
            jax.ShapeDtypeStruct((G, nblk), jnp.float32),
        ),
        compiler_params=pltpu.CompilerParams(
            dimension_semantics=("parallel",),
            vmem_limit_bytes=cfg["vmem_limit"],
        ),
    )(x, w0t, w0s, b0t, wrt, brt, fcw, fcb)


def multi_view_attention_lstm_regressor(x, params, *, max_timepoint_block=None):
    """x: (n_gene, n_timepoint) f32. Returns (y_pred (T,), attn (G, T), imp (G,))."""
    G, T = x.shape
    cfg = _tpu_config()
    want = jnp.bfloat16 if cfg["bf16_ew"] else jnp.float32
    attempts = [(want, True), (want, False)]
    if want != jnp.float32:
        attempts += [(jnp.float32, True), (jnp.float32, False)]
    last_err = None
    for ew_dtype, single_buf in attempts:
        try:
            y, attn, imp_part = _run(x, params, ew_dtype, single_buf, cfg,
                                     max_timepoint_block)
            break
        except Exception as err:   # conservative fall-back (buffering / dtype)
            last_err = err
    else:
        raise last_err
    imp = jnp.sum(imp_part, axis=1) / T       # tiny (G, nblk) read, not (G, T)
    return y.reshape(T), attn, imp


# --------------------------------------------------------------------------
# parameter setup (glue), gates packed as [i | g | o] (forget gate dropped)
# --------------------------------------------------------------------------
def init_params(key, input_size, hidden_size, num_layers):
    H = hidden_size
    k = 1.0 / np.sqrt(H)
    keys = jax.random.split(key, 3 * num_layers + 2)
    GATES = (0, 2, 3)                        # PyTorch order i, f, g, o

    def sel_rows(w):                         # (4H, D) -> (3H, D)
        return jnp.concatenate([w[g * H:(g + 1) * H, :] for g in GATES], axis=0)

    def sel_vec(b):                          # (4H,) -> (3H,)
        return jnp.concatenate([b[g * H:(g + 1) * H] for g in GATES])

    w_ih0 = jax.random.uniform(keys[0], (4 * H, input_size), jnp.float32, -k, k)
    b0f = (jax.random.uniform(keys[1], (4 * H,), jnp.float32, -k, k)
           + jax.random.uniform(keys[2], (4 * H,), jnp.float32, -k, k))   # b_ih + b_hh
    w0t = sel_rows(w_ih0)                                    # (3H, G)
    b0t = sel_vec(b0f).reshape(3 * H, 1)                     # (3H, 1)
    w0s = jnp.stack([w_ih0[g * H:(g + 1) * H, :].T for g in GATES])   # (3, G, H)

    wrt_list, brt_list = [], []
    for l in range(1, num_layers):
        w_ih = jax.random.uniform(keys[3 * l], (4 * H, H), jnp.float32, -k, k)
        bl = (jax.random.uniform(keys[3 * l + 1], (4 * H,), jnp.float32, -k, k)
              + jax.random.uniform(keys[3 * l + 2], (4 * H,), jnp.float32, -k, k))
        wrt_list.append(sel_rows(w_ih))
        brt_list.append(sel_vec(bl).reshape(3 * H, 1))
    if num_layers > 1:
        wrt = jnp.stack(wrt_list)                            # (L-1, 3H, H)
        brt = jnp.stack(brt_list)                            # (L-1, 3H, 1)
    else:
        wrt = jnp.zeros((1, 3 * H, H), jnp.float32)          # dummies, never read
        brt = jnp.zeros((1, 3 * H, 1), jnp.float32)

    fcw = jax.random.uniform(keys[-2], (1, H), jnp.float32, -k, k).T   # (H, 1)
    fcb = jax.random.uniform(keys[-1], (1,), jnp.float32, -k, k).reshape(1, 1)
    return {"w0t": w0t, "w0s": w0s, "b0t": b0t, "wrt": wrt, "brt": brt,
            "fcw": fcw, "fcb": fcb, "num_layers": num_layers}


# --------------------------------------------------------------------------
# pure-JAX reference (f32, explicit per-gene masked encode)
# --------------------------------------------------------------------------
def ref_forward(x, params):
    G, T = x.shape
    L = params["num_layers"]
    H = params["fcw"].shape[0]
    w0t, b0t, wrt, brt = params["w0t"], params["b0t"], params["wrt"], params["brt"]

    def fused(g):                            # (3H, N) -> (H, N)
        gi, gg, go = g[:H], g[H:2 * H], g[2 * H:]
        return jax.nn.sigmoid(go) * jnp.tanh(jax.nn.sigmoid(gi) * jnp.tanh(gg))

    def encode(inp):                         # (G, T) -> (H, T)
        h = fused(w0t @ inp + b0t)
        for l in range(L - 1):
            h = fused(wrt[l] @ h + brt[l])
        return h

    h_all = encode(x)
    h = jnp.stack([encode(jnp.zeros_like(x).at[g].set(x[g])) for g in range(G)])
    scores = jnp.einsum("ght,ht->gt", h, h_all)
    a = jax.nn.softmax(scores, axis=0)
    h_att = jnp.einsum("gt,ght->ht", a, h)
    y = params["fcw"][:, 0] @ h_att + params["fcb"][0, 0]
    imp = jnp.sum(a, axis=1) / T
    return y, a, imp


if __name__ == "__main__":
    n_gene, n_timepoint, hidden_size, num_layers = 8, 16, 32, 2   # input_size == n_gene

    key = jax.random.PRNGKey(0)
    kx, kp, kx2 = jax.random.split(key, 3)
    x = jax.random.normal(kx, (n_gene, n_timepoint), jnp.float32)
    params = init_params(kp, n_gene, hidden_size, num_layers)

    cfg = _tpu_config()
    tol = 2e-2 if cfg["bf16_ew"] else 2e-3   # bf16 path (v6e/v7x) is looser

    y_pred, attn, imp = multi_view_attention_lstm_regressor(x, params)
    jax.block_until_ready((y_pred, attn, imp))
    y_ref, attn_ref, imp_ref = ref_forward(x, params)

    assert y_pred.shape == (n_timepoint,)
    assert attn.shape == (n_gene, n_timepoint)
    assert imp.shape == (n_gene,)
    assert not np.isnan(np.asarray(attn)).any()
    assert np.allclose(np.asarray(y_pred), np.asarray(y_ref), atol=tol, rtol=tol)
    assert np.allclose(np.asarray(attn), np.asarray(attn_ref), atol=tol, rtol=tol)
    assert np.allclose(np.asarray(imp), np.asarray(imp_ref), atol=tol, rtol=tol)

    # multi-block / padded-tail test: T not a multiple of the tile width, so the
    # last block carries garbage columns that must not leak into imp_score.
    T2 = 200
    x2 = jax.random.normal(kx2, (n_gene, T2), jnp.float32)
    y2, a2, i2 = multi_view_attention_lstm_regressor(x2, params,
                                                     max_timepoint_block=128)
    jax.block_until_ready((y2, a2, i2))
    y2r, a2r, i2r = ref_forward(x2, params)
    assert not np.isnan(np.asarray(y2)).any() and not np.isnan(np.asarray(a2)).any()
    assert np.allclose(np.asarray(y2), np.asarray(y2r), atol=tol, rtol=tol)
    assert np.allclose(np.asarray(a2), np.asarray(a2r), atol=tol, rtol=tol)
    assert np.allclose(np.asarray(i2), np.asarray(i2r), atol=tol, rtol=tol)

    print("KERNEL_OK")
</pallas_src>

<mosaic_0001>
module attributes {stable_mosaic.version = 11 : i64} {
  func.func @_mva_lstm_kernel(%arg0: i32, %arg1: memref<8x16xf32, #tpu.memory_space<vmem>>, %arg2: memref<96x8xf32, #tpu.memory_space<vmem>>, %arg3: memref<3x8x32xf32, #tpu.memory_space<vmem>>, %arg4: memref<96x1xf32, #tpu.memory_space<vmem>>, %arg5: memref<1x96x32xf32, #tpu.memory_space<vmem>>, %arg6: memref<1x96x1xf32, #tpu.memory_space<vmem>>, %arg7: memref<32x1xf32, #tpu.memory_space<vmem>>, %arg8: memref<1x1xf32, #tpu.memory_space<vmem>>, %arg9: memref<1x16xf32, #tpu.memory_space<vmem>>, %arg10: memref<8x16xf32, #tpu.memory_space<vmem>>, %arg11: memref<8x1xf32, #tpu.memory_space<vmem>>) attributes {dimension_semantics = [#tpu.dimension_semantics<parallel>], iteration_bounds = array<i64: 1>, scalar_prefetch = 0 : i64, scratch_operands = 0 : i64, tpu.core_type = #tpu.core_type<tc>, window_params = [{transform_indices = @transform_0, window_bounds = array<i64: 8, 16>}, {pipeline_mode = #tpu.pipeline_mode<synchronous>, transform_indices = @transform_1, window_bounds = array<i64: 96, 8>}, {pipeline_mode = #tpu.pipeline_mode<synchronous>, transform_indices = @transform_2, window_bounds = array<i64: 3, 8, 32>}, {pipeline_mode = #tpu.pipeline_mode<synchronous>, transform_indices = @transform_3, window_bounds = array<i64: 96, 1>}, {pipeline_mode = #tpu.pipeline_mode<synchronous>, transform_indices = @transform_4, window_bounds = array<i64: 1, 96, 32>}, {pipeline_mode = #tpu.pipeline_mode<synchronous>, transform_indices = @transform_5, window_bounds = array<i64: 1, 96, 1>}, {pipeline_mode = #tpu.pipeline_mode<synchronous>, transform_indices = @transform_6, window_bounds = array<i64: 32, 1>}, {pipeline_mode = #tpu.pipeline_mode<synchronous>, transform_indices = @transform_7, window_bounds = array<i64: 1, 1>}, {transform_indices = @transform_8, window_bounds = array<i64: 1, 16>}, {transform_indices = @transform_9, window_bounds = array<i64: 8, 16>}, {transform_indices = @transform_10, window_bounds = array<i64: 8, 1>}]} {
    %c0 = arith.constant 0 : index
    %c0_0 = arith.constant 0 : index
    %0 = vector.load %arg1[%c0, %c0_0] : memref<8x16xf32, #tpu.memory_space<vmem>>, vector<8x16xf32>
    %c0_1 = arith.constant 0 : index
    %c0_2 = arith.constant 0 : index
    %1 = vector.load %arg2[%c0_1, %c0_2] : memref<96x8xf32, #tpu.memory_space<vmem>>, vector<96x8xf32>
    %cst = arith.constant dense<0.000000e+00> : vector<96x16xf32>
    %2 = tpu.matmul %1, %0, %cst {dimension_numbers = #tpu.dot_dimension_numbers<[1], [0], [0], [1], [0, 0, 1, 1], [], []>} : vector<96x8xf32>, vector<8x16xf32>, vector<96x16xf32> -> vector<96x16xf32>
    %c0_3 = arith.constant 0 : index
    %c0_4 = arith.constant 0 : index
    %3 = vector.load %arg4[%c0_3, %c0_4] : memref<96x1xf32, #tpu.memory_space<vmem>>, vector<96x1xf32>
    %4 = vector.broadcast %3 : vector<96x1xf32> to vector<96x16xf32>
    %5 = arith.addf %2, %4 : vector<96x16xf32>
    %6 = vector.extract_strided_slice %5 {offsets = [0, 0], sizes = [32, 16], strides = [1, 1]} : vector<96x16xf32> to vector<32x16xf32>
    %7 = vector.extract_strided_slice %5 {offsets = [32, 0], sizes = [32, 16], strides = [1, 1]} : vector<96x16xf32> to vector<32x16xf32>
    %8 = vector.extract_strided_slice %5 {offsets = [64, 0], sizes = [32, 16], strides = [1, 1]} : vector<96x16xf32> to vector<32x16xf32>
    %9 = arith.negf %8 : vector<32x16xf32>
    %10 = math.exp %9 : vector<32x16xf32>
    %cst_5 = arith.constant 1.000000e+00 : f32
    %11 = vector.broadcast %cst_5 : f32 to vector<32x16xf32>
    %12 = arith.addf %11, %10 : vector<32x16xf32>
    %13 = arith.divf %11, %12 : vector<32x16xf32>
    %14 = arith.negf %6 : vector<32x16xf32>
    %15 = math.exp %14 : vector<32x16xf32>
    %cst_6 = arith.constant 1.000000e+00 : f32
    %16 = vector.broadcast %cst_6 : f32 to vector<32x16xf32>
    %17 = arith.addf %16, %15 : vector<32x16xf32>
    %18 = arith.divf %16, %17 : vector<32x16xf32>
    %19 = math.tanh %7 : vector<32x16xf32>
    %20 = arith.mulf %18, %19 : vector<32x16xf32>
    %21 = math.tanh %20 : vector<32x16xf32>
    %22 = arith.mulf %13, %21 : vector<32x16xf32>
    %c0_7 = arith.constant 0 : index
    %c0_8 = arith.constant 0 : index
    %c0_9 = arith.constant 0 : index
    %23 = vector.load %arg5[%c0_7, %c0_8, %c0_9] : memref<1x96x32xf32, #tpu.memory_space<vmem>>, vector<1x96x32xf32>
    %24 = vector.shape_cast %23 : vector<1x96x32xf32> to vector<96x32xf32>
    %cst_10 = arith.constant dense<0.000000e+00> : vector<96x16xf32>
    %25 = tpu.matmul %24, %22, %cst_10 {dimension_numbers = #tpu.dot_dimension_numbers<[1], [0], [0], [1], [0, 0, 1, 1], [], []>} : vector<96x32xf32>, vector<32x16xf32>, vector<96x16xf32> -> vector<96x16xf32>
    %c0_11 = arith.constant 0 : index
    %c0_12 = arith.constant 0 : index
    %c0_13 = arith.constant 0 : index
    %26 = vector.load %arg6[%c0_11, %c0_12, %c0_13] : memref<1x96x1xf32, #tpu.memory_space<vmem>>, vector<1x96x1xf32>
    %27 = vector.shape_cast %26 : vector<1x96x1xf32> to vector<96x1xf32>
    %28 = vector.broadcast %27 : vector<96x1xf32> to vector<96x16xf32>
    %29 = arith.addf %25, %28 : vector<96x16xf32>
    %30 = vector.extract_strided_slice %29 {offsets = [0, 0], sizes = [32, 16], strides = [1, 1]} : vector<96x16xf32> to vector<32x16xf32>
    %31 = vector.extract_strided_slice %29 {offsets = [32, 0], sizes = [32, 16], strides = [1, 1]} : vector<96x16xf32> to vector<32x16xf32>
    %32 = vector.extract_strided_slice %29 {offsets = [64, 0], sizes = [32, 16], strides = [1, 1]} : vector<96x16xf32> to vector<32x16xf32>
    %33 = arith.negf %32 : vector<32x16xf32>
    %34 = math.exp %33 : vector<32x16xf32>
    %cst_14 = arith.constant 1.000000e+00 : f32
    %35 = vector.broadcast %cst_14 : f32 to vector<32x16xf32>
    %36 = arith.addf %35, %34 : vector<32x16xf32>
    %37 = arith.divf %35, %36 : vector<32x16xf32>
    %38 = arith.negf %30 : vector<32x16xf32>
    %39 = math.exp %38 : vector<32x16xf32>
    %cst_15 = arith.constant 1.000000e+00 : f32
    %40 = vector.broadcast %cst_15 : f32 to vector<32x16xf32>
    %41 = arith.addf %40, %39 : vector<32x16xf32>
    %42 = arith.divf %40, %41 : vector<32x16xf32>
    %43 = math.tanh %31 : vector<32x16xf32>
    %44 = arith.mulf %42, %43 : vector<32x16xf32>
    %45 = math.tanh %44 : vector<32x16xf32>
    %46 = arith.mulf %37, %45 : vector<32x16xf32>
    %c0_16 = arith.constant 0 : index
    %c0_17 = arith.constant 0 : index
    %47 = vector.load %arg4[%c0_16, %c0_17] : memref<96x1xf32, #tpu.memory_space<vmem>>, vector<96x1xf32>
    %c0_18 = arith.constant 0 : index
    %c0_19 = arith.constant 0 : index
    %c0_20 = arith.constant 0 : index
    %48 = vector.load %arg3[%c0_18, %c0_19, %c0_20] : memref<3x8x32xf32, #tpu.memory_space<vmem>>, vector<1x8x32xf32>
    %49 = vector.shape_cast %48 : vector<1x8x32xf32> to vector<8x32xf32>
    %50 = vector.extract_strided_slice %47 {offsets = [0, 0], sizes = [32, 1], strides = [1, 1]} : vector<96x1xf32> to vector<32x1xf32>
    %51 = vector.shape_cast %49 : vector<8x32xf32> to vector<8x32x1xf32>
    %52 = vector.shape_cast %0 : vector<8x16xf32> to vector<8x1x16xf32>
    %53 = vector.broadcast %51 : vector<8x32x1xf32> to vector<8x32x16xf32>
    %54 = vector.broadcast %52 : vector<8x1x16xf32> to vector<8x32x16xf32>
    %55 = arith.mulf %53, %54 : vector<8x32x16xf32>
    %56 = vector.shape_cast %50 : vector<32x1xf32> to vector<1x32x1xf32>
    %57 = vector.broadcast %56 : vector<1x32x1xf32> to vector<8x32x16xf32>
    %58 = arith.addf %55, %57 : vector<8x32x16xf32>
    %59 = arith.negf %58 : vector<8x32x16xf32>
    %60 = math.exp %59 : vector<8x32x16xf32>
    %cst_21 = arith.constant 1.000000e+00 : f32
    %61 = vector.broadcast %cst_21 : f32 to vector<8x32x16xf32>
    %62 = arith.addf %61, %60 : vector<8x32x16xf32>
    %63 = arith.divf %61, %62 : vector<8x32x16xf32>
    %c1 = arith.constant 1 : index
    %c0_22 = arith.constant 0 : index
    %c0_23 = arith.constant 0 : index
    %64 = vector.load %arg3[%c1, %c0_22, %c0_23] : memref<3x8x32xf32, #tpu.memory_space<vmem>>, vector<1x8x32xf32>
    %65 = vector.shape_cast %64 : vector<1x8x32xf32> to vector<8x32xf32>
    %66 = vector.extract_strided_slice %47 {offsets = [32, 0], sizes = [32, 1], strides = [1, 1]} : vector<96x1xf32> to vector<32x1xf32>
    %67 = vector.shape_cast %65 : vector<8x32xf32> to vector<8x32x1xf32>
    %68 = vector.shape_cast %0 : vector<8x16xf32> to vector<8x1x16xf32>
    %69 = vector.broadcast %67 : vector<8x32x1xf32> to vector<8x32x16xf32>
    %70 = vector.broadcast %68 : vector<8x1x16xf32> to vector<8x32x16xf32>
    %71 = arith.mulf %69, %70 : vector<8x32x16xf32>
    %72 = vector.shape_cast %66 : vector<32x1xf32> to vector<1x32x1xf32>
    %73 = vector.broadcast %72 : vector<1x32x1xf32> to vector<8x32x16xf32>
    %74 = arith.addf %71, %73 : vector<8x32x16xf32>
    %75 = math.tanh %74 : vector<8x32x16xf32>
    %76 = arith.mulf %63, %75 : vector<8x32x16xf32>
    %c2 = arith.constant 2 : index
    %c0_24 = arith.constant 0 : index
    %c0_25 = arith.constant 0 : index
    %77 = vector.load %arg3[%c2, %c0_24, %c0_25] : memref<3x8x32xf32, #tpu.memory_space<vmem>>, vector<1x8x32xf32>
    %78 = vector.shape_cast %77 : vector<1x8x32xf32> to vector<8x32xf32>
    %79 = vector.extract_strided_slice %47 {offsets = [64, 0], sizes = [32, 1], strides = [1, 1]} : vector<96x1xf32> to vector<32x1xf32>
    %80 = vector.shape_cast %78 : vector<8x32xf32> to vector<8x32x1xf32>
    %81 = vector.shape_cast %0 : vector<8x16xf32> to vector<8x1x16xf32>
    %82 = vector.broadcast %80 : vector<8x32x1xf32> to vector<8x32x16xf32>
    %83 = vector.broadcast %81 : vector<8x1x16xf32> to vector<8x32x16xf32>
    %84 = arith.mulf %82, %83 : vector<8x32x16xf32>
    %85 = vector.shape_cast %79 : vector<32x1xf32> to vector<1x32x1xf32>
    %86 = vector.broadcast %85 : vector<1x32x1xf32> to vector<8x32x16xf32>
    %87 = arith.addf %84, %86 : vector<8x32x16xf32>
    %88 = arith.negf %87 : vector<8x32x16xf32>
    %89 = math.exp %88 : vector<8x32x16xf32>
    %cst_26 = arith.constant 1.000000e+00 : f32
    %90 = vector.broadcast %cst_26 : f32 to vector<8x32x16xf32>
    %91 = arith.addf %90, %89 : vector<8x32x16xf32>
    %92 = arith.divf %90, %91 : vector<8x32x16xf32>
    %93 = math.tanh %76 : vector<8x32x16xf32>
    %94 = arith.mulf %92, %93 : vector<8x32x16xf32>
    %c0_27 = arith.constant 0 : index
    %c0_28 = arith.constant 0 : index
    %c0_29 = arith.constant 0 : index
    %95 = vector.load %arg5[%c0_27, %c0_28, %c0_29] : memref<1x96x32xf32, #tpu.memory_space<vmem>>, vector<1x96x32xf32>
    %96 = vector.shape_cast %95 : vector<1x96x32xf32> to vector<96x32xf32>
    %c0_30 = arith.constant 0 : index
    %c0_31 = arith.constant 0 : index
    %c0_32 = arith.constant 0 : index
    %97 = vector.load %arg6[%c0_30, %c0_31, %c0_32] : memref<1x96x1xf32, #tpu.memory_space<vmem>>, vector<1x96x1xf32>
    %98 = vector.shape_cast %97 : vector<1x96x1xf32> to vector<96x1xf32>
    %99 = vector.extract_strided_slice %96 {offsets = [0, 0], sizes = [32, 32], strides = [1, 1]} : vector<96x32xf32> to vector<32x32xf32>
    %100 = vector.shape_cast %99 : vector<32x32xf32> to vector<1x32x32xf32>
    %101 = vector.broadcast %100 : vector<1x32x32xf32> to vector<8x32x32xf32>
    "tpu.trace_start"() <{level = 10 : i32, message = "gkh,ght->gkt"}> : () -> ()
    %cst_33 = arith.constant dense<0.000000e+00> : vector<8x32x16xf32>
    %102 = tpu.matmul %101, %94, %cst_33 {dimension_numbers = #tpu.dot_dimension_numbers<[2], [1], [1], [2], [0, 0, 0, 1, 1, 2], [0], [0]>} : vector<8x32x32xf32>, vector<8x32x16xf32>, vector<8x32x16xf32> -> vector<8x32x16xf32>
    "tpu.trace_stop"() : () -> ()
    %103 = vector.extract_strided_slice %98 {offsets = [0, 0], sizes = [32, 1], strides = [1, 1]} : vector<96x1xf32> to vector<32x1xf32>
    %104 = vector.shape_cast %103 : vector<32x1xf32> to vector<1x32x1xf32>
    %105 = vector.broadcast %104 : vector<1x32x1xf32> to vector<8x32x16xf32>
    %106 = arith.addf %102, %105 : vector<8x32x16xf32>
    %107 = arith.negf %106 : vector<8x32x16xf32>
    %108 = math.exp %107 : vector<8x32x16xf32>
    %cst_34 = arith.constant 1.000000e+00 : f32
    %109 = vector.broadcast %cst_34 : f32 to vector<8x32x16xf32>
    %110 = arith.addf %109, %108 : vector<8x32x16xf32>
    %111 = arith.divf %109, %110 : vector<8x32x16xf32>
    %112 = vector.extract_strided_slice %96 {offsets = [32, 0], sizes = [32, 32], strides = [1, 1]} : vector<96x32xf32> to vector<32x32xf32>
    %113 = vector.shape_cast %112 : vector<32x32xf32> to vector<1x32x32xf32>
    %114 = vector.broadcast %113 : vector<1x32x32xf32> to vector<8x32x32xf32>
    "tpu.trace_start"() <{level = 10 : i32, message = "gkh,ght->gkt"}> : () -> ()
    %cst_35 = arith.constant dense<0.000000e+00> : vector<8x32x16xf32>
    %115 = tpu.matmul %114, %94, %cst_35 {dimension_numbers = #tpu.dot_dimension_numbers<[2], [1], [1], [2], [0, 0, 0, 1, 1, 2], [0], [0]>} : vector<8x32x32xf32>, vector<8x32x16xf32>, vector<8x32x16xf32> -> vector<8x32x16xf32>
    "tpu.trace_stop"() : () -> ()
    %116 = vector.extract_strided_slice %98 {offsets = [32, 0], sizes = [32, 1], strides = [1, 1]} : vector<96x1xf32> to vector<32x1xf32>
    %117 = vector.shape_cast %116 : vector<32x1xf32> to vector<1x32x1xf32>
    %118 = vector.broadcast %117 : vector<1x32x1xf32> to vector<8x32x16xf32>
    %119 = arith.addf %115, %118 : vector<8x32x16xf32>
    %120 = math.tanh %119 : vector<8x32x16xf32>
    %121 = arith.mulf %111, %120 : vector<8x32x16xf32>
    %122 = vector.extract_strided_slice %96 {offsets = [64, 0], sizes = [32, 32], strides = [1, 1]} : vector<96x32xf32> to vector<32x32xf32>
    %123 = vector.shape_cast %122 : vector<32x32xf32> to vector<1x32x32xf32>
    %124 = vector.broadcast %123 : vector<1x32x32xf32> to vector<8x32x32xf32>
    "tpu.trace_start"() <{level = 10 : i32, message = "gkh,ght->gkt"}> : () -> ()
    %cst_36 = arith.constant dense<0.000000e+00> : vector<8x32x16xf32>
    %125 = tpu.matmul %124, %94, %cst_36 {dimension_numbers = #tpu.dot_dimension_numbers<[2], [1], [1], [2], [0, 0, 0, 1, 1, 2], [0], [0]>} : vector<8x32x32xf32>, vector<8x32x16xf32>, vector<8x32x16xf32> -> vector<8x32x16xf32>
    "tpu.trace_stop"() : () -> ()
    %126 = vector.extract_strided_slice %98 {offsets = [64, 0], sizes = [32, 1], strides = [1, 1]} : vector<96x1xf32> to vector<32x1xf32>
    %127 = vector.shape_cast %126 : vector<32x1xf32> to vector<1x32x1xf32>
    %128 = vector.broadcast %127 : vector<1x32x1xf32> to vector<8x32x16xf32>
    %129 = arith.addf %125, %128 : vector<8x32x16xf32>
    %130 = arith.negf %129 : vector<8x32x16xf32>
    %131 = math.exp %130 : vector<8x32x16xf32>
    %cst_37 = arith.constant 1.000000e+00 : f32
    %132 = vector.broadcast %cst_37 : f32 to vector<8x32x16xf32>
    %133 = arith.addf %132, %131 : vector<8x32x16xf32>
    %134 = arith.divf %132, %133 : vector<8x32x16xf32>
    %135 = math.tanh %121 : vector<8x32x16xf32>
    %136 = arith.mulf %134, %135 : vector<8x32x16xf32>
    %137 = vector.shape_cast %46 : vector<32x16xf32> to vector<1x32x16xf32>
    %138 = vector.broadcast %137 : vector<1x32x16xf32> to vector<8x32x16xf32>
    %139 = arith.mulf %136, %138 : vector<8x32x16xf32>
    %cst_38 = arith.constant dense<0.000000e+00> : vector<8x16xf32>
    %140 = vector.multi_reduction <add>, %139, %cst_38 [1] : vector<8x32x16xf32> to vector<8x16xf32>
    %cst_39 = arith.constant dense<0xFF800000> : vector<16xf32>
    %141 = vector.multi_reduction <maximumf>, %140, %cst_39 [0] : vector<8x16xf32> to vector<16xf32>
    %142 = vector.shape_cast %141 : vector<16xf32> to vector<1x16xf32>
    %143 = vector.broadcast %142 : vector<1x16xf32> to vector<8x16xf32>
    %144 = arith.subf %140, %143 : vector<8x16xf32>
    %145 = math.exp %144 : vector<8x16xf32>
    %cst_40 = arith.constant dense<0.000000e+00> : vector<16xf32>
    %146 = vector.multi_reduction <add>, %145, %cst_40 [0] : vector<8x16xf32> to vector<16xf32>
    %147 = vector.shape_cast %146 : vector<16xf32> to vector<1x16xf32>
    %148 = vector.broadcast %147 : vector<1x16xf32> to vector<8x16xf32>
    %149 = arith.divf %145, %148 : vector<8x16xf32>
    %c0_41 = arith.constant 0 : index
    %c0_42 = arith.constant 0 : index
    %150 = vector.load %arg7[%c0_41, %c0_42] : memref<32x1xf32, #tpu.memory_space<vmem>>, vector<32x1xf32>
    %151 = vector.shape_cast %150 : vector<32x1xf32> to vector<1x32x1xf32>
    %152 = vector.broadcast %151 : vector<1x32x1xf32> to vector<8x32x16xf32>
    %153 = arith.mulf %136, %152 : vector<8x32x16xf32>
    %cst_43 = arith.constant dense<0.000000e+00> : vector<8x16xf32>
    %154 = vector.multi_reduction <add>, %153, %cst_43 [1] : vector<8x32x16xf32> to vector<8x16xf32>
    %155 = arith.mulf %149, %154 : vector<8x16xf32>
    %cst_44 = arith.constant dense<0.000000e+00> : vector<16xf32>
    %156 = vector.multi_reduction <add>, %155, %cst_44 [0] : vector<8x16xf32> to vector<16xf32>
    %157 = vector.shape_cast %156 : vector<16xf32> to vector<1x16xf32>
    %c0_45 = arith.constant 0 : index
    %c0_46 = arith.constant 0 : index
    %158 = vector.load %arg8[%c0_45, %c0_46] : memref<1x1xf32, #tpu.memory_space<vmem>>, vector<1x1xf32>
    %159 = vector.broadcast %158 : vector<1x1xf32> to vector<1x16xf32>
    %160 = arith.addf %157, %159 : vector<1x16xf32>
    %c0_47 = arith.constant 0 : index
    %c0_48 = arith.constant 0 : index
    %161 = vector.load %arg9[%c0_47, %c0_48] : memref<1x16xf32, #tpu.memory_space<vmem>>, vector<1x16xf32>
    tpu.vector_store %arg9[%c0_47, %c0_48], %160 {strides = array<i32>} : memref<1x16xf32, #tpu.memory_space<vmem>>, vector<1x16xf32>,
    %c0_49 = arith.constant 0 : index
    %c0_50 = arith.constant 0 : index
    %162 = vector.load %arg10[%c0_49, %c0_50] : memref<8x16xf32, #tpu.memory_space<vmem>>, vector<8x16xf32>
    tpu.vector_store %arg10[%c0_49, %c0_50], %149 {strides = array<i32>} : memref<8x16xf32, #tpu.memory_space<vmem>>, vector<8x16xf32>,
    %c16_i32 = arith.constant 16 : i32
    %163 = arith.muli %arg0, %c16_i32 : i32
    %164 = tpu.iota {dimensions = array<i32: 1>} : vector<8x16xi32>
    %165 = vector.broadcast %163 : i32 to vector<8x16xi32>
    %166 = arith.addi %164, %165 : vector<8x16xi32>
    %c16_i32_51 = arith.constant 16 : i32
    %167 = vector.broadcast %c16_i32_51 : i32 to vector<8x16xi32>
    %168 = arith.cmpi slt, %166, %167 : vector<8x16xi32>
    %cst_52 = arith.constant 0.000000e+00 : f32
    %169 = vector.broadcast %cst_52 : f32 to vector<8x16xf32>
    %170 = arith.select %168, %149, %169 : vector<8x16xi1>, vector<8x16xf32>
    %cst_53 = arith.constant dense<0.000000e+00> : vector<8xf32>
    %171 = vector.multi_reduction <add>, %170, %cst_53 [1] : vector<8x16xf32> to vector<8xf32>
    %172 = vector.shape_cast %171 : vector<8xf32> to vector<8x1xf32>
    %c0_54 = arith.constant 0 : index
    %c0_55 = arith.constant 0 : index
    %173 = vector.load %arg11[%c0_54, %c0_55] : memref<8x1xf32, #tpu.memory_space<vmem>>, vector<8x1xf32>
    tpu.vector_store %arg11[%c0_54, %c0_55], %172 {strides = array<i32>} : memref<8x1xf32, #tpu.memory_space<vmem>>, vector<8x1xf32>,
    return
  }
  func.func @transform_0(%arg0: i32) -> (i32, i32) {
    %c0_i32 = arith.constant 0 : i32
    %c0_i32_0 = arith.constant 0 : i32
    return %c0_i32, %arg0 : i32, i32
  }
  func.func @transform_1(%arg0: i32) -> (i32, i32) {
    %c0_i32 = arith.constant 0 : i32
    %c0_i32_0 = arith.constant 0 : i32
    %c0_i32_1 = arith.constant 0 : i32
    return %c0_i32, %c0_i32_0 : i32, i32
  }
  func.func @transform_2(%arg0: i32) -> (i32, i32, i32) {
    %c0_i32 = arith.constant 0 : i32
    %c0_i32_0 = arith.constant 0 : i32
    %c0_i32_1 = arith.constant 0 : i32
    %c0_i32_2 = arith.constant 0 : i32
    return %c0_i32, %c0_i32_0, %c0_i32_1 : i32, i32, i32
  }
  func.func @transform_3(%arg0: i32) -> (i32, i32) {
    %c0_i32 = arith.constant 0 : i32
    %c0_i32_0 = arith.constant 0 : i32
    %c0_i32_1 = arith.constant 0 : i32
    return %c0_i32, %c0_i32_0 : i32, i32
  }
  func.func @transform_4(%arg0: i32) -> (i32, i32, i32) {
    %c0_i32 = arith.constant 0 : i32
    %c0_i32_0 = arith.constant 0 : i32
    %c0_i32_1 = arith.constant 0 : i32
    %c0_i32_2 = arith.constant 0 : i32
    return %c0_i32, %c0_i32_0, %c0_i32_1 : i32, i32, i32
  }
  func.func @transform_5(%arg0: i32) -> (i32, i32, i32) {
    %c0_i32 = arith.constant 0 : i32
    %c0_i32_0 = arith.constant 0 : i32
    %c0_i32_1 = arith.constant 0 : i32
    %c0_i32_2 = arith.constant 0 : i32
    return %c0_i32, %c0_i32_0, %c0_i32_1 : i32, i32, i32
  }
  func.func @transform_6(%arg0: i32) -> (i32, i32) {
    %c0_i32 = arith.constant 0 : i32
    %c0_i32_0 = arith.constant 0 : i32
    %c0_i32_1 = arith.constant 0 : i32
    return %c0_i32, %c0_i32_0 : i32, i32
  }
  func.func @transform_7(%arg0: i32) -> (i32, i32) {
    %c0_i32 = arith.constant 0 : i32
    %c0_i32_0 = arith.constant 0 : i32
    %c0_i32_1 = arith.constant 0 : i32
    return %c0_i32, %c0_i32_0 : i32, i32
  }
  func.func @transform_8(%arg0: i32) -> (i32, i32) {
    %c0_i32 = arith.constant 0 : i32
    %c0_i32_0 = arith.constant 0 : i32
    return %c0_i32, %arg0 : i32, i32
  }
  func.func @transform_9(%arg0: i32) -> (i32, i32) {
    %c0_i32 = arith.constant 0 : i32
    %c0_i32_0 = arith.constant 0 : i32
    return %c0_i32, %arg0 : i32, i32
  }
  func.func @transform_10(%arg0: i32) -> (i32, i32) {
    %c0_i32 = arith.constant 0 : i32
    %c0_i32_0 = arith.constant 0 : i32
    return %c0_i32, %arg0 : i32, i32
  }
}

module attributes {stable_mosaic.version = 11 : i64} {
  func.func @_mva_lstm_kernel(%arg0: i32, %arg1: memref<8x16xf32, #tpu.memory_space<vmem>>, %arg2: memref<96x8xf32, #tpu.memory_space<vmem>>, %arg3: memref<3x8x32xf32, #tpu.memory_space<vmem>>, %arg4: memref<96x1xf32, #tpu.memory_space<vmem>>, %arg5: memref<1x96x32xf32, #tpu.memory_space<vmem>>, %arg6: memref<1x96x1xf32, #tpu.memory_space<vmem>>, %arg7: memref<32x1xf32, #tpu.memory_space<vmem>>, %arg8: memref<1x1xf32, #tpu.memory_space<vmem>>, %arg9: memref<1x16xf32, #tpu.memory_space<vmem>>, %arg10: memref<8x16xf32, #tpu.memory_space<vmem>>, %arg11: memref<8x1xf32, #tpu.memory_space<vmem>>) attributes {dimension_semantics = [#tpu.dimension_semantics<parallel>], iteration_bounds = array<i64: 1>, scalar_prefetch = 0 : i64, scratch_operands = 0 : i64, tpu.core_type = #tpu.core_type<tc>, window_params = [{transform_indices = @transform_0, window_bounds = array<i64: 8, 16>}, {pipeline_mode = #tpu.pipeline_mode<synchronous>, transform_indices = @transform_1, window_bounds = array<i64: 96, 8>}, {pipeline_mode = #tpu.pipeline_mode<synchronous>, transform_indices = @transform_2, window_bounds = array<i64: 3, 8, 32>}, {pipeline_mode = #tpu.pipeline_mode<synchronous>, transform_indices = @transform_3, window_bounds = array<i64: 96, 1>}, {pipeline_mode = #tpu.pipeline_mode<synchronous>, transform_indices = @transform_4, window_bounds = array<i64: 1, 96, 32>}, {pipeline_mode = #tpu.pipeline_mode<synchronous>, transform_indices = @transform_5, window_bounds = array<i64: 1, 96, 1>}, {pipeline_mode = #tpu.pipeline_mode<synchronous>, transform_indices = @transform_6, window_bounds = array<i64: 32, 1>}, {pipeline_mode = #tpu.pipeline_mode<synchronous>, transform_indices = @transform_7, window_bounds = array<i64: 1, 1>}, {transform_indices = @transform_8, window_bounds = array<i64: 1, 16>}, {transform_indices = @transform_9, window_bounds = array<i64: 8, 16>}, {transform_indices = @transform_10, window_bounds = array<i64: 8, 1>}]} {
    %c0 = arith.constant 0 : index
    %c0_0 = arith.constant 0 : index
    %0 = vector.load %arg1[%c0, %c0_0] : memref<8x16xf32, #tpu.memory_space<vmem>>, vector<8x16xf32>
    %c0_1 = arith.constant 0 : index
    %c0_2 = arith.constant 0 : index
    %1 = vector.load %arg2[%c0_1, %c0_2] : memref<96x8xf32, #tpu.memory_space<vmem>>, vector<96x8xf32>
    %cst = arith.constant dense<0.000000e+00> : vector<96x16xf32>
    %2 = tpu.matmul %1, %0, %cst {dimension_numbers = #tpu.dot_dimension_numbers<[1], [0], [0], [1], [0, 0, 1, 1], [], []>} : vector<96x8xf32>, vector<8x16xf32>, vector<96x16xf32> -> vector<96x16xf32>
    %c0_3 = arith.constant 0 : index
    %c0_4 = arith.constant 0 : index
    %3 = vector.load %arg4[%c0_3, %c0_4] : memref<96x1xf32, #tpu.memory_space<vmem>>, vector<96x1xf32>
    %4 = vector.broadcast %3 : vector<96x1xf32> to vector<96x16xf32>
    %5 = arith.addf %2, %4 : vector<96x16xf32>
    %6 = vector.extract_strided_slice %5 {offsets = [0, 0], sizes = [32, 16], strides = [1, 1]} : vector<96x16xf32> to vector<32x16xf32>
    %7 = vector.extract_strided_slice %5 {offsets = [32, 0], sizes = [32, 16], strides = [1, 1]} : vector<96x16xf32> to vector<32x16xf32>
    %8 = vector.extract_strided_slice %5 {offsets = [64, 0], sizes = [32, 16], strides = [1, 1]} : vector<96x16xf32> to vector<32x16xf32>
    %9 = arith.negf %8 : vector<32x16xf32>
    %10 = math.exp %9 : vector<32x16xf32>
    %cst_5 = arith.constant 1.000000e+00 : f32
    %11 = vector.broadcast %cst_5 : f32 to vector<32x16xf32>
    %12 = arith.addf %11, %10 : vector<32x16xf32>
    %13 = arith.divf %11, %12 : vector<32x16xf32>
    %14 = arith.negf %6 : vector<32x16xf32>
    %15 = math.exp %14 : vector<32x16xf32>
    %cst_6 = arith.constant 1.000000e+00 : f32
    %16 = vector.broadcast %cst_6 : f32 to vector<32x16xf32>
    %17 = arith.addf %16, %15 : vector<32x16xf32>
    %18 = arith.divf %16, %17 : vector<32x16xf32>
    %19 = math.tanh %7 : vector<32x16xf32>
    %20 = arith.mulf %18, %19 : vector<32x16xf32>
    %21 = math.tanh %20 : vector<32x16xf32>
    %22 = arith.mulf %13, %21 : vector<32x16xf32>
    %c0_7 = arith.constant 0 : index
    %c0_8 = arith.constant 0 : index
    %c0_9 = arith.constant 0 : index
    %23 = vector.load %arg5[%c0_7, %c0_8, %c0_9] : memref<1x96x32xf32, #tpu.memory_space<vmem>>, vector<1x96x32xf32>
    %24 = vector.shape_cast %23 : vector<1x96x32xf32> to vector<96x32xf32>
    %cst_10 = arith.constant dense<0.000000e+00> : vector<96x16xf32>
    %25 = tpu.matmul %24, %22, %cst_10 {dimension_numbers = #tpu.dot_dimension_numbers<[1], [0], [0], [1], [0, 0, 1, 1], [], []>} : vector<96x32xf32>, vector<32x16xf32>, vector<96x16xf32> -> vector<96x16xf32>
    %c0_11 = arith.constant 0 : index
    %c0_12 = arith.constant 0 : index
    %c0_13 = arith.constant 0 : index
    %26 = vector.load %arg6[%c0_11, %c0_12, %c0_13] : memref<1x96x1xf32, #tpu.memory_space<vmem>>, vector<1x96x1xf32>
    %27 = vector.shape_cast %26 : vector<1x96x1xf32> to vector<96x1xf32>
    %28 = vector.broadcast %27 : vector<96x1xf32> to vector<96x16xf32>
    %29 = arith.addf %25, %28 : vector<96x16xf32>
    %30 = vector.extract_strided_slice %29 {offsets = [0, 0], sizes = [32, 16], strides = [1, 1]} : vector<96x16xf32> to vector<32x16xf32>
    %31 = vector.extract_strided_slice %29 {offsets = [32, 0], sizes = [32, 16], strides = [1, 1]} : vector<96x16xf32> to vector<32x16xf32>
    %32 = vector.extract_strided_slice %29 {offsets = [64, 0], sizes = [32, 16], strides = [1, 1]} : vector<96x16xf32> to vector<32x16xf32>
    %33 = arith.negf %32 : vector<32x16xf32>
    %34 = math.exp %33 : vector<32x16xf32>
    %cst_14 = arith.constant 1.000000e+00 : f32
    %35 = vector.broadcast %cst_14 : f32 to vector<32x16xf32>
    %36 = arith.addf %35, %34 : vector<32x16xf32>
    %37 = arith.divf %35, %36 : vector<32x16xf32>
    %38 = arith.negf %30 : vector<32x16xf32>
    %39 = math.exp %38 : vector<32x16xf32>
    %cst_15 = arith.constant 1.000000e+00 : f32
    %40 = vector.broadcast %cst_15 : f32 to vector<32x16xf32>
    %41 = arith.addf %40, %39 : vector<32x16xf32>
    %42 = arith.divf %40, %41 : vector<32x16xf32>
    %43 = math.tanh %31 : vector<32x16xf32>
    %44 = arith.mulf %42, %43 : vector<32x16xf32>
    %45 = math.tanh %44 : vector<32x16xf32>
    %46 = arith.mulf %37, %45 : vector<32x16xf32>
    %c0_16 = arith.constant 0 : index
    %c0_17 = arith.constant 0 : index
    %47 = vector.load %arg4[%c0_16, %c0_17] : memref<96x1xf32, #tpu.memory_space<vmem>>, vector<96x1xf32>
    %c0_18 = arith.constant 0 : index
    %c0_19 = arith.constant 0 : index
    %c0_20 = arith.constant 0 : index
    %48 = vector.load %arg3[%c0_18, %c0_19, %c0_20] : memref<3x8x32xf32, #tpu.memory_space<vmem>>, vector<1x8x32xf32>
    %49 = vector.shape_cast %48 : vector<1x8x32xf32> to vector<8x32xf32>
    %50 = vector.extract_strided_slice %47 {offsets = [0, 0], sizes = [32, 1], strides = [1, 1]} : vector<96x1xf32> to vector<32x1xf32>
    %51 = vector.shape_cast %49 : vector<8x32xf32> to vector<8x32x1xf32>
    %52 = vector.shape_cast %0 : vector<8x16xf32> to vector<8x1x16xf32>
    %53 = vector.broadcast %51 : vector<8x32x1xf32> to vector<8x32x16xf32>
    %54 = vector.broadcast %52 : vector<8x1x16xf32> to vector<8x32x16xf32>
    %55 = arith.mulf %53, %54 : vector<8x32x16xf32>
    %56 = vector.shape_cast %50 : vector<32x1xf32> to vector<1x32x1xf32>
    %57 = vector.broadcast %56 : vector<1x32x1xf32> to vector<8x32x16xf32>
    %58 = arith.addf %55, %57 : vector<8x32x16xf32>
    %59 = arith.negf %58 : vector<8x32x16xf32>
    %60 = math.exp %59 : vector<8x32x16xf32>
    %cst_21 = arith.constant 1.000000e+00 : f32
    %61 = vector.broadcast %cst_21 : f32 to vector<8x32x16xf32>
    %62 = arith.addf %61, %60 : vector<8x32x16xf32>
    %63 = arith.divf %61, %62 : vector<8x32x16xf32>
    %c1 = arith.constant 1 : index
    %c0_22 = arith.constant 0 : index
    %c0_23 = arith.constant 0 : index
    %64 = vector.load %arg3[%c1, %c0_22, %c0_23] : memref<3x8x32xf32, #tpu.memory_space<vmem>>, vector<1x8x32xf32>
    %65 = vector.shape_cast %64 : vector<1x8x32xf32> to vector<8x32xf32>
    %66 = vector.extract_strided_slice %47 {offsets = [32, 0], sizes = [32, 1], strides = [1, 1]} : vector<96x1xf32> to vector<32x1xf32>
    %67 = vector.shape_cast %65 : vector<8x32xf32> to vector<8x32x1xf32>
    %68 = vector.shape_cast %0 : vector<8x16xf32> to vector<8x1x16xf32>
    %69 = vector.broadcast %67 : vector<8x32x1xf32> to vector<8x32x16xf32>
    %70 = vector.broadcast %68 : vector<8x1x16xf32> to vector<8x32x16xf32>
    %71 = arith.mulf %69, %70 : vector<8x32x16xf32>
    %72 = vector.shape_cast %66 : vector<32x1xf32> to vector<1x32x1xf32>
    %73 = vector.broadcast %72 : vector<1x32x1xf32> to vector<8x32x16xf32>
    %74 = arith.addf %71, %73 : vector<8x32x16xf32>
    %75 = math.tanh %74 : vector<8x32x16xf32>
    %76 = arith.mulf %63, %75 : vector<8x32x16xf32>
    %c2 = arith.constant 2 : index
    %c0_24 = arith.constant 0 : index
    %c0_25 = arith.constant 0 : index
    %77 = vector.load %arg3[%c2, %c0_24, %c0_25] : memref<3x8x32xf32, #tpu.memory_space<vmem>>, vector<1x8x32xf32>
    %78 = vector.shape_cast %77 : vector<1x8x32xf32> to vector<8x32xf32>
    %79 = vector.extract_strided_slice %47 {offsets = [64, 0], sizes = [32, 1], strides = [1, 1]} : vector<96x1xf32> to vector<32x1xf32>
    %80 = vector.shape_cast %78 : vector<8x32xf32> to vector<8x32x1xf32>
    %81 = vector.shape_cast %0 : vector<8x16xf32> to vector<8x1x16xf32>
    %82 = vector.broadcast %80 : vector<8x32x1xf32> to vector<8x32x16xf32>
    %83 = vector.broadcast %81 : vector<8x1x16xf32> to vector<8x32x16xf32>
    %84 = arith.mulf %82, %83 : vector<8x32x16xf32>
    %85 = vector.shape_cast %79 : vector<32x1xf32> to vector<1x32x1xf32>
    %86 = vector.broadcast %85 : vector<1x32x1xf32> to vector<8x32x16xf32>
    %87 = arith.addf %84, %86 : vector<8x32x16xf32>
    %88 = arith.negf %87 : vector<8x32x16xf32>
    %89 = math.exp %88 : vector<8x32x16xf32>
    %cst_26 = arith.constant 1.000000e+00 : f32
    %90 = vector.broadcast %cst_26 : f32 to vector<8x32x16xf32>
    %91 = arith.addf %90, %89 : vector<8x32x16xf32>
    %92 = arith.divf %90, %91 : vector<8x32x16xf32>
    %93 = math.tanh %76 : vector<8x32x16xf32>
    %94 = arith.mulf %92, %93 : vector<8x32x16xf32>
    %c0_27 = arith.constant 0 : index
    %c0_28 = arith.constant 0 : index
    %c0_29 = arith.constant 0 : index
    %95 = vector.load %arg5[%c0_27, %c0_28, %c0_29] : memref<1x96x32xf32, #tpu.memory_space<vmem>>, vector<1x96x32xf32>
    %96 = vector.shape_cast %95 : vector<1x96x32xf32> to vector<96x32xf32>
    %c0_30 = arith.constant 0 : index
    %c0_31 = arith.constant 0 : index
    %c0_32 = arith.constant 0 : index
    %97 = vector.load %arg6[%c0_30, %c0_31, %c0_32] : memref<1x96x1xf32, #tpu.memory_space<vmem>>, vector<1x96x1xf32>
    %98 = vector.shape_cast %97 : vector<1x96x1xf32> to vector<96x1xf32>
    %99 = vector.extract_strided_slice %96 {offsets = [0, 0], sizes = [32, 32], strides = [1, 1]} : vector<96x32xf32> to vector<32x32xf32>
    %100 = vector.shape_cast %99 : vector<32x32xf32> to vector<1x32x32xf32>
    %101 = vector.broadcast %100 : vector<1x32x32xf32> to vector<8x32x32xf32>
    "tpu.trace_start"() <{level = 10 : i32, message = "gkh,ght->gkt"}> : () -> ()
    %cst_33 = arith.constant dense<0.000000e+00> : vector<8x32x16xf32>
    %102 = tpu.matmul %101, %94, %cst_33 {dimension_numbers = #tpu.dot_dimension_numbers<[2], [1], [1], [2], [0, 0, 0, 1, 1, 2], [0], [0]>} : vector<8x32x32xf32>, vector<8x32x16xf32>, vector<8x32x16xf32> -> vector<8x32x16xf32>
    "tpu.trace_stop"() : () -> ()
    %103 = vector.extract_strided_slice %98 {offsets = [0, 0], sizes = [32, 1], strides = [1, 1]} : vector<96x1xf32> to vector<32x1xf32>
    %104 = vector.shape_cast %103 : vector<32x1xf32> to vector<1x32x1xf32>
    %105 = vector.broadcast %104 : vector<1x32x1xf32> to vector<8x32x16xf32>
    %106 = arith.addf %102, %105 : vector<8x32x16xf32>
    %107 = arith.negf %106 : vector<8x32x16xf32>
    %108 = math.exp %107 : vector<8x32x16xf32>
    %cst_34 = arith.constant 1.000000e+00 : f32
    %109 = vector.broadcast %cst_34 : f32 to vector<8x32x16xf32>
    %110 = arith.addf %109, %108 : vector<8x32x16xf32>
    %111 = arith.divf %109, %110 : vector<8x32x16xf32>
    %112 = vector.extract_strided_slice %96 {offsets = [32, 0], sizes = [32, 32], strides = [1, 1]} : vector<96x32xf32> to vector<32x32xf32>
    %113 = vector.shape_cast %112 : vector<32x32xf32> to vector<1x32x32xf32>
    %114 = vector.broadcast %113 : vector<1x32x32xf32> to vector<8x32x32xf32>
    "tpu.trace_start"() <{level = 10 : i32, message = "gkh,ght->gkt"}> : () -> ()
    %cst_35 = arith.constant dense<0.000000e+00> : vector<8x32x16xf32>
    %115 = tpu.matmul %114, %94, %cst_35 {dimension_numbers = #tpu.dot_dimension_numbers<[2], [1], [1], [2], [0, 0, 0, 1, 1, 2], [0], [0]>} : vector<8x32x32xf32>, vector<8x32x16xf32>, vector<8x32x16xf32> -> vector<8x32x16xf32>
    "tpu.trace_stop"() : () -> ()
    %116 = vector.extract_strided_slice %98 {offsets = [32, 0], sizes = [32, 1], strides = [1, 1]} : vector<96x1xf32> to vector<32x1xf32>
    %117 = vector.shape_cast %116 : vector<32x1xf32> to vector<1x32x1xf32>
    %118 = vector.broadcast %117 : vector<1x32x1xf32> to vector<8x32x16xf32>
    %119 = arith.addf %115, %118 : vector<8x32x16xf32>
    %120 = math.tanh %119 : vector<8x32x16xf32>
    %121 = arith.mulf %111, %120 : vector<8x32x16xf32>
    %122 = vector.extract_strided_slice %96 {offsets = [64, 0], sizes = [32, 32], strides = [1, 1]} : vector<96x32xf32> to vector<32x32xf32>
    %123 = vector.shape_cast %122 : vector<32x32xf32> to vector<1x32x32xf32>
    %124 = vector.broadcast %123 : vector<1x32x32xf32> to vector<8x32x32xf32>
    "tpu.trace_start"() <{level = 10 : i32, message = "gkh,ght->gkt"}> : () -> ()
    %cst_36 = arith.constant dense<0.000000e+00> : vector<8x32x16xf32>
    %125 = tpu.matmul %124, %94, %cst_36 {dimension_numbers = #tpu.dot_dimension_numbers<[2], [1], [1], [2], [0, 0, 0, 1, 1, 2], [0], [0]>} : vector<8x32x32xf32>, vector<8x32x16xf32>, vector<8x32x16xf32> -> vector<8x32x16xf32>
    "tpu.trace_stop"() : () -> ()
    %126 = vector.extract_strided_slice %98 {offsets = [64, 0], sizes = [32, 1], strides = [1, 1]} : vector<96x1xf32> to vector<32x1xf32>
    %127 = vector.shape_cast %126 : vector<32x1xf32> to vector<1x32x1xf32>
    %128 = vector.broadcast %127 : vector<1x32x1xf32> to vector<8x32x16xf32>
    %129 = arith.addf %125, %128 : vector<8x32x16xf32>
    %130 = arith.negf %129 : vector<8x32x16xf32>
    %131 = math.exp %130 : vector<8x32x16xf32>
    %cst_37 = arith.constant 1.000000e+00 : f32
    %132 = vector.broadcast %cst_37 : f32 to vector<8x32x16xf32>
    %133 = arith.addf %132, %131 : vector<8x32x16xf32>
    %134 = arith.divf %132, %133 : vector<8x32x16xf32>
    %135 = math.tanh %121 : vector<8x32x16xf32>
    %136 = arith.mulf %134, %135 : vector<8x32x16xf32>
    %137 = vector.shape_cast %46 : vector<32x16xf32> to vector<1x32x16xf32>
    %138 = vector.broadcast %137 : vector<1x32x16xf32> to vector<8x32x16xf32>
    %139 = arith.mulf %136, %138 : vector<8x32x16xf32>
    %cst_38 = arith.constant dense<0.000000e+00> : vector<8x16xf32>
    %140 = vector.multi_reduction <add>, %139, %cst_38 [1] : vector<8x32x16xf32> to vector<8x16xf32>
    %cst_39 = arith.constant dense<0xFF800000> : vector<16xf32>
    %141 = vector.multi_reduction <maximumf>, %140, %cst_39 [0] : vector<8x16xf32> to vector<16xf32>
    %142 = vector.shape_cast %141 : vector<16xf32> to vector<1x16xf32>
    %143 = vector.broadcast %142 : vector<1x16xf32> to vector<8x16xf32>
    %144 = arith.subf %140, %143 : vector<8x16xf32>
    %145 = math.exp %144 : vector<8x16xf32>
    %cst_40 = arith.constant dense<0.000000e+00> : vector<16xf32>
    %146 = vector.multi_reduction <add>, %145, %cst_40 [0] : vector<8x16xf32> to vector<16xf32>
    %147 = vector.shape_cast %146 : vector<16xf32> to vector<1x16xf32>
    %148 = vector.broadcast %147 : vector<1x16xf32> to vector<8x16xf32>
    %149 = arith.divf %145, %148 : vector<8x16xf32>
    %c0_41 = arith.constant 0 : index
    %c0_42 = arith.constant 0 : index
    %150 = vector.load %arg7[%c0_41, %c0_42] : memref<32x1xf32, #tpu.memory_space<vmem>>, vector<32x1xf32>
    %151 = vector.shape_cast %150 : vector<32x1xf32> to vector<1x32x1xf32>
    %152 = vector.broadcast %151 : vector<1x32x1xf32> to vector<8x32x16xf32>
    %153 = arith.mulf %136, %152 : vector<8x32x16xf32>
    %cst_43 = arith.constant dense<0.000000e+00> : vector<8x16xf32>
    %154 = vector.multi_reduction <add>, %153, %cst_43 [1] : vector<8x32x16xf32> to vector<8x16xf32>
    %155 = arith.mulf %149, %154 : vector<8x16xf32>
    %cst_44 = arith.constant dense<0.000000e+00> : vector<16xf32>
    %156 = vector.multi_reduction <add>, %155, %cst_44 [0] : vector<8x16xf32> to vector<16xf32>
    %157 = vector.shape_cast %156 : vector<16xf32> to vector<1x16xf32>
    %c0_45 = arith.constant 0 : index
    %c0_46 = arith.constant 0 : index
    %158 = vector.load %arg8[%c0_45, %c0_46] : memref<1x1xf32, #tpu.memory_space<vmem>>, vector<1x1xf32>
    %159 = vector.broadcast %158 : vector<1x1xf32> to vector<1x16xf32>
    %160 = arith.addf %157, %159 : vector<1x16xf32>
    %c0_47 = arith.constant 0 : index
    %c0_48 = arith.constant 0 : index
    %161 = vector.load %arg9[%c0_47, %c0_48] : memref<1x16xf32, #tpu.memory_space<vmem>>, vector<1x16xf32>
    tpu.vector_store %arg9[%c0_47, %c0_48], %160 {strides = array<i32>} : memref<1x16xf32, #tpu.memory_space<vmem>>, vector<1x16xf32>,
    %c0_49 = arith.constant 0 : index
    %c0_50 = arith.constant 0 : index
    %162 = vector.load %arg10[%c0_49, %c0_50] : memref<8x16xf32, #tpu.memory_space<vmem>>, vector<8x16xf32>
    tpu.vector_store %arg10[%c0_49, %c0_50], %149 {strides = array<i32>} : memref<8x16xf32, #tpu.memory_space<vmem>>, vector<8x16xf32>,
    %c16_i32 = arith.constant 16 : i32
    %163 = arith.muli %arg0, %c16_i32 : i32
    %164 = tpu.iota {dimensions = array<i32: 1>} : vector<8x16xi32>
    %165 = vector.broadcast %163 : i32 to vector<8x16xi32>
    %166 = arith.addi %164, %165 : vector<8x16xi32>
    %c16_i32_51 = arith.constant 16 : i32
    %167 = vector.broadcast %c16_i32_51 : i32 to vector<8x16xi32>
    %168 = arith.cmpi slt, %166, %167 : vector<8x16xi32>
    %cst_52 = arith.constant 0.000000e+00 : f32
    %169 = vector.broadcast %cst_52 : f32 to vector<8x16xf32>
    %170 = arith.select %168, %149, %169 : vector<8x16xi1>, vector<8x16xf32>
    %cst_53 = arith.constant dense<0.000000e+00> : vector<8xf32>
    %171 = vector.multi_reduction <add>, %170, %cst_53 [1] : vector<8x16xf32> to vector<8xf32>
    %172 = vector.shape_cast %171 : vector<8xf32> to vector<8x1xf32>
    %c0_54 = arith.constant 0 : index
    %c0_55 = arith.constant 0 : index
    %173 = vector.load %arg11[%c0_54, %c0_55] : memref<8x1xf32, #tpu.memory_space<vmem>>, vector<8x1xf32>
    tpu.vector_store %arg11[%c0_54, %c0_55], %172 {strides = array<i32>} : memref<8x1xf32, #tpu.memory_space<vmem>>, vector<8x1xf32>,
    return
  }
  func.func @transform_0(%arg0: i32) -> (i32, i32) {
    %c0_i32 = arith.constant 0 : i32
    %c0_i32_0 = arith.constant 0 : i32
    return %c0_i32, %arg0 : i32, i32
  }
  func.func @transform_1(%arg0: i32) -> (i32, i32) {
    %c0_i32 = arith.constant 0 : i32
    %c0_i32_0 = arith.constant 0 : i32
    %c0_i32_1 = arith.constant 0 : i32
    return %c0_i32, %c0_i32_0 : i32, i32
  }
  func.func @transform_2(%arg0: i32) -> (i32, i32, i32) {
    %c0_i32 = arith.constant 0 : i32
    %c0_i32_0 = arith.constant 0 : i32
    %c0_i32_1 = arith.constant 0 : i32
    %c0_i32_2 = arith.constant 0 : i32
    return %c0_i32, %c0_i32_0, %c0_i32_1 : i32, i32, i32
  }
  func.func @transform_3(%arg0: i32) -> (i32, i32) {
    %c0_i32 = arith.constant 0 : i32
    %c0_i32_0 = arith.constant 0 : i32
    %c0_i32_1 = arith.constant 0 : i32
    return %c0_i32, %c0_i32_0 : i32, i32
  }
  func.func @transform_4(%arg0: i32) -> (i32, i32, i32) {
    %c0_i32 = arith.constant 0 : i32
    %c0_i32_0 = arith.constant 0 : i32
    %c0_i32_1 = arith.constant 0 : i32
    %c0_i32_2 = arith.constant 0 : i32
    return %c0_i32, %c0_i32_0, %c0_i32_1 : i32, i32, i32
  }
  func.func @transform_5(%arg0: i32) -> (i32, i32, i32) {
    %c0_i32 = arith.constant 0 : i32
    %c0_i32_0 = arith.constant 0 : i32
    %c0_i32_1 = arith.constant 0 : i32
    %c0_i32_2 = arith.constant 0 : i32
    return %c0_i32, %c0_i32_0, %c0_i32_1 : i32, i32, i32
  }
  func.func @transform_6(%arg0: i32) -> (i32, i32) {
    %c0_i32 = arith.constant 0 : i32
    %c0_i32_0 = arith.constant 0 : i32
    %c0_i32_1 = arith.constant 0 : i32
    return %c0_i32, %c0_i32_0 : i32, i32
  }
  func.func @transform_7(%arg0: i32) -> (i32, i32) {
    %c0_i32 = arith.constant 0 : i32
    %c0_i32_0 = arith.constant 0 : i32
    %c0_i32_1 = arith.constant 0 : i32
    return %c0_i32, %c0_i32_0 : i32, i32
  }
  func.func @transform_8(%arg0: i32) -> (i32, i32) {
    %c0_i32 = arith.constant 0 : i32
    %c0_i32_0 = arith.constant 0 : i32
    return %c0_i32, %arg0 : i32, i32
  }
  func.func @transform_9(%arg0: i32) -> (i32, i32) {
    %c0_i32 = arith.constant 0 : i32
    %c0_i32_0 = arith.constant 0 : i32
    return %c0_i32, %arg0 : i32, i32
  }
  func.func @transform_10(%arg0: i32) -> (i32, i32) {
    %c0_i32 = arith.constant 0 : i32
    %c0_i32_0 = arith.constant 0 : i32
    return %c0_i32, %arg0 : i32, i32
  }
}

</mosaic_0001>

<bundles_post_ra>
// kernel: tpu_custom_call.1
= control target key start
LH: loop header
LB: loop body
LE: loop exit
PB: predicated region body
PF: predicated region fallthrough
CT: control target
= control target key end

     0   :  { %s8986_s0 = inlined_call_operand.vmem [shape: f32[8,16], index: 0, kind: input, shape index: {}]   ;;  %s8987_s1 = inlined_call_operand.vmem [shape: f32[96,8], index: 1, kind: input, shape index: {}]   ;;  %s8988_s2 = inlined_call_operand.vmem [shape: f32[3,8,32], index: 2, kind: input, shape index: {}]   ;;  %s8989_s3 = inlined_call_operand.vmem [shape: f32[96,1], index: 3, kind: input, shape index: {}]   ;;  %s8990_s4 = inlined_call_operand.vmem [shape: f32[1,96,32], index: 4, kind: input, shape index: {}]   ;;  %s8991_s5 = inlined_call_operand.vmem [shape: f32[1,96,1], index: 5, kind: input, shape index: {}]   ;;  %s8992_s6 = inlined_call_operand.vmem [shape: f32[32,1], index: 6, kind: input, shape index: {}]   ;;  %s8993_s7 = inlined_call_operand.<no memory space> [shape: f32[1,1], index: 7, kind: input, shape index: {}]   ;;  %s8994_s8 = inlined_call_operand.hbm [shape: f32[1,16], index: 8, kind: output, shape index: {0}]   ;;  %s8995_s9 = inlined_call_operand.hbm [shape: f32[8,16], index: 9, kind: output, shape index: {1}]   ;;  %s8996_s10 = inlined_call_operand.vmem [shape: f32[8,1], index: 10, kind: output, shape index: {2}]  }
   0x1   :  { %v16_v0 = vstv %s8993_s7 }
   0x2   :  { %17 = vst [vmem:[#allocation2] sm:$0x1] %v16_v0 }
   0x3   :  { %18 = vsyncpa [#allocation4], 0  ;;  %v36_v1 = vld [vmem:[%s8986_s0] sm:$0xff]  ;;  %v8997_v2 = vlaneseq  ;;  %v52_v3 = vld [vmem:[%s8989_s3 + $0x18] sm:$0xff]  ;;  %v6788_v5 = vmov 0   ;;  %vm121_vm0 = vcmask 64512  }
   0x4   :  { %v50_v4 = vld [vmem:[%s8989_s3 + $0x8] sm:$0xff]  ;;  %5851 = vset.pattern.permute.xlu1 %v6788_v5  ;;  %5850 = vset.pattern.permute.xlu0 %v6788_v5  ;;  %v6789_v6 = vmov 1966171168   ;;  %v37_v8 = vld [vmem:[%s8987_s1] sm:$0xff]  ;;  %v811_v11 = vcombine.high %v36_v1, %v36_v1  ;;  %v51_v13 = vld [vmem:[%s8989_s3 + $0x10] sm:$0xff] }
   0x5   :  { %v813_v7 = vunpack.c.l.s4 %v6789_v6  ;;  %5456 = vmatprep.subr.mxu0 %v36_v1  ;;  %v6863_v9 = vshrl.u32 %v8997_v2, 7  ;;  %78 = vperm.xlu0 %5850, %v52_v3   ;;  %v38_v10 = vld [vmem:[%s8987_s1 + $0x8] sm:$0xff]  ;;  %v39_v14 = vld [vmem:[%s8987_s1 + $0x10] sm:$0xff]  ;;  %v49_v16 = vld [vmem:[%s8989_s3] sm:$0xff] }
   0x6   :  { %68 = vperm.xlu1 %5851, %v50_v4   ;;  %5457 = vmatpush3.msra.mxu0 %v36_v1  ;;  %v6884_v17 = vld [vmem:[%s8988_s2] sm:$0xff]  ;;  %v40_v20 = vld [vmem:[%s8987_s1 + $0x18] sm:$0xff] }
   0x7   :  { %v814_v12 = vunpack.c.0.s8 %v813_v7  ;;  %v6875_v15 = vsub.s32 0, %v6863_v9  ;;  %5458 = vmatprep.mubr.msk.f32.mxu0 %vm121_vm0, %v37_v8  ;;  %v6889_v19 = vsub.s32 6, %v6863_v9  ;;  %v6896_v21 = vsub.s32 5, %v6863_v9  ;;  %v60_v24 = vld [vmem:[%s8989_s3 + $0x58] sm:$0xff]  ;;  %v41_v26 = vld [vmem:[%s8987_s1 + $0x20] sm:$0xff] }
   0x8   :  { %5459 = vmatmul.mubr.msk.f32.vlgmr.msra.gmra.mxu0 %vm121_vm0, %v38_v10 }
   0x9   :  { %9024 = vst [vmem:[#allocation9_spill] sm:$0xff] %v6875_v15  ;;  %v817_v18 = vsub.s32 %v814_v12, %v6863_v9  ;;  %73 = vperm.xlu0 %5850, %v51_v13   ;;  %5461 = vmatprep.mubr.msk.f32.mxu0 %vm121_vm0, %v39_v14  ;;  %v661_v25 = vrot.slane %v6884_v17, %v6875_v15 }
   0xa   :  { %63 = vperm.xlu1 %5851, %v49_v16   ;;  %v6908_v27 = vrot.slane %v6884_v17, %v6889_v19  ;;  %v6912_v28 = vrot.slane %v6884_v17, %v6896_v21 }
   0xb   :  { %v818_v22 = vrot.slane %v36_v1, %v817_v18  ;;  %v825_v23 = vrot.slane %v811_v11, %v817_v18 }
   0xc   :  { %5462 = vmatmul.mubr.msk.f32.gmra.mxu0 %vm121_vm0, %v40_v20 }
   0xd   :  { %v826_v29 = vcombine.high %v818_v22, %v818_v22  ;;  %v827_v30 = vcombine.high %v825_v23, %v825_v23  ;;  %v6914_v31 = vrot.slane %v818_v22, %v817_v18  ;;  %v6916_v32 = vrot.slane %v825_v23, %v817_v18 }
   0xe   :  { %19 = vsyncpa [#allocation6], 0  ;;  %118 = vperm.xlu0 %5850, %v60_v24   ;;  %5464 = vmatprep.mubr.msk.f32.mxu0 %vm121_vm0, %v41_v26  ;;  %v42_v33 = vld [vmem:[%s8987_s1 + $0x28] sm:$0xff]  ;;  %v56_v36 = vld [vmem:[%s8989_s3 + $0x38] sm:$0xff]  ;;  %v698_v48 = vsub.s32 2, %v6863_v9  ;;  %v679_v49 = vsub.s32 1, %v6863_v9 }
   0xf   :  { %v6923_v34 = vrot.slane %v826_v29, %v817_v18  ;;  %v6925_v35 = vrot.slane %v827_v30, %v817_v18  ;;  %675 = vbcast.lane.b32.xlu1 %v661_v25, 280  ;;  %v43_v37 = vld [vmem:[%s8987_s1 + $0x30] sm:$0xff]  ;;  %v44_v39 = vld [vmem:[%s8987_s1 + $0x38] sm:$0xff]  ;;  %v45_v40 = vld [vmem:[%s8987_s1 + $0x40] sm:$0xff]  ;;  %v6978_v53 = vsub.s32 4, %v6863_v9  ;;  %v6988_v56 = vsub.s32 3, %v6863_v9 }
  0x10   :  { %v59_v38 = vld [vmem:[%s8989_s3 + $0x50] sm:$0xff]  ;;  %5465 = vmatmul.mubr.msk.f32.gmra.mxu0 %vm121_vm0, %v42_v33  ;;  %v46_v42 = vld [vmem:[%s8987_s1 + $0x48] sm:$0xff]  ;;  %v48_v45 = vld [vmem:[%s8987_s1 + $0x58] sm:$0xff]  ;;  %v699_v51 = vrot.slane %v6884_v17, %v698_v48  ;;  %v680_v52 = vrot.slane %v6884_v17, %v679_v49  ;;  %v7014_v1 = vsub.s32 7, %v6863_v9  ;;  %v7044_v14 = vrot.slane %v6914_v31, %v6875_v15 }
  0x11   :  { %5467 = vmatprep.mubr.msk.f32.mxu0 %vm121_vm0, %v43_v37  ;;  %v55_v41 = vld [vmem:[%s8989_s3 + $0x30] sm:$0xff]  ;;  %v58_v43 = vld [vmem:[%s8989_s3 + $0x48] sm:$0xff]  ;;  %v57_v47 = vld [vmem:[%s8989_s3 + $0x40] sm:$0xff]  ;;  %v737_v55 = vrot.slane %v6884_v17, %v6978_v53  ;;  %v718_v58 = vrot.slane %v6884_v17, %v6988_v56  ;;  %vm431_vm1 = vcmask 261120   ;;  %vm4496_vm2 = vcmask 130048  }
  0x12   :  { %98 = vperm.xlu0 %5850, %v56_v36   ;;  %v47_v44 = vld [vmem:[%s8987_s1 + $0x50] sm:$0xff]  ;;  %v54_v46 = vld [vmem:[%s8989_s3 + $0x28] sm:$0xff]  ;;  %v53_v50 = vld [vmem:[%s8989_s3 + $0x20] sm:$0xff]  ;;  %v794_v6 = vrot.slane %v6884_v17, %v7014_v1  ;;  %v856_v36 = vcombine.high %v6914_v31, %v6914_v31  ;;  %v7086_v31 = vrot.slane %v6923_v34, %v6875_v15  ;;  %vm4649_vm3 = vcmask 1041409   ;;  %s6791_s1 = smov [#allocation5]  }
  0x13   :  { %113 = vperm.xlu1 %5851, %v59_v38   ;;  %v6983_v54 = vld [vmem:[%s8988_s2 + $0x10] sm:$0xff]  ;;  %v6997_v59 = vld [vmem:[%s8988_s2 + $0x8] sm:$0xff]  ;;  %v347_v24 = vld [vmem:[%s8990_s4] sm:$0xff]  ;;  %vm4652_vm4 = vcmask 1042434   ;;  %vm4655_vm5 = vcmask 1043459   ;;  %vm4658_vm6 = vcmask 1044484  }
  0x14   :  { %5468 = vmatmul.mubr.msk.f32.gmra.mxu0 %vm121_vm0, %v44_v39  ;;  %v1443_v57 = vrot.slane %v6983_v54, %v6875_v15  ;;  %v1161_v60 = vrot.slane %v6997_v59, %v6875_v15  ;;  %v1481_v61 = vrot.slane %v6983_v54, %v698_v48  ;;  %v1199_v62 = vrot.slane %v6997_v59, %v698_v48  ;;  %s4953_s0 = sshll.u32 %s6791_s1, 4  ;;  %s4954_s0 = int_to_ptr.vmem [resolvable:$true] %s4953_s0 }
  0x15   :  { %5470 = vmatprep.mubr.msk.f32.mxu0 %vm121_vm0, %v45_v40  ;;  %v1462_v63 = vrot.slane %v6983_v54, %v679_v49  ;;  %v1180_v0 = vrot.slane %v6997_v59, %v679_v49  ;;  %v1519_v3 = vrot.slane %v6983_v54, %v6978_v53  ;;  %v7030_v9 = vrot.slane %v6997_v59, %v6978_v53  ;;  %s6744_s3 = scalar_lea.vmem %s4954_s0, 128  ;;  %p6749_p1 = scmp.lt.s32.totalorder %s4954_s0, %s4954_s0 }
  0x16   :  { %671 = vbcast.lane.b32.xlu0 %v661_v25, 272  ;;  %v7034_v10 = vrot.slane %v6983_v54, %v6988_v56  ;;  %v7050_v17 = vrot.slane %v6997_v59, %v6988_v56  ;;  %5484 = vmatprep.mubr.msk.f32.mxu1 %vm431_vm1, %v347_v24  ;;  %vm4661_vm7 = vcmask 1045509   ;;  %vm4664_vm8 = vcmask 1046534   ;;  %p6745_p0 = scmp.ne.s32.totalorder %s4954_s0, %s6744_s3  ;;  %p6750_p2 = scmp.lt.s32.totalorder %s6744_s3, %s6744_s3 }
  0x17   :  { %93 = vperm.xlu1 %5851, %v55_v41   ;;  %vm4667_vm9 = vcmask 1047559   ;;  %vm4899_vm11 = vcmask 122880  }
  0x18   :  { %5471 = vmatmul.mubr.msk.f32.gmra.mxu0 %vm121_vm0, %v46_v42  ;;  %v7078_v42 = vrot.slane %v856_v36, %v6875_v15  ;;  %v7122_v36 = vrot.slane %v6983_v54, %v6896_v21  ;;  %p6751_p3 = por %p6750_p2, %p6749_p1 }
  0x19   :  { %5473 = vmatprep.mubr.msk.f32.mxu0 %vm121_vm0, %v47_v44 }
  0x1a   :  { %108 = vperm.xlu0 %5850, %v58_v43   ;;  %p6752_p4 = pnand %p6751_p3, %p6745_p0 }
  0x1b   :  { %667 = vbcast.lane.b32.xlu1 %v661_v25, 264 }
  0x1c   :  { %5474 = vmatmul.mubr.msk.f32.gmra.mxu0 %vm121_vm0, %v48_v45 }
  0x1d   :  { %5510 = vmatprep.mubr.msk.f32.mxu0 %vm431_vm1, %v347_v24 }
  0x1e   :  { %88 = vperm.xlu0 %5850, %v54_v46  }
  0x1f   :  { %103 = vperm.xlu1 %5851, %v57_v47  }
  0x22   :  { %663 = vbcast.lane.b32.xlu0 %v661_v25, 256 }
  0x23   :  { %83 = vperm.xlu1 %5851, %v53_v50  }
  0x26   :  { %713 = vbcast.lane.b32.xlu0 %v699_v51, 280 }
  0x27   :  { %694 = vbcast.lane.b32.xlu1 %v680_v52, 280 }
  0x2a   :  { %709 = vbcast.lane.b32.xlu0 %v699_v51, 272 }
  0x2b   :  { %690 = vbcast.lane.b32.xlu1 %v680_v52, 272 }
  0x2e   :  { %705 = vbcast.lane.b32.xlu0 %v699_v51, 264 }
  0x2f   :  { %686 = vbcast.lane.b32.xlu1 %v680_v52, 264 }
  0x32   :  { %701 = vbcast.lane.b32.xlu0 %v699_v51, 256 }
  0x33   :  { %682 = vbcast.lane.b32.xlu1 %v680_v52, 256 }
  0x36   :  { %751 = vbcast.lane.b32.xlu0 %v737_v55, 280 }
  0x37   :  { %1457 = vbcast.lane.b32.xlu1 %v1443_v57, 280 }
  0x3a   :  { %732 = vbcast.lane.b32.xlu0 %v718_v58, 280 }
  0x3b   :  { %747 = vbcast.lane.b32.xlu1 %v737_v55, 272 }
  0x3e   :  { %1175 = vbcast.lane.b32.xlu0 %v1161_v60, 280 }
  0x3f   :  { %1453 = vbcast.lane.b32.xlu1 %v1443_v57, 272 }
  0x42   :  { %728 = vbcast.lane.b32.xlu0 %v718_v58, 272 }
  0x43   :  { %743 = vbcast.lane.b32.xlu1 %v737_v55, 264 }
  0x46   :  { %1171 = vbcast.lane.b32.xlu0 %v1161_v60, 272 }
  0x47   :  { %1449 = vbcast.lane.b32.xlu1 %v1443_v57, 264 }
  0x4a   :  { %724 = vbcast.lane.b32.xlu0 %v718_v58, 264 }
  0x4b   :  { %739 = vbcast.lane.b32.xlu1 %v737_v55, 256 }
  0x4e   :  { %1167 = vbcast.lane.b32.xlu0 %v1161_v60, 264 }
  0x4f   :  { %1445 = vbcast.lane.b32.xlu1 %v1443_v57, 256 }
  0x52   :  { %720 = vbcast.lane.b32.xlu0 %v718_v58, 256 }
  0x53   :  { %789 = vbcast.lane.b32.xlu1 %v6908_v27, 280 }
  0x56   :  { %1163 = vbcast.lane.b32.xlu0 %v1161_v60, 256 }
  0x57   :  { %1495 = vbcast.lane.b32.xlu1 %v1481_v61, 280 }
  0x5a   :  { %770 = vbcast.lane.b32.xlu0 %v6912_v28, 280 }
  0x5b   :  { %785 = vbcast.lane.b32.xlu1 %v6908_v27, 272 }
  0x5e   :  { %1213 = vbcast.lane.b32.xlu0 %v1199_v62, 280 }
  0x5f   :  { %1476 = vbcast.lane.b32.xlu1 %v1462_v63, 280 }
  0x62   :  { %1491 = vbcast.lane.b32.xlu0 %v1481_v61, 272 }
  0x63   :  { %766 = vbcast.lane.b32.xlu1 %v6912_v28, 272 }
  0x66   :  { %781 = vbcast.lane.b32.xlu0 %v6908_v27, 264 }
  0x67   :  { %1194 = vbcast.lane.b32.xlu1 %v1180_v0, 280 }
  0x6a   :  { %1209 = vbcast.lane.b32.xlu0 %v1199_v62, 272 }
  0x6b   :  { %1472 = vbcast.lane.b32.xlu1 %v1462_v63, 272 }
  0x6e   :  { %1487 = vbcast.lane.b32.xlu0 %v1481_v61, 264 }
  0x6f   :  { %762 = vbcast.lane.b32.xlu1 %v6912_v28, 264 }
  0x72   :  { %777 = vbcast.lane.b32.xlu0 %v6908_v27, 256 }
  0x73   :  { %1190 = vbcast.lane.b32.xlu1 %v1180_v0, 272 }
  0x76   :  { %1205 = vbcast.lane.b32.xlu0 %v1199_v62, 264 }
  0x77   :  { %1468 = vbcast.lane.b32.xlu1 %v1462_v63, 264 }
  0x7a   :  { %1483 = vbcast.lane.b32.xlu0 %v1481_v61, 256  ;;  %v7100_v61 = vrot.slane %v6983_v54, %v6889_v19 }
  0x7b   :  { %758 = vbcast.lane.b32.xlu1 %v6912_v28, 256 }
  0x7e   :  { %1186 = vbcast.lane.b32.xlu0 %v1180_v0, 264 }
  0x7f   :  { %1201 = vbcast.lane.b32.xlu1 %v1199_v62, 256 }
  0x80   :  { %v7018_v4 = vpop.permute.xlu0 %78 }
  0x81   :  { %v7020_v5 = vpop.permute.xlu1 %68 }
  0x82   :  { %1464 = vbcast.lane.b32.xlu0 %v1462_v63, 256 }
  0x83   :  { %1533 = vbcast.lane.b32.xlu1 %v1519_v3, 280 }
  0x84   :  { %v7024_v7 = vpop.permute.xlu0 %73 }
  0x85   :  { %v7026_v8 = vpop.permute.xlu1 %63 }
  0x86   :  { %808 = vbcast.lane.b32.xlu0 %v794_v6, 280 }
  0x87   :  { %1182 = vbcast.lane.b32.xlu1 %v1180_v0, 256 }
  0x89   :  { %v7036_v11 = vpop.permute.xlu0 %118  ;;  %v676_v12 = vpop.permute.xlu1 %675 }
  0x8a   :  { %1251 = vbcast.lane.b32.xlu0 %v7030_v9, 280  ;;  %v903_v20 = vmul.f32 %v7044_v14, %v676_v12 }
  0x8b   :  { %1514 = vbcast.lane.b32.xlu1 %v7034_v10, 280 }
  0x8c   :  { %v935_v26 = vadd.f32 %v903_v20, %v7018_v4 }
  0x8d   :  { %v7040_v13 = vpop.permute.xlu0 %98 }
  0x8e   :  { %v7046_v16 = vpop.permute.xlu1 %113  ;;  %1529 = vbcast.lane.b32.xlu0 %v1519_v3, 272  ;;  %v5012_v37 = vmul.f32 -1.442695, %v935_v26 }
  0x8f   :  { %804 = vbcast.lane.b32.xlu1 %v794_v6, 272 }
  0x90   :  { %5853 = vpow2.f32 %v5012_v37 }
  0x91   :  { %v672_v18 = vpop.permute.xlu0 %671 }
  0x92   :  { %v7053_v22 = vpop.permute.xlu1 %93  ;;  %1232 = vbcast.lane.b32.xlu0 %v7050_v17, 280  ;;  %v902_v23 = vmul.f32 %v7044_v14, %v672_v18 }
  0x93   :  { %1247 = vbcast.lane.b32.xlu1 %v7030_v9, 272 }
  0x94   :  { %v934_v28 = vadd.f32 %v902_v23, %v7024_v7  ;;  %v7110_v23 = vrot.slane %v6997_v59, %v6889_v19 }
  0x95   :  { %v7063_v25 = vpop.permute.xlu0 %108 }
  0x96   :  { %v668_v27 = vpop.permute.xlu1 %667  ;;  %1510 = vbcast.lane.b32.xlu0 %v7034_v10, 272  ;;  %v5011_v39 = vmul.f32 -1.442695, %v934_v28  ;;  %v858_v28 = vcombine.high %v6923_v34, %v6923_v34 }
  0x97   :  { %v901_v29 = vmul.f32 %v7044_v14, %v668_v27  ;;  %1525 = vbcast.lane.b32.xlu1 %v1519_v3, 264 }
  0x98   :  { %5855 = vpow2.f32 %v5011_v39 }
  0x99   :  { %v933_v30 = vadd.f32 %v901_v29, %v7020_v5  ;;  %v7070_v33 = vpop.permute.xlu0 %88 }
  0x9a   :  { %v7074_v38 = vpop.permute.xlu1 %103  ;;  %800 = vbcast.lane.b32.xlu0 %v794_v6, 264 }
  0x9b   :  { %1228 = vbcast.lane.b32.xlu1 %v7050_v17, 272  ;;  %v5010_v40 = vmul.f32 -1.442695, %v933_v30 }
  0x9d   :  { %v664_v41 = vpop.permute.xlu0 %663  ;;  %5857 = vpow2.f32 %v5010_v40  ;;  %v5854_v18 = vpop.eup %5853 }
  0x9e   :  { %v900_v43 = vmul.f32 %v7044_v14, %v664_v41  ;;  %v7081_v44 = vpop.permute.xlu1 %83  ;;  %1243 = vbcast.lane.b32.xlu0 %v7030_v9, 264  ;;  %v1063_v19 = vadd.f32 1.0, %v5854_v18 }
  0x9f   :  { %1506 = vbcast.lane.b32.xlu1 %v7034_v10, 264 }
  0xa0   :  { %v932_v45 = vadd.f32 %v900_v43, %v7026_v8 }
  0xa1   :  { %v714_v46 = vpop.permute.xlu0 %713 }
  0xa2   :  { %v5009_v47 = vmul.f32 -1.442695, %v932_v45  ;;  %v911_v48 = vmul.f32 %v7078_v42, %v714_v46  ;;  %v695_v49 = vpop.permute.xlu1 %694  ;;  %1521 = vbcast.lane.b32.xlu0 %v1519_v3, 256 }
  0xa3   :  { %v907_v50 = vmul.f32 %v7086_v31, %v695_v49  ;;  %796 = vbcast.lane.b32.xlu1 %v794_v6, 256 }
  0xa4   :  { %5859 = vpow2.f32 %v5009_v47  ;;  %v943_v51 = vadd.f32 %v911_v48, %v7018_v4  ;;  %v7130_v48 = vrot.slane %v858_v28, %v6875_v15 }
  0xa5   :  { %v939_v52 = vadd.f32 %v907_v50, %v7018_v4  ;;  %v710_v53 = vpop.permute.xlu0 %709  ;;  %v5856_v24 = vpop.eup %5855 }
  0xa6   :  { %v5020_v55 = vmul.f32 -1.442695, %v943_v51  ;;  %v910_v56 = vmul.f32 %v7078_v42, %v710_v53  ;;  %v691_v57 = vpop.permute.xlu1 %690  ;;  %1224 = vbcast.lane.b32.xlu0 %v7050_v17, 264  ;;  %v1062_v34 = vadd.f32 1.0, %v5856_v24  ;;  %v7137_v53 = vrot.slane %v6997_v59, %v6896_v21 }
  0xa7   :  { %v5016_v58 = vmul.f32 -1.442695, %v939_v52  ;;  %v906_v60 = vmul.f32 %v7086_v31, %v691_v57  ;;  %1239 = vbcast.lane.b32.xlu1 %v7030_v9, 256 }
  0xa8   :  { %v942_v62 = vadd.f32 %v910_v56, %v7024_v7  ;;  %5861 = vpow2.f32 %v5020_v55 }
  0xa9   :  { %v938_v63 = vadd.f32 %v906_v60, %v7024_v7  ;;  %v706_v0 = vpop.permute.xlu0 %705  ;;  %5863 = vpow2.f32 %v5016_v58 }
  0xaa   :  { %v5019_v3 = vmul.f32 -1.442695, %v942_v62  ;;  %v909_v6 = vmul.f32 %v7078_v42, %v706_v0  ;;  %v687_v12 = vpop.permute.xlu1 %686  ;;  %1502 = vbcast.lane.b32.xlu0 %v7034_v10, 256  ;;  %v5858_v27 = vpop.eup %5857  ;;  %v7117_v10 = vrot.slane %v6916_v32, %v6875_v15 }
  0xab   :  { %v5015_v20 = vmul.f32 -1.442695, %v938_v63  ;;  %v905_v9 = vmul.f32 %v7086_v31, %v687_v12  ;;  %1571 = vbcast.lane.b32.xlu1 %v7100_v61, 280  ;;  %v1061_v45 = vadd.f32 1.0, %v5858_v27 }
  0xac   :  { %5865 = vpow2.f32 %v5019_v3  ;;  %v941_v26 = vadd.f32 %v909_v6, %v7020_v5 }
  0xad   :  { %v937_v29 = vadd.f32 %v905_v9, %v7020_v5  ;;  %v702_v30 = vpop.permute.xlu0 %701  ;;  %5867 = vpow2.f32 %v5015_v20 }
  0xae   :  { %v5018_v37 = vmul.f32 -1.442695, %v941_v26  ;;  %v908_v39 = vmul.f32 %v7078_v42, %v702_v30  ;;  %v683_v40 = vpop.permute.xlu1 %682  ;;  %1220 = vbcast.lane.b32.xlu0 %v7050_v17, 256 }
  0xaf   :  { %v5014_v41 = vmul.f32 -1.442695, %v937_v29  ;;  %v904_v43 = vmul.f32 %v7086_v31, %v683_v40  ;;  %1289 = vbcast.lane.b32.xlu1 %v7110_v23, 280 }
  0xb0   :  { %5869 = vpow2.f32 %v5018_v37  ;;  %v940_v46 = vadd.f32 %v908_v39, %v7026_v8 }
  0xb1   :  { %v5860_v47 = vpop.eup %5859  ;;  %5871 = vpow2.f32 %v5014_v41  ;;  %v936_v49 = vadd.f32 %v904_v43, %v7026_v8  ;;  %v752_v50 = vpop.permute.xlu0 %751 }
  0xb2   :  { %5873 = vrcp.f32 %v1063_v19  ;;  %v5017_v17 = vmul.f32 -1.442695, %v940_v46  ;;  %v919_v51 = vmul.f32 %v7117_v10, %v752_v50  ;;  %v1458_v52 = vpop.permute.xlu1 %1457  ;;  %1552 = vbcast.lane.b32.xlu0 %v7122_v36, 280  ;;  %v1060_v55 = vadd.f32 1.0, %v5860_v47 }
  0xb3   :  { %5875 = vrcp.f32 %v1062_v34  ;;  %v5013_v56 = vmul.f32 -1.442695, %v936_v49  ;;  %v1595_v57 = vmul.f32 %v1458_v52, %v7044_v14  ;;  %1567 = vbcast.lane.b32.xlu1 %v7100_v61, 272 }
  0xb4   :  { %5877 = vrcp.f32 %v1061_v45  ;;  %v951_v58 = vadd.f32 %v919_v51, %v7018_v4 }
  0xb5   :  { %5879 = vpow2.f32 %v5017_v17  ;;  %v1627_v60 = vadd.f32 %v1595_v57, %v7036_v11  ;;  %v733_v62 = vpop.permute.xlu0 %732  ;;  %v5862_v63 = vpop.eup %5861 }
  0xb6   :  { %5881 = vpow2.f32 %v5013_v56  ;;  %v5028_v0 = vmul.f32 -1.442695, %v951_v58  ;;  %v915_v21 = vmul.f32 %v7130_v48, %v733_v62  ;;  %v748_v3 = vpop.permute.xlu1 %747  ;;  %1270 = vbcast.lane.b32.xlu0 %v7137_v53, 280  ;;  %v5864_v6 = vpop.eup %5863  ;;  %v1071_v12 = vadd.f32 1.0, %v5862_v63 }
  0xb7   :  { %5883 = vrcp.f32 %v1060_v55  ;;  %v5046_v18 = vmul.f32 -1.442695, %v1627_v60  ;;  %v918_v20 = vmul.f32 %v7117_v10, %v748_v3  ;;  %1285 = vbcast.lane.b32.xlu1 %v7110_v23, 272  ;;  %v1067_v9 = vadd.f32 1.0, %v5864_v6 }
  0xb8   :  { %5885 = vpow2.f32 %v5028_v0  ;;  %v947_v24 = vadd.f32 %v915_v21, %v7018_v4 }
  0xb9   :  { %v5866_v26 = vpop.eup %5865  ;;  %5887 = vrcp.f32 %v1071_v12  ;;  %v950_v27 = vadd.f32 %v918_v20, %v7024_v7  ;;  %v1176_v28 = vpop.permute.xlu0 %1175 }
  0xba   :  { %5889 = vrcp.f32 %v1067_v9  ;;  %v1070_v29 = vadd.f32 1.0, %v5866_v26  ;;  %v5024_v30 = vmul.f32 -1.442695, %v947_v24  ;;  %v1313_v19 = vmul.f32 %v1176_v28, %v7044_v14  ;;  %v1454_v37 = vpop.permute.xlu1 %1453  ;;  %1548 = vbcast.lane.b32.xlu0 %v7122_v36, 272  ;;  %v5868_v39 = vpop.eup %5867 }
  0xbb   :  { %5891 = vpow2.f32 %v5046_v18  ;;  %v5027_v40 = vmul.f32 -1.442695, %v950_v27  ;;  %v1594_v34 = vmul.f32 %v1454_v37, %v7044_v14  ;;  %1563 = vbcast.lane.b32.xlu1 %v7100_v61, 264  ;;  %v1066_v41 = vadd.f32 1.0, %v5868_v39 }
  0xbc   :  { %5893 = vrcp.f32 %v1070_v29  ;;  %v1345_v50 = vadd.f32 %v1313_v19, %v7040_v13  ;;  %v857_v27 = vcombine.high %v6916_v32, %v6916_v32 }
  0xbd   :  { %v5870_v43 = vpop.eup %5869  ;;  %5895 = vpow2.f32 %v5024_v30  ;;  %v1626_v45 = vadd.f32 %v1594_v34, %v7046_v16  ;;  %v729_v46 = vpop.permute.xlu0 %728 }
  0xbe   :  { %v5872_v47 = vpop.eup %5871  ;;  %5897 = vrcp.f32 %v1066_v41  ;;  %v1069_v49 = vadd.f32 1.0, %v5870_v43  ;;  %v914_v17 = vmul.f32 %v7130_v48, %v729_v46  ;;  %v744_v51 = vpop.permute.xlu1 %743  ;;  %1266 = vbcast.lane.b32.xlu0 %v7137_v53, 272  ;;  %v7186_v46 = vrot.slane %v857_v27, %v6875_v15 }
  0xbf   :  { %v7157_v52 = vpop.eup %5873  ;;  %v1065_v55 = vadd.f32 1.0, %v5872_v47  ;;  %5899 = vpow2.f32 %v5027_v40  ;;  %v5045_v56 = vmul.f32 -1.442695, %v1626_v45  ;;  %v917_v57 = vmul.f32 %v7117_v10, %v744_v51  ;;  %1281 = vbcast.lane.b32.xlu1 %v7110_v23, 264 }
  0xc0   :  { %v7161_v58 = vpop.eup %5875  ;;  %5901 = vrcp.f32 %v1069_v49  ;;  %v946_v60 = vadd.f32 %v914_v17, %v7024_v7  ;;  %v7191_v49 = vrot.slane %v6983_v54, %v7014_v1 }
  0xc1   :  { %v7164_v62 = vpop.eup %5877  ;;  %5903 = vrcp.f32 %v1065_v55  ;;  %v949_v63 = vadd.f32 %v917_v57, %v7020_v5  ;;  %v1172_v0 = vpop.permute.xlu0 %1171 }
  0xc2   :  { %v5880_v21 = vpop.eup %5879  ;;  %5905 = vtanh.f32 %v1345_v50  ;;  %v5023_v3 = vmul.f32 -1.442695, %v946_v60  ;;  %v1312_v6 = vmul.f32 %v1172_v0, %v7044_v14  ;;  %v1450_v12 = vpop.permute.xlu1 %1449  ;;  %1544 = vbcast.lane.b32.xlu0 %v7122_v36, 264 }
  0xc3   :  { %v5882_v18 = vpop.eup %5881  ;;  %v1068_v20 = vadd.f32 1.0, %v5880_v21  ;;  %5907 = vpow2.f32 %v5045_v56  ;;  %v5026_v9 = vmul.f32 -1.442695, %v949_v63  ;;  %v1593_v24 = vmul.f32 %v1450_v12, %v7044_v14  ;;  %1559 = vbcast.lane.b32.xlu1 %v7100_v61, 256 }
  0xc4   :  { %v7171_v26 = vpop.eup %5883  ;;  %v1064_v28 = vadd.f32 1.0, %v5882_v18  ;;  %5909 = vpow2.f32 %v5023_v3  ;;  %v1344_v30 = vadd.f32 %v1312_v6, %v7053_v22 }
  0xc5   :  { %v5886_v29 = vpop.eup %5885  ;;  %5911 = vrcp.f32 %v1068_v20  ;;  %v1625_v19 = vadd.f32 %v1593_v24, %v7063_v25  ;;  %v725_v37 = vpop.permute.xlu0 %724 }
  0xc6   :  { %v7177_v39 = vpop.eup %5887  ;;  %5913 = vrcp.f32 %v1064_v28  ;;  %v1079_v40 = vadd.f32 1.0, %v5886_v29  ;;  %v913_v61 = vmul.f32 %v7130_v48, %v725_v37  ;;  %v740_v34 = vpop.permute.xlu1 %739  ;;  %1262 = vbcast.lane.b32.xlu0 %v7137_v53, 264 }
  0xc7   :  { %v7181_v41 = vpop.eup %5889  ;;  %5915 = vpow2.f32 %v5026_v9  ;;  %v5044_v32 = vmul.f32 -1.442695, %v1625_v19  ;;  %v916_v43 = vmul.f32 %v7117_v10, %v740_v34  ;;  %1277 = vbcast.lane.b32.xlu1 %v7110_v23, 256  ;;  %v7198_v23 = vrot.slane %v6997_v59, %v7014_v1 }
  0xc8   :  { %v5892_v45 = vpop.eup %5891  ;;  %5917 = vrcp.f32 %v1079_v40  ;;  %v945_v47 = vadd.f32 %v913_v61, %v7020_v5  ;;  %v5460_v55 = vpop.f32.mrf.mxu0 }
  0xc9   :  { %v7193_v50 = vpop.eup %5893  ;;  %v1755_v17 = vadd.f32 1.0, %v5892_v45  ;;  %5919 = vtanh.f32 %v1344_v30  ;;  %v948_v51 = vadd.f32 %v916_v43, %v7026_v8  ;;  %v1168_v56 = vpop.permute.xlu0 %1167  ;;  %v230_v63 = vadd.f32 %v5460_v55, %v7020_v5 }
  0xca   :  { %v5896_v57 = vpop.eup %5895  ;;  %5921 = vpow2.f32 %v5044_v32  ;;  %v5022_v60 = vmul.f32 -1.442695, %v945_v47  ;;  %v1311_v54 = vmul.f32 %v1168_v56, %v7044_v14  ;;  %v1446_v0 = vpop.permute.xlu1 %1445  ;;  %1540 = vbcast.lane.b32.xlu0 %v7122_v36, 256  ;;  %v7224_v56 = vrot.slane %v6925_v35, %v6875_v15 }
  0xcb   :  { %v7203_v21 = vpop.eup %5897  ;;  %5923 = vrcp.f32 %v1755_v17  ;;  %v1075_v3 = vadd.f32 1.0, %v5896_v57  ;;  %v5025_v6 = vmul.f32 -1.442695, %v948_v51  ;;  %v1592_v12 = vmul.f32 %v1446_v0, %v7044_v14  ;;  %v224_v18 = vpop.f32.mrf.mxu0  ;;  %1258 = vbcast.lane.b32.xlu1 %v7137_v53, 256 }
  0xcc   :  { %v5900_v59 = vpop.eup %5899  ;;  %5925 = vpow2.f32 %v5022_v60  ;;  %v4986_v1 = vmul.f32 -1.442695, %v230_v63  ;;  %v1343_v24 = vadd.f32 %v1311_v54, %v7070_v33  ;;  %v225_v30 = vadd.f32 %v224_v18, %v7026_v8  ;;  %9025 = vst [vmem:[#allocation10_spill] sm:$0xff] %v7224_v56 }
  0xcd   :  { %v7207_v20 = vpop.eup %5901  ;;  %5927 = vrcp.f32 %v1075_v3  ;;  %v1078_v9 = vadd.f32 1.0, %v5900_v59  ;;  %v1624_v36 = vadd.f32 %v1592_v12, %v7074_v38  ;;  %v5463_v27 = vpop.f32.mrf.mxu0 }
  0xce   :  { %v721_v28 = vpop.permute.xlu0 %720  ;;  %v7211_v29 = vpop.eup %5903  ;;  %5929 = vpow2.f32 %v5025_v6  ;;  %1590 = vbcast.lane.b32.xlu0 %v7191_v49, 280  ;;  %v240_v32 = vadd.f32 %v5463_v27, %v7018_v4  ;;  %v4985_v60 = vmul.f32 -1.442695, %v225_v30 }
  0xcf   :  { %v912_v53 = vmul.f32 %v7130_v48, %v721_v28  ;;  %v790_v19 = vpop.permute.xlu1 %789  ;;  %v5906_v37 = vpop.eup %5905  ;;  %5931 = vrcp.f32 %v1078_v9  ;;  %1308 = vbcast.lane.b32.xlu1 %v7198_v23, 280  ;;  %v5043_v47 = vmul.f32 -1.442695, %v1624_v36 }
  0xd0   :  { %v927_v40 = vmul.f32 %v7186_v46, %v790_v19  ;;  %v5908_v61 = vpop.eup %5907  ;;  %v1409_v34 = vmul.f32 %v5906_v37, %v7157_v52  ;;  %5933 = vpow2.f32 %v4986_v1  ;;  %v234_v17 = vpop.f32.mrf.mxu0  ;;  %v4988_v3 = vmul.f32 -1.442695, %v240_v32 }
  0xd1   :  { %v5910_v43 = vpop.eup %5909  ;;  %v1754_v45 = vadd.f32 1.0, %v5908_v61  ;;  %5935 = vtanh.f32 %v1343_v24  ;;  %v944_v54 = vadd.f32 %v912_v53, %v7026_v8  ;;  %v235_v24 = vadd.f32 %v234_v17, %v7024_v7 }
  0xd2   :  { %v1164_v51 = vpop.permute.xlu0 %1163  ;;  %v7220_v55 = vpop.eup %5911  ;;  %5937 = vtanh.f32 %v1409_v34  ;;  %v1074_v57 = vadd.f32 1.0, %v5910_v43  ;;  %1586 = vbcast.lane.b32.xlu0 %v7191_v49, 272  ;;  %v959_v18 = vadd.f32 %v927_v40, %v7018_v4 }
  0xd3   :  { %v1496_v63 = vpop.permute.xlu1 %1495  ;;  %v7227_v52 = vpop.eup %5913  ;;  %5939 = vrcp.f32 %v1754_v45  ;;  %1304 = vbcast.lane.b32.xlu1 %v7198_v23, 272  ;;  %v5021_v53 = vmul.f32 -1.442695, %v944_v54  ;;  %v1310_v54 = vmul.f32 %v1164_v51, %v7044_v14 }
  0xd4   :  { %v5916_v0 = vpop.eup %5915  ;;  %5941 = vrcp.f32 %v1074_v57  ;;  %v5466_v59 = vpop.f32.mrf.mxu0  ;;  %v1603_v61 = vmul.f32 %v1496_v63, %v7078_v42  ;;  %v5036_v32 = vmul.f32 -1.442695, %v959_v18  ;;  %v359_v63 = vld [vmem:[%s8991_s5] sm:$0xff] }
  0xd5   :  { %v7231_v6 = vpop.eup %5917  ;;  %v1077_v12 = vadd.f32 1.0, %v5916_v0  ;;  %5943 = vpow2.f32 %v5043_v47 }
  0xd6   :  { %v771_v1 = vpop.permute.xlu0 %770  ;;  %v5920_v9 = vpop.eup %5919  ;;  %5945 = vpow2.f32 %v4985_v60  ;;  %1582 = vbcast.lane.b32.xlu0 %v7191_v49, 264  ;;  %v4987_v60 = vmul.f32 -1.442695, %v235_v24 }
  0xd7   :  { %v923_v36 = vmul.f32 %v7224_v56, %v771_v1  ;;  %v786_v27 = vpop.permute.xlu1 %785  ;;  %v5922_v28 = vpop.eup %5921  ;;  %5947 = vrcp.f32 %v1077_v12  ;;  %v1408_v30 = vmul.f32 %v5920_v9, %v7161_v58  ;;  %1300 = vbcast.lane.b32.xlu1 %v7198_v23, 264  ;;  %v1635_v12 = vadd.f32 %v1603_v61, %v7036_v11 }
  0xd8   :  { %v7239_v19 = vmul.f32 %v7186_v46, %v786_v27  ;;  %v5924_v37 = vpop.eup %5923  ;;  %v1753_v40 = vadd.f32 1.0, %v5922_v28  ;;  %5949 = vpow2.f32 %v4988_v3  ;;  %v244_v43 = vpop.f32.mrf.mxu0  ;;  %v250_v9 = vadd.f32 %v5466_v59, %v7070_v33  ;;  %v362_v59 = vld [vmem:[%s8991_s5 + $0x18] sm:$0xff] }
  0xd9   :  { %v5926_v34 = vpop.eup %5925  ;;  %5951 = vtanh.f32 %v1408_v30  ;;  %v1342_v30 = vadd.f32 %v1310_v54, %v7081_v44  ;;  %v5054_v61 = vmul.f32 -1.442695, %v1635_v12  ;;  %v955_v54 = vadd.f32 %v923_v36, %v7018_v4 }
  0xda   :  { %v7243_v45 = vpop.permute.xlu0 %1213  ;;  %v7245_v47 = vpop.eup %5927  ;;  %5953 = vrcp.f32 %v1753_v40  ;;  %v1073_v58 = vadd.f32 1.0, %v5926_v34  ;;  %1578 = vbcast.lane.b32.xlu0 %v7191_v49, 256  ;;  %v360_v49 = vld [vmem:[%s8991_s5 + $0x8] sm:$0xff] }
  0xdb   :  { %9026 = vst [vmem:[#allocation11_spill] sm:$0xff] %v7245_v47  ;;  %v7247_v17 = vpop.permute.xlu1 %1476  ;;  %v5930_v57 = vpop.eup %5929  ;;  %5955 = vpow2.f32 %v5021_v53  ;;  %1296 = vbcast.lane.b32.xlu1 %v7198_v23, 256  ;;  %v361_v53 = vld [vmem:[%s8991_s5 + $0x10] sm:$0xff] }
  0xdc   :  { %v7255_v0 = vpop.eup %5931  ;;  %5957 = vrcp.f32 %v1073_v58  ;;  %v1076_v3 = vadd.f32 1.0, %v5930_v57  ;;  %v5469_v1 = vpop.f32.mrf.mxu0 }
  0xdd   :  { %9027 = vst [vmem:[#allocation12_spill] sm:$0xff] %v7255_v0  ;;  %v5934_v18 = vpop.eup %5933  ;;  %5959 = vpow2.f32 %v5036_v32 }
  0xde   :  { %v7261_v14 = vpop.permute.xlu0 %1491  ;;  %v5936_v23 = vpop.eup %5935  ;;  %5961 = vrcp.f32 %v1076_v3  ;;  %v320_v51 = vadd.f32 1.0, %v5934_v18  ;;  %373 = vperm.xlu0 %5850, %v359_v63   ;;  %v245_v18 = vadd.f32 %v244_v43, %v7081_v44  ;;  %v368_v43 = vld [vmem:[%s8991_s5 + $0x48] sm:$0xff] }
  0xdf   :  { %v767_v24 = vpop.permute.xlu1 %766  ;;  %v5938_v27 = vpop.eup %5937  ;;  %v1407_v28 = vmul.f32 %v5936_v23, %v7164_v62  ;;  %5963 = vpow2.f32 %v4987_v60  ;;  %378 = vperm.xlu1 %5851, %v360_v49  }
  0xe0   :  { %v5940_v40 = vpop.eup %5939  ;;  %5965 = vrcp.f32 %v320_v51  ;;  %v7270_v34 = vmul.f32 %v7224_v56, %v767_v24  ;;  %v254_v62 = vpop.f32.mrf.mxu0  ;;  %v7277_v58 = vmul.f32 %v5938_v27, %v5924_v37  ;;  %v367_v37 = vld [vmem:[%s8991_s5 + $0x40] sm:$0xff]  ;;  %v958_v51 = vadd.f32 %v7239_v19, %v7024_v7 }
  0xe1   :  { %v7275_v32 = vpop.eup %5941  ;;  %5967 = vtanh.f32 %v1407_v28  ;;  %v260_v24 = vadd.f32 %v5469_v1, %v7040_v13 }
  0xe2   :  { %9028 = vst [vmem:[#allocation13_spill] sm:$0xff] %v7275_v32  ;;  %9029 = vst [vmem:[#allocation14_spill] sm:$0xff] %v7277_v58  ;;  %v782_v57 = vpop.permute.xlu0 %781  ;;  %v5944_v60 = vpop.eup %5943  ;;  %5969 = vtanh.f32 %v250_v9  ;;  %383 = vperm.xlu0 %5850, %v361_v53   ;;  %5502 = vmatprep.subr.mxu0 %v7277_v58 }
  0xe3   :  { %v7281_v63 = vmul.f32 %v7186_v46, %v782_v57  ;;  %v7283_v3 = vpop.permute.xlu1 %1194  ;;  %v5946_v12 = vpop.eup %5945  ;;  %v1752_v49 = vadd.f32 1.0, %v5944_v60  ;;  %5971 = vtanh.f32 %v1342_v30  ;;  %388 = vperm.xlu1 %5851, %v362_v59   ;;  %5503 = vmatpush3.msra.mxu0 %v7277_v58  ;;  %v363_v60 = vld [vmem:[%s8991_s5 + $0x20] sm:$0xff] }
  0xe4   :  { %v7290_v23 = vpop.eup %5947  ;;  %v319_v36 = vadd.f32 1.0, %v5946_v12  ;;  %5973 = vpow2.f32 %v5054_v61  ;;  %v5472_v27 = vpop.f32.mrf.mxu0  ;;  %v5032_v61 = vmul.f32 -1.442695, %v955_v54  ;;  %v5035_v12 = vmul.f32 -1.442695, %v958_v51 }
  0xe5   :  { %9030 = vst [vmem:[#allocation15_spill] sm:$0xff] %v7290_v23  ;;  %v5950_v9 = vpop.eup %5949  ;;  %5975 = vrcp.f32 %v1752_v49  ;;  %v270_v49 = vadd.f32 %v5472_v27, %v7063_v25  ;;  %v1321_v54 = vmul.f32 %v7243_v45, %v7078_v42  ;;  %v255_v45 = vadd.f32 %v254_v62, %v7053_v22 }
  0xe6   :  { %v7299_v28 = vpop.permute.xlu0 %1209  ;;  %v5952_v30 = vpop.eup %5951  ;;  %5977 = vrcp.f32 %v319_v36  ;;  %v322_v53 = vadd.f32 1.0, %v5950_v9  ;;  %413 = vperm.xlu0 %5850, %v367_v37   ;;  %v364_v37 = vld [vmem:[%s8991_s5 + $0x28] sm:$0xff]  ;;  %v1599_v36 = vmul.f32 %v7247_v17, %v7086_v31  ;;  %v369_v17 = vld [vmem:[%s8991_s5 + $0x50] sm:$0xff] }
  0xe7   :  { %v7301_v59 = vpop.permute.xlu1 %1472  ;;  %v5954_v19 = vpop.eup %5953  ;;  %5979 = vtanh.f32 %v245_v18  ;;  %418 = vperm.xlu1 %5851, %v368_v43   ;;  %v7303_v57 = vmul.f32 %v5952_v30, %v5940_v40  ;;  %v1353_v62 = vadd.f32 %v1321_v54, %v7040_v13 }
  0xe8   :  { %v5956_v1 = vpop.eup %5955  ;;  %5981 = vrcp.f32 %v322_v53  ;;  %v264_v43 = vpop.f32.mrf.mxu0 }
  0xe9   :  { %9031 = vst [vmem:[#allocation16_spill] sm:$0xff] %v7303_v57  ;;  %v7314_v18 = vpop.eup %5957  ;;  %v1072_v40 = vadd.f32 1.0, %v5956_v1  ;;  %5983 = vtanh.f32 %v260_v24  ;;  %5504 = vmatprep.subr.mxu0 %v7303_v57 }
  0xea   :  { %9032 = vst [vmem:[#allocation17_spill] sm:$0xff] %v7314_v18  ;;  %v7319_v51 = vpop.permute.xlu0 %1487  ;;  %v5960_v9 = vpop.eup %5959  ;;  %5985 = vpow2.f32 %v5032_v61  ;;  %5505 = vmatpush3.msra.mxu0 %v7303_v57  ;;  %393 = vperm.xlu0 %5850, %v363_v60   ;;  %v4982_v61 = vmul.f32 -1.442695, %v270_v49  ;;  %v365_v60 = vld [vmem:[%s8991_s5 + $0x30] sm:$0xff] }
  0xeb   :  { %v763_v27 = vpop.permute.xlu1 %762  ;;  %v7323_v30 = vpop.eup %5961  ;;  %5987 = vrcp.f32 %v1072_v40  ;;  %v1087_v24 = vadd.f32 1.0, %v5960_v9  ;;  %398 = vperm.xlu1 %5851, %v364_v37   ;;  %v1631_v9 = vadd.f32 %v1599_v36, %v7036_v11  ;;  %v1602_v37 = vmul.f32 %v7261_v14, %v7078_v42  ;;  %v370_v14 = vld [vmem:[%s8991_s5 + $0x58] sm:$0xff] }
  0xec   :  { %9033 = vst [vmem:[#allocation18_spill] sm:$0xff] %v7323_v30  ;;  %v7326_v53 = vmul.f32 %v7224_v56, %v763_v27  ;;  %v5964_v1 = vpop.eup %5963  ;;  %5989 = vpow2.f32 %v5035_v12  ;;  %v5475_v27 = vpop.f32.mrf.mxu0  ;;  %v265_v12 = vadd.f32 %v264_v43, %v7074_v38 }
  0xed   :  { %v5966_v2 = vpop.eup %5965  ;;  %5991 = vrcp.f32 %v1087_v24  ;;  %v321_v40 = vadd.f32 1.0, %v5964_v1  ;;  %v280_v43 = vadd.f32 %v5475_v27, %v7036_v11 }
  0xee   :  { %v778_v57 = vpop.permute.xlu0 %777  ;;  %v5968_v58 = vpop.eup %5967  ;;  %5993 = vtanh.f32 %v255_v45  ;;  %423 = vperm.xlu0 %5850, %v369_v17  }
  0xef   :  { %v7340_v49 = vmul.f32 %v7186_v46, %v778_v57  ;;  %v7342_v54 = vpop.permute.xlu1 %1190  ;;  %v5970_v30 = vpop.eup %5969  ;;  %5995 = vrcp.f32 %v321_v40  ;;  %403 = vperm.xlu1 %5851, %v365_v60   ;;  %v7344_v24 = vmul.f32 %v5968_v58, %v5954_v19  ;;  %v366_v57 = vld [vmem:[%s8991_s5 + $0x38] sm:$0xff]  ;;  %v5050_v60 = vmul.f32 -1.442695, %v1631_v9  ;;  %v4690_v9 = vld [vmem:[%s8992_s6] sm:$0xff] }
  0xf0   :  { %v5972_v36 = vpop.eup %5971  ;;  %v336_v1 = vmul.f32 %v5970_v30, %v5966_v2  ;;  %5997 = vpow2.f32 %v4982_v61  ;;  %v1634_v58 = vadd.f32 %v1602_v37, %v7046_v16  ;;  %v4981_v30 = vmul.f32 -1.442695, %v265_v12  ;;  %v274_v61 = vpop.f32.mrf.mxu0  ;;  %v4691_v12 = vld [vmem:[%s8992_s6 + $0x8] sm:$0xff] }
  0xf1   :  { %9034 = vst [vmem:[#allocation19_spill] sm:$0xff] %v7344_v24  ;;  %v5974_v45 = vpop.eup %5973  ;;  %v1406_v17 = vmul.f32 %v5972_v36, %v7171_v26  ;;  %5999 = vtanh.f32 %v1353_v62  ;;  %5506 = vmatprep.subr.mxu0 %v7344_v24  ;;  %v954_v62 = vadd.f32 %v7270_v34, %v7024_v7  ;;  %v4984_v36 = vmul.f32 -1.442695, %v280_v43 }
  0xf2   :  { %v7356_v19 = vpop.permute.xlu0 %1205  ;;  %v7358_v40 = vpop.eup %5975  ;;  %6001 = vtanh.f32 %v336_v1  ;;  %v1763_v2 = vadd.f32 1.0, %v5974_v45  ;;  %5507 = vmatpush3.msra.mxu0 %v7344_v24  ;;  %428 = vperm.xlu0 %5850, %v370_v14   ;;  %v5053_v45 = vmul.f32 -1.442695, %v1634_v58 }
  0xf3   :  { %v7361_v27 = vpop.permute.xlu1 %1468  ;;  %v5978_v26 = vpop.eup %5977  ;;  %6003 = vtanh.f32 %v1406_v17  ;;  %408 = vperm.xlu1 %5851, %v366_v57   ;;  %v275_v17 = vadd.f32 %v274_v61, %v7046_v16  ;;  %v5031_v18 = vmul.f32 -1.442695, %v954_v62 }
  0xf4   :  { %v5980_v37 = vpop.eup %5979  ;;  %6005 = vrcp.f32 %v1763_v2  ;;  %v957_v2 = vadd.f32 %v7281_v63, %v7020_v5  ;;  %v1598_v63 = vmul.f32 %v7301_v59, %v7086_v31 }
  0xf5   :  { %v7371_v1 = vpop.eup %5981  ;;  %v335_v14 = vmul.f32 %v5980_v37, %v5978_v26  ;;  %6007 = vpow2.f32 %v5050_v60  ;;  %v4692_v60 = vld [vmem:[%s8992_s6 + $0x10] sm:$0xff]  ;;  %v4983_v62 = vmul.f32 -1.442695, %v275_v17 }
  0xf6   :  { %v7374_v34 = vpop.permute.xlu0 %1483  ;;  %v7376_v57 = vpop.eup %5983  ;;  %6009 = vpow2.f32 %v4981_v30  ;;  %4696 = vperm.xlu0 %5850, %v4690_v9   ;;  %v4693_v30 = vld [vmem:[%s8992_s6 + $0x18] sm:$0xff] }
  0xf7   :  { %v759_v43 = vpop.permute.xlu1 %758  ;;  %v5986_v24 = vpop.eup %5985  ;;  %6011 = vtanh.f32 %v335_v14  ;;  %4701 = vperm.xlu1 %5851, %v4691_v12   ;;  %v5034_v14 = vmul.f32 -1.442695, %v957_v2  ;;  %v4888_v2 = vld [vmem:[#allocation2] sm:$0x1] }
  0xf8   :  { %v7381_v23 = vmul.f32 %v7224_v56, %v759_v43  ;;  %v7386_v58 = vpop.eup %5987  ;;  %v1083_v61 = vadd.f32 1.0, %v5986_v24  ;;  %6013 = vpow2.f32 %v4984_v36  ;;  %v1317_v24 = vmul.f32 %v7283_v3, %v7086_v31 }
  0xf9   :  { %9035 = vst [vmem:[#allocation20_spill] sm:$0xff] %v7386_v58  ;;  %v5990_v26 = vpop.eup %5989  ;;  %6015 = vpow2.f32 %v5053_v45  ;;  %v1320_v43 = vmul.f32 %v7299_v28, %v7078_v42  ;;  %v1601_v45 = vmul.f32 %v7319_v51, %v7078_v42 }
  0xfa   :  { %v7393_v9 = vpop.permute.xlu0 %1186  ;;  %v7395_v37 = vpop.eup %5991  ;;  %6017 = vrcp.f32 %v1083_v61  ;;  %v1086_v12 = vadd.f32 1.0, %v5990_v26  ;;  %4706 = vperm.xlu0 %5850, %v4692_v60   ;;  %v1630_v61 = vadd.f32 %v1598_v63, %v7046_v16 }
  0xfb   :  { %9036 = vst [vmem:[#allocation21_spill] sm:$0xff] %v7395_v37  ;;  %v7399_v36 = vpop.permute.xlu1 %1201  ;;  %v5994_v59 = vpop.eup %5993  ;;  %6019 = vpow2.f32 %v5031_v18  ;;  %4711 = vperm.xlu1 %5851, %v4693_v30   ;;  %v1349_v18 = vadd.f32 %v1317_v24, %v7040_v13  ;;  %v1352_v63 = vadd.f32 %v1320_v43, %v7053_v22  ;;  %v1633_v30 = vadd.f32 %v1601_v45, %v7063_v25 }
  0xfc   :  { %v5996_v17 = vpop.eup %5995  ;;  %6021 = vrcp.f32 %v1086_v12  ;;  %v5049_v12 = vmul.f32 -1.442695, %v1630_v61 }
  0xfd   :  { %v5998_v26 = vpop.eup %5997  ;;  %v337_v37 = vmul.f32 %v5996_v17, %v5994_v59  ;;  %6023 = vpow2.f32 %v4983_v62  ;;  %v5052_v61 = vmul.f32 -1.442695, %v1633_v30 }
  0xfe   :  { %v7406_v3 = vpop.permute.xlu0 %1464  ;;  %v6000_v60 = vpop.eup %5999  ;;  %v296_v58 = vadd.f32 1.0, %v5998_v26  ;;  %6025 = vpow2.f32 %v5034_v14  ;;  %v956_v26 = vadd.f32 %v7340_v49, %v7026_v8  ;;  %v7454_v49 = vld [vmem:[%s8990_s4 + $0x18] sm:$0xff] }
  0xff   :  { %v7409_v28 = vpop.permute.xlu1 %1533  ;;  %v7411_v32 = vpop.eup %6001  ;;  %6027 = vtanh.f32 %v337_v37  ;;  %v1417_v51 = vmul.f32 %v6000_v60, %v7177_v39  ;;  %4891 = vperm.xlu1 %5851, %v4888_v2   ;;  %v953_v39 = vadd.f32 %v7326_v53, %v7020_v5  ;;  %v7428_v37 = vld [vmem:[%s8990_s4 + $0x8] sm:$0xff] }
 0x100   :  { %v6004_v62 = vpop.eup %6003  ;;  %6029 = vrcp.f32 %v296_v58 }
 0x101   :  { %v7416_v59 = vpop.eup %6005  ;;  %6031 = vtanh.f32 %v1417_v51  ;;  %v7419_v14 = vmul.f32 %v6004_v62, %v7358_v40  ;;  %v7436_v40 = vld [vmem:[%s8990_s4 + $0x10] sm:$0xff]  ;;  %v5030_v62 = vmul.f32 -1.442695, %v953_v39  ;;  %v5033_v39 = vmul.f32 -1.442695, %v956_v26 }
 0x102   :  { %v7421_v24 = vpop.permute.xlu0 %808  ;;  %v6008_v17 = vpop.eup %6007  ;;  %6033 = vtanh.f32 %v1349_v18  ;;  %v1597_v18 = vmul.f32 %v7361_v27, %v7086_v31 }
 0x103   :  { %9037 = vst [vmem:[#allocation22_spill] sm:$0xff] %v7419_v14  ;;  %v7430_v58 = vpop.permute.xlu1 %1182  ;;  %v6010_v43 = vpop.eup %6009  ;;  %v1759_v45 = vadd.f32 1.0, %v6008_v17  ;;  %6035 = vtanh.f32 %v1352_v63  ;;  %5508 = vmatprep.subr.mxu0 %v7419_v14 }
 0x104   :  { %v7438_v2 = vpop.eup %6011  ;;  %v295_v53 = vadd.f32 1.0, %v6010_v43  ;;  %6037 = vpow2.f32 %v5049_v12  ;;  %5509 = vmatpush3.msra.mxu0 %v7419_v14  ;;  %v1316_v43 = vmul.f32 %v7342_v54, %v7086_v31 }
 0x105   :  { %v6014_v60 = vpop.eup %6013  ;;  %6039 = vrcp.f32 %v1759_v45  ;;  %5511 = vmatmul.mubr.msk.f32.vlgmr.msra.gmra.mxu0 %vm431_vm1, %v7428_v37 }
 0x106   :  { %v7447_v51 = vpop.permute.xlu0 %1251  ;;  %v6016_v63 = vpop.eup %6015  ;;  %6041 = vrcp.f32 %v295_v53  ;;  %v298_v30 = vadd.f32 1.0, %v6014_v60  ;;  %5513 = vmatprep.mubr.msk.f32.mxu0 %vm431_vm1, %v7436_v40  ;;  %v1319_v53 = vmul.f32 %v7356_v19, %v7078_v42  ;;  %v1600_v60 = vmul.f32 %v7374_v34, %v7078_v42  ;;  %v7478_v19 = vld [vmem:[%s8990_s4] sm:$0xff] }
 0x107   :  { %v7456_v12 = vpop.permute.xlu1 %1514  ;;  %v7458_v27 = vpop.eup %6017  ;;  %v1762_v17 = vadd.f32 1.0, %v6016_v63  ;;  %6043 = vpow2.f32 %v5052_v61  ;;  %9040 = vst [vmem:[#allocation25_spill] sm:$0xff] %v7478_v19  ;;  %v1348_v63 = vadd.f32 %v1316_v43, %v7053_v22  ;;  %v952_v43 = vadd.f32 %v7381_v23, %v7026_v8 }
 0x108   :  { %9038 = vst [vmem:[#allocation23_spill] sm:$0xff] %v7458_v27  ;;  %v6020_v45 = vpop.eup %6019  ;;  %6045 = vrcp.f32 %v298_v30  ;;  %v1629_v27 = vadd.f32 %v1597_v18, %v7063_v25 }
 0x109   :  { %v7466_v14 = vpop.eup %6021  ;;  %6047 = vrcp.f32 %v1762_v17  ;;  %v1082_v56 = vadd.f32 1.0, %v6020_v45  ;;  %5514 = vmatmul.mubr.msk.f32.gmra.mxu0 %vm431_vm1, %v7454_v49  ;;  %v1632_v45 = vadd.f32 %v1600_v60, %v7074_v38 }
 0x10a   :  { %9039 = vst [vmem:[#allocation24_spill] sm:$0xff] %v7466_v14  ;;  %v7471_v61 = vpop.permute.xlu0 %1529  ;;  %v6024_v54 = vpop.eup %6023  ;;  %6049 = vpow2.f32 %v5030_v62  ;;  %5538 = vmatprep.mubr.msk.f32.mxu0 %vm431_vm1, %v7478_v19  ;;  %v1351_v62 = vadd.f32 %v1319_v53, %v7070_v33  ;;  %v5048_v0 = vmul.f32 -1.442695, %v1629_v27  ;;  %v1596_v53 = vmul.f32 %v7406_v3, %v7086_v31 }
 0x10b   :  { %v7473_v26 = vpop.permute.xlu1 %804  ;;  %v6026_v34 = vpop.eup %6025  ;;  %6051 = vrcp.f32 %v1082_v56  ;;  %v297_v18 = vadd.f32 1.0, %v6024_v54  ;;  %v859_v56 = vcombine.high %v6925_v35, %v6925_v35  ;;  %v1315_v35 = vmul.f32 %v7393_v9, %v7086_v31 }
 0x10c   :  { %v7483_v30 = vpop.eup %6027  ;;  %v1085_v17 = vadd.f32 1.0, %v6026_v34  ;;  %6053 = vpow2.f32 %v5033_v39  ;;  %v1611_v3 = vmul.f32 %v7409_v28, %v7117_v10 }
 0x10d   :  { %v7487_v14 = vpop.eup %6029  ;;  %6055 = vrcp.f32 %v297_v18  ;;  %v5051_v18 = vmul.f32 -1.442695, %v1632_v45  ;;  %v1347_v28 = vadd.f32 %v1315_v35, %v7070_v33 }
 0x10e   :  { %v7489_v47 = vpop.permute.xlu0 %1232  ;;  %v6032_v19 = vpop.eup %6031  ;;  %6057 = vrcp.f32 %v1085_v17 }
 0x10f   :  { %v7495_v54 = vpop.permute.xlu1 %1247  ;;  %v6034_v39 = vpop.eup %6033  ;;  %6059 = vtanh.f32 %v1348_v63  ;;  %v7500_v60 = vmul.f32 %v6032_v19, %v7416_v59  ;;  %v1318_v63 = vmul.f32 %v7399_v36, %v7078_v42  ;;  %v7516_v19 = vrot.slane %v859_v56, %v6875_v15 }
 0x110   :  { %v6036_v27 = vpop.eup %6035  ;;  %v1413_v34 = vmul.f32 %v6034_v39, %v7181_v41  ;;  %6061 = vtanh.f32 %v1351_v62  ;;  %v5029_v62 = vmul.f32 -1.442695, %v952_v43  ;;  %v1643_v43 = vadd.f32 %v1611_v3, %v7036_v11 }
 0x111   :  { %9041 = vst [vmem:[#allocation26_spill] sm:$0xff] %v7500_v60  ;;  %v6038_v17 = vpop.eup %6037  ;;  %v1416_v23 = vmul.f32 %v6036_v27, %v7193_v50  ;;  %6063 = vpow2.f32 %v5048_v0  ;;  %5530 = vmatprep.subr.mxu0 %v7500_v60  ;;  %v1628_v0 = vadd.f32 %v1596_v53, %v7074_v38  ;;  %v1350_v39 = vadd.f32 %v1318_v63, %v7081_v44 }
 0x112   :  { %v7511_v59 = vpop.permute.xlu0 %1510  ;;  %v7513_v41 = vpop.eup %6039  ;;  %6065 = vtanh.f32 %v1413_v34  ;;  %v1758_v9 = vadd.f32 1.0, %v6038_v17  ;;  %5531 = vmatpush3.msra.mxu0 %v7500_v60  ;;  %v931_v17 = vmul.f32 %v7516_v19, %v7421_v24  ;;  %v5062_v63 = vmul.f32 -1.442695, %v1643_v43 }
 0x113   :  { %v7519_v50 = vpop.permute.xlu1 %1525  ;;  %v7521_v42 = vpop.eup %6041  ;;  %6067 = vtanh.f32 %v1416_v23  ;;  %v5047_v35 = vmul.f32 -1.442695, %v1628_v0 }
 0x114   :  { %v6044_v36 = vpop.eup %6043  ;;  %6069 = vrcp.f32 %v1758_v9  ;;  %v963_v60 = vadd.f32 %v931_v17, %v7018_v4 }
 0x115   :  { %v7525_v45 = vpop.eup %6045  ;;  %v1761_v56 = vadd.f32 1.0, %v6044_v36  ;;  %6071 = vpow2.f32 %v5051_v18 }
 0x116   :  { %v7529_v27 = vpop.permute.xlu0 %800  ;;  %v6048_v34 = vpop.eup %6047  ;;  %6073 = vpow2.f32 %v5029_v62  ;;  %v338_v62 = vmul.f32 %v7376_v57, %v7371_v1  ;;  %v1329_v1 = vmul.f32 %v7447_v51, %v7117_v10 }
 0x117   :  { %v7533_v53 = vpop.permute.xlu1 %1228  ;;  %v6050_v23 = vpop.eup %6049  ;;  %6075 = vrcp.f32 %v1761_v56 }
 0x118   :  { %v7535_v9 = vpop.eup %6051  ;;  %v1081_v36 = vadd.f32 1.0, %v6050_v23  ;;  %6077 = vtanh.f32 %v1347_v28  ;;  %v1314_v28 = vmul.f32 %v7430_v58, %v7086_v31  ;;  %v1610_v31 = vmul.f32 %v7471_v61, %v7117_v10 }
 0x119   :  { %v6054_v18 = vpop.eup %6053  ;;  %6079 = vtanh.f32 %v1350_v39  ;;  %v1607_v39 = vmul.f32 %v7456_v12, %v7130_v48 }
 0x11a   :  { %v7537_v3 = vpop.permute.xlu0 %1243  ;;  %v7539_v15 = vpop.eup %6055  ;;  %6081 = vrcp.f32 %v1081_v36  ;;  %v1084_v24 = vadd.f32 1.0, %v6054_v18  ;;  %v5040_v36 = vmul.f32 -1.442695, %v963_v60  ;;  %v1346_v18 = vadd.f32 %v1314_v28, %v7081_v44 }
 0x11b   :  { %v7544_v56 = vpop.permute.xlu1 %1506  ;;  %v7546_v0 = vpop.eup %6057  ;;  %6083 = vpow2.f32 %v5047_v35  ;;  %v1642_v28 = vadd.f32 %v1610_v31, %v7046_v16  ;;  %v1609_v31 = vmul.f32 %v7519_v50, %v7117_v10  ;;  %v1328_v50 = vmul.f32 %v7495_v54, %v7117_v10 }
 0x11c   :  { %v6060_v43 = vpop.eup %6059  ;;  %6085 = vrcp.f32 %v1084_v24  ;;  %v1361_v24 = vadd.f32 %v1329_v1, %v7040_v13 }
 0x11d   :  { %v6062_v57 = vpop.eup %6061  ;;  %v1412_v23 = vmul.f32 %v6060_v43, %v7203_v21  ;;  %6087 = vpow2.f32 %v5062_v63  ;;  %v1639_v21 = vadd.f32 %v1607_v39, %v7036_v11 }
 0x11e   :  { %v7555_v4 = vpop.permute.xlu0 %1521  ;;  %v6064_v17 = vpop.eup %6063  ;;  %v1415_v35 = vmul.f32 %v6062_v57, %v7207_v20  ;;  %6089 = vtanh.f32 %v338_v62  ;;  %v930_v20 = vmul.f32 %v7516_v19, %v7473_v26  ;;  %v1606_v26 = vmul.f32 %v7511_v59, %v7130_v48 }
 0x11f   :  { %v7560_v58 = vpop.permute.xlu1 %796  ;;  %v7562_v12 = vpop.eup %6065  ;;  %6091 = vtanh.f32 %v1412_v23  ;;  %v1757_v51 = vadd.f32 1.0, %v6064_v17  ;;  %v5058_v1 = vmul.f32 -1.442695, %v1639_v21  ;;  %v1325_v59 = vmul.f32 %v7489_v47, %v7130_v48 }
 0x120   :  { %v6068_v63 = vpop.eup %6067  ;;  %6093 = vtanh.f32 %v1415_v35  ;;  %v962_v35 = vadd.f32 %v930_v20, %v7024_v7 }
 0x121   :  { %v7569_v60 = vpop.eup %6069  ;;  %6095 = vrcp.f32 %v1757_v51  ;;  %v7571_v61 = vmul.f32 %v6068_v63, %v6048_v34  ;;  %v5061_v63 = vmul.f32 -1.442695, %v1642_v28  ;;  %v1357_v54 = vadd.f32 %v1325_v59, %v7040_v13 }
 0x122   :  { %v7573_v62 = vpop.permute.xlu0 %1224  ;;  %v6072_v43 = vpop.eup %6071  ;;  %6097 = vpow2.f32 %v5040_v36 }
 0x123   :  { %9042 = vst [vmem:[#allocation27_spill] sm:$0xff] %v7571_v61  ;;  %v7576_v57 = vpop.permute.xlu1 %1239  ;;  %v6074_v39 = vpop.eup %6073  ;;  %v1760_v23 = vadd.f32 1.0, %v6072_v43  ;;  %6099 = vtanh.f32 %v1346_v18  ;;  %5532 = vmatprep.subr.mxu0 %v7571_v61  ;;  %v1638_v43 = vadd.f32 %v1606_v26, %v7046_v16 }
 0x124   :  { %v6076_v17 = vpop.eup %6075  ;;  %v1080_v34 = vadd.f32 1.0, %v6074_v39  ;;  %6101 = vtanh.f32 %v1361_v24  ;;  %5533 = vmatpush3.msra.mxu0 %v7571_v61  ;;  %v1605_v61 = vmul.f32 %v7544_v56, %v7130_v48 }
 0x125   :  { %v6078_v36 = vpop.eup %6077  ;;  %6103 = vrcp.f32 %v1760_v23  ;;  %v5039_v23 = vmul.f32 -1.442695, %v962_v35 }
 0x126   :  { %v7585_v51 = vpop.permute.xlu0 %1502  ;;  %v6080_v18 = vpop.eup %6079  ;;  %6105 = vrcp.f32 %v1080_v34  ;;  %v1411_v21 = vmul.f32 %v6078_v36, %v7211_v29  ;;  %v929_v29 = vmul.f32 %v7516_v19, %v7529_v27  ;;  %v1641_v34 = vadd.f32 %v1609_v31, %v7063_v25 }
 0x127   :  { %v7590_v24 = vpop.permute.xlu1 %1571  ;;  %v7592_v7 = vpop.eup %6081  ;;  %v1414_v20 = vmul.f32 %v6080_v18, %v7220_v55  ;;  %6107 = vpow2.f32 %v5058_v1  ;;  %v1360_v18 = vadd.f32 %v1328_v50, %v7053_v22  ;;  %v5057_v27 = vmul.f32 -1.442695, %v1638_v43 }
 0x128   :  { %v6084_v39 = vpop.eup %6083  ;;  %6109 = vtanh.f32 %v1411_v21  ;;  %v345_v31 = vmul.f32 %v7539_v15, %v7483_v30  ;;  %v5060_v59 = vmul.f32 -1.442695, %v1641_v34  ;;  %v1608_v30 = vmul.f32 %v7555_v4, %v7117_v10 }
 0x129   :  { %v7600_v28 = vpop.eup %6085  ;;  %6111 = vtanh.f32 %v1414_v20  ;;  %v1756_v47 = vadd.f32 1.0, %v6084_v39  ;;  %v961_v39 = vadd.f32 %v929_v29, %v7020_v5  ;;  %v344_v5 = vmul.f32 %v7487_v14, %v7411_v32 }
 0x12a   :  { %v7603_v36 = vpop.permute.xlu0 %1220  ;;  %v6088_v55 = vpop.eup %6087  ;;  %6113 = vpow2.f32 %v5061_v63  ;;  %v1637_v32 = vadd.f32 %v1605_v61, %v7063_v25  ;;  %v928_v14 = vmul.f32 %v7516_v19, %v7560_v58  ;;  %v1640_v61 = vadd.f32 %v1608_v30, %v7074_v38 }
 0x12b   :  { %v7606_v1 = vpop.permute.xlu1 %1289  ;;  %v6090_v26 = vpop.eup %6089  ;;  %6115 = vrcp.f32 %v1756_v47  ;;  %v1771_v35 = vadd.f32 1.0, %v6088_v55  ;;  %v5038_v29 = vmul.f32 -1.442695, %v961_v39  ;;  %v7646_v58 = vmul.f32 %v7562_v12, %v7513_v41 }
 0x12c   :  { %v6092_v21 = vpop.eup %6091  ;;  %v346_v20 = vmul.f32 %v6090_v26, %v7525_v45  ;;  %6117 = vpow2.f32 %v5039_v23  ;;  %v1324_v45 = vmul.f32 %v7533_v53, %v7130_v48  ;;  %v1327_v53 = vmul.f32 %v7537_v3, %v7117_v10 }
 0x12d   :  { %v6094_v63 = vpop.eup %6093  ;;  %6119 = vrcp.f32 %v1771_v35  ;;  %v343_v3 = vmul.f32 %v7521_v42, %v7438_v2 }
 0x12e   :  { %v7615_v47 = vpop.permute.xlu0 %1552  ;;  %v6096_v55 = vpop.eup %6095  ;;  %5476 = vmatprep.subr.mxu1 %v346_v20  ;;  %6121 = vtanh.f32 %v1357_v54  ;;  %v7619_v50 = vmul.f32 %v6094_v63, %v6076_v17  ;;  %v1359_v2 = vadd.f32 %v1327_v53, %v7070_v33 }
 0x12f   :  { %v6098_v15 = vpop.eup %6097  ;;  %5477 = vmatpush3.msra.mxu1 %v346_v20  ;;  %6123 = vtanh.f32 %v1360_v18  ;;  %v7625_v56 = vpop.permute.xlu1 %1567  ;;  %v5056_v20 = vmul.f32 -1.442695, %v1637_v32 }
 0x130   :  { %v6100_v43 = vpop.eup %6099  ;;  %v1091_v23 = vadd.f32 1.0, %v6098_v15  ;;  %5478 = vmatprep.subr.mxu1 %v345_v31  ;;  %6125 = vpow2.f32 %v5057_v27  ;;  %5534 = vmatprep.subr.mxu0 %v7619_v50  ;;  %v7670_v15 = vld [vmem:[%s8990_s4 + $0x20] sm:$0xff] }
 0x131   :  { %v6102_v17 = vpop.eup %6101  ;;  %v1410_v34 = vmul.f32 %v6100_v43, %v7227_v52  ;;  %5479 = vmatpush3.msra.mxu1 %v345_v31  ;;  %6127 = vpow2.f32 %v5060_v59  ;;  %5535 = vmatpush3.msra.mxu0 %v7619_v50  ;;  %v1356_v52 = vadd.f32 %v1324_v45, %v7053_v22  ;;  %v960_v31 = vadd.f32 %v928_v14, %v7026_v8  ;;  %v9043_v14 = vld [vmem:[#allocation11_spill] sm:$0xff] }
 0x132   :  { %v7635_v4 = vpop.permute.xlu0 %1270  ;;  %v6104_v54 = vpop.eup %6103  ;;  %6129 = vrcp.f32 %v1091_v23  ;;  %5480 = vmatprep.subr.mxu1 %v344_v5  ;;  %v1425_v26 = vmul.f32 %v6102_v17, %v7231_v6  ;;  %v7649_v6 = vmul.f32 %v6092_v21, %v7569_v60  ;;  %v5059_v8 = vmul.f32 -1.442695, %v1640_v61 }
 0x133   :  { %v7641_v35 = vpop.eup %6105  ;;  %6131 = vtanh.f32 %v1410_v34  ;;  %5481 = vmatpush3.msra.mxu1 %v344_v5  ;;  %v7653_v39 = vpop.permute.xlu1 %1285  ;;  %v5037_v30 = vmul.f32 -1.442695, %v960_v31  ;;  %v1326_v17 = vmul.f32 %v7576_v57, %v7117_v10  ;;  %v1619_v34 = vmul.f32 %v7590_v24, %v7186_v46  ;;  %v9044_v57 = vld [vmem:[#allocation12_spill] sm:$0xff] }
 0x134   :  { %v6108_v18 = vpop.eup %6107  ;;  %6133 = vtanh.f32 %v1425_v26  ;;  %5482 = vmatprep.subr.mxu1 %v343_v3  ;;  %v7700_v26 = vld [vmem:[%s8990_s4 + $0x30] sm:$0xff] }
 0x135   :  { %v6110_v42 = vpop.eup %6109  ;;  %v1767_v27 = vadd.f32 1.0, %v6108_v18  ;;  %5483 = vmatpush3.msra.mxu1 %v343_v3  ;;  %6135 = vpow2.f32 %v5038_v29  ;;  %v1323_v29 = vmul.f32 %v7573_v62, %v7130_v48  ;;  %v1358_v31 = vadd.f32 %v1326_v17, %v7081_v44  ;;  %v9046_v17 = vld [vmem:[#allocation10_spill] sm:$0xff] }
 0x136   :  { %v6112_v63 = vpop.eup %6111  ;;  %5485 = vmatmul.mubr.msk.f32.vlgmr.msra.gmra.mxu1 %vm431_vm1, %v7428_v37  ;;  %5516 = vmatprep.subr.mxu1 %v7646_v58  ;;  %6137 = vtanh.f32 %v1356_v52  ;;  %v7658_v41 = vmul.f32 %v6110_v42, %v6096_v55  ;;  %v7660_v12 = vpop.permute.xlu0 %1548  ;;  %v1604_v55 = vmul.f32 %v7585_v51, %v7130_v48  ;;  %v7687_v51 = vld [vmem:[%s8990_s4 + $0x28] sm:$0xff] }
 0x137   :  { %v6114_v60 = vpop.eup %6113  ;;  %6139 = vrcp.f32 %v1767_v27  ;;  %5517 = vmatpush3.msra.mxu1 %v7646_v58  ;;  %5487 = vmatprep.mubr.msk.f32.mxu1 %vm431_vm1, %v7436_v40  ;;  %v7665_v21 = vmul.f32 %v6112_v63, %v6104_v54  ;;  %v7694_v32 = vpop.permute.xlu1 %1563  ;;  %v1651_v63 = vadd.f32 %v1619_v34, %v7036_v11  ;;  %v1615_v34 = vmul.f32 %v7615_v47, %v9046_v17 }
 0x138   :  { %v6116_v59 = vpop.eup %6115  ;;  %v1770_v45 = vadd.f32 1.0, %v6114_v60  ;;  %5518 = vmatprep.subr.mxu1 %v7649_v6  ;;  %6141 = vtanh.f32 %v1359_v2  ;;  %v1636_v3 = vadd.f32 %v1604_v55, %v7074_v38  ;;  %v1355_v2 = vadd.f32 %v1323_v29, %v7070_v33 }
 0x139   :  { %v6118_v5 = vpop.eup %6117  ;;  %5519 = vmatpush3.msra.mxu1 %v7649_v6  ;;  %6143 = vpow2.f32 %v5056_v20  ;;  %5536 = vmatprep.subr.mxu0 %v7665_v21  ;;  %v7721_v20 = vld [vmem:[%s8990_s4 + $0x38] sm:$0xff]  ;;  %v1322_v29 = vmul.f32 %v7603_v36, %v7130_v48  ;;  %v5070_v48 = vmul.f32 -1.442695, %v1651_v63  ;;  %v1618_v36 = vmul.f32 %v7625_v56, %v7186_v46 }
 0x13a   :  { %v6120_v43 = vpop.eup %6119  ;;  %6145 = vrcp.f32 %v1770_v45  ;;  %v1090_v23 = vadd.f32 1.0, %v6118_v5  ;;  %5488 = vmatmul.mubr.msk.f32.gmra.mxu1 %vm431_vm1, %v7454_v49  ;;  %5520 = vmatprep.subr.mxu1 %v7658_v41  ;;  %v7704_v52 = vpop.permute.xlu0 %1266  ;;  %v5055_v45 = vmul.f32 -1.442695, %v1636_v3  ;;  %v7753_v3 = vld [vmem:[%s8990_s4 + $0x48] sm:$0xff] }
 0x13b   :  { %v6122_v53 = vpop.eup %6121  ;;  %5490 = vmatprep.mubr.msk.f32.mxu1 %vm431_vm1, %v7670_v15  ;;  %6147 = vpow2.f32 %v5059_v8  ;;  %5521 = vmatpush3.msra.mxu1 %v7658_v41  ;;  %v7728_v8 = vld [vmem:[%s8990_s4 + $0x40] sm:$0xff]  ;;  %9048 = vst [vmem:[#allocation12_spill] sm:$0xff] %v7753_v3 }
 0x13c   :  { %v6124_v62 = vpop.eup %6123  ;;  %6149 = vrcp.f32 %v1090_v23  ;;  %v1421_v54 = vmul.f32 %v6122_v53, %v9043_v14  ;;  %5537 = vmatpush3.msra.mxu0 %v7665_v21  ;;  %9045 = vst [vmem:[#allocation11_spill] sm:$0xff] %v7728_v8  ;;  %v9047_v14 = vld [vmem:[#allocation25_spill] sm:$0xff] }
 0x13d   :  { %v6126_v10 = vpop.eup %6125  ;;  %v1424_v24 = vmul.f32 %v6124_v62, %v9044_v57  ;;  %6151 = vpow2.f32 %v5037_v30  ;;  %5539 = vmatmul.mubr.msk.f32.vlgmr.msra.gmra.mxu0 %vm431_vm1, %v7428_v37  ;;  %v7734_v30 = vpop.permute.xlu1 %1281  ;;  %v7762_v57 = vld [vmem:[%s8990_s4 + $0x50] sm:$0xff] }
 0x13e   :  { %v6128_v61 = vpop.eup %6127  ;;  %6153 = vtanh.f32 %v1421_v54  ;;  %5491 = vmatmul.mubr.msk.f32.gmra.mxu1 %vm431_vm1, %v7687_v51  ;;  %v1766_v18 = vadd.f32 1.0, %v6126_v10  ;;  %5541 = vmatprep.mubr.msk.f32.mxu0 %vm431_vm1, %v7436_v40  ;;  %v7744_v62 = vpop.permute.xlu0 %1544  ;;  %9050 = vst [vmem:[#allocation10_spill] sm:$0xff] %v7762_v57 }
 0x13f   :  { %v7714_v42 = vpop.eup %6129  ;;  %6155 = vtanh.f32 %v1424_v24  ;;  %v1769_v27 = vadd.f32 1.0, %v6128_v61  ;;  %5493 = vmatprep.mubr.msk.f32.mxu1 %vm431_vm1, %v7700_v26  ;;  %v1337_v24 = vmul.f32 %v7606_v1, %v7186_v46  ;;  %v7779_v1 = vld [vmem:[%s8990_s4 + $0x58] sm:$0xff] }
 0x140   :  { %v6132_v60 = vpop.eup %6131  ;;  %6157 = vrcp.f32 %v1766_v18  ;;  %v9051_v18 = vld [vmem:[#allocation15_spill] sm:$0xff]  ;;  %9052 = vst [vmem:[#allocation25_spill] sm:$0xff] %v7779_v1 }
 0x141   :  { %v6134_v55 = vpop.eup %6133  ;;  %6159 = vrcp.f32 %v1769_v27  ;;  %5542 = vmatmul.mubr.msk.f32.gmra.mxu0 %vm431_vm1, %v7454_v49  ;;  %v7732_v5 = vmul.f32 %v6132_v60, %v6116_v59  ;;  %v1354_v27 = vadd.f32 %v1322_v29, %v7081_v44  ;;  %v1369_v29 = vadd.f32 %v1337_v24, %v7040_v13 }
 0x142   :  { %v6136_v23 = vpop.eup %6135  ;;  %5494 = vmatmul.mubr.msk.f32.gmra.mxu1 %vm431_vm1, %v7721_v20  ;;  %6161 = vtanh.f32 %v1355_v2  ;;  %v7740_v53 = vmul.f32 %v6134_v55, %v6120_v43  ;;  %5566 = vmatprep.mubr.msk.f32.mxu0 %vm431_vm1, %v9047_v14  ;;  %v9049_v43 = vld [vmem:[#allocation13_spill] sm:$0xff]  ;;  %v1560_v55 = vpop.permute.xlu1 %1559 }
 0x143   :  { %v6138_v59 = vpop.eup %6137  ;;  %v1089_v54 = vadd.f32 1.0, %v6136_v23  ;;  %5496 = vmatprep.mubr.msk.f32.mxu1 %vm431_vm1, %v7728_v8  ;;  %6163 = vtanh.f32 %v1358_v31  ;;  %5522 = vmatprep.subr.mxu1 %v7732_v5  ;;  %v1647_v31 = vadd.f32 %v1615_v34, %v7036_v11  ;;  %v1333_v34 = vmul.f32 %v7635_v4, %v9046_v17  ;;  %v9058_v8 = vld [vmem:[#allocation24_spill] sm:$0xff] }
 0x144   :  { %v6140_v47 = vpop.eup %6139  ;;  %v1420_v10 = vmul.f32 %v6138_v59, %v9049_v43  ;;  %6165 = vpow2.f32 %v5055_v45  ;;  %5523 = vmatpush3.msra.mxu1 %v7732_v5  ;;  %5558 = vmatprep.subr.mxu0 %v7740_v53  ;;  %v1650_v45 = vadd.f32 %v1618_v36, %v7046_v16  ;;  %v1614_v59 = vmul.f32 %v7660_v12, %v9046_v17 }
 0x145   :  { %v6142_v61 = vpop.eup %6141  ;;  %6167 = vrcp.f32 %v1089_v54  ;;  %5559 = vmatpush3.msra.mxu0 %v7740_v53  ;;  %v7787_v54 = vpop.permute.xlu0 %1262  ;;  %v5066_v24 = vmul.f32 -1.442695, %v1647_v31  ;;  %v1617_v4 = vmul.f32 %v7694_v32, %v7186_v46 }
 0x146   :  { %v6144_v56 = vpop.eup %6143  ;;  %6169 = vtanh.f32 %v1420_v10  ;;  %5497 = vmatmul.mubr.msk.f32.gmra.mxu1 %vm431_vm1, %v7753_v3  ;;  %v1423_v2 = vmul.f32 %v6142_v61, %v9051_v18 }
 0x147   :  { %v6146_v63 = vpop.eup %6145  ;;  %v1765_v60 = vadd.f32 1.0, %v6144_v56  ;;  %5499 = vmatprep.mubr.msk.f32.mxu1 %vm431_vm1, %v7762_v57  ;;  %6171 = vpow2.f32 %v5070_v48  ;;  %v1336_v48 = vmul.f32 %v7653_v39, %v7186_v46  ;;  %v5069_v56 = vmul.f32 -1.442695, %v1650_v45 }
 0x148   :  { %v6148_v23 = vpop.eup %6147  ;;  %6173 = vtanh.f32 %v1423_v2  ;;  %v1365_v39 = vadd.f32 %v1333_v34, %v7040_v13 }
 0x149   :  { %v7789_v43 = vpop.eup %6149  ;;  %6175 = vrcp.f32 %v1765_v60  ;;  %v1768_v10 = vadd.f32 1.0, %v6148_v23  ;;  %v1646_v60 = vadd.f32 %v1614_v59, %v7046_v16  ;;  %v1368_v31 = vadd.f32 %v1336_v48, %v7053_v22  ;;  %v7806_v23 = vpop.permute.xlu1 %1277  ;;  %v9053_v59 = vld [vmem:[#allocation17_spill] sm:$0xff] }
 0x14a   :  { %v6152_v36 = vpop.eup %6151  ;;  %5500 = vmatmul.mubr.msk.f32.gmra.mxu1 %vm431_vm1, %v7779_v1  ;;  %6177 = vtanh.f32 %v1354_v27  ;;  %v1541_v45 = vpop.permute.xlu0 %1540 }
 0x14b   :  { %v6154_v61 = vpop.eup %6153  ;;  %6179 = vrcp.f32 %v1768_v10  ;;  %v1088_v12 = vadd.f32 1.0, %v6152_v36  ;;  %5524 = vmatprep.mubr.msk.f32.mxu1 %vm431_vm1, %v9047_v14  ;;  %v5065_v36 = vmul.f32 -1.442695, %v1646_v60 }
 0x14c   :  { %v6156_v18 = vpop.eup %6155  ;;  %6181 = vtanh.f32 %v1369_v29  ;;  %v7800_v2 = vmul.f32 %v6154_v61, %v6140_v47  ;;  %v1649_v47 = vadd.f32 %v1617_v4, %v7063_v25  ;;  %v9054_v61 = vld [vmem:[#allocation18_spill] sm:$0xff] }
 0x14d   :  { %v6158_v27 = vpop.eup %6157  ;;  %6183 = vrcp.f32 %v1088_v12  ;;  %v7804_v32 = vmul.f32 %v6156_v18, %v6146_v63  ;;  %v1613_v63 = vmul.f32 %v7744_v62, %v9046_v17  ;;  %v1616_v62 = vmul.f32 %v1560_v55, %v7186_v46 }
 0x14e   :  { %v6160_v10 = vpop.eup %6159  ;;  %5525 = vmatmul.mubr.msk.f32.vlgmr.msra.gmra.mxu1 %vm431_vm1, %v7428_v37  ;;  %6185 = vpow2.f32 %v5066_v24  ;;  %5544 = vmatprep.subr.mxu1 %v7800_v2  ;;  %v1332_v24 = vmul.f32 %v7704_v52, %v9046_v17  ;;  %v5068_v60 = vmul.f32 -1.442695, %v1649_v47 }
 0x14f   :  { %v6162_v29 = vpop.eup %6161  ;;  %5527 = vmatprep.mubr.msk.f32.mxu1 %vm431_vm1, %v7436_v40  ;;  %6187 = vpow2.f32 %v5069_v56  ;;  %5560 = vmatprep.subr.mxu0 %v7804_v32  ;;  %v1335_v56 = vmul.f32 %v7734_v30, %v7186_v46  ;;  %v1645_v52 = vadd.f32 %v1613_v63, %v7063_v25 }
 0x150   :  { %v6164_v34 = vpop.eup %6163  ;;  %v1419_v48 = vmul.f32 %v6162_v29, %v9053_v59  ;;  %6189 = vtanh.f32 %v1365_v39  ;;  %5545 = vmatpush3.msra.mxu1 %v7800_v2  ;;  %5561 = vmatpush3.msra.mxu0 %v7804_v32  ;;  %v1259_v59 = vpop.permute.xlu1 %1258  ;;  %v1364_v30 = vadd.f32 %v1332_v24, %v7053_v22 }
 0x151   :  { %v6166_v4 = vpop.eup %6165  ;;  %v1422_v12 = vmul.f32 %v6164_v34, %v9054_v61  ;;  %6191 = vtanh.f32 %v1368_v31  ;;  %v1591_v34 = vpop.permute.xlu0 %1590  ;;  %v1367_v47 = vadd.f32 %v1335_v56, %v7070_v33  ;;  %v1648_v61 = vadd.f32 %v1616_v62, %v7074_v38 }
 0x152   :  { %v7826_v18 = vpop.eup %6167  ;;  %6193 = vtanh.f32 %v1419_v48  ;;  %v1764_v39 = vadd.f32 1.0, %v6166_v4  ;;  %5528 = vmatmul.mubr.msk.f32.gmra.mxu1 %vm431_vm1, %v7454_v49  ;;  %v1623_v3 = vmul.f32 %v1591_v34, %v7516_v19 }
 0x153   :  { %v6170_v29 = vpop.eup %6169  ;;  %6195 = vtanh.f32 %v1422_v12  ;;  %5552 = vmatprep.mubr.msk.f32.mxu1 %vm431_vm1, %v9047_v14  ;;  %v5067_v62 = vmul.f32 -1.442695, %v1648_v61 }
 0x154   :  { %v6172_v31 = vpop.eup %6171  ;;  %6197 = vrcp.f32 %v1764_v39  ;;  %v7834_v55 = vmul.f32 %v6170_v29, %v6158_v27  ;;  %v5064_v27 = vmul.f32 -1.442695, %v1645_v52  ;;  %v9055_v39 = vld [vmem:[#allocation20_spill] sm:$0xff]  ;;  %v1331_v52 = vmul.f32 %v7787_v54, %v9046_v17 }
 0x155   :  { %v6174_v48 = vpop.eup %6173  ;;  %v1779_v4 = vadd.f32 1.0, %v6172_v31  ;;  %6199 = vpow2.f32 %v5065_v36  ;;  %v1612_v36 = vmul.f32 %v1541_v45, %v9046_v17  ;;  %v9056_v31 = vld [vmem:[#allocation21_spill] sm:$0xff]  ;;  %v1334_v45 = vmul.f32 %v7806_v23, %v7186_v46 }
 0x156   :  { %v6176_v12 = vpop.eup %6175  ;;  %6201 = vpow2.f32 %v5068_v60  ;;  %5546 = vmatprep.subr.mxu1 %v7834_v55  ;;  %v7839_v63 = vmul.f32 %v6174_v48, %v6160_v10  ;;  %v1309_v10 = vpop.permute.xlu1 %1308  ;;  %v1363_v54 = vadd.f32 %v1331_v52, %v7070_v33 }
 0x157   :  { %v6178_v1 = vpop.eup %6177  ;;  %6203 = vrcp.f32 %v1779_v4  ;;  %5547 = vmatpush3.msra.mxu1 %v7834_v55  ;;  %v1644_v61 = vadd.f32 %v1612_v36, %v7074_v38  ;;  %v1366_v23 = vadd.f32 %v1334_v45, %v7081_v44 }
 0x158   :  { %v6180_v24 = vpop.eup %6179  ;;  %v1418_v29 = vmul.f32 %v6178_v1, %v9055_v39  ;;  %6205 = vtanh.f32 %v1364_v30  ;;  %5562 = vmatprep.subr.mxu0 %v7839_v63  ;;  %v1587_v1 = vpop.permute.xlu0 %1586 }
 0x159   :  { %v6182_v56 = vpop.eup %6181  ;;  %6207 = vtanh.f32 %v1367_v47  ;;  %5563 = vmatpush3.msra.mxu0 %v7839_v63 }
 0x15a   :  { %v7846_v60 = vpop.eup %6183  ;;  %6209 = vtanh.f32 %v1418_v29  ;;  %v1433_v48 = vmul.f32 %v6182_v56, %v9056_v31  ;;  %v9057_v56 = vld [vmem:[#allocation23_spill] sm:$0xff]  ;;  %v1305_v36 = vpop.permute.xlu1 %1304 }
 0x15b   :  { %v6186_v30 = vpop.eup %6185  ;;  %6211 = vpow2.f32 %v5064_v27 }
 0x15c   :  { %v6188_v4 = vpop.eup %6187  ;;  %6213 = vtanh.f32 %v1433_v48  ;;  %v1775_v47 = vadd.f32 1.0, %v6186_v30  ;;  %v1330_v48 = vmul.f32 %v1259_v59, %v9046_v17 }
 0x15d   :  { %v6190_v39 = vpop.eup %6189  ;;  %v1778_v57 = vadd.f32 1.0, %v6188_v4  ;;  %6215 = vpow2.f32 %v5067_v62  ;;  %v5063_v62 = vmul.f32 -1.442695, %v1644_v61  ;;  %v1341_v61 = vmul.f32 %v1309_v10, %v7516_v19 }
 0x15e   :  { %v6192_v29 = vpop.eup %6191  ;;  %6217 = vrcp.f32 %v1775_v47  ;;  %v1429_v31 = vmul.f32 %v6190_v39, %v9057_v56  ;;  %v1583_v47 = vpop.permute.xlu0 %1582  ;;  %v1362_v45 = vadd.f32 %v1330_v48, %v7081_v44 }
 0x15f   :  { %v6194_v27 = vpop.eup %6193  ;;  %6219 = vrcp.f32 %v1778_v57  ;;  %v1432_v46 = vmul.f32 %v6192_v29, %v9058_v8  ;;  %v1655_v8 = vadd.f32 %v1623_v3, %v7036_v11  ;;  %v1622_v57 = vmul.f32 %v1587_v1, %v7516_v19  ;;  %v1301_v1 = vpop.permute.xlu1 %1300 }
 0x160   :  { %v6196_v30 = vpop.eup %6195  ;;  %6221 = vtanh.f32 %v1429_v31  ;;  %v7860_v4 = vmul.f32 %v6194_v27, %v6176_v12  ;;  %v1621_v11 = vmul.f32 %v1583_v47, %v7516_v19 }
 0x161   :  { %v6198_v39 = vpop.eup %6197  ;;  %6223 = vtanh.f32 %v1432_v46  ;;  %v7862_v52 = vmul.f32 %v6196_v30, %v6180_v24  ;;  %v5074_v31 = vmul.f32 -1.442695, %v1655_v8 }
 0x162   :  { %v6200_v34 = vpop.eup %6199  ;;  %6225 = vtanh.f32 %v1363_v54  ;;  %5548 = vmatprep.subr.mxu1 %v7860_v4  ;;  %v1654_v54 = vadd.f32 %v1622_v57, %v7046_v16  ;;  %v1579_v27 = vpop.permute.xlu0 %1578  ;;  %v1339_v16 = vmul.f32 %v1301_v1, %v7516_v19  ;;  %v7900_v57 = vld [vmem:[%s8990_s4 + $0x8] sm:$0xff] }
 0x163   :  { %v6202_v17 = vpop.eup %6201  ;;  %v1774_v59 = vadd.f32 1.0, %v6200_v34  ;;  %6227 = vtanh.f32 %v1366_v23  ;;  %5564 = vmatprep.subr.mxu0 %v7862_v52  ;;  %5549 = vmatpush3.msra.mxu1 %v7860_v4  ;;  %v1340_v23 = vmul.f32 %v1305_v36, %v7516_v19 }
 0x164   :  { %v6204_v12 = vpop.eup %6203  ;;  %v1777_v24 = vadd.f32 1.0, %v6202_v17  ;;  %6229 = vpow2.f32 %v5063_v62  ;;  %5565 = vmatpush3.msra.mxu0 %v7862_v52  ;;  %v5073_v36 = vmul.f32 -1.442695, %v1654_v54 }
 0x165   :  { %v6206_v3 = vpop.eup %6205  ;;  %6231 = vrcp.f32 %v1774_v59  ;;  %5567 = vmatmul.mubr.msk.f32.vlgmr.msra.gmra.mxu0 %vm431_vm1, %v7428_v37  ;;  %v1373_v37 = vadd.f32 %v1341_v61, %v7040_v13  ;;  %v1372_v34 = vadd.f32 %v1340_v23, %v7053_v22  ;;  %v1371_v22 = vadd.f32 %v1339_v16, %v7070_v33  ;;  %v7909_v59 = vld [vmem:[%s8990_s4 + $0x10] sm:$0xff] }
 0x166   :  { %v6208_v29 = vpop.eup %6207  ;;  %6233 = vrcp.f32 %v1777_v24  ;;  %v1428_v56 = vmul.f32 %v6206_v3, %v7535_v9  ;;  %5569 = vmatprep.mubr.msk.f32.mxu0 %vm431_vm1, %v7436_v40  ;;  %v1653_v9 = vadd.f32 %v1621_v11, %v7063_v25 }
 0x167   :  { %v6210_v10 = vpop.eup %6209  ;;  %v1431_v46 = vmul.f32 %v6208_v29, %v7546_v0  ;;  %6235 = vtanh.f32 %v1362_v45  ;;  %v1620_v0 = vmul.f32 %v1579_v27, %v7516_v19  ;;  %v7923_v29 = vld [vmem:[%s8990_s4 + $0x18] sm:$0xff]  ;;  %v7936_v27 = vld [vmem:[%s8990_s4] sm:$0xff] }
 0x168   :  { %v6212_v48 = vpop.eup %6211  ;;  %6237 = vtanh.f32 %v1428_v56  ;;  %v7882_v30 = vmul.f32 %v6210_v10, %v6198_v39 }
 0x169   :  { %v6214_v62 = vpop.eup %6213  ;;  %6239 = vtanh.f32 %v1431_v46  ;;  %v1773_v40 = vadd.f32 1.0, %v6212_v48  ;;  %5570 = vmatmul.mubr.msk.f32.gmra.mxu0 %vm431_vm1, %v7454_v49  ;;  %v1297_v49 = vpop.permute.xlu1 %1296  ;;  %v1652_v45 = vadd.f32 %v1620_v0, %v7074_v38 }
 0x16a   :  { %v6216_v47 = vpop.eup %6215  ;;  %6241 = vpow2.f32 %v5074_v31  ;;  %5550 = vmatprep.subr.mxu1 %v7882_v30  ;;  %v7890_v13 = vmul.f32 %v6214_v62, %v6204_v12  ;;  %5594 = vmatprep.mubr.msk.f32.mxu0 %vm431_vm1, %v9047_v14  ;;  %v5072_v14 = vmul.f32 -1.442695, %v1653_v9  ;;  %v1338_v24 = vmul.f32 %v1297_v49, %v7516_v19 }
 0x16b   :  { %v6218_v25 = vpop.eup %6217  ;;  %6243 = vrcp.f32 %v1773_v40  ;;  %v1776_v39 = vadd.f32 1.0, %v6216_v47  ;;  %5551 = vmatpush3.msra.mxu1 %v7882_v30  ;;  %v5071_v56 = vmul.f32 -1.442695, %v1652_v45 }
 0x16c   :  { %v6220_v8 = vpop.eup %6219  ;;  %6245 = vtanh.f32 %v1373_v37  ;;  %5586 = vmatprep.subr.mxu0 %v7890_v13  ;;  %5553 = vmatmul.mubr.msk.f32.vlgmr.msra.gmra.mxu1 %vm431_vm1, %v7900_v57  ;;  %v1370_v54 = vadd.f32 %v1338_v24, %v7081_v44 }
 0x16d   :  { %v6222_v17 = vpop.eup %6221  ;;  %6247 = vrcp.f32 %v1776_v39  ;;  %5587 = vmatpush3.msra.mxu0 %v7890_v13  ;;  %5555 = vmatprep.mubr.msk.f32.mxu1 %vm431_vm1, %v7909_v59 }
 0x16e   :  { %v6224_v12 = vpop.eup %6223  ;;  %6249 = vpow2.f32 %v5073_v36  ;;  %v7915_v61 = vmul.f32 %v6222_v17, %v6218_v25 }
 0x16f   :  { %v6226_v11 = vpop.eup %6225  ;;  %6251 = vtanh.f32 %v1372_v34  ;;  %v7917_v3 = vmul.f32 %v6224_v12, %v6220_v8 }
 0x170   :  { %v6228_v33 = vpop.eup %6227  ;;  %v1427_v1 = vmul.f32 %v6226_v11, %v7592_v7  ;;  %6253 = vpow2.f32 %v5072_v14  ;;  %5556 = vmatmul.mubr.msk.f32.gmra.mxu1 %vm431_vm1, %v7923_v29  ;;  %5572 = vmatprep.subr.mxu1 %v7915_v61 }
 0x171   :  { %v6230_v38 = vpop.eup %6229  ;;  %v1430_v19 = vmul.f32 %v6228_v33, %v7600_v28  ;;  %6255 = vtanh.f32 %v1371_v22  ;;  %5588 = vmatprep.subr.mxu0 %v7917_v3  ;;  %5573 = vmatpush3.msra.mxu1 %v7915_v61 }
 0x172   :  { %v6232_v7 = vpop.eup %6231  ;;  %6257 = vtanh.f32 %v1427_v1  ;;  %v1772_v31 = vadd.f32 1.0, %v6230_v38  ;;  %5589 = vmatpush3.msra.mxu0 %v7917_v3  ;;  %5580 = vmatprep.mubr.msk.f32.mxu1 %vm431_vm1, %v7936_v27  ;;  %v9059_v1 = vld [vmem:[#allocation14_spill] sm:$0xff] }
 0x173   :  { %v6234_v28 = vpop.eup %6233  ;;  %6259 = vtanh.f32 %v1430_v19 }
 0x174   :  { %v6236_v10 = vpop.eup %6235  ;;  %6261 = vrcp.f32 %v1772_v31 }
 0x175   :  { %v6238_v46 = vpop.eup %6237  ;;  %v1426_v23 = vmul.f32 %v6236_v10, %v7641_v35  ;;  %6263 = vpow2.f32 %v5071_v56  ;;  %v9060_v56 = vld [vmem:[#allocation16_spill] sm:$0xff] }
 0x176   :  { %v6240_v48 = vpop.eup %6239  ;;  %6265 = vtanh.f32 %v1370_v54  ;;  %v7941_v44 = vmul.f32 %v6238_v46, %v6232_v7  ;;  %v9061_v7 = vld [vmem:[#allocation19_spill] sm:$0xff]  ;;  %v9063_v46 = vld [vmem:[#allocation26_spill] sm:$0xff] }
 0x177   :  { %v6242_v37 = vpop.eup %6241  ;;  %6267 = vtanh.f32 %v1426_v23  ;;  %v7943_v9 = vmul.f32 %v6240_v48, %v6234_v28  ;;  %v9062_v28 = vld [vmem:[#allocation22_spill] sm:$0xff] }
 0x178   :  { %v6244_v62 = vpop.eup %6243  ;;  %v1783_v40 = vadd.f32 1.0, %v6242_v37  ;;  %5574 = vmatprep.subr.mxu1 %v7941_v44 }
 0x179   :  { %v6246_v16 = vpop.eup %6245  ;;  %5590 = vmatprep.subr.mxu0 %v7943_v9  ;;  %5575 = vmatpush3.msra.mxu1 %v7941_v44 }
 0x17a   :  { %v6248_v0 = vpop.eup %6247  ;;  %6269 = vrcp.f32 %v1783_v40  ;;  %v1437_v35 = vmul.f32 %v6246_v16, %v7714_v42  ;;  %5591 = vmatpush3.msra.mxu0 %v7943_v9 }
 0x17b   :  { %v6250_v47 = vpop.eup %6249 }
 0x17c   :  { %v6252_v36 = vpop.eup %6251  ;;  %6271 = vtanh.f32 %v1437_v35  ;;  %v1782_v25 = vadd.f32 1.0, %v6250_v47 }
 0x17d   :  { %v6254_v39 = vpop.eup %6253  ;;  %v1436_v34 = vmul.f32 %v6252_v36, %v7789_v43 }
 0x17e   :  { %v6256_v49 = vpop.eup %6255  ;;  %6273 = vrcp.f32 %v1782_v25  ;;  %v1781_v8 = vadd.f32 1.0, %v6254_v39 }
 0x17f   :  { %v6258_v14 = vpop.eup %6257  ;;  %6275 = vtanh.f32 %v1436_v34  ;;  %v1435_v17 = vmul.f32 %v6256_v49, %v7826_v18 }
 0x180   :  { %v6260_v22 = vpop.eup %6259  ;;  %v7952_v45 = vmul.f32 %v6258_v14, %v6244_v62  ;;  %6277 = vrcp.f32 %v1781_v8  ;;  %v9064_v62 = vld [vmem:[#allocation27_spill] sm:$0xff] }
 0x181   :  { %v6262_v42 = vpop.eup %6261  ;;  %v7954_v12 = vmul.f32 %v6260_v22, %v6248_v0  ;;  %6279 = vtanh.f32 %v1435_v17 }
 0x182   :  { %v6264_v24 = vpop.eup %6263  ;;  %5576 = vmatprep.subr.mxu1 %v7952_v45 }
 0x183   :  { %v6266_v11 = vpop.eup %6265  ;;  %v1780_v43 = vadd.f32 1.0, %v6264_v24  ;;  %5592 = vmatprep.subr.mxu0 %v7954_v12  ;;  %5577 = vmatpush3.msra.mxu1 %v7952_v45 }
 0x184   :  { %v6268_v33 = vpop.eup %6267  ;;  %v1434_v18 = vmul.f32 %v6266_v11, %v7846_v60  ;;  %5593 = vmatpush3.msra.mxu0 %v7954_v12 }
 0x185   :  { %6281 = vrcp.f32 %v1780_v43  ;;  %5595 = vmatmul.mubr.msk.f32.vlgmr.msra.gmra.mxu0 %vm431_vm1, %v7900_v57  ;;  %5614 = vmatprep.subr.mxu0 %v9059_v1  ;;  %v7964_v38 = vmul.f32 %v6268_v33, %v6262_v42 }
 0x186   :  { %5615 = vmatpush3.msra.mxu0 %v9059_v1  ;;  %5597 = vmatprep.mubr.msk.f32.mxu0 %vm431_vm1, %v7909_v59  ;;  %6283 = vtanh.f32 %v1434_v18 }
 0x187   :  { %v6270_v19 = vpop.eup %6269  ;;  %5616 = vmatprep.subr.mxu0 %v9060_v56  ;;  %5578 = vmatprep.subr.mxu1 %v7964_v38 }
 0x188   :  { %5617 = vmatpush3.msra.mxu0 %v9060_v56  ;;  %5579 = vmatpush3.msra.mxu1 %v7964_v38 }
 0x189   :  { %v6272_v60 = vpop.eup %6271  ;;  %5598 = vmatmul.mubr.msk.f32.gmra.mxu0 %vm431_vm1, %v7923_v29  ;;  %5618 = vmatprep.subr.mxu0 %v9061_v7 }
 0x18a   :  { %5619 = vmatpush3.msra.mxu0 %v9061_v7  ;;  %5581 = vmatmul.mubr.msk.f32.vlgmr.msra.gmra.mxu1 %vm431_vm1, %v7900_v57  ;;  %v7979_v31 = vmul.f32 %v6272_v60, %v6270_v19 }
 0x18b   :  { %v6274_v54 = vpop.eup %6273  ;;  %5620 = vmatprep.subr.mxu0 %v9062_v28  ;;  %5622 = vmatprep.mubr.msk.f32.mxu0 %vm431_vm1, %v7670_v15 }
 0x18c   :  { %v6276_v10 = vpop.eup %6275  ;;  %5621 = vmatpush3.msra.mxu0 %v9062_v28  ;;  %5600 = vmatprep.subr.mxu1 %v7979_v31 }
 0x18d   :  { %5623 = vmatmul.mubr.msk.f32.vlgmr.msra.gmra.mxu0 %vm431_vm1, %v7687_v51  ;;  %5642 = vmatprep.subr.mxu0 %v9063_v46  ;;  %v7989_v23 = vmul.f32 %v6276_v10, %v6274_v54  ;;  %v6278_v48 = vpop.eup %6277 }
 0x18e   :  { %5583 = vmatprep.mubr.msk.f32.mxu1 %vm431_vm1, %v7909_v59  ;;  %5601 = vmatpush3.msra.mxu1 %v7979_v31  ;;  %v6280_v37 = vpop.eup %6279 }
 0x18f   :  { %5643 = vmatpush3.msra.mxu0 %v9063_v46  ;;  %5584 = vmatmul.mubr.msk.f32.gmra.mxu1 %vm431_vm1, %v7923_v29  ;;  %v8002_v40 = vmul.f32 %v6280_v37, %v6278_v48 }
 0x190   :  { %5644 = vmatprep.subr.mxu0 %v9064_v62  ;;  %5625 = vmatprep.mubr.msk.f32.mxu0 %vm431_vm1, %v7700_v26 }
 0x191   :  { %5645 = vmatpush3.msra.mxu0 %v9064_v62  ;;  %5602 = vmatprep.subr.mxu1 %v7989_v23 }
 0x192   :  { %v6282_v16 = vpop.eup %6281  ;;  %5626 = vmatmul.mubr.msk.f32.gmra.mxu0 %vm431_vm1, %v7721_v20  ;;  %5646 = vmatprep.subr.mxu0 %v7619_v50 }
 0x193   :  { %5603 = vmatpush3.msra.mxu1 %v7989_v23  ;;  %5647 = vmatpush3.msra.mxu0 %v7619_v50  ;;  %v6284_v0 = vpop.eup %6283 }
 0x194   :  { %5648 = vmatprep.subr.mxu0 %v7665_v21  ;;  %5650 = vmatprep.mubr.msk.f32.mxu0 %vm431_vm1, %v7670_v15  ;;  %v8014_v35 = vmul.f32 %v6284_v0, %v6282_v16 }
 0x195   :  { %5649 = vmatpush3.msra.mxu0 %v7665_v21  ;;  %5604 = vmatprep.subr.mxu1 %v8002_v40 }
 0x196   :  { %5651 = vmatmul.mubr.msk.f32.vlgmr.msra.gmra.mxu0 %vm431_vm1, %v7687_v51  ;;  %5670 = vmatprep.subr.mxu0 %v7740_v53 }
 0x197   :  { %5605 = vmatpush3.msra.mxu1 %v8002_v40  ;;  %5671 = vmatpush3.msra.mxu0 %v7740_v53 }
 0x198   :  { %5672 = vmatprep.subr.mxu0 %v7804_v32  ;;  %5653 = vmatprep.mubr.msk.f32.mxu0 %vm431_vm1, %v7700_v26 }
 0x199   :  { %5673 = vmatpush3.msra.mxu0 %v7804_v32  ;;  %5606 = vmatprep.subr.mxu1 %v8014_v35 }
 0x19a   :  { %5654 = vmatmul.mubr.msk.f32.gmra.mxu0 %vm431_vm1, %v7721_v20  ;;  %5674 = vmatprep.subr.mxu0 %v7839_v63 }
 0x19b   :  { %5607 = vmatpush3.msra.mxu1 %v8014_v35  ;;  %5608 = vmatprep.mubr.msk.f32.mxu1 %vm431_vm1, %v7936_v27  ;;  %v9068_v27 = vld [vmem:[#allocation25_spill] sm:$0xff] }
 0x19c   :  { %5675 = vmatpush3.msra.mxu0 %v7839_v63  ;;  %5609 = vmatmul.mubr.msk.f32.vlgmr.msra.gmra.mxu1 %vm431_vm1, %v7900_v57  ;;  %v9065_v57 = vld [vmem:[#allocation11_spill] sm:$0xff] }
 0x19d   :  { %5628 = vmatprep.subr.mxu1 %v7646_v58  ;;  %5676 = vmatprep.subr.mxu0 %v7862_v52 }
 0x19e   :  { %5629 = vmatpush3.msra.mxu1 %v7646_v58  ;;  %5677 = vmatpush3.msra.mxu0 %v7862_v52 }
 0x19f   :  { %5678 = vmatprep.mubr.msk.f32.mxu0 %vm431_vm1, %v7670_v15  ;;  %5630 = vmatprep.subr.mxu1 %v7649_v6 }
 0x1a0   :  { %5679 = vmatmul.mubr.msk.f32.vlgmr.msra.gmra.mxu0 %vm431_vm1, %v7687_v51  ;;  %5698 = vmatprep.subr.mxu0 %v7890_v13 }
 0x1a1   :  { %5611 = vmatprep.mubr.msk.f32.mxu1 %vm431_vm1, %v7909_v59  ;;  %5631 = vmatpush3.msra.mxu1 %v7649_v6  ;;  %v9066_v59 = vld [vmem:[#allocation12_spill] sm:$0xff] }
 0x1a2   :  { %5699 = vmatpush3.msra.mxu0 %v7890_v13  ;;  %5612 = vmatmul.mubr.msk.f32.gmra.mxu1 %vm431_vm1, %v7923_v29  ;;  %v9067_v29 = vld [vmem:[#allocation10_spill] sm:$0xff] }
 0x1a3   :  { %5632 = vmatprep.subr.mxu1 %v7658_v41  ;;  %5700 = vmatprep.subr.mxu0 %v7917_v3 }
 0x1a4   :  { %5633 = vmatpush3.msra.mxu1 %v7658_v41  ;;  %5681 = vmatprep.mubr.msk.f32.mxu0 %vm431_vm1, %v7700_v26 }
 0x1a5   :  { %5701 = vmatpush3.msra.mxu0 %v7917_v3  ;;  %5634 = vmatprep.subr.mxu1 %v7732_v5 }
 0x1a6   :  { %5682 = vmatmul.mubr.msk.f32.gmra.mxu0 %vm431_vm1, %v7721_v20  ;;  %5702 = vmatprep.subr.mxu0 %v7943_v9 }
 0x1a7   :  { %5635 = vmatpush3.msra.mxu1 %v7732_v5  ;;  %5636 = vmatprep.mubr.msk.f32.mxu1 %vm431_vm1, %v7670_v15 }
 0x1a8   :  { %5703 = vmatpush3.msra.mxu0 %v7943_v9  ;;  %5637 = vmatmul.mubr.msk.f32.vlgmr.msra.gmra.mxu1 %vm431_vm1, %v7687_v51 }
 0x1a9   :  { %5656 = vmatprep.subr.mxu1 %v7800_v2  ;;  %5704 = vmatprep.subr.mxu0 %v7954_v12 }
 0x1aa   :  { %5657 = vmatpush3.msra.mxu1 %v7800_v2  ;;  %5705 = vmatpush3.msra.mxu0 %v7954_v12 }
 0x1ab   :  { %5706 = vmatprep.mubr.msk.f32.mxu0 %vm431_vm1, %v7670_v15  ;;  %5658 = vmatprep.subr.mxu1 %v7834_v55 }
 0x1ac   :  { %5707 = vmatmul.mubr.msk.f32.vlgmr.msra.gmra.mxu0 %vm431_vm1, %v7687_v51  ;;  %5726 = vmatprep.subr.mxu0 %v9059_v1 }
 0x1ad   :  { %5639 = vmatprep.mubr.msk.f32.mxu1 %vm431_vm1, %v7700_v26  ;;  %5659 = vmatpush3.msra.mxu1 %v7834_v55 }
 0x1ae   :  { %5727 = vmatpush3.msra.mxu0 %v9059_v1  ;;  %5640 = vmatmul.mubr.msk.f32.gmra.mxu1 %vm431_vm1, %v7721_v20 }
 0x1af   :  { %5660 = vmatprep.subr.mxu1 %v7860_v4  ;;  %5728 = vmatprep.subr.mxu0 %v9060_v56 }
 0x1b0   :  { %5661 = vmatpush3.msra.mxu1 %v7860_v4  ;;  %5709 = vmatprep.mubr.msk.f32.mxu0 %vm431_vm1, %v7700_v26 }
 0x1b1   :  { %5729 = vmatpush3.msra.mxu0 %v9060_v56  ;;  %5662 = vmatprep.subr.mxu1 %v7882_v30 }
 0x1b2   :  { %5710 = vmatmul.mubr.msk.f32.gmra.mxu0 %vm431_vm1, %v7721_v20  ;;  %5730 = vmatprep.subr.mxu0 %v9061_v7 }
 0x1b3   :  { %5663 = vmatpush3.msra.mxu1 %v7882_v30  ;;  %5664 = vmatprep.mubr.msk.f32.mxu1 %vm431_vm1, %v7670_v15 }
 0x1b4   :  { %5731 = vmatpush3.msra.mxu0 %v9061_v7  ;;  %5665 = vmatmul.mubr.msk.f32.vlgmr.msra.gmra.mxu1 %vm431_vm1, %v7687_v51 }
 0x1b5   :  { %5684 = vmatprep.subr.mxu1 %v7915_v61  ;;  %5732 = vmatprep.subr.mxu0 %v9062_v28 }
 0x1b6   :  { %5685 = vmatpush3.msra.mxu1 %v7915_v61  ;;  %5733 = vmatpush3.msra.mxu0 %v9062_v28 }
 0x1b7   :  { %5734 = vmatprep.mubr.msk.f32.mxu0 %vm431_vm1, %v9065_v57  ;;  %5686 = vmatprep.subr.mxu1 %v7941_v44 }
 0x1b8   :  { %5735 = vmatmul.mubr.msk.f32.vlgmr.msra.gmra.mxu0 %vm431_vm1, %v9066_v59  ;;  %5754 = vmatprep.subr.mxu0 %v9063_v46 }
 0x1b9   :  { %5667 = vmatprep.mubr.msk.f32.mxu1 %vm431_vm1, %v7700_v26  ;;  %5687 = vmatpush3.msra.mxu1 %v7941_v44 }
 0x1ba   :  { %5755 = vmatpush3.msra.mxu0 %v9063_v46  ;;  %5668 = vmatmul.mubr.msk.f32.gmra.mxu1 %vm431_vm1, %v7721_v20 }
 0x1bb   :  { %5688 = vmatprep.subr.mxu1 %v7952_v45  ;;  %5756 = vmatprep.subr.mxu0 %v9064_v62 }
 0x1bc   :  { %5689 = vmatpush3.msra.mxu1 %v7952_v45  ;;  %5737 = vmatprep.mubr.msk.f32.mxu0 %vm431_vm1, %v9067_v29 }
 0x1bd   :  { %5757 = vmatpush3.msra.mxu0 %v9064_v62  ;;  %5690 = vmatprep.subr.mxu1 %v7964_v38 }
 0x1be   :  { %5738 = vmatmul.mubr.msk.f32.gmra.mxu0 %vm431_vm1, %v9068_v27  ;;  %5758 = vmatprep.subr.mxu0 %v7619_v50 }
 0x1bf   :  { %5691 = vmatpush3.msra.mxu1 %v7964_v38  ;;  %5692 = vmatprep.mubr.msk.f32.mxu1 %vm431_vm1, %v7670_v15  ;;  %v6742_v15 = vld [vmem:[%s8990_s4 + $0x48] sm:$0xff] }
 0x1c0   :  { %5759 = vmatpush3.msra.mxu0 %v7619_v50  ;;  %5693 = vmatmul.mubr.msk.f32.vlgmr.msra.gmra.mxu1 %vm431_vm1, %v7687_v51  ;;  %v6740_v50 = vld [vmem:[%s8990_s4 + $0x20] sm:$0xff] }
 0x1c1   :  { %5712 = vmatprep.subr.mxu1 %v7979_v31  ;;  %5760 = vmatprep.subr.mxu0 %v7665_v21 }
 0x1c2   :  { %5713 = vmatpush3.msra.mxu1 %v7979_v31  ;;  %5761 = vmatpush3.msra.mxu0 %v7665_v21 }
 0x1c3   :  { %5762 = vmatprep.mubr.msk.f32.mxu0 %vm431_vm1, %v9065_v57  ;;  %5714 = vmatprep.subr.mxu1 %v7989_v23 }
 0x1c4   :  { %5763 = vmatmul.mubr.msk.f32.vlgmr.msra.gmra.mxu0 %vm431_vm1, %v9066_v59  ;;  %5782 = vmatprep.subr.mxu0 %v7740_v53 }
 0x1c5   :  { %5695 = vmatprep.mubr.msk.f32.mxu1 %vm431_vm1, %v7700_v26  ;;  %5715 = vmatpush3.msra.mxu1 %v7989_v23  ;;  %v5512_v24 = vpop.f32.mrf.mxu0 }
 0x1c6   :  { %5783 = vmatpush3.msra.mxu0 %v7740_v53  ;;  %5696 = vmatmul.mubr.msk.f32.gmra.mxu1 %vm431_vm1, %v7721_v20 }
 0x1c7   :  { %5716 = vmatprep.subr.mxu1 %v8002_v40  ;;  %5784 = vmatprep.subr.mxu0 %v7804_v32  ;;  %v1978_v7 = vpop.f32.mrf.mxu0 }
 0x1c8   :  { %5717 = vmatpush3.msra.mxu1 %v8002_v40  ;;  %5765 = vmatprep.mubr.msk.f32.mxu0 %vm431_vm1, %v9067_v29 }
 0x1c9   :  { %5785 = vmatpush3.msra.mxu0 %v7804_v32  ;;  %5718 = vmatprep.subr.mxu1 %v8014_v35 }
 0x1ca   :  { %5766 = vmatmul.mubr.msk.f32.gmra.mxu0 %vm431_vm1, %v9068_v27  ;;  %5786 = vmatprep.subr.mxu0 %v7839_v63 }
 0x1cb   :  { %5719 = vmatpush3.msra.mxu1 %v8014_v35  ;;  %5720 = vmatprep.mubr.msk.f32.mxu1 %vm431_vm1, %v6740_v50 }
 0x1cc   :  { %5787 = vmatpush3.msra.mxu0 %v7839_v63  ;;  %5721 = vmatmul.mubr.msk.f32.vlgmr.msra.gmra.mxu1 %vm431_vm1, %v7687_v51  ;;  %v6743_v51 = vld [vmem:[%s8990_s4 + $0x50] sm:$0xff] }
 0x1cd   :  { %5740 = vmatprep.subr.mxu1 %v7646_v58  ;;  %5788 = vmatprep.subr.mxu0 %v7862_v52 }
 0x1ce   :  { %5741 = vmatpush3.msra.mxu1 %v7646_v58  ;;  %5789 = vmatpush3.msra.mxu0 %v7862_v52  ;;  %v6741_v58 = vld [vmem:[%s8990_s4 + $0x40] sm:$0xff]  ;;  %s6790_s4 = smov [#allocation3]  }
 0x1cf   :  { %5790 = vmatprep.mubr.msk.f32.mxu0 %vm431_vm1, %v9065_v57  ;;  %5742 = vmatprep.subr.mxu1 %v7649_v6  ;;  %s4943_s21 = sshll.u32 %s6790_s4, 4  ;;  %s4944_s21 = int_to_ptr.vmem [resolvable:$true] %s4943_s21 }
 0x1d0   :  { %5791 = vmatmul.mubr.msk.f32.vlgmr.msra.gmra.mxu0 %vm431_vm1, %v9066_v59  ;;  %5810 = vmatprep.subr.mxu0 %v7890_v13 }
 0x1d1   :  { %5723 = vmatprep.mubr.msk.f32.mxu1 %vm431_vm1, %v7700_v26  ;;  %5743 = vmatpush3.msra.mxu1 %v7649_v6  ;;  %v8233_v6 = vpop.permute.xlu1 %378 }
 0x1d2   :  { %5811 = vmatpush3.msra.mxu0 %v7890_v13  ;;  %5724 = vmatmul.mubr.msk.f32.gmra.mxu1 %vm431_vm1, %v7721_v20 }
 0x1d3   :  { %5744 = vmatprep.subr.mxu1 %v7658_v41  ;;  %5812 = vmatprep.subr.mxu0 %v7917_v3 }
 0x1d4   :  { %5745 = vmatpush3.msra.mxu1 %v7658_v41  ;;  %5793 = vmatprep.mubr.msk.f32.mxu0 %vm431_vm1, %v9067_v29  ;;  %v8247_v41 = vpop.permute.xlu0 %373 }
 0x1d5   :  { %5813 = vmatpush3.msra.mxu0 %v7917_v3  ;;  %5746 = vmatprep.subr.mxu1 %v7732_v5  ;;  %v8251_v21 = vpop.permute.xlu1 %388 }
 0x1d6   :  { %5794 = vmatmul.mubr.msk.f32.gmra.mxu0 %vm431_vm1, %v9068_v27  ;;  %5814 = vmatprep.subr.mxu0 %v7943_v9 }
 0x1d7   :  { %5747 = vmatpush3.msra.mxu1 %v7732_v5  ;;  %5748 = vmatprep.mubr.msk.f32.mxu1 %vm431_vm1, %v9065_v57 }
 0x1d8   :  { %5815 = vmatpush3.msra.mxu0 %v7943_v9  ;;  %5749 = vmatmul.mubr.msk.f32.vlgmr.msra.gmra.mxu1 %vm431_vm1, %v9066_v59  ;;  %v8266_v26 = vpop.permute.xlu0 %383 }
 0x1d9   :  { %5768 = vmatprep.subr.mxu1 %v7800_v2  ;;  %5816 = vmatprep.subr.mxu0 %v7954_v12  ;;  %v8269_v20 = vpop.permute.xlu1 %418 }
 0x1da   :  { %5769 = vmatpush3.msra.mxu1 %v7800_v2  ;;  %5817 = vmatpush3.msra.mxu0 %v7954_v12 }
 0x1db   :  { %5818 = vmatprep.mubr.msk.f32.mxu0 %vm431_vm1, %v9065_v57  ;;  %5770 = vmatprep.subr.mxu1 %v7834_v55 }
 0x1dc   :  { %5819 = vmatmul.mubr.msk.f32.vlgmr.msra.gmra.mxu0 %vm431_vm1, %v9066_v59  ;;  %5824 = vmatprep.subr.mxu0 %v7979_v31  ;;  %v8280_v53 = vpop.permute.xlu0 %413 }
 0x1dd   :  { %5751 = vmatprep.mubr.msk.f32.mxu1 %vm431_vm1, %v9067_v29  ;;  %5771 = vmatpush3.msra.mxu1 %v7834_v55  ;;  %v8283_v32 = vpop.permute.xlu1 %398 }
 0x1de   :  { %5825 = vmatpush3.msra.mxu0 %v7979_v31  ;;  %5752 = vmatmul.mubr.msk.f32.gmra.mxu1 %vm431_vm1, %v9068_v27 }
 0x1df   :  { %5772 = vmatprep.subr.mxu1 %v7860_v4  ;;  %5826 = vmatprep.subr.mxu0 %v7989_v23 }
 0x1e0   :  { %5773 = vmatpush3.msra.mxu1 %v7860_v4  ;;  %5821 = vmatprep.mubr.msk.f32.mxu0 %vm431_vm1, %v9067_v29  ;;  %v8287_v3 = vpop.permute.xlu0 %393 }
 0x1e1   :  { %5827 = vmatpush3.msra.mxu0 %v7989_v23  ;;  %5774 = vmatprep.subr.mxu1 %v7882_v30  ;;  %v8290_v47 = vpop.permute.xlu1 %403 }
 0x1e2   :  { %5822 = vmatmul.mubr.msk.f32.gmra.mxu0 %vm431_vm1, %v9068_v27  ;;  %5828 = vmatprep.subr.mxu0 %v8002_v40 }
 0x1e3   :  { %5775 = vmatpush3.msra.mxu1 %v7882_v30  ;;  %5776 = vmatprep.mubr.msk.f32.mxu1 %vm431_vm1, %v6741_v58 }
 0x1e4   :  { %5829 = vmatpush3.msra.mxu0 %v8002_v40  ;;  %5777 = vmatmul.mubr.msk.f32.vlgmr.msra.gmra.mxu1 %vm431_vm1, %v9066_v59  ;;  %v8292_v49 = vpop.permute.xlu0 %423 }
 0x1e5   :  { %5796 = vmatprep.subr.mxu1 %v7915_v61  ;;  %5830 = vmatprep.subr.mxu0 %v8014_v35  ;;  %v8295_v14 = vpop.permute.xlu1 %408 }
 0x1e6   :  { %5797 = vmatpush3.msra.mxu1 %v7915_v61  ;;  %5831 = vmatpush3.msra.mxu0 %v8014_v35 }
 0x1e7   :  { %5832 = vmatprep.mubr.msk.f32.mxu0 %vm431_vm1, %v6741_v58  ;;  %5798 = vmatprep.subr.mxu1 %v7941_v44 }
 0x1e8   :  { %5833 = vmatmul.mubr.msk.f32.vlgmr.msra.gmra.mxu0 %vm431_vm1, %v9066_v59  ;;  %5779 = vmatprep.mubr.msk.f32.mxu1 %vm431_vm1, %v9067_v29  ;;  %v8302_v56 = vpop.permute.xlu0 %428 }
 0x1e9   :  { %5799 = vmatpush3.msra.mxu1 %v7941_v44 }
 0x1ea   :  { %5780 = vmatmul.mubr.msk.f32.gmra.mxu1 %vm431_vm1, %v9068_v27  ;;  %5800 = vmatprep.subr.mxu1 %v7952_v45 }
 0x1eb   :  { %5801 = vmatpush3.msra.mxu1 %v7952_v45  ;;  %5804 = vmatprep.mubr.msk.f32.mxu1 %vm431_vm1, %v6741_v58 }
 0x1ec   :  { %5802 = vmatprep.subr.mxu1 %v7964_v38 }
 0x1ed   :  { %5803 = vmatpush3.msra.mxu1 %v7964_v38 }
 0x1ee   :  { %5805 = vmatmul.mubr.msk.f32.vlgmr.msra.gmra.mxu1 %vm431_vm1, %v6742_v15  ;;  %5838 = vmatprep.subr.mxu1 %v7979_v31 }
 0x1ef   :  { %5842 = vmatpush3.msra.mxu1 %v7979_v31  ;;  %5807 = vmatprep.mubr.msk.f32.mxu1 %vm431_vm1, %v6743_v51 }
 0x1f0   :  { %5839 = vmatprep.subr.mxu1 %v7989_v23 }
 0x1f1   :  { %5843 = vmatpush3.msra.mxu1 %v7989_v23 }
 0x1f2   :  { %5808 = vmatmul.mubr.msk.f32.gmra.mxu1 %vm431_vm1, %v9068_v27  ;;  %5840 = vmatprep.subr.mxu1 %v8002_v40 }
 0x1f3   :  { %5844 = vmatpush3.msra.mxu1 %v8002_v40  ;;  %5835 = vmatprep.mubr.msk.f32.mxu1 %vm431_vm1, %v6743_v51  ;;  %v5515_v40 = vpop.f32.mrf.mxu0 }
 0x1f4   :  { %5841 = vmatprep.subr.mxu1 %v8014_v35 }
 0x1f5   :  { %5845 = vmatpush3.msra.mxu1 %v8014_v35  ;;  %v1988_v35 = vpop.f32.mrf.mxu0 }
 0x1f6   :  { %5836 = vmatmul.mubr.msk.f32.vlgmr.msra.gmra.mxu1 %vm431_vm1, %v9068_v27  ;;  %v5486_v5 = vpop.f32.mrf.mxu1 }
 0x1f7   :  { %v540_v2 = vadd.f32 %v5486_v5, %v8233_v6 }
 0x1f8   :  { %v534_v55 = vpop.f32.mrf.mxu1 }
 0x1f9   :  { %v5006_v63 = vmul.f32 -1.442695, %v540_v2  ;;  %v535_v4 = vadd.f32 %v534_v55, %v8247_v41 }
 0x1fa   :  { %v5489_v52 = vpop.f32.mrf.mxu1 }
 0x1fb   :  { %6285 = vpow2.f32 %v5006_v63  ;;  %v5005_v30 = vmul.f32 -1.442695, %v535_v4  ;;  %v550_v13 = vadd.f32 %v5489_v52, %v8251_v21 }
 0x1fc   :  { %v544_v61 = vpop.f32.mrf.mxu1 }
 0x1fd   :  { %6287 = vpow2.f32 %v5005_v30  ;;  %v5008_v44 = vmul.f32 -1.442695, %v550_v13  ;;  %v545_v9 = vadd.f32 %v544_v61, %v8266_v26  ;;  %v5540_v29 = vpop.f32.mrf.mxu0  ;;  %v1984_v61 = vadd.f32 %v5512_v24, %v8233_v6 }
 0x1fe   :  { %v5492_v36 = vpop.f32.mrf.mxu1  ;;  %v2154_v24 = vadd.f32 %v5540_v29, %v8233_v6 }
 0x1ff   :  { %6289 = vpow2.f32 %v5008_v44  ;;  %v5007_v25 = vmul.f32 -1.442695, %v545_v9  ;;  %v560_v8 = vadd.f32 %v5492_v36, %v8283_v32  ;;  %v2148_v5 = vpop.f32.mrf.mxu0 }
 0x200   :  { %v554_v39 = vpop.f32.mrf.mxu1 }
 0x201   :  { %6291 = vpow2.f32 %v5007_v25  ;;  %v555_v17 = vadd.f32 %v554_v39, %v8287_v3  ;;  %v5543_v9 = vpop.f32.mrf.mxu0  ;;  %v1979_v25 = vadd.f32 %v1978_v7, %v8247_v41  ;;  %v5116_v7 = vmul.f32 -1.442695, %v2154_v24 }
 0x202   :  { %v5495_v34 = vpop.f32.mrf.mxu1  ;;  %6293 = vtanh.f32 %v560_v8 }
 0x203   :  { %v570_v45 = vadd.f32 %v5495_v34, %v8295_v14  ;;  %6295 = vtanh.f32 %v555_v17  ;;  %v1994_v17 = vadd.f32 %v5515_v40, %v8251_v21 }
 0x204   :  { %v564_v22 = vpop.f32.mrf.mxu1 }
 0x205   :  { %v565_v42 = vadd.f32 %v564_v22, %v8290_v47  ;;  %6297 = vtanh.f32 %v570_v45  ;;  %v1989_v45 = vadd.f32 %v1988_v35, %v8266_v26 }
 0x206   :  { %v5498_v12 = vpop.f32.mrf.mxu1 }
 0x207   :  { %v580_v11 = vadd.f32 %v5498_v12, %v8269_v20  ;;  %6299 = vtanh.f32 %v565_v42  ;;  %v5108_v12 = vmul.f32 -1.442695, %v1984_v61 }
 0x208   :  { %v6286_v43 = vpop.eup %6285  ;;  %v574_v33 = vpop.f32.mrf.mxu1 }
 0x209   :  { %v630_v18 = vadd.f32 1.0, %v6286_v43  ;;  %v5002_v1 = vmul.f32 -1.442695, %v580_v11  ;;  %v575_v38 = vadd.f32 %v574_v33, %v8280_v53  ;;  %v2158_v11 = vpop.f32.mrf.mxu0  ;;  %v5107_v43 = vmul.f32 -1.442695, %v1979_v25 }
 0x20a   :  { %v6288_v19 = vpop.eup %6287  ;;  %v5501_v60 = vpop.f32.mrf.mxu1  ;;  %v2149_v33 = vadd.f32 %v2148_v5, %v8247_v41 }
 0x20b   :  { %6301 = vrcp.f32 %v630_v18  ;;  %v629_v31 = vadd.f32 1.0, %v6288_v19  ;;  %v5001_v54 = vmul.f32 -1.442695, %v575_v38  ;;  %v590_v28 = vadd.f32 %v5501_v60, %v8302_v56 }
 0x20c   :  { %v6290_v10 = vpop.eup %6289  ;;  %6303 = vpow2.f32 %v5002_v1  ;;  %v584_v46 = vpop.f32.mrf.mxu1  ;;  %v5110_v1 = vmul.f32 -1.442695, %v1994_v17  ;;  %v2164_v38 = vadd.f32 %v5543_v9, %v8251_v21  ;;  %v5109_v19 = vmul.f32 -1.442695, %v1989_v45 }
 0x20d   :  { %6305 = vrcp.f32 %v629_v31  ;;  %v632_v23 = vadd.f32 1.0, %v6290_v10  ;;  %v5004_v48 = vmul.f32 -1.442695, %v590_v28  ;;  %v585_v37 = vadd.f32 %v584_v46, %v8292_v49 }
 0x20e   :  { %v6292_v62 = vpop.eup %6291  ;;  %6307 = vpow2.f32 %v5001_v54  ;;  %v5526_v34 = vpop.f32.mrf.mxu1  ;;  %v2159_v60 = vadd.f32 %v2158_v11, %v8266_v26  ;;  %v5115_v54 = vmul.f32 -1.442695, %v2149_v33  ;;  %v5118_v10 = vmul.f32 -1.442695, %v2164_v38 }
 0x20f   :  { %6309 = vrcp.f32 %v632_v23  ;;  %v631_v16 = vadd.f32 1.0, %v6292_v62  ;;  %v5003_v0 = vmul.f32 -1.442695, %v585_v37  ;;  %v6294_v57 = vpop.eup %6293  ;;  %v2069_v31 = vadd.f32 %v5526_v34, %v8233_v6 }
 0x210   :  { %6311 = vpow2.f32 %v5004_v48  ;;  %v6296_v59 = vpop.eup %6295  ;;  %v2063_v18 = vpop.f32.mrf.mxu1  ;;  %v5117_v48 = vmul.f32 -1.442695, %v2159_v60 }
 0x211   :  { %6313 = vrcp.f32 %v631_v16  ;;  %v2064_v46 = vadd.f32 %v2063_v18, %v8247_v41  ;;  %v5112_v62 = vmul.f32 -1.442695, %v2069_v31 }
 0x212   :  { %6315 = vpow2.f32 %v5003_v0  ;;  %v6298_v27 = vpop.eup %6297  ;;  %v5529_v28 = vpop.f32.mrf.mxu1 }
 0x213   :  { %v2079_v40 = vadd.f32 %v5529_v28, %v8251_v21 }
 0x214   :  { %v6300_v50 = vpop.eup %6299  ;;  %v2073_v35 = vpop.f32.mrf.mxu1 }
 0x218   :  { %v6302_v58 = vpop.eup %6301 }
 0x219   :  { %v6304_v15 = vpop.eup %6303  ;;  %v646_v51 = vmul.f32 %v6302_v58, %v6294_v57  ;;  %v5114_v58 = vmul.f32 -1.442695, %v2079_v40 }
 0x21a   :  { %v6306_v2 = vpop.eup %6305  ;;  %v606_v55 = vadd.f32 1.0, %v6304_v15  ;;  %v2074_v15 = vadd.f32 %v2073_v35, %v8266_v26 }
 0x21b   :  { %v6308_v63 = vpop.eup %6307  ;;  %6317 = vtanh.f32 %v646_v51  ;;  %v645_v4 = vmul.f32 %v6306_v2, %v6296_v59  ;;  %v5111_v59 = vmul.f32 -1.442695, %v2064_v46 }
 0x21c   :  { %v6310_v52 = vpop.eup %6309  ;;  %6319 = vrcp.f32 %v606_v55  ;;  %v605_v30 = vadd.f32 1.0, %v6308_v63 }
 0x21d   :  { %v6312_v13 = vpop.eup %6311  ;;  %6321 = vtanh.f32 %v645_v4  ;;  %v648_v44 = vmul.f32 %v6310_v52, %v6298_v27  ;;  %v5113_v4 = vmul.f32 -1.442695, %v2074_v15 }
 0x21e   :  { %v6314_v36 = vpop.eup %6313  ;;  %6323 = vrcp.f32 %v605_v30  ;;  %v608_v39 = vadd.f32 1.0, %v6312_v13 }
 0x21f   :  { %v6316_v8 = vpop.eup %6315  ;;  %6325 = vtanh.f32 %v648_v44  ;;  %v647_v22 = vmul.f32 %v6314_v36, %v6300_v50 }
 0x220   :  { %6327 = vrcp.f32 %v608_v39  ;;  %v607_v42 = vadd.f32 1.0, %v6316_v8 }
 0x221   :  { %6329 = vtanh.f32 %v647_v22 }
 0x222   :  { %6331 = vrcp.f32 %v607_v42 }
 0x223   :  { %6333 = vpow2.f32 %v5108_v12 }
 0x224   :  { %6335 = vpow2.f32 %v5107_v43 }
 0x225   :  { %6337 = vpow2.f32 %v5110_v1  ;;  %v5568_v63 = vpop.f32.mrf.mxu0 }
 0x226   :  { %6339 = vpow2.f32 %v5109_v19  ;;  %v2324_v33 = vadd.f32 %v5568_v63, %v8233_v6 }
 0x227   :  { %6341 = vpow2.f32 %v5116_v7  ;;  %v2318_v61 = vpop.f32.mrf.mxu0 }
 0x228   :  { %v6318_v23 = vpop.eup %6317  ;;  %6343 = vpow2.f32 %v5115_v54  ;;  %v2319_v19 = vadd.f32 %v2318_v61, %v8247_v41  ;;  %v5124_v28 = vmul.f32 -1.442695, %v2324_v33 }
 0x229   :  { %v6320_v37 = vpop.eup %6319  ;;  %6345 = vpow2.f32 %v5118_v10  ;;  %v5571_v45 = vpop.f32.mrf.mxu0 }
 0x22a   :  { %v6322_v16 = vpop.eup %6321  ;;  %v8317_v0 = vmul.f32 %v6320_v37, %v6318_v23  ;;  %6347 = vpow2.f32 %v5117_v48  ;;  %v2334_v10 = vadd.f32 %v5571_v45, %v8251_v21  ;;  %v5123_v48 = vmul.f32 -1.442695, %v2319_v19 }
 0x22b   :  { %v6324_v57 = vpop.eup %6323  ;;  %6349 = vpow2.f32 %v5112_v62  ;;  %v2328_v60 = vpop.f32.mrf.mxu0 }
 0x22c   :  { %v6326_v29 = vpop.eup %6325  ;;  %v8319_v27 = vmul.f32 %v6324_v57, %v6322_v16  ;;  %6351 = vpow2.f32 %v5111_v59  ;;  %v5554_v36 = vpop.f32.mrf.mxu1  ;;  %v2329_v23 = vadd.f32 %v2328_v60, %v8266_v26  ;;  %v5126_v35 = vmul.f32 -1.442695, %v2334_v10 }
 0x22d   :  { %v6328_v50 = vpop.eup %6327  ;;  %6353 = vpow2.f32 %v5114_v58  ;;  %v2239_v37 = vadd.f32 %v5554_v36, %v8233_v6 }
 0x22e   :  { %v6330_v51 = vpop.eup %6329  ;;  %v8322_v5 = vmul.f32 %v6328_v50, %v6326_v29  ;;  %6355 = vpow2.f32 %v5113_v4  ;;  %v2233_v24 = vpop.f32.mrf.mxu1  ;;  %v5125_v59 = vmul.f32 -1.442695, %v2329_v23 }
 0x22f   :  { %v6332_v2 = vpop.eup %6331  ;;  %v2234_v57 = vadd.f32 %v2233_v24, %v8247_v41  ;;  %v5120_v50 = vmul.f32 -1.442695, %v2239_v37 }
 0x230   :  { %v8324_v55 = vmul.f32 %v6332_v2, %v6330_v51  ;;  %v6334_v52 = vpop.eup %6333  ;;  %v5557_v31 = vpop.f32.mrf.mxu1 }
 0x231   :  { %v6336_v30 = vpop.eup %6335  ;;  %v2689_v9 = vadd.f32 1.0, %v6334_v52  ;;  %v2249_v29 = vadd.f32 %v5557_v31, %v8251_v21  ;;  %v5119_v63 = vmul.f32 -1.442695, %v2234_v57 }
 0x232   :  { %v6338_v13 = vpop.eup %6337  ;;  %v2688_v39 = vadd.f32 1.0, %v6336_v30  ;;  %v2243_v40 = vpop.f32.mrf.mxu1 }
 0x233   :  { %v6340_v44 = vpop.eup %6339  ;;  %v2691_v8 = vadd.f32 1.0, %v6338_v13  ;;  %6357 = vrcp.f32 %v2689_v9  ;;  %v2244_v58 = vadd.f32 %v2243_v40, %v8266_v26  ;;  %v5122_v30 = vmul.f32 -1.442695, %v2249_v29 }
 0x234   :  { %v6342_v25 = vpop.eup %6341  ;;  %v2690_v22 = vadd.f32 1.0, %v6340_v44  ;;  %6359 = vrcp.f32 %v2688_v39 }
 0x235   :  { %v6344_v34 = vpop.eup %6343  ;;  %v2697_v12 = vadd.f32 1.0, %v6342_v25  ;;  %6361 = vrcp.f32 %v2691_v8  ;;  %v5121_v44 = vmul.f32 -1.442695, %v2244_v58 }
 0x236   :  { %v6346_v17 = vpop.eup %6345  ;;  %v2696_v43 = vadd.f32 1.0, %v6344_v34  ;;  %6363 = vrcp.f32 %v2690_v22 }
 0x237   :  { %v6348_v42 = vpop.eup %6347  ;;  %v2699_v18 = vadd.f32 1.0, %v6346_v17  ;;  %6365 = vrcp.f32 %v2697_v12 }
 0x238   :  { %v6350_v11 = vpop.eup %6349  ;;  %v2698_v38 = vadd.f32 1.0, %v6348_v42  ;;  %6367 = vrcp.f32 %v2696_v43 }
 0x239   :  { %v6352_v1 = vpop.eup %6351  ;;  %v2693_v7 = vadd.f32 1.0, %v6350_v11  ;;  %6369 = vrcp.f32 %v2699_v18 }
 0x23a   :  { %v6354_v54 = vpop.eup %6353  ;;  %v2692_v46 = vadd.f32 1.0, %v6352_v1  ;;  %6371 = vrcp.f32 %v2698_v38 }
 0x23b   :  { %6373 = vrcp.f32 %v2693_v7  ;;  %v2695_v62 = vadd.f32 1.0, %v6354_v54  ;;  %v6356_v16 = vpop.eup %6355 }
 0x23c   :  { %6375 = vpow2.f32 %v5124_v28  ;;  %v2694_v15 = vadd.f32 1.0, %v6356_v16 }
 0x23d   :  { %6377 = vrcp.f32 %v2692_v46 }
 0x23e   :  { %6379 = vpow2.f32 %v5123_v48 }
 0x23f   :  { %6381 = vrcp.f32 %v2695_v62 }
 0x240   :  { %v8334_v2 = vpop.eup %6357  ;;  %6383 = vpow2.f32 %v5126_v35 }
 0x241   :  { %v8337_v52 = vpop.eup %6359  ;;  %6385 = vpow2.f32 %v5125_v59 }
 0x242   :  { %v8339_v61 = vpop.eup %6361  ;;  %6387 = vpow2.f32 %v5120_v50 }
 0x243   :  { %v8342_v36 = vpop.eup %6363  ;;  %6389 = vrcp.f32 %v2694_v15 }
 0x244   :  { %v8344_v34 = vpop.eup %6365  ;;  %6391 = vpow2.f32 %v5119_v63 }
 0x245   :  { %v5596_v51 = vpop.f32.mrf.mxu0  ;;  %v8347_v45 = vpop.eup %6367  ;;  %6393 = vpow2.f32 %v5122_v30 }
 0x246   :  { %v2494_v4 = vadd.f32 %v5596_v51, %v8233_v6  ;;  %v8350_v24 = vpop.eup %6369  ;;  %6395 = vpow2.f32 %v5121_v44 }
 0x247   :  { %v2488_v13 = vpop.f32.mrf.mxu0  ;;  %v8353_v18 = vpop.eup %6371 }
 0x248   :  { %v2489_v9 = vadd.f32 %v2488_v13, %v8247_v41  ;;  %v5132_v25 = vmul.f32 -1.442695, %v2494_v4  ;;  %v8356_v60 = vpop.eup %6373 }
 0x249   :  { %v5599_v39 = vpop.f32.mrf.mxu0  ;;  %v6376_v54 = vpop.eup %6375 }
 0x24a   :  { %v5131_v8 = vmul.f32 -1.442695, %v2489_v9  ;;  %v2504_v17 = vadd.f32 %v5599_v39, %v8251_v21  ;;  %v5582_v22 = vpop.f32.mrf.mxu1  ;;  %6397 = vpow2.f32 %v5132_v25  ;;  %v8359_v46 = vpop.eup %6377  ;;  %v2705_v16 = vadd.f32 1.0, %v6376_v54 }
 0x24b   :  { %v2409_v42 = vadd.f32 %v5582_v22, %v8233_v6  ;;  %v2498_v12 = vpop.f32.mrf.mxu0  ;;  %v6380_v37 = vpop.eup %6379 }
 0x24c   :  { %v5134_v11 = vmul.f32 -1.442695, %v2504_v17  ;;  %v2499_v43 = vadd.f32 %v2498_v12, %v8266_v26  ;;  %v2403_v33 = vpop.f32.mrf.mxu1  ;;  %6399 = vpow2.f32 %v5131_v8  ;;  %v8363_v40 = vpop.eup %6381  ;;  %v2704_v58 = vadd.f32 1.0, %v6380_v37 }
 0x24d   :  { %v5128_v1 = vmul.f32 -1.442695, %v2409_v42  ;;  %v2404_v38 = vadd.f32 %v2403_v33, %v8247_v41  ;;  %v5624_v19 = vpop.f32.mrf.mxu0  ;;  %v6384_v59 = vpop.eup %6383 }
 0x24e   :  { %v5133_v7 = vmul.f32 -1.442695, %v2499_v43  ;;  %v2856_v31 = vadd.f32 %v5624_v19, %v8283_v32  ;;  %6401 = vpow2.f32 %v5134_v11  ;;  %v6386_v50 = vpop.eup %6385  ;;  %v2707_v44 = vadd.f32 1.0, %v6384_v59 }
 0x24f   :  { %v5585_v28 = vpop.f32.mrf.mxu1  ;;  %v2850_v10 = vpop.f32.mrf.mxu0  ;;  %6403 = vpow2.f32 %v5128_v1  ;;  %v5127_v23 = vmul.f32 -1.442695, %v2404_v38  ;;  %v2706_v39 = vadd.f32 1.0, %v6386_v50 }
 0x250   :  { %v2851_v48 = vadd.f32 %v2850_v10, %v8287_v3  ;;  %6405 = vpow2.f32 %v5133_v7  ;;  %v2419_v62 = vadd.f32 %v5585_v28, %v8251_v21  ;;  %v6388_v51 = vpop.eup %6387 }
 0x251   :  { %6407 = vtanh.f32 %v2856_v31  ;;  %v2413_v35 = vpop.f32.mrf.mxu1  ;;  %v8368_v13 = vpop.eup %6389  ;;  %v2701_v17 = vadd.f32 1.0, %v6388_v51 }
 0x252   :  { %v5627_v57 = vpop.f32.mrf.mxu0  ;;  %6409 = vtanh.f32 %v2851_v48  ;;  %v5130_v63 = vmul.f32 -1.442695, %v2419_v62  ;;  %v2414_v4 = vadd.f32 %v2413_v35, %v8266_v26  ;;  %v6392_v25 = vpop.eup %6391 }
 0x253   :  { %v2866_v29 = vadd.f32 %v5627_v57, %v8295_v14  ;;  %6411 = vpow2.f32 %v5127_v23  ;;  %v6394_v8 = vpop.eup %6393  ;;  %v2700_v43 = vadd.f32 1.0, %v6392_v25 }
 0x254   :  { %v2860_v15 = vpop.f32.mrf.mxu0  ;;  %v6396_v42 = vpop.eup %6395  ;;  %v5129_v12 = vmul.f32 -1.442695, %v2414_v4  ;;  %v2703_v38 = vadd.f32 1.0, %v6394_v8 }
 0x255   :  { %6413 = vtanh.f32 %v2866_v29  ;;  %v2861_v30 = vadd.f32 %v2860_v15, %v8290_v47  ;;  %v2702_v7 = vadd.f32 1.0, %v6396_v42 }
 0x256   :  { %6415 = vrcp.f32 %v2705_v16  ;;  %v5652_v9 = vpop.f32.mrf.mxu0 }
 0x257   :  { %6417 = vtanh.f32 %v2861_v30  ;;  %v6398_v11 = vpop.eup %6397  ;;  %v3026_v10 = vadd.f32 %v5652_v9, %v8283_v32 }
 0x258   :  { %6419 = vrcp.f32 %v2704_v58  ;;  %v3020_v22 = vpop.f32.mrf.mxu0  ;;  %v2713_v48 = vadd.f32 1.0, %v6398_v11 }
 0x259   :  { %6421 = vpow2.f32 %v5130_v63  ;;  %v6400_v1 = vpop.eup %6399  ;;  %v3021_v16 = vadd.f32 %v3020_v22, %v8287_v3 }
 0x25a   :  { %6423 = vrcp.f32 %v2707_v44  ;;  %v5655_v33 = vpop.f32.mrf.mxu0  ;;  %v2712_v57 = vadd.f32 1.0, %v6400_v1 }
 0x25b   :  { %6425 = vrcp.f32 %v2706_v39  ;;  %v6402_v19 = vpop.eup %6401  ;;  %v3036_v15 = vadd.f32 %v5655_v33, %v8295_v14 }
 0x25c   :  { %6427 = vrcp.f32 %v2701_v17  ;;  %v5610_v31 = vpop.f32.mrf.mxu1  ;;  %v3030_v54 = vpop.f32.mrf.mxu0  ;;  %v2715_v63 = vadd.f32 1.0, %v6402_v19 }
 0x25d   :  { %v6404_v28 = vpop.eup %6403  ;;  %6429 = vpow2.f32 %v5129_v12  ;;  %v2579_v8 = vadd.f32 %v5610_v31, %v8233_v6  ;;  %v3031_v31 = vadd.f32 %v3030_v54, %v8290_v47 }
 0x25e   :  { %v6406_v23 = vpop.eup %6405  ;;  %6431 = vrcp.f32 %v2700_v43  ;;  %v2573_v37 = vpop.f32.mrf.mxu1  ;;  %v2709_v9 = vadd.f32 1.0, %v6404_v28 }
 0x25f   :  { %v6408_v62 = vpop.eup %6407  ;;  %6433 = vrcp.f32 %v2703_v38  ;;  %v5136_v33 = vmul.f32 -1.442695, %v2579_v8  ;;  %v2574_v6 = vadd.f32 %v2573_v37, %v8247_v41 }
 0x260   :  { %v6410_v35 = vpop.eup %6409  ;;  %6435 = vrcp.f32 %v2702_v7  ;;  %v3497_v59 = vmul.f32 %v6408_v62, %v8334_v2  ;;  %v5680_v29 = vpop.f32.mrf.mxu0  ;;  %v2714_v2 = vadd.f32 1.0, %v6406_v23 }
 0x261   :  { %v6412_v50 = vpop.eup %6411  ;;  %v3496_v58 = vmul.f32 %v6410_v35, %v8337_v52  ;;  %6437 = vtanh.f32 %v3026_v10  ;;  %v3196_v54 = vadd.f32 %v5680_v29, %v8283_v32 }
 0x262   :  { %v6414_v51 = vpop.eup %6413  ;;  %6439 = vrcp.f32 %v2713_v48  ;;  %v5613_v4 = vpop.f32.mrf.mxu1  ;;  %v2708_v17 = vadd.f32 1.0, %v6412_v50  ;;  %v5135_v48 = vmul.f32 -1.442695, %v2574_v6 }
 0x263   :  { %v3190_v30 = vpop.f32.mrf.mxu0  ;;  %v8375_v44 = vpop.eup %6415  ;;  %v3499_v25 = vmul.f32 %v6414_v51, %v8339_v61  ;;  %6441 = vtanh.f32 %v3021_v16  ;;  %v2589_v10 = vadd.f32 %v5613_v4, %v8251_v21 }
 0x264   :  { %v6418_v39 = vpop.eup %6417  ;;  %6443 = vrcp.f32 %v2712_v57  ;;  %v2583_v42 = vpop.f32.mrf.mxu1 }
 0x265   :  { %v8379_v52 = vpop.eup %6419  ;;  %v8382_v22 = vmul.f32 %v6418_v39, %v8342_v36  ;;  %6445 = vtanh.f32 %v3036_v15  ;;  %v2584_v16 = vadd.f32 %v2583_v42, %v8266_v26  ;;  %v5138_v21 = vmul.f32 -1.442695, %v2589_v10 }
 0x266   :  { %v6422_v12 = vpop.eup %6421  ;;  %6447 = vrcp.f32 %v2715_v63  ;;  %v5683_v11 = vpop.f32.mrf.mxu0  ;;  %v3191_v15 = vadd.f32 %v3190_v30, %v8287_v3 }
 0x267   :  { %v8384_v43 = vpop.eup %6423  ;;  %6449 = vrcp.f32 %v2709_v9  ;;  %v2711_v36 = vadd.f32 1.0, %v6422_v12  ;;  %v5137_v63 = vmul.f32 -1.442695, %v2584_v16  ;;  %v3206_v9 = vadd.f32 %v5683_v11, %v8295_v14 }
 0x268   :  { %v8386_v61 = vpop.eup %6425  ;;  %6451 = vrcp.f32 %v2714_v2  ;;  %v3200_v1 = vpop.f32.mrf.mxu0 }
 0x269   :  { %v8389_v38 = vpop.eup %6427  ;;  %6453 = vrcp.f32 %v2708_v17  ;;  %v5638_v19 = vpop.f32.mrf.mxu1  ;;  %v3201_v30 = vadd.f32 %v3200_v1, %v8290_v47 }
 0x26a   :  { %v6430_v7 = vpop.eup %6429  ;;  %6455 = vtanh.f32 %v3497_v59 }
 0x26b   :  { %v8392_v28 = vpop.eup %6431  ;;  %6457 = vtanh.f32 %v3496_v58  ;;  %v2710_v62 = vadd.f32 1.0, %v6430_v7  ;;  %v2935_v35 = vpop.f32.mrf.mxu1 }
 0x26c   :  { %v8395_v23 = vpop.eup %6433  ;;  %6459 = vpow2.f32 %v5136_v33  ;;  %v5708_v41 = vpop.f32.mrf.mxu0  ;;  %v2936_v17 = vadd.f32 %v2935_v35, %v8287_v3 }
 0x26d   :  { %v8397_v37 = vpop.eup %6435  ;;  %6461 = vrcp.f32 %v2711_v36  ;;  %v3366_v6 = vadd.f32 %v5708_v41, %v8283_v32 }
 0x26e   :  { %v6438_v57 = vpop.eup %6437  ;;  %6463 = vtanh.f32 %v3031_v31  ;;  %v3360_v59 = vpop.f32.mrf.mxu0 }
 0x26f   :  { %v8401_v50 = vpop.eup %6439  ;;  %6465 = vtanh.f32 %v3499_v25  ;;  %v5641_v4 = vpop.f32.mrf.mxu1  ;;  %v2941_v25 = vadd.f32 %v5638_v19, %v8283_v32  ;;  %v3505_v1 = vmul.f32 %v6438_v57, %v8344_v34 }
 0x270   :  { %v6442_v58 = vpop.eup %6441  ;;  %6467 = vpow2.f32 %v5135_v48  ;;  %v2951_v41 = vadd.f32 %v5641_v4, %v8295_v14 }
 0x271   :  { %v8404_v51 = vpop.eup %6443  ;;  %6469 = vrcp.f32 %v2710_v62  ;;  %v2945_v42 = vpop.f32.mrf.mxu1  ;;  %v3504_v7 = vmul.f32 %v6442_v58, %v8347_v45  ;;  %v3361_v45 = vadd.f32 %v3360_v59, %v8287_v3 }
 0x272   :  { %v6446_v26 = vpop.eup %6445  ;;  %6471 = vtanh.f32 %v3196_v54  ;;  %v5711_v39 = vpop.f32.mrf.mxu0 }
 0x273   :  { %v8407_v29 = vpop.eup %6447  ;;  %6473 = vpow2.f32 %v5138_v21  ;;  %v3507_v48 = vmul.f32 %v6446_v26, %v8350_v24 }
 0x274   :  { %v8410_v2 = vpop.eup %6449  ;;  %6475 = vtanh.f32 %v3191_v15  ;;  %v8418_v11 = vpop.f32.mrf.mxu0  ;;  %v2946_v15 = vadd.f32 %v2945_v42, %v8290_v47 }
 0x275   :  { %v8413_v8 = vpop.eup %6451  ;;  %6477 = vpow2.f32 %v5137_v63  ;;  %v8427_v31 = vpop.f32.mrf.mxu1 }
 0x276   :  { %v8416_v12 = vpop.eup %6453  ;;  %6479 = vtanh.f32 %v3206_v9  ;;  %v3376_v9 = vadd.f32 %v5711_v39, %v8295_v14 }
 0x277   :  { %v8420_v33 = vpop.eup %6455  ;;  %6481 = vtanh.f32 %v2941_v25  ;;  %v8437_v54 = vpop.f32.mrf.mxu1 }
 0x278   :  { %v8423_v36 = vpop.eup %6457  ;;  %6483 = vtanh.f32 %v3201_v30  ;;  %v5736_v62 = vpop.f32.mrf.mxu0 }
 0x279   :  { %v6460_v19 = vpop.eup %6459  ;;  %6485 = vtanh.f32 %v2936_v17 }
 0x27a   :  { %v8429_v10 = vpop.eup %6461  ;;  %6487 = vtanh.f32 %v8382_v22  ;;  %v2717_v34 = vadd.f32 1.0, %v6460_v19  ;;  %v3594_v22 = vpop.f32.mrf.mxu0 }
 0x27b   :  { %v6464_v16 = vpop.eup %6463  ;;  %6489 = vtanh.f32 %v3366_v6  ;;  %v8444_v59 = vpop.f32.mrf.mxu1 }
 0x27c   :  { %v8434_v35 = vpop.eup %6465  ;;  %6491 = vtanh.f32 %v3505_v1  ;;  %v3506_v24 = vmul.f32 %v6464_v16, %v8353_v18 }
 0x27d   :  { %v6468_v57 = vpop.eup %6467  ;;  %6493 = vtanh.f32 %v3504_v7 }
 0x27e   :  { %v8439_v21 = vpop.eup %6469  ;;  %6495 = vtanh.f32 %v3507_v48  ;;  %v2716_v4 = vadd.f32 1.0, %v6468_v57  ;;  %v5739_v17 = vpop.f32.mrf.mxu0 }
 0x27f   :  { %v6472_v58 = vpop.eup %6471  ;;  %6497 = vtanh.f32 %v2951_v41  ;;  %v8448_v48 = vpop.f32.mrf.mxu1  ;;  %v3600_v41 = vadd.f32 %v5736_v62, %v8269_v20 }
 0x280   :  { %v6474_v63 = vpop.eup %6473  ;;  %6499 = vrcp.f32 %v2717_v34  ;;  %v3513_v30 = vmul.f32 %v6472_v58, %v8375_v44  ;;  %v3604_v44 = vpop.f32.mrf.mxu0 }
 0x281   :  { %v6476_v26 = vpop.eup %6475  ;;  %6501 = vtanh.f32 %v3361_v45  ;;  %v2719_v6 = vadd.f32 1.0, %v6474_v63  ;;  %v5204_v63 = vmul.f32 -1.442695, %v3600_v41 }
 0x282   :  { %v6478_v25 = vpop.eup %6477  ;;  %6503 = vtanh.f32 %v3506_v24  ;;  %v3512_v42 = vmul.f32 %v6476_v26, %v8379_v52  ;;  %v3595_v24 = vadd.f32 %v3594_v22, %v8280_v53 }
 0x283   :  { %v6480_v18 = vpop.eup %6479  ;;  %6505 = vtanh.f32 %v2946_v15  ;;  %v2718_v7 = vadd.f32 1.0, %v6478_v25  ;;  %v3605_v25 = vadd.f32 %v3604_v44, %v8292_v49 }
 0x284   :  { %v6482_v1 = vpop.eup %6481  ;;  %6507 = vrcp.f32 %v2716_v4  ;;  %v3515_v16 = vmul.f32 %v6480_v18, %v8384_v43  ;;  %v8460_v43 = vpop.f32.mrf.mxu1  ;;  %v3610_v4 = vadd.f32 %v5739_v17, %v8302_v56 }
 0x285   :  { %v6484_v19 = vpop.eup %6483  ;;  %6509 = vtanh.f32 %v3376_v9  ;;  %v3501_v57 = vmul.f32 %v6482_v1, %v8356_v60  ;;  %v5764_v60 = vpop.f32.mrf.mxu0  ;;  %v5203_v9 = vmul.f32 -1.442695, %v3595_v24 }
 0x286   :  { %v6486_v39 = vpop.eup %6485  ;;  %6511 = vtanh.f32 %v3513_v30  ;;  %v3514_v52 = vmul.f32 %v6484_v19, %v8386_v61  ;;  %v3111_v30 = vadd.f32 %v8427_v31, %v8283_v32  ;;  %v8473_v18 = vpop.f32.mrf.mxu1  ;;  %v3770_v1 = vadd.f32 %v5764_v60, %v8269_v20 }
 0x287   :  { %v8452_v34 = vpop.eup %6487  ;;  %6513 = vrcp.f32 %v2719_v6  ;;  %v3500_v15 = vmul.f32 %v6486_v39, %v8359_v46  ;;  %v5206_v6 = vmul.f32 -1.442695, %v3610_v4  ;;  %v3371_v19 = vadd.f32 %v8418_v11, %v8290_v47 }
 0x288   :  { %v6490_v45 = vpop.eup %6489  ;;  %6515 = vtanh.f32 %v3512_v42  ;;  %v3764_v42 = vpop.f32.mrf.mxu0  ;;  %v5205_v39 = vmul.f32 -1.442695, %v3605_v25 }
 0x289   :  { %v8457_v58 = vpop.eup %6491  ;;  %6517 = vrcp.f32 %v2718_v7  ;;  %v3521_v61 = vmul.f32 %v6490_v45, %v8401_v50  ;;  %v5697_v41 = vpop.f32.mrf.mxu1  ;;  %v3765_v44 = vadd.f32 %v3764_v42, %v8280_v53  ;;  %v5212_v45 = vmul.f32 -1.442695, %v3770_v1 }
 0x28a   :  { %v8462_v62 = vpop.eup %6493  ;;  %6519 = vtanh.f32 %v3515_v16 }
 0x28b   :  { %v8465_v26 = vpop.eup %6495  ;;  %6521 = vtanh.f32 %v3501_v57  ;;  %v5211_v4 = vmul.f32 -1.442695, %v3765_v44  ;;  %v8493_v60 = vpop.f32.mrf.mxu1 }
 0x28c   :  { %v6498_v22 = vpop.eup %6497  ;;  %6523 = vtanh.f32 %v3514_v52  ;;  %v5767_v52 = vpop.f32.mrf.mxu0 }
 0x28d   :  { %v8469_v46 = vpop.eup %6499  ;;  %6525 = vtanh.f32 %v3500_v15  ;;  %v3503_v31 = vmul.f32 %v6498_v22, %v8363_v40  ;;  %v8509_v1 = vpop.f32.mrf.mxu1 }
 0x28e   :  { %v6502_v17 = vpop.eup %6501  ;;  %6527 = vpow2.f32 %v5204_v63  ;;  %v3106_v63 = vadd.f32 %v8437_v54, %v8287_v3  ;;  %v3121_v54 = vadd.f32 %v8444_v59, %v8295_v14  ;;  %v3774_v42 = vpop.f32.mrf.mxu0 }
 0x28f   :  { %v8476_v50 = vpop.eup %6503  ;;  %6529 = vtanh.f32 %v3521_v61  ;;  %v3520_v15 = vmul.f32 %v6502_v17, %v8404_v51  ;;  %v3780_v61 = vadd.f32 %v5767_v52, %v8302_v56  ;;  %v8518_v44 = vpop.f32.mrf.mxu1 }
 0x290   :  { %v6506_v7 = vpop.eup %6505  ;;  %6531 = vpow2.f32 %v5203_v9 }
 0x291   :  { %v8480_v16 = vpop.eup %6507  ;;  %6533 = vtanh.f32 %v3111_v30  ;;  %v3502_v9 = vmul.f32 %v6506_v7, %v8368_v13  ;;  %v3116_v30 = vadd.f32 %v8448_v48, %v8290_v47  ;;  %v3281_v48 = vadd.f32 %v8460_v43, %v8283_v32 }
 0x292   :  { %9069 = vst [vmem:[#allocation13_spill] sm:$0xff] %v8480_v16  ;;  %v6510_v57 = vpop.eup %6509  ;;  %6535 = vpow2.f32 %v5206_v6  ;;  %v5214_v6 = vmul.f32 -1.442695, %v3780_v61  ;;  %v8523_v43 = vpop.f32.mrf.mxu1 }
 0x293   :  { %v8484_v24 = vpop.eup %6511  ;;  %6537 = vtanh.f32 %v3371_v19  ;;  %v3523_v7 = vmul.f32 %v6510_v57, %v8407_v29  ;;  %v3276_v29 = vadd.f32 %v8473_v18, %v8287_v3 }
 0x294   :  { %v8487_v11 = vpop.eup %6513  ;;  %6539 = vpow2.f32 %v5205_v39 }
 0x295   :  { %9070 = vst [vmem:[#allocation15_spill] sm:$0xff] %v8487_v11  ;;  %v8491_v40 = vpop.eup %6515  ;;  %6541 = vtanh.f32 %v3503_v31 }
 0x296   :  { %v8496_v22 = vpop.eup %6517  ;;  %6543 = vpow2.f32 %v5212_v45 }
 0x297   :  { %9071 = vst [vmem:[#allocation17_spill] sm:$0xff] %v8496_v22  ;;  %v8499_v51 = vpop.eup %6519  ;;  %6545 = vtanh.f32 %v3520_v15  ;;  %v5792_v15 = vpop.f32.mrf.mxu0 }
 0x298   :  { %v8503_v25 = vpop.eup %6521  ;;  %6547 = vtanh.f32 %v3106_v63 }
 0x299   :  { %v8507_v17 = vpop.eup %6523  ;;  %6549 = vpow2.f32 %v5211_v4 }
 0x29a   :  { %v8511_v13 = vpop.eup %6525  ;;  %6551 = vtanh.f32 %v3502_v9  ;;  %v3291_v9 = vadd.f32 %v5697_v41, %v8295_v14 }
 0x29b   :  { %v6528_v19 = vpop.eup %6527  ;;  %6553 = vtanh.f32 %v3121_v54 }
 0x29c   :  { %v8514_v59 = vpop.eup %6529  ;;  %v4305_v39 = vadd.f32 1.0, %v6528_v19  ;;  %6555 = vtanh.f32 %v3116_v30  ;;  %v3934_v19 = vpop.f32.mrf.mxu0 }
 0x29d   :  { %v6532_v31 = vpop.eup %6531  ;;  %6557 = vpow2.f32 %v5214_v6  ;;  %v3775_v6 = vadd.f32 %v3774_v42, %v8292_v49  ;;  %v3940_v42 = vadd.f32 %v5792_v15, %v8269_v20 }
 0x29e   :  { %v6534_v45 = vpop.eup %6533  ;;  %6559 = vrcp.f32 %v4305_v39  ;;  %v4304_v52 = vadd.f32 1.0, %v6532_v31 }
 0x29f   :  { %v6536_v63 = vpop.eup %6535  ;;  %6561 = vtanh.f32 %v3523_v7  ;;  %v3509_v39 = vmul.f32 %v6534_v45, %v8389_v38  ;;  %v3286_v45 = vadd.f32 %v8493_v60, %v8290_v47  ;;  %v5220_v15 = vmul.f32 -1.442695, %v3940_v42  ;;  %v8550_v42 = vpop.permute.xlu0 %4696 }
 0x2a0   :  { %v6538_v57 = vpop.eup %6537  ;;  %6563 = vrcp.f32 %v4304_v52  ;;  %v4307_v4 = vadd.f32 1.0, %v6536_v63  ;;  %v8532_v52 = vpop.f32.mrf.mxu1 }
 0x2a1   :  { %v6540_v61 = vpop.eup %6539  ;;  %6565 = vtanh.f32 %v3281_v48  ;;  %v3522_v31 = vmul.f32 %v6538_v57, %v8413_v8 }
 0x2a2   :  { %v8525_v54 = vpop.eup %6541  ;;  %6567 = vrcp.f32 %v4307_v4  ;;  %v4306_v30 = vadd.f32 1.0, %v6540_v61  ;;  %v5213_v4 = vmul.f32 -1.442695, %v3775_v6  ;;  %v5795_v61 = vpop.f32.mrf.mxu0 }
 0x2a3   :  { %v6544_v7 = vpop.eup %6543  ;;  %6569 = vtanh.f32 %v3276_v29  ;;  %v3950_v60 = vadd.f32 %v5795_v61, %v8302_v56 }
 0x2a4   :  { %v8529_v18 = vpop.eup %6545  ;;  %6571 = vrcp.f32 %v4306_v30  ;;  %v4313_v48 = vadd.f32 1.0, %v6544_v7  ;;  %v5750_v30 = vpop.f32.mrf.mxu1 }
 0x2a5   :  { %v6548_v41 = vpop.eup %6547  ;;  %6573 = vtanh.f32 %v3291_v9  ;;  %v3935_v9 = vadd.f32 %v3934_v19, %v8280_v53  ;;  %v3944_v7 = vpop.f32.mrf.mxu0 }
 0x2a6   :  { %v6550_v63 = vpop.eup %6549  ;;  %6575 = vrcp.f32 %v4313_v48  ;;  %v3508_v29 = vmul.f32 %v6548_v41, %v8392_v28  ;;  %v3685_v41 = vadd.f32 %v5750_v30, %v8269_v20 }
 0x2a7   :  { %v8535_v22 = vpop.eup %6551  ;;  %6577 = vtanh.f32 %v3509_v39  ;;  %v4312_v38 = vadd.f32 1.0, %v6550_v63 }
 0x2a8   :  { %9072 = vst [vmem:[#allocation18_spill] sm:$0xff] %v8535_v22  ;;  %v6554_v8 = vpop.eup %6553  ;;  %6579 = vtanh.f32 %v3522_v31  ;;  %v8545_v31 = vpop.permute.xlu1 %4701 }
 0x2a9   :  { %v6556_v57 = vpop.eup %6555  ;;  %6581 = vrcp.f32 %v4312_v38  ;;  %v3511_v39 = vmul.f32 %v6554_v8, %v8395_v23  ;;  %v5219_v23 = vmul.f32 -1.442695, %v3935_v9  ;;  %v3945_v38 = vadd.f32 %v3944_v7, %v8292_v49 }
 0x2aa   :  { %v6558_v6 = vpop.eup %6557  ;;  %6583 = vpow2.f32 %v5213_v4  ;;  %v3510_v19 = vmul.f32 %v6556_v57, %v8397_v37  ;;  %v5222_v37 = vmul.f32 -1.442695, %v3950_v60  ;;  %v5208_v9 = vmul.f32 -1.442695, %v3685_v41 }
 0x2ab   :  { %v6560_v48 = vpop.eup %6559  ;;  %6585 = vtanh.f32 %v3286_v45  ;;  %v4315_v63 = vadd.f32 1.0, %v6558_v6 }
 0x2ac   :  { %v8543_v11 = vpop.eup %6561  ;;  %6587 = vtanh.f32 %v3508_v29  ;;  %v4433_v28 = vmul.f32 %v6560_v48, %v8420_v33  ;;  %v3679_v48 = vpop.f32.mrf.mxu1 }
 0x2ad   :  { %9073 = vst [vmem:[#allocation20_spill] sm:$0xff] %v8543_v11  ;;  %v6564_v4 = vpop.eup %6563  ;;  %6589 = vrcp.f32 %v4315_v63 }
 0x2ae   :  { %v6566_v61 = vpop.eup %6565  ;;  %v4465_v45 = vmul.f32 %v4433_v28, %v8317_v0  ;;  %v4715_v8 = vmul.f32 %v8545_v31, %v4433_v28  ;;  %v4432_v29 = vmul.f32 %v6564_v4, %v8423_v36  ;;  %6591 = vpow2.f32 %v5220_v15  ;;  %v8562_v15 = vpop.permute.xlu1 %4711 }
 0x2af   :  { %v6568_v33 = vpop.eup %6567  ;;  %6593 = vtanh.f32 %v3511_v39  ;;  %v5221_v28 = vmul.f32 -1.442695, %v3945_v38 }
 0x2b0   :  { %v6570_v57 = vpop.eup %6569  ;;  %v4464_v30 = vmul.f32 %v4432_v29, %v8319_v27  ;;  %v4714_v6 = vmul.f32 %v8550_v42, %v4432_v29  ;;  %6595 = vtanh.f32 %v3510_v19  ;;  %v4498_v63 = vsel %vm4496_vm2, %v4465_v45, 0.0  ;;  %v8568_v29 = vpop.permute.xlu0 %4706 }
 0x2b1   :  { %v6572_v7 = vpop.eup %6571  ;;  %v4435_v16 = vmul.f32 %v6568_v33, %v8434_v35  ;;  %6597 = vpow2.f32 %v5219_v23  ;;  %v4747_v39 = vsel %vm4496_vm2, %v4715_v8, 0.0 }
 0x2b2   :  { %v8560_v36 = vpop.eup %6573  ;;  %v4497_v60 = vsel %vm4496_vm2, %v4464_v30, 0.0  ;;  %v4746_v4 = vsel %vm4496_vm2, %v4714_v6, 0.0  ;;  %v4434_v19 = vmul.f32 %v6572_v7, %v8452_v34  ;;  %6599 = vpow2.f32 %v5222_v37  ;;  %v5820_v6 = vpop.f32.mrf.mxu0 }
 0x2b3   :  { %v6576_v41 = vpop.eup %6575  ;;  %v4499_v45 = vadd.f32 %v4498_v63, %v4497_v60  ;;  %v4748_v11 = vadd.f32 %v4747_v39, %v4746_v4  ;;  %v4467_v35 = vmul.f32 %v4435_v16, %v8322_v5  ;;  %v4717_v23 = vmul.f32 %v8562_v15, %v4435_v16  ;;  %v5753_v34 = vpop.f32.mrf.mxu1 }
 0x2b4   :  { %v8572_v38 = vpop.eup %6577  ;;  %v4466_v33 = vmul.f32 %v4434_v19, %v8324_v55  ;;  %v4716_v8 = vmul.f32 %v8568_v29, %v4434_v19  ;;  %v4441_v30 = vmul.f32 %v6576_v41, %v8457_v58  ;;  %v3517_v63 = vmul.f32 %v6566_v61, %v8410_v2 }
 0x2b5   :  { %9074 = vst [vmem:[#allocation21_spill] sm:$0xff] %v8572_v38  ;;  %v8577_v7 = vpop.eup %6579  ;;  %6601 = vpow2.f32 %v5208_v9  ;;  %v3680_v39 = vadd.f32 %v3679_v48, %v8280_v53  ;;  %v3516_v38 = vmul.f32 %v6570_v57, %v8416_v12  ;;  %v4502_v61 = vsel %vm4496_vm2, %v4467_v35, 0.0 }
 0x2b6   :  { %9075 = vst [vmem:[#allocation23_spill] sm:$0xff] %v8577_v7  ;;  %v6582_v60 = vpop.eup %6581  ;;  %v4500_v16 = vsel %vm4496_vm2, %v4466_v33, 0.0  ;;  %v4749_v4 = vsel %vm4496_vm2, %v4716_v8, 0.0  ;;  %v4473_v19 = vmul.f32 %v4441_v30, %v8317_v0  ;;  %v4723_v22 = vmul.f32 %v8545_v31, %v4441_v30  ;;  %v4104_v33 = vpop.f32.mrf.mxu0 }
 0x2b7   :  { %v6584_v58 = vpop.eup %6583  ;;  %v4501_v37 = vadd.f32 %v4500_v16, %v4499_v45  ;;  %v4750_v41 = vadd.f32 %v4749_v4, %v4748_v11  ;;  %v4440_v7 = vmul.f32 %v6582_v60, %v8462_v62  ;;  %v4751_v9 = vsel %vm4496_vm2, %v4717_v23, 0.0  ;;  %v3689_v8 = vpop.f32.mrf.mxu1 }
 0x2b8   :  { %v8587_v2 = vpop.eup %6585  ;;  %v4314_v48 = vadd.f32 1.0, %v6584_v58  ;;  %6603 = vpow2.f32 %v5221_v28  ;;  %v3451_v35 = vadd.f32 %v8509_v1, %v8283_v32  ;;  %v5207_v23 = vmul.f32 -1.442695, %v3680_v39  ;;  %v5823_v1 = vpop.f32.mrf.mxu0 }
 0x2b9   :  { %v8591_v12 = vpop.eup %6587  ;;  %v8593_v57 = vadd.f32 %v4502_v61, %v4501_v37  ;;  %v8595_v45 = vadd.f32 %v4751_v9, %v4750_v41  ;;  %v4472_v11 = vmul.f32 %v4440_v7, %v8319_v27  ;;  %v4722_v62 = vmul.f32 %v8550_v42, %v4440_v7 }
 0x2ba   :  { %v6590_v30 = vpop.eup %6589  ;;  %6605 = vtanh.f32 %v3517_v63  ;;  %v4110_v28 = vadd.f32 %v5820_v6, %v8269_v20  ;;  %v4524_v16 = vsel %vm4496_vm2, %v4473_v19, 0.0  ;;  %v4773_v4 = vsel %vm4496_vm2, %v4723_v22, 0.0  ;;  %v5778_v6 = vpop.f32.mrf.mxu1 }
 0x2bb   :  { %v6592_v60 = vpop.eup %6591  ;;  %v4523_v58 = vsel %vm4496_vm2, %v4472_v11, 0.0  ;;  %v4772_v37 = vsel %vm4496_vm2, %v4722_v62, 0.0  ;;  %v4443_v32 = vmul.f32 %v6590_v30, %v8465_v26  ;;  %6607 = vrcp.f32 %v4314_v48  ;;  %v4114_v30 = vpop.f32.mrf.mxu0 }
 0x2bc   :  { %v8606_v41 = vpop.eup %6593  ;;  %v8608_v7 = vadd.f32 %v4524_v16, %v4523_v58  ;;  %v8610_v63 = vadd.f32 %v4773_v4, %v4772_v37  ;;  %6609 = vtanh.f32 %v3516_v38  ;;  %v4321_v19 = vadd.f32 1.0, %v6592_v60  ;;  %v3849_v16 = vpop.f32.mrf.mxu1 }
 0x2bd   :  { %v8613_v39 = vpop.eup %6595  ;;  %v8616_v61 = vmul.f32 %v4443_v32, %v8322_v5  ;;  %v3446_v9 = vadd.f32 %v8518_v44, %v8287_v3  ;;  %6611 = vpow2.f32 %v5207_v23  ;;  %v3695_v11 = vadd.f32 %v5753_v34, %v8302_v56 }
 0x2be   :  { %v6598_v22 = vpop.eup %6597  ;;  %6613 = vrcp.f32 %v4321_v19  ;;  %v5228_v26 = vmul.f32 -1.442695, %v4110_v28  ;;  %v4105_v48 = vadd.f32 %v4104_v33, %v8280_v53  ;;  %v3690_v60 = vadd.f32 %v3689_v8, %v8292_v49  ;;  %v5781_v28 = vpop.f32.mrf.mxu1 }
 0x2bf   :  { %v4320_v62 = vadd.f32 1.0, %v6598_v22  ;;  %6615 = vtanh.f32 %v3451_v35  ;;  %v6600_v38 = vpop.eup %6599  ;;  %v5210_v37 = vmul.f32 -1.442695, %v3695_v11  ;;  %v4120_v3 = vadd.f32 %v5823_v1, %v8302_v56  ;;  %v5834_v35 = vpop.f32.mrf.mxu0 }
 0x2c0   :  { %v4323_v58 = vadd.f32 1.0, %v6600_v38  ;;  %v5227_v34 = vmul.f32 -1.442695, %v4105_v48  ;;  %v3855_v23 = vadd.f32 %v5778_v6, %v8269_v20  ;;  %v4115_v33 = vadd.f32 %v4114_v30, %v8292_v49  ;;  %v3859_v48 = vpop.f32.mrf.mxu1 }
 0x2c1   :  { %6617 = vrcp.f32 %v4320_v62  ;;  %v5209_v22 = vmul.f32 -1.442695, %v3690_v60  ;;  %v3850_v8 = vadd.f32 %v3849_v16, %v8280_v53  ;;  %v5230_v11 = vmul.f32 -1.442695, %v4120_v3  ;;  %v4189_v3 = vpop.f32.mrf.mxu0 }
 0x2c2   :  { %v6602_v4 = vpop.eup %6601  ;;  %6619 = vtanh.f32 %v3446_v9  ;;  %v5216_v1 = vmul.f32 -1.442695, %v3855_v23  ;;  %v5229_v6 = vmul.f32 -1.442695, %v4115_v33  ;;  %v4504_v16 = vrot.slane %v8593_v57, 4 }
 0x2c3   :  { %v4309_v44 = vadd.f32 1.0, %v6602_v4  ;;  %6621 = vpow2.f32 %v5228_v26  ;;  %v4195_v26 = vadd.f32 %v5834_v35, %v8269_v20  ;;  %v5215_v38 = vmul.f32 -1.442695, %v3850_v8 }
 0x2c4   :  { %6623 = vrcp.f32 %v4323_v58  ;;  %v3865_v4 = vadd.f32 %v5781_v28, %v8302_v56  ;;  %v3456_v23 = vadd.f32 %v8532_v52, %v8290_v47  ;;  %v4505_v47 = vadd.f32 %v4504_v16, %v8593_v57 }
 0x2c5   :  { %v6604_v19 = vpop.eup %6603  ;;  %6625 = vrcp.f32 %v4309_v44  ;;  %v8640_v33 = vmul.f32 -1.442695, %v4195_v26 }
 0x2c6   :  { %v4322_v9 = vadd.f32 1.0, %v6604_v19  ;;  %6627 = vpow2.f32 %v5210_v37  ;;  %v3461_v37 = vadd.f32 %v8523_v43, %v8295_v14  ;;  %v5218_v8 = vmul.f32 -1.442695, %v3865_v4 }
 0x2c7   :  { %v8627_v62 = vpop.eup %6605  ;;  %6629 = vpow2.f32 %v5227_v34  ;;  %v4725_v34 = vmul.f32 %v8562_v15, %v4443_v32  ;;  %v4190_v32 = vadd.f32 %v4189_v3, %v8280_v53  ;;  %v4528_v4 = vsel %vm4496_vm2, %v8616_v61, 0.0 }
 0x2c8   :  { %6631 = vrcp.f32 %v4322_v9  ;;  %v6608_v30 = vpop.eup %6607 }
 0x2c9   :  { %6633 = vpow2.f32 %v5209_v22  ;;  %v8631_v60 = vpop.eup %6609  ;;  %v4442_v58 = vmul.f32 %v6608_v30, %v8476_v50  ;;  %v5806_v22 = vpop.f32.mrf.mxu1  ;;  %v3860_v30 = vadd.f32 %v3859_v48, %v8292_v49  ;;  %v4777_v57 = vsel %vm4496_vm2, %v4725_v34, 0.0 }
 0x2ca   :  { %6635 = vpow2.f32 %v5230_v11  ;;  %v6612_v44 = vpop.eup %6611 }
 0x2cb   :  { %6637 = vpow2.f32 %v5216_v1  ;;  %v6614_v35 = vpop.eup %6613  ;;  %v4474_v28 = vmul.f32 %v4442_v58, %v8324_v55  ;;  %v4724_v19 = vmul.f32 %v8568_v29, %v4442_v58  ;;  %v4308_v50 = vadd.f32 1.0, %v6612_v44  ;;  %v4019_v3 = vpop.f32.mrf.mxu1 }
 0x2cc   :  { %6639 = vpow2.f32 %v5229_v6  ;;  %v6616_v14 = vpop.eup %6615  ;;  %v4449_v43 = vmul.f32 %v6614_v35, %v8484_v24 }
 0x2cd   :  { %6641 = vpow2.f32 %v5215_v38  ;;  %v4526_v52 = vsel %vm4496_vm2, %v4474_v28, 0.0  ;;  %v4775_v11 = vsel %vm4496_vm2, %v4724_v19, 0.0  ;;  %v4506_v28 = vrot.slane %v4505_v47, 2 }
 0x2ce   :  { %v6618_v9 = vpop.eup %6617  ;;  %6643 = vrcp.f32 %v4308_v50  ;;  %v4527_v26 = vadd.f32 %v4526_v52, %v8608_v7  ;;  %v4776_v6 = vadd.f32 %v4775_v11, %v8610_v63  ;;  %v4481_v24 = vmul.f32 %v4449_v43, %v8317_v0 }
 0x2cf   :  { %v8649_v1 = vpop.eup %6619  ;;  %v4731_v16 = vmul.f32 %v8545_v31, %v4449_v43  ;;  %v4448_v58 = vmul.f32 %v6618_v9, %v8491_v40  ;;  %6645 = vtanh.f32 %v3461_v37  ;;  %v8664_v63 = vmul.f32 -1.442695, %v4190_v32 }
 0x2d0   :  { %v6622_v38 = vpop.eup %6621  ;;  %v8660_v35 = vadd.f32 %v4528_v4, %v4527_v26  ;;  %v8662_v7 = vadd.f32 %v4777_v57, %v4776_v6  ;;  %v4550_v40 = vsel %vm4496_vm2, %v4481_v24, 0.0  ;;  %6647 = vpow2.f32 %v5218_v8  ;;  %v5809_v6 = vpop.f32.mrf.mxu1 }
 0x2d1   :  { %v6624_v44 = vpop.eup %6623  ;;  %v4480_v19 = vmul.f32 %v4448_v58, %v8319_v27  ;;  %v4730_v61 = vmul.f32 %v8550_v42, %v4448_v58  ;;  %v4329_v9 = vadd.f32 1.0, %v6622_v38  ;;  %v4799_v37 = vsel %vm4496_vm2, %v4731_v16, 0.0 }
 0x2d2   :  { %v6626_v48 = vpop.eup %6625  ;;  %v4451_v34 = vmul.f32 %v6624_v44, %v8499_v51  ;;  %v8675_v58 = vmul.f32 -1.442695, %v3860_v30  ;;  %v4025_v24 = vadd.f32 %v5806_v22, %v8269_v20  ;;  %v3525_v8 = vmul.f32 %v6616_v14, %v8469_v46 }
 0x2d3   :  { %v6628_v50 = vpop.eup %6627  ;;  %v4437_v43 = vmul.f32 %v6626_v48, %v8503_v25  ;;  %v4549_v32 = vsel %vm4496_vm2, %v4480_v19, 0.0  ;;  %v4798_v11 = vsel %vm4496_vm2, %v4730_v61, 0.0  ;;  %6649 = vtanh.f32 %v3456_v23 }
 0x2d4   :  { %v6630_v52 = vpop.eup %6629  ;;  %v4483_v26 = vmul.f32 %v4451_v34, %v8322_v5  ;;  %v4551_v57 = vadd.f32 %v4550_v40, %v4549_v32  ;;  %v4800_v51 = vadd.f32 %v4799_v37, %v4798_v11  ;;  %v4020_v16 = vadd.f32 %v4019_v3, %v8280_v53 }
 0x2d5   :  { %v6632_v4 = vpop.eup %6631  ;;  %v4469_v38 = vmul.f32 %v4437_v43, %v8317_v0  ;;  %6651 = vrcp.f32 %v4329_v9  ;;  %v4311_v19 = vadd.f32 1.0, %v6628_v50  ;;  %v4035_v61 = vadd.f32 %v5809_v6, %v8302_v56 }
 0x2d6   :  { %v6634_v25 = vpop.eup %6633  ;;  %v4450_v48 = vmul.f32 %v6632_v4, %v8507_v17  ;;  %v4507_v30 = vadd.f32 %v4506_v28, %v4505_v47  ;;  %v4328_v37 = vadd.f32 1.0, %v6630_v52  ;;  %6653 = vpow2.f32 %v8640_v33 }
 0x2d7   :  { %v6636_v44 = vpop.eup %6635  ;;  %v4310_v32 = vadd.f32 1.0, %v6634_v25  ;;  %v4733_v46 = vmul.f32 %v8562_v15, %v4451_v34  ;;  %6655 = vrcp.f32 %v4311_v19  ;;  %v4719_v17 = vmul.f32 %v8545_v31, %v4437_v43 }
 0x2d8   :  { %v6638_v40 = vpop.eup %6637  ;;  %v4482_v23 = vmul.f32 %v4450_v48, %v8324_v55  ;;  %v4732_v53 = vmul.f32 %v8568_v29, %v4450_v48  ;;  %6657 = vrcp.f32 %v4328_v37  ;;  %v4331_v14 = vadd.f32 1.0, %v6636_v44 }
 0x2d9   :  { %v6640_v20 = vpop.eup %6639  ;;  %v4317_v3 = vadd.f32 1.0, %v6638_v40  ;;  %6659 = vrcp.f32 %v4310_v32  ;;  %v4554_v11 = vsel %vm4496_vm2, %v4483_v26, 0.0  ;;  %v4803_v6 = vsel %vm4496_vm2, %v4733_v46, 0.0 }
 0x2da   :  { %v6642_v22 = vpop.eup %6641  ;;  %v4552_v47 = vsel %vm4496_vm2, %v4482_v23, 0.0  ;;  %v4801_v28 = vsel %vm4496_vm2, %v4732_v53, 0.0  ;;  %v4330_v33 = vadd.f32 1.0, %v6640_v20  ;;  %6661 = vrcp.f32 %v4331_v14 }
 0x2db   :  { %v6644_v50 = vpop.eup %6643  ;;  %v4553_v9 = vadd.f32 %v4552_v47, %v4551_v57  ;;  %v4802_v34 = vadd.f32 %v4801_v28, %v4800_v51  ;;  %6663 = vrcp.f32 %v4317_v3  ;;  %v4316_v43 = vadd.f32 1.0, %v6642_v22  ;;  %v4029_v57 = vpop.f32.mrf.mxu1 }
 0x2dc   :  { %v4436_v52 = vmul.f32 %v6644_v50, %v8511_v13  ;;  %v8693_v4 = vpop.eup %6645  ;;  %v4508_v51 = vrot.slane %v4507_v30, 1  ;;  %v4511_v13 = vsel %vm4496_vm2, %v4469_v38, 0.0  ;;  %v4760_v40 = vsel %vm4496_vm2, %v4719_v17, 0.0 }
 0x2dd   :  { %v4555_v25 = vadd.f32 %v4554_v11, %v4553_v9  ;;  %v8695_v44 = vadd.f32 %v4803_v6, %v4802_v34  ;;  %6665 = vrcp.f32 %v4330_v33  ;;  %v6648_v26 = vpop.eup %6647  ;;  %v4030_v22 = vadd.f32 %v4029_v57, %v8292_v49 }
 0x2de   :  { %v4468_v48 = vmul.f32 %v4436_v52, %v8319_v27  ;;  %v4718_v19 = vmul.f32 %v8550_v42, %v4436_v52  ;;  %6667 = vrcp.f32 %v4316_v43  ;;  %v4319_v53 = vadd.f32 1.0, %v6648_v26  ;;  %v9077_v26 = vld [vmem:[#allocation20_spill] sm:$0xff] }
 0x2df   :  { %v4556_v37 = vrot.slane %v4555_v25, 4  ;;  %6669 = vtanh.f32 %v3525_v8  ;;  %v5224_v38 = vmul.f32 -1.442695, %v4025_v24  ;;  %v5223_v17 = vmul.f32 -1.442695, %v4020_v16 }
 0x2e0   :  { %v4510_v32 = vsel %vm4496_vm2, %v4468_v48, 0.0  ;;  %v4759_v20 = vsel %vm4496_vm2, %v4718_v19, 0.0  ;;  %v8708_v3 = vpop.eup %6649  ;;  %6671 = vrcp.f32 %v4319_v53  ;;  %v8710_v47 = vadd.f32 %v4508_v51, %v4507_v30  ;;  %v9076_v51 = vld [vmem:[#allocation18_spill] sm:$0xff] }
 0x2e1   :  { %v8703_v46 = vadd.f32 %v4511_v13, %v4510_v32  ;;  %v8705_v23 = vadd.f32 %v4760_v40, %v4759_v20  ;;  %v4557_v14 = vadd.f32 %v4556_v37, %v4555_v25  ;;  %6673 = vpow2.f32 %v8664_v63  ;;  %v9078_v32 = vld [vmem:[#allocation21_spill] sm:$0xff] }
 0x2e2   :  { %v6652_v50 = vpop.eup %6651  ;;  %v5226_v33 = vmul.f32 -1.442695, %v4035_v61  ;;  %6675 = vpow2.f32 %v8675_v58  ;;  %v5225_v52 = vmul.f32 -1.442695, %v4030_v22  ;;  %v8717_v24 = vmul.f32 %v8560_v36, %v8429_v10 }
 0x2e3   :  { %v4558_v28 = vrot.slane %v4557_v14, 2  ;;  %v6654_v9 = vpop.eup %6653  ;;  %v4457_v34 = vmul.f32 %v6652_v50, %v8514_v59  ;;  %v8721_v16 = vmul.f32 %v8587_v2, %v8439_v21  ;;  %6677 = vpow2.f32 %v5224_v38 }
 0x2e4   :  { %v6656_v8 = vpop.eup %6655  ;;  %6679 = vpow2.f32 %v5223_v17  ;;  %v8728_v6 = vsel %vm4496_vm2, %v8710_v47, -inf  ;;  %v4530_v2 = vrot.slane %v8660_v35, 4 }
 0x2e5   :  { %v4559_v30 = vadd.f32 %v4558_v28, %v4557_v14  ;;  %v6658_v11 = vpop.eup %6657  ;;  %v4489_v63 = vmul.f32 %v4457_v34, %v8317_v0  ;;  %v4739_v61 = vmul.f32 %v8545_v31, %v4457_v34  ;;  %v4439_v59 = vmul.f32 %v6656_v8, %v8525_v54  ;;  %v9079_v8 = vld [vmem:[#allocation13_spill] sm:$0xff] }
 0x2e6   :  { %v6660_v58 = vpop.eup %6659  ;;  %v4456_v36 = vmul.f32 %v6658_v11, %v8529_v18  ;;  %6681 = vpow2.f32 %v5226_v33 }
 0x2e7   :  { %v4560_v10 = vrot.slane %v4559_v30, 1  ;;  %v6662_v21 = vpop.eup %6661  ;;  %v4576_v43 = vsel %vm4496_vm2, %v4489_v63, 0.0  ;;  %v4471_v25 = vmul.f32 %v4439_v59, %v8322_v5  ;;  %6683 = vpow2.f32 %v5225_v52 }
 0x2e8   :  { %v6664_v48 = vpop.eup %6663  ;;  %v4488_v19 = vmul.f32 %v4456_v36, %v8319_v27  ;;  %v4738_v57 = vmul.f32 %v8550_v42, %v4456_v36  ;;  %v4438_v13 = vmul.f32 %v6660_v58, %v9076_v51  ;;  %v4825_v18 = vsel %vm4496_vm2, %v4739_v61, 0.0 }
 0x2e9   :  { %v8734_v54 = vadd.f32 %v4560_v10, %v4559_v30  ;;  %v4721_v40 = vmul.f32 %v8562_v15, %v4439_v59  ;;  %v8742_v37 = vmul.f32 %v6662_v21, %v9077_v26  ;;  %v4445_v20 = vmul.f32 %v6664_v48, %v9078_v32  ;;  %v9080_v21 = vld [vmem:[#allocation23_spill] sm:$0xff] }
 0x2ea   :  { %v6666_v53 = vpop.eup %6665  ;;  %v4575_v14 = vsel %vm4496_vm2, %v4488_v19, 0.0  ;;  %v4824_v38 = vsel %vm4496_vm2, %v4738_v57, 0.0  ;;  %v4470_v17 = vmul.f32 %v4438_v13, %v8324_v55  ;;  %v4720_v52 = vmul.f32 %v8568_v29, %v4438_v13 }
 0x2eb   :  { %v8747_v22 = vsel %vm4496_vm2, %v8734_v54, -inf  ;;  %v6668_v50 = vpop.eup %6667  ;;  %v4577_v33 = vadd.f32 %v4576_v43, %v4575_v14  ;;  %v8754_v34 = vadd.f32 %v4825_v18, %v4824_v38  ;;  %v3524_v30 = vmul.f32 %v8649_v1, %v9079_v8  ;;  %v5837_v8 = vpop.f32.mrf.mxu1 }
 0x2ec   :  { %v4606_v28 = vmax.f32 %v8728_v6, %v8747_v22  ;;  %v4513_v11 = vsel %vm4496_vm2, %v4470_v17, 0.0  ;;  %v4477_v63 = vmul.f32 %v4445_v20, %v8317_v0  ;;  %v4333_v61 = vadd.f32 1.0, %v6654_v9  ;;  %v8761_v59 = vpop.eup %6669 }
 0x2ed   :  { %v4531_v58 = vadd.f32 %v4530_v2, %v8660_v35  ;;  %v4514_v10 = vadd.f32 %v4513_v11, %v8703_v46  ;;  %v4762_v36 = vsel %vm4496_vm2, %v4720_v52, 0.0  ;;  %v4458_v43 = vmul.f32 %v6666_v53, %v9080_v21  ;;  %v6672_v48 = vpop.eup %6671 }
 0x2ee   :  { %v4515_v19 = vsel %vm4496_vm2, %v4471_v25, 0.0  ;;  %v4763_v1 = vadd.f32 %v4762_v36, %v8705_v23  ;;  %v4727_v57 = vmul.f32 %v8545_v31, %v4445_v20  ;;  %v4444_v51 = vmul.f32 %v6668_v50, %v8591_v12  ;;  %v6674_v9 = vpop.eup %6673 }
 0x2ef   :  { %v4764_v13 = vsel %vm4496_vm2, %v4721_v40, 0.0  ;;  %v8772_v18 = vadd.f32 %v4515_v19, %v4514_v10  ;;  %v4491_v35 = vmul.f32 %v8742_v37, %v8322_v5  ;;  %v4490_v46 = vmul.f32 %v4458_v43, %v8324_v55  ;;  %v6676_v2 = vpop.eup %6675 }
 0x2f0   :  { %v8777_v26 = vadd.f32 %v4764_v13, %v4763_v1  ;;  %v4476_v25 = vmul.f32 %v4444_v51, %v8319_v27  ;;  %v4726_v23 = vmul.f32 %v8550_v42, %v4444_v51  ;;  %6685 = vrcp.f32 %v4333_v61  ;;  %v6678_v32 = vpop.eup %6677 }
 0x2f1   :  { %v4532_v12 = vrot.slane %v4531_v58, 2  ;;  %v4537_v20 = vsel %vm4496_vm2, %v4477_v63, 0.0  ;;  %v4578_v40 = vsel %vm4496_vm2, %v4490_v46, 0.0  ;;  %v8784_v53 = vmul.f32 %v6672_v48, %v8606_v41  ;;  %v6680_v14 = vpop.eup %6679 }
 0x2f2   :  { %v4786_v38 = vsel %vm4496_vm2, %v4727_v57, 0.0  ;;  %v4579_v17 = vadd.f32 %v4578_v40, %v4577_v33  ;;  %v4536_v50 = vsel %vm4496_vm2, %v4476_v25, 0.0  ;;  %v4785_v52 = vsel %vm4496_vm2, %v4726_v23, 0.0  ;;  %v4199_v57 = vpop.f32.mrf.mxu1 }
 0x2f3   :  { %v6682_v11 = vpop.eup %6681  ;;  %v4580_v61 = vsel %vm4496_vm2, %v4491_v35, 0.0  ;;  %v4740_v10 = vmul.f32 %v8568_v29, %v4458_v43  ;;  %v8791_v63 = vadd.f32 %v4537_v20, %v4536_v50  ;;  %v8793_v36 = vadd.f32 %v4786_v38, %v4785_v52  ;;  %v9081_v52 = vld [vmem:[#allocation15_spill] sm:$0xff] }
 0x2f4   :  { %v6684_v41 = vpop.eup %6683  ;;  %6687 = vtanh.f32 %v8717_v24  ;;  %v4581_v21 = vadd.f32 %v4580_v61, %v4579_v17  ;;  %v8798_v33 = vmul.f32 %v8784_v53, %v8322_v5  ;;  %v4332_v48 = vadd.f32 1.0, %v6674_v9 }
 0x2f5   :  { %6689 = vtanh.f32 %v8721_v16  ;;  %v4533_v19 = vadd.f32 %v4532_v12, %v4531_v58  ;;  %v4205_v43 = vadd.f32 %v5837_v8, %v8302_v56  ;;  %v4741_v51 = vmul.f32 %v8562_v15, %v8742_v37 }
 0x2f6   :  { %6691 = vtanh.f32 %v3524_v30  ;;  %v4582_v1 = vrot.slane %v4581_v21, 4  ;;  %v4827_v13 = vsel %vm4496_vm2, %v4740_v10, 0.0  ;;  %v4318_v24 = vadd.f32 1.0, %v6676_v2 }
 0x2f7   :  { %6693 = vrcp.f32 %v4332_v48  ;;  %v4325_v46 = vadd.f32 1.0, %v6678_v32  ;;  %v4324_v25 = vadd.f32 1.0, %v6680_v14  ;;  %v4327_v23 = vadd.f32 1.0, %v6682_v11 }
 0x2f8   :  { %v4583_v35 = vadd.f32 %v4582_v1, %v4581_v21  ;;  %6695 = vrcp.f32 %v4318_v24  ;;  %v4326_v16 = vadd.f32 1.0, %v6684_v41  ;;  %v4200_v58 = vadd.f32 %v4199_v57, %v8292_v49  ;;  %v9082_v41 = vld [vmem:[#allocation17_spill] sm:$0xff] }
 0x2f9   :  { %v4534_v30 = vrot.slane %v4533_v19, 1  ;;  %6697 = vrcp.f32 %v4325_v46  ;;  %v4828_v56 = vadd.f32 %v4827_v13, %v8754_v34  ;;  %v5234_v37 = vmul.f32 -1.442695, %v4205_v43 }
 0x2fa   :  { %v4584_v9 = vrot.slane %v4583_v35, 2  ;;  %6699 = vrcp.f32 %v4324_v25  ;;  %v4829_v20 = vsel %vm4496_vm2, %v4741_v51, 0.0  ;;  %v5233_v32 = vmul.f32 -1.442695, %v4200_v58 }
 0x2fb   :  { %6701 = vrcp.f32 %v4327_v23  ;;  %v8808_v40 = vadd.f32 %v4829_v20, %v4828_v56  ;;  %v8810_v14 = vadd.f32 %v4534_v30, %v4533_v19  ;;  %v3527_v8 = vmul.f32 %v8693_v4, %v9081_v52 }
 0x2fc   :  { %v4585_v12 = vadd.f32 %v4584_v9, %v4583_v35  ;;  %6703 = vrcp.f32 %v4326_v16  ;;  %v4517_v19 = vrot.slane %v8772_v18, 4  ;;  %v4729_v16 = vmul.f32 %v8562_v15, %v8784_v53 }
 0x2fd   :  { %v6686_v2 = vpop.eup %6685  ;;  %6705 = vpow2.f32 %v5234_v37  ;;  %v8819_v11 = vsel %vm4496_vm2, %v8810_v14, -inf }
 0x2fe   :  { %v4586_v38 = vrot.slane %v4585_v12, 1  ;;  %v4461_v49 = vmul.f32 %v6686_v2, %v8761_v59  ;;  %6707 = vpow2.f32 %v5233_v32  ;;  %v3526_v59 = vmul.f32 %v8708_v3, %v9082_v41 }
 0x2ff   :  { %6709 = vtanh.f32 %v3527_v8  ;;  %v4518_v3 = vadd.f32 %v4517_v19, %v8772_v18  ;;  %v4541_v32 = vsel %vm4496_vm2, %v8798_v33, 0.0 }
 0x300   :  { %v8813_v17 = vadd.f32 %v4586_v38, %v4585_v12  ;;  %v4493_v4 = vmul.f32 %v4461_v49, %v8317_v0  ;;  %6711 = vtanh.f32 %v3526_v59  ;;  %v4743_v46 = vmul.f32 %v8545_v31, %v4461_v49 }
 0x301   :  { %v6688_v50 = vpop.eup %6687 }
 0x302   :  { %v6690_v34 = vpop.eup %6689  ;;  %v8823_v61 = vsel %vm4496_vm2, %v8813_v17, -inf  ;;  %v4589_v35 = vsel %vm4496_vm2, %v4493_v4, 0.0 }
 0x303   :  { %v6692_v10 = vpop.eup %6691  ;;  %v4610_v21 = vmax.f32 %v8819_v11, %v8823_v61 }
 0x304   :  { %v6694_v48 = vpop.eup %6693 }
 0x305   :  { %v4460_v1 = vmul.f32 %v6694_v48, %v6692_v10  ;;  %v6696_v43 = vpop.eup %6695 }
 0x306   :  { %v6698_v57 = vpop.eup %6697  ;;  %v4446_v13 = vmul.f32 %v6696_v43, %v8613_v39 }
 0x307   :  { %v4492_v51 = vmul.f32 %v4460_v1, %v8319_v27  ;;  %v6700_v24 = vpop.eup %6699  ;;  %v4453_v25 = vmul.f32 %v6698_v57, %v8627_v62  ;;  %v4742_v38 = vmul.f32 %v8550_v42, %v4460_v1 }
 0x308   :  { %v6702_v23 = vpop.eup %6701  ;;  %v4478_v30 = vmul.f32 %v4446_v13, %v8324_v55  ;;  %v4728_v9 = vmul.f32 %v8568_v29, %v4446_v13  ;;  %v4452_v37 = vmul.f32 %v6700_v24, %v8631_v60  ;;  %v4519_v24 = vrot.slane %v4518_v3, 2 }
 0x309   :  { %v4588_v58 = vsel %vm4496_vm2, %v4492_v51, 0.0  ;;  %v6704_v39 = vpop.eup %6703  ;;  %v4485_v18 = vmul.f32 %v4453_v25, %v8317_v0  ;;  %v4735_v12 = vmul.f32 %v8545_v31, %v4453_v25  ;;  %v4455_v53 = vmul.f32 %v6702_v23, %v6688_v50 }
 0x30a   :  { %v8842_v56 = vadd.f32 %v4589_v35, %v4588_v58  ;;  %v4539_v62 = vsel %vm4496_vm2, %v4478_v30, 0.0  ;;  %v4788_v20 = vsel %vm4496_vm2, %v4728_v9, 0.0  ;;  %v4454_v2 = vmul.f32 %v6704_v39, %v6690_v34  ;;  %v6706_v0 = vpop.eup %6705 }
 0x30b   :  { %v4540_v49 = vadd.f32 %v4539_v62, %v8791_v63  ;;  %v4789_v52 = vadd.f32 %v4788_v20, %v8793_v36  ;;  %v4790_v31 = vsel %vm4496_vm2, %v4729_v16, 0.0  ;;  %v4563_v60 = vsel %vm4496_vm2, %v4485_v18, 0.0  ;;  %v6708_v50 = vpop.eup %6707 }
 0x30c   :  { %v4484_v8 = vmul.f32 %v4452_v37, %v8319_v27  ;;  %v4734_v10 = vmul.f32 %v8550_v42, %v4452_v37  ;;  %v4486_v33 = vmul.f32 %v4454_v2, %v8324_v55  ;;  %v4736_v59 = vmul.f32 %v8568_v29, %v4454_v2  ;;  %v6710_v16 = vpop.eup %6709 }
 0x30d   :  { %v4542_v34 = vadd.f32 %v4541_v32, %v4540_v49  ;;  %v8858_v41 = vadd.f32 %v4790_v31, %v4789_v52  ;;  %v4812_v63 = vsel %vm4496_vm2, %v4735_v12, 0.0  ;;  %v4487_v19 = vmul.f32 %v4455_v53, %v8322_v5  ;;  %v6712_v9 = vpop.eup %6711 }
 0x30e   :  { %v4562_v36 = vsel %vm4496_vm2, %v4484_v8, 0.0  ;;  %v4811_v48 = vsel %vm4496_vm2, %v4734_v10, 0.0  ;;  %v4837_v27 = vsel %vm4496_vm2, %v4742_v38, 0.0  ;;  %v4737_v1 = vmul.f32 %v8562_v15, %v4455_v53 }
 0x30f   :  { %v4564_v4 = vadd.f32 %v4563_v60, %v4562_v36  ;;  %v4813_v42 = vadd.f32 %v4812_v63, %v4811_v48  ;;  %v4565_v43 = vsel %vm4496_vm2, %v4486_v33, 0.0  ;;  %v4814_v57 = vsel %vm4496_vm2, %v4736_v59, 0.0 }
 0x310   :  { %v4335_v51 = vadd.f32 1.0, %v6706_v0  ;;  %v4334_v13 = vadd.f32 1.0, %v6708_v50  ;;  %v4838_v35 = vsel %vm4496_vm2, %v4743_v46, 0.0  ;;  %v4567_v58 = vsel %vm4496_vm2, %v4487_v19, 0.0 }
 0x311   :  { %v4566_v25 = vadd.f32 %v4565_v43, %v4564_v4  ;;  %v4815_v23 = vadd.f32 %v4814_v57, %v4813_v42  ;;  %v4839_v30 = vadd.f32 %v4838_v35, %v4837_v27  ;;  %v4816_v39 = vsel %vm4496_vm2, %v4737_v1, 0.0 }
 0x312   :  { %6713 = vrcp.f32 %v4335_v51  ;;  %v4520_v37 = vadd.f32 %v4519_v24, %v4518_v3  ;;  %v4543_v49 = vrot.slane %v4542_v34, 4 }
 0x313   :  { %v4568_v18 = vadd.f32 %v4567_v58, %v4566_v25  ;;  %6715 = vrcp.f32 %v4334_v13  ;;  %v8873_v12 = vadd.f32 %v4816_v39, %v4815_v23 }
 0x314   :  { %v4521_v53 = vrot.slane %v4520_v37, 1  ;;  %v4544_v33 = vadd.f32 %v4543_v49, %v4542_v34 }
 0x315   :  { %v4569_v62 = vrot.slane %v4568_v18, 4 }
 0x316   :  { %v4522_v32 = vadd.f32 %v4521_v53, %v4520_v37  ;;  %v4545_v42 = vrot.slane %v4544_v33, 2 }
 0x317   :  { %v4570_v20 = vadd.f32 %v4569_v62, %v4568_v18 }
 0x318   :  { %v4602_v8 = vsel %vm4496_vm2, %v4522_v32, -inf }
 0x319   :  { %v4571_v2 = vrot.slane %v4570_v20, 2 }
 0x31b   :  { %v4572_v46 = vadd.f32 %v4571_v2, %v4570_v20 }
 0x31d   :  { %v4573_v38 = vrot.slane %v4572_v46, 1 }
 0x31f   :  { %v6714_v52 = vpop.eup %6713  ;;  %v4574_v0 = vadd.f32 %v4573_v38, %v4572_v46 }
 0x320   :  { %v6716_v31 = vpop.eup %6715  ;;  %v4463_v60 = vmul.f32 %v6714_v52, %v6710_v16 }
 0x321   :  { %v4462_v10 = vmul.f32 %v6716_v31, %v6712_v9  ;;  %v4607_v50 = vsel %vm4496_vm2, %v4574_v0, -inf }
 0x322   :  { %v4608_v59 = vmax.f32 %v4602_v8, %v4607_v50  ;;  %v4495_v3 = vmul.f32 %v4463_v60, %v8322_v5  ;;  %v4745_v63 = vmul.f32 %v8562_v15, %v4463_v60 }
 0x323   :  { %v4494_v36 = vmul.f32 %v4462_v10, %v8324_v55  ;;  %v4744_v48 = vmul.f32 %v8568_v29, %v4462_v10  ;;  %v4546_v29 = vadd.f32 %v4545_v42, %v4544_v33 }
 0x324   :  { %v4613_v19 = vmax.f32 %v4606_v28, %v4608_v59  ;;  %v4593_v5 = vsel %vm4496_vm2, %v4495_v3, 0.0  ;;  %v4842_v15 = vsel %vm4496_vm2, %v4745_v63, 0.0 }
 0x325   :  { %v4591_v27 = vsel %vm4496_vm2, %v4494_v36, 0.0  ;;  %v4840_v4 = vsel %vm4496_vm2, %v4744_v48, 0.0  ;;  %v4547_v6 = vrot.slane %v4546_v29, 1 }
 0x326   :  { %v4592_v34 = vadd.f32 %v4591_v27, %v8842_v56  ;;  %v4841_v1 = vadd.f32 %v4840_v4, %v4839_v30 }
 0x327   :  { %v4548_v13 = vadd.f32 %v4547_v6, %v4546_v29  ;;  %v4779_v29 = vrot.slane %v8662_v7, 4  ;;  %v4805_v6 = vrot.slane %v8695_v44, 4 }
 0x328   :  { %v4594_v43 = vadd.f32 %v4593_v5, %v4592_v34  ;;  %v8889_v55 = vadd.f32 %v4842_v15, %v4841_v1 }
 0x329   :  { %v4604_v25 = vsel %vm4496_vm2, %v4548_v13, -inf }
 0x32a   :  { %v4595_v57 = vrot.slane %v4594_v43, 4 }
 0x32c   :  { %v4596_v51 = vadd.f32 %v4595_v57, %v4594_v43  ;;  %v4766_v57 = vrot.slane %v8777_v26, 4 }
 0x32e   :  { %v4597_v22 = vrot.slane %v4596_v51, 2 }
 0x330   :  { %v4598_v28 = vadd.f32 %v4597_v22, %v4596_v51  ;;  %v4792_v22 = vrot.slane %v8858_v41, 4 }
 0x332   :  { %v4599_v24 = vrot.slane %v4598_v28, 1 }
 0x334   :  { %v4600_v35 = vadd.f32 %v4599_v24, %v4598_v28  ;;  %v4818_v28 = vrot.slane %v8873_v12, 4  ;;  %v4844_v24 = vrot.slane %v8889_v55, 4 }
 0x336   :  { %v4611_v56 = vsel %vm4496_vm2, %v4600_v35, -inf }
 0x337   :  { %v4612_v23 = vmax.f32 %v4604_v25, %v4611_v56  ;;  %v4753_v25 = vrot.slane %v8595_v45, 4  ;;  %v4780_v56 = vadd.f32 %v4779_v29, %v8662_v7 }
 0x339   :  { %v4614_v16 = vmax.f32 %v4610_v21, %v4612_v23  ;;  %v4767_v23 = vadd.f32 %v4766_v57, %v8777_v26  ;;  %v4781_v7 = vrot.slane %v4780_v56, 2 }
 0x33b   :  { %v4615_v58 = vmax.f32 %v4613_v19, %v4614_v16 }
 0x33d   :  { %v4616_v30 = vsub.f32 %v8710_v47, %v4615_v58  ;;  %v4617_v9 = vsub.f32 %v4522_v32, %v4615_v58  ;;  %v4618_v39 = vsub.f32 %v8810_v14, %v4615_v58  ;;  %v4619_v18 = vsub.f32 %v4548_v13, %v4615_v58 }
 0x33e   :  { %v4620_v37 = vsub.f32 %v8734_v54, %v4615_v58  ;;  %v4621_v62 = vsub.f32 %v4574_v0, %v4615_v58  ;;  %v4622_v20 = vsub.f32 %v8813_v17, %v4615_v58  ;;  %v4623_v53 = vsub.f32 %v4600_v35, %v4615_v58 }
 0x33f   :  { %v4624_v2 = vmul.f32 1.442695, %v4616_v30  ;;  %v4626_v46 = vmul.f32 1.442695, %v4617_v9  ;;  %v4628_v38 = vmul.f32 1.442695, %v4618_v39  ;;  %v4806_v58 = vadd.f32 %v4805_v6, %v8695_v44 }
 0x340   :  { %v4630_v49 = vmul.f32 1.442695, %v4619_v18  ;;  %v4632_v11 = vmul.f32 1.442695, %v4620_v37  ;;  %v4634_v61 = vmul.f32 1.442695, %v4621_v62  ;;  %v4793_v30 = vadd.f32 %v4792_v22, %v8858_v41 }
 0x341   :  { %6717 = vpow2.f32 %v4624_v2  ;;  %v4636_v47 = vmul.f32 1.442695, %v4622_v20  ;;  %v4638_v21 = vmul.f32 1.442695, %v4623_v53  ;;  %v4831_v13 = vrot.slane %v8808_v40, 4  ;;  %v9083_v37 = vld [vmem:[#allocation9_spill] sm:$0xff] }
 0x342   :  { %6719 = vpow2.f32 %v4626_v46  ;;  %v4819_v9 = vadd.f32 %v4818_v28, %v8873_v12  ;;  %v4845_v18 = vadd.f32 %v4844_v24, %v8889_v55  ;;  %v4754_v20 = vadd.f32 %v4753_v25, %v8595_v45 }
 0x343   :  { %6721 = vpow2.f32 %v4628_v38  ;;  %v4832_v39 = vadd.f32 %v4831_v13, %v8808_v40  ;;  %v4768_v53 = vrot.slane %v4767_v23, 2  ;;  %v4807_v2 = vrot.slane %v4806_v58, 2 }
 0x344   :  { %6723 = vpow2.f32 %v4630_v49  ;;  %v4794_v26 = vrot.slane %v4793_v30, 2  ;;  %v4820_v46 = vrot.slane %v4819_v9, 2  ;;  %v4846_v44 = vrot.slane %v4845_v18, 2 }
 0x345   :  { %6725 = vpow2.f32 %v4632_v11  ;;  %v4833_v38 = vrot.slane %v4832_v39, 2  ;;  %v4755_v49 = vrot.slane %v4754_v20, 2  ;;  %v4769_v41 = vadd.f32 %v4768_v53, %v4767_v23 }
 0x346   :  { %6727 = vpow2.f32 %v4634_v61  ;;  %v4782_v11 = vadd.f32 %v4781_v7, %v4780_v56  ;;  %v4808_v12 = vadd.f32 %v4807_v2, %v4806_v58  ;;  %v4795_v61 = vadd.f32 %v4794_v26, %v4793_v30 }
 0x347   :  { %6729 = vpow2.f32 %v4636_v47  ;;  %v4821_v40 = vadd.f32 %v4820_v46, %v4819_v9  ;;  %v4834_v47 = vadd.f32 %v4833_v38, %v4832_v39  ;;  %v4847_v55 = vadd.f32 %v4846_v44, %v4845_v18 }
 0x348   :  { %6731 = vpow2.f32 %v4638_v21  ;;  %v4756_v21 = vadd.f32 %v4755_v49, %v4754_v20  ;;  %v4809_v45 = vrot.slane %v4808_v12, 1  ;;  %v9084_v23 = vlaneseq }
 0x34e   :  { %v8900_v54 = vpop.eup %6717 }
 0x34f   :  { %v8902_v14 = vpop.eup %6719 }
 0x350   :  { %v8904_v17 = vpop.eup %6721  ;;  %v4648_v32 = vrot.slane %v8902_v14, 7 }
 0x351   :  { %v8907_v52 = vpop.eup %6723  ;;  %v4651_v0 = vrot.slane %v8904_v17, 6 }
 0x352   :  { %v8910_v31 = vpop.eup %6725  ;;  %v4650_v60 = vsel %vm4649_vm3, %v4648_v32, %v8900_v54  ;;  %v4654_v8 = vrot.slane %v8907_v52, 5  ;;  %v4770_v32 = vrot.slane %v4769_v41, 1 }
 0x353   :  { %v8915_v10 = vpop.eup %6727  ;;  %v4653_v50 = vsel %vm4652_vm4, %v4651_v0, %v4650_v60  ;;  %v4657_v33 = vrot.slane %v8910_v31, 4  ;;  %v4783_v0 = vrot.slane %v4782_v11, 1  ;;  %v4796_v60 = vrot.slane %v4795_v61, 1 }
 0x354   :  { %v8919_v59 = vpop.eup %6729  ;;  %v4656_v3 = vsel %vm4655_vm5, %v4654_v8, %v4653_v50  ;;  %v4660_v63 = vrot.slane %v8915_v10, 3  ;;  %v4822_v8 = vrot.slane %v4821_v40, 1  ;;  %v4835_v50 = vrot.slane %v4834_v47, 1 }
 0x355   :  { %v8923_v36 = vpop.eup %6731  ;;  %v4659_v48 = vsel %vm4658_vm6, %v4657_v33, %v4656_v3  ;;  %v4663_v19 = vrot.slane %v8919_v59, 2  ;;  %v4848_v33 = vrot.slane %v4847_v55, 1  ;;  %v4757_v3 = vrot.slane %v4756_v21, 1 }
 0x356   :  { %v4662_v27 = vsel %vm4661_vm7, %v4660_v63, %v4659_v48  ;;  %v4666_v4 = vrot.slane %v8923_v36, 1  ;;  %v4771_v63 = vadd.f32 %v4770_v32, %v4769_v41  ;;  %v4784_v48 = vadd.f32 %v4783_v0, %v4782_v11 }
 0x357   :  { %v4665_v42 = vsel %vm4664_vm8, %v4663_v19, %v4662_v27  ;;  %v4810_v19 = vadd.f32 %v4809_v45, %v4808_v12 }
 0x358   :  { %v4668_v34 = vsel %vm4667_vm9, %v4666_v4, %v4665_v42  ;;  %v4797_v4 = vadd.f32 %v4796_v60, %v4795_v61  ;;  %v4823_v42 = vadd.f32 %v4822_v8, %v4821_v40 }
 0x359   :  { %v4670_v1 = vsel %vm4496_vm2, %v4668_v34, 0.0  ;;  %v4836_v34 = vadd.f32 %v4835_v50, %v4834_v47 }
 0x35a   :  { %v4671_v5 = vrot.slane %v4670_v1, 4 }
 0x35c   :  { %v4672_v15 = vadd.f32 %v4671_v5, %v4670_v1  ;;  %v4849_v1 = vadd.f32 %v4848_v33, %v4847_v55 }
 0x35e   :  { %v4673_v43 = vrot.slane %v4672_v15, 2 }
 0x360   :  { %v4674_v51 = vadd.f32 %v4673_v43, %v4672_v15 }
 0x362   :  { %v4675_v35 = vrot.slane %v4674_v51, 1 }
 0x364   :  { %v4676_v16 = vadd.f32 %v4675_v35, %v4674_v51 }
 0x366   :  { %v4680_v62 = vrot.slane %v4676_v16, %v9083_v37  ;;  %v4758_v16 = vadd.f32 %v4757_v3, %v4756_v21  ;;  %v4892_v3 = vpop.permute.xlu1 %4891 }
 0x368   :  { %6733 = vrcp.f32 %v4680_v62 }
 0x375   :  { %v6734_v27 = vpop.eup %6733 }
 0x376   :  { %v4682_v5 = vmul.f32 %v6734_v27, %v8900_v54  ;;  %v4683_v15 = vmul.f32 %v6734_v27, %v8902_v14  ;;  %v4684_v43 = vmul.f32 %v6734_v27, %v8904_v17  ;;  %v4685_v29 = vmul.f32 %v6734_v27, %v8907_v52 }
 0x377   :  { %v4686_v57 = vmul.f32 %v6734_v27, %v8910_v31  ;;  %v4687_v51 = vmul.f32 %v6734_v27, %v8915_v10  ;;  %v4688_v6 = vmul.f32 %v6734_v27, %v8919_v59  ;;  %v4689_v22 = vmul.f32 %v6734_v27, %v8923_v36 }
 0x378   :  { %v4851_v28 = vmul.f32 %v4771_v63, %v4683_v15  ;;  %v4852_v13 = vmul.f32 %v4784_v48, %v4684_v43  ;;  %v4853_v24 = vmul.f32 %v4797_v4, %v4685_v29  ;;  %v4909_v35 = vrot.slane %v4683_v15, 7 }
 0x379   :  { %v4854_v25 = vmul.f32 %v4810_v19, %v4686_v57  ;;  %v4855_v54 = vmul.f32 %v4823_v42, %v4687_v51  ;;  %v4856_v56 = vmul.f32 %v4836_v34, %v4688_v6  ;;  %v4857_v14 = vmul.f32 %v4849_v1, %v4689_v22 }
 0x37a   :  { %v4910_v17 = vsel %vm4649_vm3, %v4909_v35, %v4682_v5  ;;  %v4927_v52 = vand.u32 127, %v9084_v23  ;;  %v4866_v31 = vrot.slane %v4851_v28, 7  ;;  %v4868_v58 = vrot.slane %v4852_v13, 6 }
 0x37b   :  { %v4911_v10 = vrot.slane %v4684_v43, 6  ;;  %v4913_v30 = vrot.slane %v4685_v29, 5  ;;  %v4850_v59 = vmul.f32 %v4758_v16, %v4682_v5  ;;  %v4915_v9 = vrot.slane %v4686_v57, 4 }
 0x37c   :  { %vm4930_vm10 = vcmp.lt.s32.totalorder %v4927_v52, 16  ;;  %v4870_v39 = vrot.slane %v4853_v24, 5  ;;  %v4917_v62 = vrot.slane %v4687_v51, 3  ;;  %v4872_v53 = vrot.slane %v4854_v25, 4 }
 0x37d   :  { %v4912_v36 = vsel %vm4652_vm4, %v4911_v10, %v4910_v17  ;;  %v4867_v20 = vsel %vm4649_vm3, %v4866_v31, %v4850_v59  ;;  %v4919_v2 = vrot.slane %v4688_v6, 2  ;;  %v4874_v46 = vrot.slane %v4855_v54, 3 }
 0x37e   :  { %v4914_v18 = vsel %vm4655_vm5, %v4913_v30, %v4912_v36  ;;  %v4869_v26 = vsel %vm4652_vm4, %v4868_v58, %v4867_v20  ;;  %v4921_v44 = vrot.slane %v4689_v22, 1  ;;  %v4876_v41 = vrot.slane %v4856_v56, 2 }
 0x37f   :  { %v4916_v7 = vsel %vm4658_vm6, %v4915_v9, %v4914_v18  ;;  %v4871_v49 = vsel %vm4655_vm5, %v4870_v39, %v4869_v26  ;;  %v4878_v61 = vrot.slane %v4857_v14, 1  ;;  %v4897_v48 = vrot.slane %v4892_v3, %v9083_v37 }
 0x380   :  { %v4918_v38 = vsel %vm4661_vm7, %v4917_v62, %v4916_v7  ;;  %v4873_v12 = vsel %vm4658_vm6, %v4872_v53, %v4871_v49 }
 0x381   :  { %v4920_v11 = vsel %vm4664_vm8, %v4919_v2, %v4918_v38  ;;  %v4875_v47 = vsel %vm4661_vm7, %v4874_v46, %v4873_v12 }
 0x382   :  { %v4922_v40 = vsel %vm4667_vm9, %v4921_v44, %v4920_v11  ;;  %v4877_v21 = vsel %vm4664_vm8, %v4876_v41, %v4875_v47 }
 0x383   :  { %v4931_v55 = vsel %vm4930_vm10, %v4922_v40, 0.0  ;;  %4924 = vst.msk [vmem:[#allocation5] sm:$0xff] %vm4496_vm2, %v4922_v40  ;;  %v4879_v0 = vsel %vm4667_vm9, %v4878_v61, %v4877_v21 }
 0x384   :  { %v4932_v32 = vsel %vm4496_vm2, %v4931_v55, 0.0  ;;  %v4881_v45 = vsel %vm4496_vm2, %v4879_v0, 0.0 }
 0x385   :  { %4933 = vadd.xlane.f32.xlu0 %v4932_v32  ;;  %v4882_v60 = vrot.slane %v4881_v45, 4 }
 0x387   :  { %v4883_v8 = vadd.f32 %v4882_v60, %v4881_v45 }
 0x389   :  { %v4884_v50 = vrot.slane %v4883_v8, 2 }
 0x38b   :  { %v4885_v33 = vadd.f32 %v4884_v50, %v4883_v8 }
 0x38d   :  { %v4886_v63 = vrot.slane %v4885_v33, 1 }
 0x38f   :  { %v4887_v19 = vadd.f32 %v4886_v63, %v4885_v33 }
 0x391   :  { %v4898_v27 = vadd.f32 %v4897_v48, %v4887_v19 }
 0x392   :  { %6755 = shalt.err (!%p6752_p4)
}
 0x393   :  { %4956 = dma.vmem_to_hbm [thread:$0]  %s4954_s0, 128, %s8995_s9, [#allocation6]   ;;  %4900 = vst.msk [vmem:[#allocation3] sm:$0x1] %vm4899_vm11, %v4898_v27 }
 0x394   :  { %s6764_s5 = scalar_lea.vmem %s4944_s21, 16  ;;  %s6768_s23 = scalar_lea.vmem %s4944_s21, 32 }
 0x395   :  { %p6765_p5 = scmp.ne.s32.totalorder %s4944_s21, %s6764_s5  ;;  %p6769_p6 = scmp.lt.s32.totalorder %s4944_s21, %s4944_s21 }
 0x396   :  { %p6770_p7 = scmp.lt.s32.totalorder %s6768_s23, %s6764_s5 }
 0x398   :  { %p6771_p8 = por %p6770_p7, %p6769_p6 }
 0x39a   :  { %p6772_p9 = pnand %p6771_p8, %p6765_p5 }
 0x39c   :  { %6775 = shalt.err (!%p6772_p9)
}
 0x39d   :  { %4946 = dma.vmem_to_hbm [thread:$0]  %s4944_s21, 16, %s8994_s8, [#allocation4]   ;;  %vm4935_vm12 = vcmask 7168  }
 0x40e   :  { %v4934_v37 = vpop.xlane.xlu0 %4933 }
 0x40f   :  { %4936 = vst.msk [vmem:[%s8996_s10] sm:$0xff] %vm4935_vm12, %v4934_v37 }
 0x410   :  { %6784 = dma.done.wait [#allocation4], 16  }
 0x411   :  { %6785 = vsyncadd [#allocation4], 4294967280 }
 0x412   :  { %6786 = dma.done.wait [#allocation6], 128  }
 0x413   :  { %6787 = vsyncadd [#allocation6], 4294967168 }
 0x414   :  { %4967 = vsyncpa [#allocation4], 1 }
 0x415   :  { %4968 = vsyncpa [#allocation6], 1 }

// kernel: tpu_custom_call.1
= control target key start
LH: loop header
LB: loop body
LE: loop exit
PB: predicated region body
PF: predicated region fallthrough
CT: control target
= control target key end

     0   :  { %s8986_s0 = inlined_call_operand.vmem [shape: f32[8,16], index: 0, kind: input, shape index: {}]   ;;  %s8987_s1 = inlined_call_operand.vmem [shape: f32[96,8], index: 1, kind: input, shape index: {}]   ;;  %s8988_s2 = inlined_call_operand.vmem [shape: f32[3,8,32], index: 2, kind: input, shape index: {}]   ;;  %s8989_s3 = inlined_call_operand.vmem [shape: f32[96,1], index: 3, kind: input, shape index: {}]   ;;  %s8990_s4 = inlined_call_operand.vmem [shape: f32[1,96,32], index: 4, kind: input, shape index: {}]   ;;  %s8991_s5 = inlined_call_operand.vmem [shape: f32[1,96,1], index: 5, kind: input, shape index: {}]   ;;  %s8992_s6 = inlined_call_operand.vmem [shape: f32[32,1], index: 6, kind: input, shape index: {}]   ;;  %s8993_s7 = inlined_call_operand.<no memory space> [shape: f32[1,1], index: 7, kind: input, shape index: {}]   ;;  %s8994_s8 = inlined_call_operand.hbm [shape: f32[1,16], index: 8, kind: output, shape index: {0}]   ;;  %s8995_s9 = inlined_call_operand.hbm [shape: f32[8,16], index: 9, kind: output, shape index: {1}]   ;;  %s8996_s10 = inlined_call_operand.vmem [shape: f32[8,1], index: 10, kind: output, shape index: {2}]  }
   0x1   :  { %v16_v0 = vstv %s8993_s7 }
   0x2   :  { %17 = vst [vmem:[#allocation2] sm:$0x1] %v16_v0 }
   0x3   :  { %18 = vsyncpa [#allocation4], 0  ;;  %v36_v1 = vld [vmem:[%s8986_s0] sm:$0xff]  ;;  %v8997_v2 = vlaneseq  ;;  %v52_v3 = vld [vmem:[%s8989_s3 + $0x18] sm:$0xff]  ;;  %v6788_v5 = vmov 0   ;;  %vm121_vm0 = vcmask 64512  }
   0x4   :  { %v50_v4 = vld [vmem:[%s8989_s3 + $0x8] sm:$0xff]  ;;  %5851 = vset.pattern.permute.xlu1 %v6788_v5  ;;  %5850 = vset.pattern.permute.xlu0 %v6788_v5  ;;  %v6789_v6 = vmov 1966171168   ;;  %v37_v8 = vld [vmem:[%s8987_s1] sm:$0xff]  ;;  %v811_v11 = vcombine.high %v36_v1, %v36_v1  ;;  %v51_v13 = vld [vmem:[%s8989_s3 + $0x10] sm:$0xff] }
   0x5   :  { %v813_v7 = vunpack.c.l.s4 %v6789_v6  ;;  %5456 = vmatprep.subr.mxu0 %v36_v1  ;;  %v6863_v9 = vshrl.u32 %v8997_v2, 7  ;;  %78 = vperm.xlu0 %5850, %v52_v3   ;;  %v38_v10 = vld [vmem:[%s8987_s1 + $0x8] sm:$0xff]  ;;  %v39_v14 = vld [vmem:[%s8987_s1 + $0x10] sm:$0xff]  ;;  %v49_v16 = vld [vmem:[%s8989_s3] sm:$0xff] }
   0x6   :  { %68 = vperm.xlu1 %5851, %v50_v4   ;;  %5457 = vmatpush3.msra.mxu0 %v36_v1  ;;  %v6884_v17 = vld [vmem:[%s8988_s2] sm:$0xff]  ;;  %v40_v20 = vld [vmem:[%s8987_s1 + $0x18] sm:$0xff] }
   0x7   :  { %v814_v12 = vunpack.c.0.s8 %v813_v7  ;;  %v6875_v15 = vsub.s32 0, %v6863_v9  ;;  %5458 = vmatprep.mubr.msk.f32.mxu0 %vm121_vm0, %v37_v8  ;;  %v6889_v19 = vsub.s32 6, %v6863_v9  ;;  %v6896_v21 = vsub.s32 5, %v6863_v9  ;;  %v60_v24 = vld [vmem:[%s8989_s3 + $0x58] sm:$0xff]  ;;  %v41_v26 = vld [vmem:[%s8987_s1 + $0x20] sm:$0xff] }
   0x8   :  { %5459 = vmatmul.mubr.msk.f32.vlgmr.msra.gmra.mxu0 %vm121_vm0, %v38_v10 }
   0x9   :  { %9024 = vst [vmem:[#allocation9_spill] sm:$0xff] %v6875_v15  ;;  %v817_v18 = vsub.s32 %v814_v12, %v6863_v9  ;;  %73 = vperm.xlu0 %5850, %v51_v13   ;;  %5461 = vmatprep.mubr.msk.f32.mxu0 %vm121_vm0, %v39_v14  ;;  %v661_v25 = vrot.slane %v6884_v17, %v6875_v15 }
   0xa   :  { %63 = vperm.xlu1 %5851, %v49_v16   ;;  %v6908_v27 = vrot.slane %v6884_v17, %v6889_v19  ;;  %v6912_v28 = vrot.slane %v6884_v17, %v6896_v21 }
   0xb   :  { %v818_v22 = vrot.slane %v36_v1, %v817_v18  ;;  %v825_v23 = vrot.slane %v811_v11, %v817_v18 }
   0xc   :  { %5462 = vmatmul.mubr.msk.f32.gmra.mxu0 %vm121_vm0, %v40_v20 }
   0xd   :  { %v826_v29 = vcombine.high %v818_v22, %v818_v22  ;;  %v827_v30 = vcombine.high %v825_v23, %v825_v23  ;;  %v6914_v31 = vrot.slane %v818_v22, %v817_v18  ;;  %v6916_v32 = vrot.slane %v825_v23, %v817_v18 }
   0xe   :  { %19 = vsyncpa [#allocation6], 0  ;;  %118 = vperm.xlu0 %5850, %v60_v24   ;;  %5464 = vmatprep.mubr.msk.f32.mxu0 %vm121_vm0, %v41_v26  ;;  %v42_v33 = vld [vmem:[%s8987_s1 + $0x28] sm:$0xff]  ;;  %v56_v36 = vld [vmem:[%s8989_s3 + $0x38] sm:$0xff]  ;;  %v698_v48 = vsub.s32 2, %v6863_v9  ;;  %v679_v49 = vsub.s32 1, %v6863_v9 }
   0xf   :  { %v6923_v34 = vrot.slane %v826_v29, %v817_v18  ;;  %v6925_v35 = vrot.slane %v827_v30, %v817_v18  ;;  %675 = vbcast.lane.b32.xlu1 %v661_v25, 280  ;;  %v43_v37 = vld [vmem:[%s8987_s1 + $0x30] sm:$0xff]  ;;  %v44_v39 = vld [vmem:[%s8987_s1 + $0x38] sm:$0xff]  ;;  %v45_v40 = vld [vmem:[%s8987_s1 + $0x40] sm:$0xff]  ;;  %v6978_v53 = vsub.s32 4, %v6863_v9  ;;  %v6988_v56 = vsub.s32 3, %v6863_v9 }
  0x10   :  { %v59_v38 = vld [vmem:[%s8989_s3 + $0x50] sm:$0xff]  ;;  %5465 = vmatmul.mubr.msk.f32.gmra.mxu0 %vm121_vm0, %v42_v33  ;;  %v46_v42 = vld [vmem:[%s8987_s1 + $0x48] sm:$0xff]  ;;  %v48_v45 = vld [vmem:[%s8987_s1 + $0x58] sm:$0xff]  ;;  %v699_v51 = vrot.slane %v6884_v17, %v698_v48  ;;  %v680_v52 = vrot.slane %v6884_v17, %v679_v49  ;;  %v7014_v1 = vsub.s32 7, %v6863_v9  ;;  %v7044_v14 = vrot.slane %v6914_v31, %v6875_v15 }
  0x11   :  { %5467 = vmatprep.mubr.msk.f32.mxu0 %vm121_vm0, %v43_v37  ;;  %v55_v41 = vld [vmem:[%s8989_s3 + $0x30] sm:$0xff]  ;;  %v58_v43 = vld [vmem:[%s8989_s3 + $0x48] sm:$0xff]  ;;  %v57_v47 = vld [vmem:[%s8989_s3 + $0x40] sm:$0xff]  ;;  %v737_v55 = vrot.slane %v6884_v17, %v6978_v53  ;;  %v718_v58 = vrot.slane %v6884_v17, %v6988_v56  ;;  %vm431_vm1 = vcmask 261120   ;;  %vm4496_vm2 = vcmask 130048  }
  0x12   :  { %98 = vperm.xlu0 %5850, %v56_v36   ;;  %v47_v44 = vld [vmem:[%s8987_s1 + $0x50] sm:$0xff]  ;;  %v54_v46 = vld [vmem:[%s8989_s3 + $0x28] sm:$0xff]  ;;  %v53_v50 = vld [vmem:[%s8989_s3 + $0x20] sm:$0xff]  ;;  %v794_v6 = vrot.slane %v6884_v17, %v7014_v1  ;;  %v856_v36 = vcombine.high %v6914_v31, %v6914_v31  ;;  %v7086_v31 = vrot.slane %v6923_v34, %v6875_v15  ;;  %vm4649_vm3 = vcmask 1041409   ;;  %s6791_s1 = smov [#allocation5]  }
  0x13   :  { %113 = vperm.xlu1 %5851, %v59_v38   ;;  %v6983_v54 = vld [vmem:[%s8988_s2 + $0x10] sm:$0xff]  ;;  %v6997_v59 = vld [vmem:[%s8988_s2 + $0x8] sm:$0xff]  ;;  %v347_v24 = vld [vmem:[%s8990_s4] sm:$0xff]  ;;  %vm4652_vm4 = vcmask 1042434   ;;  %vm4655_vm5 = vcmask 1043459   ;;  %vm4658_vm6 = vcmask 1044484  }
  0x14   :  { %5468 = vmatmul.mubr.msk.f32.gmra.mxu0 %vm121_vm0, %v44_v39  ;;  %v1443_v57 = vrot.slane %v6983_v54, %v6875_v15  ;;  %v1161_v60 = vrot.slane %v6997_v59, %v6875_v15  ;;  %v1481_v61 = vrot.slane %v6983_v54, %v698_v48  ;;  %v1199_v62 = vrot.slane %v6997_v59, %v698_v48  ;;  %s4953_s0 = sshll.u32 %s6791_s1, 4  ;;  %s4954_s0 = int_to_ptr.vmem [resolvable:$true] %s4953_s0 }
  0x15   :  { %5470 = vmatprep.mubr.msk.f32.mxu0 %vm121_vm0, %v45_v40  ;;  %v1462_v63 = vrot.slane %v6983_v54, %v679_v49  ;;  %v1180_v0 = vrot.slane %v6997_v59, %v679_v49  ;;  %v1519_v3 = vrot.slane %v6983_v54, %v6978_v53  ;;  %v7030_v9 = vrot.slane %v6997_v59, %v6978_v53  ;;  %s6744_s3 = scalar_lea.vmem %s4954_s0, 128  ;;  %p6749_p1 = scmp.lt.s32.totalorder %s4954_s0, %s4954_s0 }
  0x16   :  { %671 = vbcast.lane.b32.xlu0 %v661_v25, 272  ;;  %v7034_v10 = vrot.slane %v6983_v54, %v6988_v56  ;;  %v7050_v17 = vrot.slane %v6997_v59, %v6988_v56  ;;  %5484 = vmatprep.mubr.msk.f32.mxu1 %vm431_vm1, %v347_v24  ;;  %vm4661_vm7 = vcmask 1045509   ;;  %vm4664_vm8 = vcmask 1046534   ;;  %p6745_p0 = scmp.ne.s32.totalorder %s4954_s0, %s6744_s3  ;;  %p6750_p2 = scmp.lt.s32.totalorder %s6744_s3, %s6744_s3 }
  0x17   :  { %93 = vperm.xlu1 %5851, %v55_v41   ;;  %vm4667_vm9 = vcmask 1047559   ;;  %vm4899_vm11 = vcmask 122880  }
  0x18   :  { %5471 = vmatmul.mubr.msk.f32.gmra.mxu0 %vm121_vm0, %v46_v42  ;;  %v7078_v42 = vrot.slane %v856_v36, %v6875_v15  ;;  %v7122_v36 = vrot.slane %v6983_v54, %v6896_v21  ;;  %p6751_p3 = por %p6750_p2, %p6749_p1 }
  0x19   :  { %5473 = vmatprep.mubr.msk.f32.mxu0 %vm121_vm0, %v47_v44 }
  0x1a   :  { %108 = vperm.xlu0 %5850, %v58_v43   ;;  %p6752_p4 = pnand %p6751_p3, %p6745_p0 }
  0x1b   :  { %667 = vbcast.lane.b32.xlu1 %v661_v25, 264 }
  0x1c   :  { %5474 = vmatmul.mubr.msk.f32.gmra.mxu0 %vm121_vm0, %v48_v45 }
  0x1d   :  { %5510 = vmatprep.mubr.msk.f32.mxu0 %vm431_vm1, %v347_v24 }
  0x1e   :  { %88 = vperm.xlu0 %5850, %v54_v46  }
  0x1f   :  { %103 = vperm.xlu1 %5851, %v57_v47  }
  0x22   :  { %663 = vbcast.lane.b32.xlu0 %v661_v25, 256 }
  0x23   :  { %83 = vperm.xlu1 %5851, %v53_v50  }
  0x26   :  { %713 = vbcast.lane.b32.xlu0 %v699_v51, 280 }
  0x27   :  { %694 = vbcast.lane.b32.xlu1 %v680_v52, 280 }
  0x2a   :  { %709 = vbcast.lane.b32.xlu0 %v699_v51, 272 }
  0x2b   :  { %690 = vbcast.lane.b32.xlu1 %v680_v52, 272 }
  0x2e   :  { %705 = vbcast.lane.b32.xlu0 %v699_v51, 264 }
  0x2f   :  { %686 = vbcast.lane.b32.xlu1 %v680_v52, 264 }
  0x32   :  { %701 = vbcast.lane.b32.xlu0 %v699_v51, 256 }
  0x33   :  { %682 = vbcast.lane.b32.xlu1 %v680_v52, 256 }
  0x36   :  { %751 = vbcast.lane.b32.xlu0 %v737_v55, 280 }
  0x37   :  { %1457 = vbcast.lane.b32.xlu1 %v1443_v57, 280 }
  0x3a   :  { %732 = vbcast.lane.b32.xlu0 %v718_v58, 280 }
  0x3b   :  { %747 = vbcast.lane.b32.xlu1 %v737_v55, 272 }
  0x3e   :  { %1175 = vbcast.lane.b32.xlu0 %v1161_v60, 280 }
  0x3f   :  { %1453 = vbcast.lane.b32.xlu1 %v1443_v57, 272 }
  0x42   :  { %728 = vbcast.lane.b32.xlu0 %v718_v58, 272 }
  0x43   :  { %743 = vbcast.lane.b32.xlu1 %v737_v55, 264 }
  0x46   :  { %1171 = vbcast.lane.b32.xlu0 %v1161_v60, 272 }
  0x47   :  { %1449 = vbcast.lane.b32.xlu1 %v1443_v57, 264 }
  0x4a   :  { %724 = vbcast.lane.b32.xlu0 %v718_v58, 264 }
  0x4b   :  { %739 = vbcast.lane.b32.xlu1 %v737_v55, 256 }
  0x4e   :  { %1167 = vbcast.lane.b32.xlu0 %v1161_v60, 264 }
  0x4f   :  { %1445 = vbcast.lane.b32.xlu1 %v1443_v57, 256 }
  0x52   :  { %720 = vbcast.lane.b32.xlu0 %v718_v58, 256 }
  0x53   :  { %789 = vbcast.lane.b32.xlu1 %v6908_v27, 280 }
  0x56   :  { %1163 = vbcast.lane.b32.xlu0 %v1161_v60, 256 }
  0x57   :  { %1495 = vbcast.lane.b32.xlu1 %v1481_v61, 280 }
  0x5a   :  { %770 = vbcast.lane.b32.xlu0 %v6912_v28, 280 }
  0x5b   :  { %785 = vbcast.lane.b32.xlu1 %v6908_v27, 272 }
  0x5e   :  { %1213 = vbcast.lane.b32.xlu0 %v1199_v62, 280 }
  0x5f   :  { %1476 = vbcast.lane.b32.xlu1 %v1462_v63, 280 }
  0x62   :  { %1491 = vbcast.lane.b32.xlu0 %v1481_v61, 272 }
  0x63   :  { %766 = vbcast.lane.b32.xlu1 %v6912_v28, 272 }
  0x66   :  { %781 = vbcast.lane.b32.xlu0 %v6908_v27, 264 }
  0x67   :  { %1194 = vbcast.lane.b32.xlu1 %v1180_v0, 280 }
  0x6a   :  { %1209 = vbcast.lane.b32.xlu0 %v1199_v62, 272 }
  0x6b   :  { %1472 = vbcast.lane.b32.xlu1 %v1462_v63, 272 }
  0x6e   :  { %1487 = vbcast.lane.b32.xlu0 %v1481_v61, 264 }
  0x6f   :  { %762 = vbcast.lane.b32.xlu1 %v6912_v28, 264 }
  0x72   :  { %777 = vbcast.lane.b32.xlu0 %v6908_v27, 256 }
  0x73   :  { %1190 = vbcast.lane.b32.xlu1 %v1180_v0, 272 }
  0x76   :  { %1205 = vbcast.lane.b32.xlu0 %v1199_v62, 264 }
  0x77   :  { %1468 = vbcast.lane.b32.xlu1 %v1462_v63, 264 }
  0x7a   :  { %1483 = vbcast.lane.b32.xlu0 %v1481_v61, 256  ;;  %v7100_v61 = vrot.slane %v6983_v54, %v6889_v19 }
  0x7b   :  { %758 = vbcast.lane.b32.xlu1 %v6912_v28, 256 }
  0x7e   :  { %1186 = vbcast.lane.b32.xlu0 %v1180_v0, 264 }
  0x7f   :  { %1201 = vbcast.lane.b32.xlu1 %v1199_v62, 256 }
  0x80   :  { %v7018_v4 = vpop.permute.xlu0 %78 }
  0x81   :  { %v7020_v5 = vpop.permute.xlu1 %68 }
  0x82   :  { %1464 = vbcast.lane.b32.xlu0 %v1462_v63, 256 }
  0x83   :  { %1533 = vbcast.lane.b32.xlu1 %v1519_v3, 280 }
  0x84   :  { %v7024_v7 = vpop.permute.xlu0 %73 }
  0x85   :  { %v7026_v8 = vpop.permute.xlu1 %63 }
  0x86   :  { %808 = vbcast.lane.b32.xlu0 %v794_v6, 280 }
  0x87   :  { %1182 = vbcast.lane.b32.xlu1 %v1180_v0, 256 }
  0x89   :  { %v7036_v11 = vpop.permute.xlu0 %118  ;;  %v676_v12 = vpop.permute.xlu1 %675 }
  0x8a   :  { %1251 = vbcast.lane.b32.xlu0 %v7030_v9, 280  ;;  %v903_v20 = vmul.f32 %v7044_v14, %v676_v12 }
  0x8b   :  { %1514 = vbcast.lane.b32.xlu1 %v7034_v10, 280 }
  0x8c   :  { %v935_v26 = vadd.f32 %v903_v20, %v7018_v4 }
  0x8d   :  { %v7040_v13 = vpop.permute.xlu0 %98 }
  0x8e   :  { %v7046_v16 = vpop.permute.xlu1 %113  ;;  %1529 = vbcast.lane.b32.xlu0 %v1519_v3, 272  ;;  %v5012_v37 = vmul.f32 -1.442695, %v935_v26 }
  0x8f   :  { %804 = vbcast.lane.b32.xlu1 %v794_v6, 272 }
  0x90   :  { %5853 = vpow2.f32 %v5012_v37 }
  0x91   :  { %v672_v18 = vpop.permute.xlu0 %671 }
  0x92   :  { %v7053_v22 = vpop.permute.xlu1 %93  ;;  %1232 = vbcast.lane.b32.xlu0 %v7050_v17, 280  ;;  %v902_v23 = vmul.f32 %v7044_v14, %v672_v18 }
  0x93   :  { %1247 = vbcast.lane.b32.xlu1 %v7030_v9, 272 }
  0x94   :  { %v934_v28 = vadd.f32 %v902_v23, %v7024_v7  ;;  %v7110_v23 = vrot.slane %v6997_v59, %v6889_v19 }
  0x95   :  { %v7063_v25 = vpop.permute.xlu0 %108 }
  0x96   :  { %v668_v27 = vpop.permute.xlu1 %667  ;;  %1510 = vbcast.lane.b32.xlu0 %v7034_v10, 272  ;;  %v5011_v39 = vmul.f32 -1.442695, %v934_v28  ;;  %v858_v28 = vcombine.high %v6923_v34, %v6923_v34 }
  0x97   :  { %v901_v29 = vmul.f32 %v7044_v14, %v668_v27  ;;  %1525 = vbcast.lane.b32.xlu1 %v1519_v3, 264 }
  0x98   :  { %5855 = vpow2.f32 %v5011_v39 }
  0x99   :  { %v933_v30 = vadd.f32 %v901_v29, %v7020_v5  ;;  %v7070_v33 = vpop.permute.xlu0 %88 }
  0x9a   :  { %v7074_v38 = vpop.permute.xlu1 %103  ;;  %800 = vbcast.lane.b32.xlu0 %v794_v6, 264 }
  0x9b   :  { %1228 = vbcast.lane.b32.xlu1 %v7050_v17, 272  ;;  %v5010_v40 = vmul.f32 -1.442695, %v933_v30 }
  0x9d   :  { %v664_v41 = vpop.permute.xlu0 %663  ;;  %5857 = vpow2.f32 %v5010_v40  ;;  %v5854_v18 = vpop.eup %5853 }
  0x9e   :  { %v900_v43 = vmul.f32 %v7044_v14, %v664_v41  ;;  %v7081_v44 = vpop.permute.xlu1 %83  ;;  %1243 = vbcast.lane.b32.xlu0 %v7030_v9, 264  ;;  %v1063_v19 = vadd.f32 1.0, %v5854_v18 }
  0x9f   :  { %1506 = vbcast.lane.b32.xlu1 %v7034_v10, 264 }
  0xa0   :  { %v932_v45 = vadd.f32 %v900_v43, %v7026_v8 }
  0xa1   :  { %v714_v46 = vpop.permute.xlu0 %713 }
  0xa2   :  { %v5009_v47 = vmul.f32 -1.442695, %v932_v45  ;;  %v911_v48 = vmul.f32 %v7078_v42, %v714_v46  ;;  %v695_v49 = vpop.permute.xlu1 %694  ;;  %1521 = vbcast.lane.b32.xlu0 %v1519_v3, 256 }
  0xa3   :  { %v907_v50 = vmul.f32 %v7086_v31, %v695_v49  ;;  %796 = vbcast.lane.b32.xlu1 %v794_v6, 256 }
  0xa4   :  { %5859 = vpow2.f32 %v5009_v47  ;;  %v943_v51 = vadd.f32 %v911_v48, %v7018_v4  ;;  %v7130_v48 = vrot.slane %v858_v28, %v6875_v15 }
  0xa5   :  { %v939_v52 = vadd.f32 %v907_v50, %v7018_v4  ;;  %v710_v53 = vpop.permute.xlu0 %709  ;;  %v5856_v24 = vpop.eup %5855 }
  0xa6   :  { %v5020_v55 = vmul.f32 -1.442695, %v943_v51  ;;  %v910_v56 = vmul.f32 %v7078_v42, %v710_v53  ;;  %v691_v57 = vpop.permute.xlu1 %690  ;;  %1224 = vbcast.lane.b32.xlu0 %v7050_v17, 264  ;;  %v1062_v34 = vadd.f32 1.0, %v5856_v24  ;;  %v7137_v53 = vrot.slane %v6997_v59, %v6896_v21 }
  0xa7   :  { %v5016_v58 = vmul.f32 -1.442695, %v939_v52  ;;  %v906_v60 = vmul.f32 %v7086_v31, %v691_v57  ;;  %1239 = vbcast.lane.b32.xlu1 %v7030_v9, 256 }
  0xa8   :  { %v942_v62 = vadd.f32 %v910_v56, %v7024_v7  ;;  %5861 = vpow2.f32 %v5020_v55 }
  0xa9   :  { %v938_v63 = vadd.f32 %v906_v60, %v7024_v7  ;;  %v706_v0 = vpop.permute.xlu0 %705  ;;  %5863 = vpow2.f32 %v5016_v58 }
  0xaa   :  { %v5019_v3 = vmul.f32 -1.442695, %v942_v62  ;;  %v909_v6 = vmul.f32 %v7078_v42, %v706_v0  ;;  %v687_v12 = vpop.permute.xlu1 %686  ;;  %1502 = vbcast.lane.b32.xlu0 %v7034_v10, 256  ;;  %v5858_v27 = vpop.eup %5857  ;;  %v7117_v10 = vrot.slane %v6916_v32, %v6875_v15 }
  0xab   :  { %v5015_v20 = vmul.f32 -1.442695, %v938_v63  ;;  %v905_v9 = vmul.f32 %v7086_v31, %v687_v12  ;;  %1571 = vbcast.lane.b32.xlu1 %v7100_v61, 280  ;;  %v1061_v45 = vadd.f32 1.0, %v5858_v27 }
  0xac   :  { %5865 = vpow2.f32 %v5019_v3  ;;  %v941_v26 = vadd.f32 %v909_v6, %v7020_v5 }
  0xad   :  { %v937_v29 = vadd.f32 %v905_v9, %v7020_v5  ;;  %v702_v30 = vpop.permute.xlu0 %701  ;;  %5867 = vpow2.f32 %v5015_v20 }
  0xae   :  { %v5018_v37 = vmul.f32 -1.442695, %v941_v26  ;;  %v908_v39 = vmul.f32 %v7078_v42, %v702_v30  ;;  %v683_v40 = vpop.permute.xlu1 %682  ;;  %1220 = vbcast.lane.b32.xlu0 %v7050_v17, 256 }
  0xaf   :  { %v5014_v41 = vmul.f32 -1.442695, %v937_v29  ;;  %v904_v43 = vmul.f32 %v7086_v31, %v683_v40  ;;  %1289 = vbcast.lane.b32.xlu1 %v7110_v23, 280 }
  0xb0   :  { %5869 = vpow2.f32 %v5018_v37  ;;  %v940_v46 = vadd.f32 %v908_v39, %v7026_v8 }
  0xb1   :  { %v5860_v47 = vpop.eup %5859  ;;  %5871 = vpow2.f32 %v5014_v41  ;;  %v936_v49 = vadd.f32 %v904_v43, %v7026_v8  ;;  %v752_v50 = vpop.permute.xlu0 %751 }
  0xb2   :  { %5873 = vrcp.f32 %v1063_v19  ;;  %v5017_v17 = vmul.f32 -1.442695, %v940_v46  ;;  %v919_v51 = vmul.f32 %v7117_v10, %v752_v50  ;;  %v1458_v52 = vpop.permute.xlu1 %1457  ;;  %1552 = vbcast.lane.b32.xlu0 %v7122_v36, 280  ;;  %v1060_v55 = vadd.f32 1.0, %v5860_v47 }
  0xb3   :  { %5875 = vrcp.f32 %v1062_v34  ;;  %v5013_v56 = vmul.f32 -1.442695, %v936_v49  ;;  %v1595_v57 = vmul.f32 %v1458_v52, %v7044_v14  ;;  %1567 = vbcast.lane.b32.xlu1 %v7100_v61, 272 }
  0xb4   :  { %5877 = vrcp.f32 %v1061_v45  ;;  %v951_v58 = vadd.f32 %v919_v51, %v7018_v4 }
  0xb5   :  { %5879 = vpow2.f32 %v5017_v17  ;;  %v1627_v60 = vadd.f32 %v1595_v57, %v7036_v11  ;;  %v733_v62 = vpop.permute.xlu0 %732  ;;  %v5862_v63 = vpop.eup %5861 }
  0xb6   :  { %5881 = vpow2.f32 %v5013_v56  ;;  %v5028_v0 = vmul.f32 -1.442695, %v951_v58  ;;  %v915_v21 = vmul.f32 %v7130_v48, %v733_v62  ;;  %v748_v3 = vpop.permute.xlu1 %747  ;;  %1270 = vbcast.lane.b32.xlu0 %v7137_v53, 280  ;;  %v5864_v6 = vpop.eup %5863  ;;  %v1071_v12 = vadd.f32 1.0, %v5862_v63 }
  0xb7   :  { %5883 = vrcp.f32 %v1060_v55  ;;  %v5046_v18 = vmul.f32 -1.442695, %v1627_v60  ;;  %v918_v20 = vmul.f32 %v7117_v10, %v748_v3  ;;  %1285 = vbcast.lane.b32.xlu1 %v7110_v23, 272  ;;  %v1067_v9 = vadd.f32 1.0, %v5864_v6 }
  0xb8   :  { %5885 = vpow2.f32 %v5028_v0  ;;  %v947_v24 = vadd.f32 %v915_v21, %v7018_v4 }
  0xb9   :  { %v5866_v26 = vpop.eup %5865  ;;  %5887 = vrcp.f32 %v1071_v12  ;;  %v950_v27 = vadd.f32 %v918_v20, %v7024_v7  ;;  %v1176_v28 = vpop.permute.xlu0 %1175 }
  0xba   :  { %5889 = vrcp.f32 %v1067_v9  ;;  %v1070_v29 = vadd.f32 1.0, %v5866_v26  ;;  %v5024_v30 = vmul.f32 -1.442695, %v947_v24  ;;  %v1313_v19 = vmul.f32 %v1176_v28, %v7044_v14  ;;  %v1454_v37 = vpop.permute.xlu1 %1453  ;;  %1548 = vbcast.lane.b32.xlu0 %v7122_v36, 272  ;;  %v5868_v39 = vpop.eup %5867 }
  0xbb   :  { %5891 = vpow2.f32 %v5046_v18  ;;  %v5027_v40 = vmul.f32 -1.442695, %v950_v27  ;;  %v1594_v34 = vmul.f32 %v1454_v37, %v7044_v14  ;;  %1563 = vbcast.lane.b32.xlu1 %v7100_v61, 264  ;;  %v1066_v41 = vadd.f32 1.0, %v5868_v39 }
  0xbc   :  { %5893 = vrcp.f32 %v1070_v29  ;;  %v1345_v50 = vadd.f32 %v1313_v19, %v7040_v13  ;;  %v857_v27 = vcombine.high %v6916_v32, %v6916_v32 }
  0xbd   :  { %v5870_v43 = vpop.eup %5869  ;;  %5895 = vpow2.f32 %v5024_v30  ;;  %v1626_v45 = vadd.f32 %v1594_v34, %v7046_v16  ;;  %v729_v46 = vpop.permute.xlu0 %728 }
  0xbe   :  { %v5872_v47 = vpop.eup %5871  ;;  %5897 = vrcp.f32 %v1066_v41  ;;  %v1069_v49 = vadd.f32 1.0, %v5870_v43  ;;  %v914_v17 = vmul.f32 %v7130_v48, %v729_v46  ;;  %v744_v51 = vpop.permute.xlu1 %743  ;;  %1266 = vbcast.lane.b32.xlu0 %v7137_v53, 272  ;;  %v7186_v46 = vrot.slane %v857_v27, %v6875_v15 }
  0xbf   :  { %v7157_v52 = vpop.eup %5873  ;;  %v1065_v55 = vadd.f32 1.0, %v5872_v47  ;;  %5899 = vpow2.f32 %v5027_v40  ;;  %v5045_v56 = vmul.f32 -1.442695, %v1626_v45  ;;  %v917_v57 = vmul.f32 %v7117_v10, %v744_v51  ;;  %1281 = vbcast.lane.b32.xlu1 %v7110_v23, 264 }
  0xc0   :  { %v7161_v58 = vpop.eup %5875  ;;  %5901 = vrcp.f32 %v1069_v49  ;;  %v946_v60 = vadd.f32 %v914_v17, %v7024_v7  ;;  %v7191_v49 = vrot.slane %v6983_v54, %v7014_v1 }
  0xc1   :  { %v7164_v62 = vpop.eup %5877  ;;  %5903 = vrcp.f32 %v1065_v55  ;;  %v949_v63 = vadd.f32 %v917_v57, %v7020_v5  ;;  %v1172_v0 = vpop.permute.xlu0 %1171 }
  0xc2   :  { %v5880_v21 = vpop.eup %5879  ;;  %5905 = vtanh.f32 %v1345_v50  ;;  %v5023_v3 = vmul.f32 -1.442695, %v946_v60  ;;  %v1312_v6 = vmul.f32 %v1172_v0, %v7044_v14  ;;  %v1450_v12 = vpop.permute.xlu1 %1449  ;;  %1544 = vbcast.lane.b32.xlu0 %v7122_v36, 264 }
  0xc3   :  { %v5882_v18 = vpop.eup %5881  ;;  %v1068_v20 = vadd.f32 1.0, %v5880_v21  ;;  %5907 = vpow2.f32 %v5045_v56  ;;  %v5026_v9 = vmul.f32 -1.442695, %v949_v63  ;;  %v1593_v24 = vmul.f32 %v1450_v12, %v7044_v14  ;;  %1559 = vbcast.lane.b32.xlu1 %v7100_v61, 256 }
  0xc4   :  { %v7171_v26 = vpop.eup %5883  ;;  %v1064_v28 = vadd.f32 1.0, %v5882_v18  ;;  %5909 = vpow2.f32 %v5023_v3  ;;  %v1344_v30 = vadd.f32 %v1312_v6, %v7053_v22 }
  0xc5   :  { %v5886_v29 = vpop.eup %5885  ;;  %5911 = vrcp.f32 %v1068_v20  ;;  %v1625_v19 = vadd.f32 %v1593_v24, %v7063_v25  ;;  %v725_v37 = vpop.permute.xlu0 %724 }
  0xc6   :  { %v7177_v39 = vpop.eup %5887  ;;  %5913 = vrcp.f32 %v1064_v28  ;;  %v1079_v40 = vadd.f32 1.0, %v5886_v29  ;;  %v913_v61 = vmul.f32 %v7130_v48, %v725_v37  ;;  %v740_v34 = vpop.permute.xlu1 %739  ;;  %1262 = vbcast.lane.b32.xlu0 %v7137_v53, 264 }
  0xc7   :  { %v7181_v41 = vpop.eup %5889  ;;  %5915 = vpow2.f32 %v5026_v9  ;;  %v5044_v32 = vmul.f32 -1.442695, %v1625_v19  ;;  %v916_v43 = vmul.f32 %v7117_v10, %v740_v34  ;;  %1277 = vbcast.lane.b32.xlu1 %v7110_v23, 256  ;;  %v7198_v23 = vrot.slane %v6997_v59, %v7014_v1 }
  0xc8   :  { %v5892_v45 = vpop.eup %5891  ;;  %5917 = vrcp.f32 %v1079_v40  ;;  %v945_v47 = vadd.f32 %v913_v61, %v7020_v5  ;;  %v5460_v55 = vpop.f32.mrf.mxu0 }
  0xc9   :  { %v7193_v50 = vpop.eup %5893  ;;  %v1755_v17 = vadd.f32 1.0, %v5892_v45  ;;  %5919 = vtanh.f32 %v1344_v30  ;;  %v948_v51 = vadd.f32 %v916_v43, %v7026_v8  ;;  %v1168_v56 = vpop.permute.xlu0 %1167  ;;  %v230_v63 = vadd.f32 %v5460_v55, %v7020_v5 }
  0xca   :  { %v5896_v57 = vpop.eup %5895  ;;  %5921 = vpow2.f32 %v5044_v32  ;;  %v5022_v60 = vmul.f32 -1.442695, %v945_v47  ;;  %v1311_v54 = vmul.f32 %v1168_v56, %v7044_v14  ;;  %v1446_v0 = vpop.permute.xlu1 %1445  ;;  %1540 = vbcast.lane.b32.xlu0 %v7122_v36, 256  ;;  %v7224_v56 = vrot.slane %v6925_v35, %v6875_v15 }
  0xcb   :  { %v7203_v21 = vpop.eup %5897  ;;  %5923 = vrcp.f32 %v1755_v17  ;;  %v1075_v3 = vadd.f32 1.0, %v5896_v57  ;;  %v5025_v6 = vmul.f32 -1.442695, %v948_v51  ;;  %v1592_v12 = vmul.f32 %v1446_v0, %v7044_v14  ;;  %v224_v18 = vpop.f32.mrf.mxu0  ;;  %1258 = vbcast.lane.b32.xlu1 %v7137_v53, 256 }
  0xcc   :  { %v5900_v59 = vpop.eup %5899  ;;  %5925 = vpow2.f32 %v5022_v60  ;;  %v4986_v1 = vmul.f32 -1.442695, %v230_v63  ;;  %v1343_v24 = vadd.f32 %v1311_v54, %v7070_v33  ;;  %v225_v30 = vadd.f32 %v224_v18, %v7026_v8  ;;  %9025 = vst [vmem:[#allocation10_spill] sm:$0xff] %v7224_v56 }
  0xcd   :  { %v7207_v20 = vpop.eup %5901  ;;  %5927 = vrcp.f32 %v1075_v3  ;;  %v1078_v9 = vadd.f32 1.0, %v5900_v59  ;;  %v1624_v36 = vadd.f32 %v1592_v12, %v7074_v38  ;;  %v5463_v27 = vpop.f32.mrf.mxu0 }
  0xce   :  { %v721_v28 = vpop.permute.xlu0 %720  ;;  %v7211_v29 = vpop.eup %5903  ;;  %5929 = vpow2.f32 %v5025_v6  ;;  %1590 = vbcast.lane.b32.xlu0 %v7191_v49, 280  ;;  %v240_v32 = vadd.f32 %v5463_v27, %v7018_v4  ;;  %v4985_v60 = vmul.f32 -1.442695, %v225_v30 }
  0xcf   :  { %v912_v53 = vmul.f32 %v7130_v48, %v721_v28  ;;  %v790_v19 = vpop.permute.xlu1 %789  ;;  %v5906_v37 = vpop.eup %5905  ;;  %5931 = vrcp.f32 %v1078_v9  ;;  %1308 = vbcast.lane.b32.xlu1 %v7198_v23, 280  ;;  %v5043_v47 = vmul.f32 -1.442695, %v1624_v36 }
  0xd0   :  { %v927_v40 = vmul.f32 %v7186_v46, %v790_v19  ;;  %v5908_v61 = vpop.eup %5907  ;;  %v1409_v34 = vmul.f32 %v5906_v37, %v7157_v52  ;;  %5933 = vpow2.f32 %v4986_v1  ;;  %v234_v17 = vpop.f32.mrf.mxu0  ;;  %v4988_v3 = vmul.f32 -1.442695, %v240_v32 }
  0xd1   :  { %v5910_v43 = vpop.eup %5909  ;;  %v1754_v45 = vadd.f32 1.0, %v5908_v61  ;;  %5935 = vtanh.f32 %v1343_v24  ;;  %v944_v54 = vadd.f32 %v912_v53, %v7026_v8  ;;  %v235_v24 = vadd.f32 %v234_v17, %v7024_v7 }
  0xd2   :  { %v1164_v51 = vpop.permute.xlu0 %1163  ;;  %v7220_v55 = vpop.eup %5911  ;;  %5937 = vtanh.f32 %v1409_v34  ;;  %v1074_v57 = vadd.f32 1.0, %v5910_v43  ;;  %1586 = vbcast.lane.b32.xlu0 %v7191_v49, 272  ;;  %v959_v18 = vadd.f32 %v927_v40, %v7018_v4 }
  0xd3   :  { %v1496_v63 = vpop.permute.xlu1 %1495  ;;  %v7227_v52 = vpop.eup %5913  ;;  %5939 = vrcp.f32 %v1754_v45  ;;  %1304 = vbcast.lane.b32.xlu1 %v7198_v23, 272  ;;  %v5021_v53 = vmul.f32 -1.442695, %v944_v54  ;;  %v1310_v54 = vmul.f32 %v1164_v51, %v7044_v14 }
  0xd4   :  { %v5916_v0 = vpop.eup %5915  ;;  %5941 = vrcp.f32 %v1074_v57  ;;  %v5466_v59 = vpop.f32.mrf.mxu0  ;;  %v1603_v61 = vmul.f32 %v1496_v63, %v7078_v42  ;;  %v5036_v32 = vmul.f32 -1.442695, %v959_v18  ;;  %v359_v63 = vld [vmem:[%s8991_s5] sm:$0xff] }
  0xd5   :  { %v7231_v6 = vpop.eup %5917  ;;  %v1077_v12 = vadd.f32 1.0, %v5916_v0  ;;  %5943 = vpow2.f32 %v5043_v47 }
  0xd6   :  { %v771_v1 = vpop.permute.xlu0 %770  ;;  %v5920_v9 = vpop.eup %5919  ;;  %5945 = vpow2.f32 %v4985_v60  ;;  %1582 = vbcast.lane.b32.xlu0 %v7191_v49, 264  ;;  %v4987_v60 = vmul.f32 -1.442695, %v235_v24 }
  0xd7   :  { %v923_v36 = vmul.f32 %v7224_v56, %v771_v1  ;;  %v786_v27 = vpop.permute.xlu1 %785  ;;  %v5922_v28 = vpop.eup %5921  ;;  %5947 = vrcp.f32 %v1077_v12  ;;  %v1408_v30 = vmul.f32 %v5920_v9, %v7161_v58  ;;  %1300 = vbcast.lane.b32.xlu1 %v7198_v23, 264  ;;  %v1635_v12 = vadd.f32 %v1603_v61, %v7036_v11 }
  0xd8   :  { %v7239_v19 = vmul.f32 %v7186_v46, %v786_v27  ;;  %v5924_v37 = vpop.eup %5923  ;;  %v1753_v40 = vadd.f32 1.0, %v5922_v28  ;;  %5949 = vpow2.f32 %v4988_v3  ;;  %v244_v43 = vpop.f32.mrf.mxu0  ;;  %v250_v9 = vadd.f32 %v5466_v59, %v7070_v33  ;;  %v362_v59 = vld [vmem:[%s8991_s5 + $0x18] sm:$0xff] }
  0xd9   :  { %v5926_v34 = vpop.eup %5925  ;;  %5951 = vtanh.f32 %v1408_v30  ;;  %v1342_v30 = vadd.f32 %v1310_v54, %v7081_v44  ;;  %v5054_v61 = vmul.f32 -1.442695, %v1635_v12  ;;  %v955_v54 = vadd.f32 %v923_v36, %v7018_v4 }
  0xda   :  { %v7243_v45 = vpop.permute.xlu0 %1213  ;;  %v7245_v47 = vpop.eup %5927  ;;  %5953 = vrcp.f32 %v1753_v40  ;;  %v1073_v58 = vadd.f32 1.0, %v5926_v34  ;;  %1578 = vbcast.lane.b32.xlu0 %v7191_v49, 256  ;;  %v360_v49 = vld [vmem:[%s8991_s5 + $0x8] sm:$0xff] }
  0xdb   :  { %9026 = vst [vmem:[#allocation11_spill] sm:$0xff] %v7245_v47  ;;  %v7247_v17 = vpop.permute.xlu1 %1476  ;;  %v5930_v57 = vpop.eup %5929  ;;  %5955 = vpow2.f32 %v5021_v53  ;;  %1296 = vbcast.lane.b32.xlu1 %v7198_v23, 256  ;;  %v361_v53 = vld [vmem:[%s8991_s5 + $0x10] sm:$0xff] }
  0xdc   :  { %v7255_v0 = vpop.eup %5931  ;;  %5957 = vrcp.f32 %v1073_v58  ;;  %v1076_v3 = vadd.f32 1.0, %v5930_v57  ;;  %v5469_v1 = vpop.f32.mrf.mxu0 }
  0xdd   :  { %9027 = vst [vmem:[#allocation12_spill] sm:$0xff] %v7255_v0  ;;  %v5934_v18 = vpop.eup %5933  ;;  %5959 = vpow2.f32 %v5036_v32 }
  0xde   :  { %v7261_v14 = vpop.permute.xlu0 %1491  ;;  %v5936_v23 = vpop.eup %5935  ;;  %5961 = vrcp.f32 %v1076_v3  ;;  %v320_v51 = vadd.f32 1.0, %v5934_v18  ;;  %373 = vperm.xlu0 %5850, %v359_v63   ;;  %v245_v18 = vadd.f32 %v244_v43, %v7081_v44  ;;  %v368_v43 = vld [vmem:[%s8991_s5 + $0x48] sm:$0xff] }
  0xdf   :  { %v767_v24 = vpop.permute.xlu1 %766  ;;  %v5938_v27 = vpop.eup %5937  ;;  %v1407_v28 = vmul.f32 %v5936_v23, %v7164_v62  ;;  %5963 = vpow2.f32 %v4987_v60  ;;  %378 = vperm.xlu1 %5851, %v360_v49  }
  0xe0   :  { %v5940_v40 = vpop.eup %5939  ;;  %5965 = vrcp.f32 %v320_v51  ;;  %v7270_v34 = vmul.f32 %v7224_v56, %v767_v24  ;;  %v254_v62 = vpop.f32.mrf.mxu0  ;;  %v7277_v58 = vmul.f32 %v5938_v27, %v5924_v37  ;;  %v367_v37 = vld [vmem:[%s8991_s5 + $0x40] sm:$0xff]  ;;  %v958_v51 = vadd.f32 %v7239_v19, %v7024_v7 }
  0xe1   :  { %v7275_v32 = vpop.eup %5941  ;;  %5967 = vtanh.f32 %v1407_v28  ;;  %v260_v24 = vadd.f32 %v5469_v1, %v7040_v13 }
  0xe2   :  { %9028 = vst [vmem:[#allocation13_spill] sm:$0xff] %v7275_v32  ;;  %9029 = vst [vmem:[#allocation14_spill] sm:$0xff] %v7277_v58  ;;  %v782_v57 = vpop.permute.xlu0 %781  ;;  %v5944_v60 = vpop.eup %5943  ;;  %5969 = vtanh.f32 %v250_v9  ;;  %383 = vperm.xlu0 %5850, %v361_v53   ;;  %5502 = vmatprep.subr.mxu0 %v7277_v58 }
  0xe3   :  { %v7281_v63 = vmul.f32 %v7186_v46, %v782_v57  ;;  %v7283_v3 = vpop.permute.xlu1 %1194  ;;  %v5946_v12 = vpop.eup %5945  ;;  %v1752_v49 = vadd.f32 1.0, %v5944_v60  ;;  %5971 = vtanh.f32 %v1342_v30  ;;  %388 = vperm.xlu1 %5851, %v362_v59   ;;  %5503 = vmatpush3.msra.mxu0 %v7277_v58  ;;  %v363_v60 = vld [vmem:[%s8991_s5 + $0x20] sm:$0xff] }
  0xe4   :  { %v7290_v23 = vpop.eup %5947  ;;  %v319_v36 = vadd.f32 1.0, %v5946_v12  ;;  %5973 = vpow2.f32 %v5054_v61  ;;  %v5472_v27 = vpop.f32.mrf.mxu0  ;;  %v5032_v61 = vmul.f32 -1.442695, %v955_v54  ;;  %v5035_v12 = vmul.f32 -1.442695, %v958_v51 }
  0xe5   :  { %9030 = vst [vmem:[#allocation15_spill] sm:$0xff] %v7290_v23  ;;  %v5950_v9 = vpop.eup %5949  ;;  %5975 = vrcp.f32 %v1752_v49  ;;  %v270_v49 = vadd.f32 %v5472_v27, %v7063_v25  ;;  %v1321_v54 = vmul.f32 %v7243_v45, %v7078_v42  ;;  %v255_v45 = vadd.f32 %v254_v62, %v7053_v22 }
  0xe6   :  { %v7299_v28 = vpop.permute.xlu0 %1209  ;;  %v5952_v30 = vpop.eup %5951  ;;  %5977 = vrcp.f32 %v319_v36  ;;  %v322_v53 = vadd.f32 1.0, %v5950_v9  ;;  %413 = vperm.xlu0 %5850, %v367_v37   ;;  %v364_v37 = vld [vmem:[%s8991_s5 + $0x28] sm:$0xff]  ;;  %v1599_v36 = vmul.f32 %v7247_v17, %v7086_v31  ;;  %v369_v17 = vld [vmem:[%s8991_s5 + $0x50] sm:$0xff] }
  0xe7   :  { %v7301_v59 = vpop.permute.xlu1 %1472  ;;  %v5954_v19 = vpop.eup %5953  ;;  %5979 = vtanh.f32 %v245_v18  ;;  %418 = vperm.xlu1 %5851, %v368_v43   ;;  %v7303_v57 = vmul.f32 %v5952_v30, %v5940_v40  ;;  %v1353_v62 = vadd.f32 %v1321_v54, %v7040_v13 }
  0xe8   :  { %v5956_v1 = vpop.eup %5955  ;;  %5981 = vrcp.f32 %v322_v53  ;;  %v264_v43 = vpop.f32.mrf.mxu0 }
  0xe9   :  { %9031 = vst [vmem:[#allocation16_spill] sm:$0xff] %v7303_v57  ;;  %v7314_v18 = vpop.eup %5957  ;;  %v1072_v40 = vadd.f32 1.0, %v5956_v1  ;;  %5983 = vtanh.f32 %v260_v24  ;;  %5504 = vmatprep.subr.mxu0 %v7303_v57 }
  0xea   :  { %9032 = vst [vmem:[#allocation17_spill] sm:$0xff] %v7314_v18  ;;  %v7319_v51 = vpop.permute.xlu0 %1487  ;;  %v5960_v9 = vpop.eup %5959  ;;  %5985 = vpow2.f32 %v5032_v61  ;;  %5505 = vmatpush3.msra.mxu0 %v7303_v57  ;;  %393 = vperm.xlu0 %5850, %v363_v60   ;;  %v4982_v61 = vmul.f32 -1.442695, %v270_v49  ;;  %v365_v60 = vld [vmem:[%s8991_s5 + $0x30] sm:$0xff] }
  0xeb   :  { %v763_v27 = vpop.permute.xlu1 %762  ;;  %v7323_v30 = vpop.eup %5961  ;;  %5987 = vrcp.f32 %v1072_v40  ;;  %v1087_v24 = vadd.f32 1.0, %v5960_v9  ;;  %398 = vperm.xlu1 %5851, %v364_v37   ;;  %v1631_v9 = vadd.f32 %v1599_v36, %v7036_v11  ;;  %v1602_v37 = vmul.f32 %v7261_v14, %v7078_v42  ;;  %v370_v14 = vld [vmem:[%s8991_s5 + $0x58] sm:$0xff] }
  0xec   :  { %9033 = vst [vmem:[#allocation18_spill] sm:$0xff] %v7323_v30  ;;  %v7326_v53 = vmul.f32 %v7224_v56, %v763_v27  ;;  %v5964_v1 = vpop.eup %5963  ;;  %5989 = vpow2.f32 %v5035_v12  ;;  %v5475_v27 = vpop.f32.mrf.mxu0  ;;  %v265_v12 = vadd.f32 %v264_v43, %v7074_v38 }
  0xed   :  { %v5966_v2 = vpop.eup %5965  ;;  %5991 = vrcp.f32 %v1087_v24  ;;  %v321_v40 = vadd.f32 1.0, %v5964_v1  ;;  %v280_v43 = vadd.f32 %v5475_v27, %v7036_v11 }
  0xee   :  { %v778_v57 = vpop.permute.xlu0 %777  ;;  %v5968_v58 = vpop.eup %5967  ;;  %5993 = vtanh.f32 %v255_v45  ;;  %423 = vperm.xlu0 %5850, %v369_v17  }
  0xef   :  { %v7340_v49 = vmul.f32 %v7186_v46, %v778_v57  ;;  %v7342_v54 = vpop.permute.xlu1 %1190  ;;  %v5970_v30 = vpop.eup %5969  ;;  %5995 = vrcp.f32 %v321_v40  ;;  %403 = vperm.xlu1 %5851, %v365_v60   ;;  %v7344_v24 = vmul.f32 %v5968_v58, %v5954_v19  ;;  %v366_v57 = vld [vmem:[%s8991_s5 + $0x38] sm:$0xff]  ;;  %v5050_v60 = vmul.f32 -1.442695, %v1631_v9  ;;  %v4690_v9 = vld [vmem:[%s8992_s6] sm:$0xff] }
  0xf0   :  { %v5972_v36 = vpop.eup %5971  ;;  %v336_v1 = vmul.f32 %v5970_v30, %v5966_v2  ;;  %5997 = vpow2.f32 %v4982_v61  ;;  %v1634_v58 = vadd.f32 %v1602_v37, %v7046_v16  ;;  %v4981_v30 = vmul.f32 -1.442695, %v265_v12  ;;  %v274_v61 = vpop.f32.mrf.mxu0  ;;  %v4691_v12 = vld [vmem:[%s8992_s6 + $0x8] sm:$0xff] }
  0xf1   :  { %9034 = vst [vmem:[#allocation19_spill] sm:$0xff] %v7344_v24  ;;  %v5974_v45 = vpop.eup %5973  ;;  %v1406_v17 = vmul.f32 %v5972_v36, %v7171_v26  ;;  %5999 = vtanh.f32 %v1353_v62  ;;  %5506 = vmatprep.subr.mxu0 %v7344_v24  ;;  %v954_v62 = vadd.f32 %v7270_v34, %v7024_v7  ;;  %v4984_v36 = vmul.f32 -1.442695, %v280_v43 }
  0xf2   :  { %v7356_v19 = vpop.permute.xlu0 %1205  ;;  %v7358_v40 = vpop.eup %5975  ;;  %6001 = vtanh.f32 %v336_v1  ;;  %v1763_v2 = vadd.f32 1.0, %v5974_v45  ;;  %5507 = vmatpush3.msra.mxu0 %v7344_v24  ;;  %428 = vperm.xlu0 %5850, %v370_v14   ;;  %v5053_v45 = vmul.f32 -1.442695, %v1634_v58 }
  0xf3   :  { %v7361_v27 = vpop.permute.xlu1 %1468  ;;  %v5978_v26 = vpop.eup %5977  ;;  %6003 = vtanh.f32 %v1406_v17  ;;  %408 = vperm.xlu1 %5851, %v366_v57   ;;  %v275_v17 = vadd.f32 %v274_v61, %v7046_v16  ;;  %v5031_v18 = vmul.f32 -1.442695, %v954_v62 }
  0xf4   :  { %v5980_v37 = vpop.eup %5979  ;;  %6005 = vrcp.f32 %v1763_v2  ;;  %v957_v2 = vadd.f32 %v7281_v63, %v7020_v5  ;;  %v1598_v63 = vmul.f32 %v7301_v59, %v7086_v31 }
  0xf5   :  { %v7371_v1 = vpop.eup %5981  ;;  %v335_v14 = vmul.f32 %v5980_v37, %v5978_v26  ;;  %6007 = vpow2.f32 %v5050_v60  ;;  %v4692_v60 = vld [vmem:[%s8992_s6 + $0x10] sm:$0xff]  ;;  %v4983_v62 = vmul.f32 -1.442695, %v275_v17 }
  0xf6   :  { %v7374_v34 = vpop.permute.xlu0 %1483  ;;  %v7376_v57 = vpop.eup %5983  ;;  %6009 = vpow2.f32 %v4981_v30  ;;  %4696 = vperm.xlu0 %5850, %v4690_v9   ;;  %v4693_v30 = vld [vmem:[%s8992_s6 + $0x18] sm:$0xff] }
  0xf7   :  { %v759_v43 = vpop.permute.xlu1 %758  ;;  %v5986_v24 = vpop.eup %5985  ;;  %6011 = vtanh.f32 %v335_v14  ;;  %4701 = vperm.xlu1 %5851, %v4691_v12   ;;  %v5034_v14 = vmul.f32 -1.442695, %v957_v2  ;;  %v4888_v2 = vld [vmem:[#allocation2] sm:$0x1] }
  0xf8   :  { %v7381_v23 = vmul.f32 %v7224_v56, %v759_v43  ;;  %v7386_v58 = vpop.eup %5987  ;;  %v1083_v61 = vadd.f32 1.0, %v5986_v24  ;;  %6013 = vpow2.f32 %v4984_v36  ;;  %v1317_v24 = vmul.f32 %v7283_v3, %v7086_v31 }
  0xf9   :  { %9035 = vst [vmem:[#allocation20_spill] sm:$0xff] %v7386_v58  ;;  %v5990_v26 = vpop.eup %5989  ;;  %6015 = vpow2.f32 %v5053_v45  ;;  %v1320_v43 = vmul.f32 %v7299_v28, %v7078_v42  ;;  %v1601_v45 = vmul.f32 %v7319_v51, %v7078_v42 }
  0xfa   :  { %v7393_v9 = vpop.permute.xlu0 %1186  ;;  %v7395_v37 = vpop.eup %5991  ;;  %6017 = vrcp.f32 %v1083_v61  ;;  %v1086_v12 = vadd.f32 1.0, %v5990_v26  ;;  %4706 = vperm.xlu0 %5850, %v4692_v60   ;;  %v1630_v61 = vadd.f32 %v1598_v63, %v7046_v16 }
  0xfb   :  { %9036 = vst [vmem:[#allocation21_spill] sm:$0xff] %v7395_v37  ;;  %v7399_v36 = vpop.permute.xlu1 %1201  ;;  %v5994_v59 = vpop.eup %5993  ;;  %6019 = vpow2.f32 %v5031_v18  ;;  %4711 = vperm.xlu1 %5851, %v4693_v30   ;;  %v1349_v18 = vadd.f32 %v1317_v24, %v7040_v13  ;;  %v1352_v63 = vadd.f32 %v1320_v43, %v7053_v22  ;;  %v1633_v30 = vadd.f32 %v1601_v45, %v7063_v25 }
  0xfc   :  { %v5996_v17 = vpop.eup %5995  ;;  %6021 = vrcp.f32 %v1086_v12  ;;  %v5049_v12 = vmul.f32 -1.442695, %v1630_v61 }
  0xfd   :  { %v5998_v26 = vpop.eup %5997  ;;  %v337_v37 = vmul.f32 %v5996_v17, %v5994_v59  ;;  %6023 = vpow2.f32 %v4983_v62  ;;  %v5052_v61 = vmul.f32 -1.442695, %v1633_v30 }
  0xfe   :  { %v7406_v3 = vpop.permute.xlu0 %1464  ;;  %v6000_v60 = vpop.eup %5999  ;;  %v296_v58 = vadd.f32 1.0, %v5998_v26  ;;  %6025 = vpow2.f32 %v5034_v14  ;;  %v956_v26 = vadd.f32 %v7340_v49, %v7026_v8  ;;  %v7454_v49 = vld [vmem:[%s8990_s4 + $0x18] sm:$0xff] }
  0xff   :  { %v7409_v28 = vpop.permute.xlu1 %1533  ;;  %v7411_v32 = vpop.eup %6001  ;;  %6027 = vtanh.f32 %v337_v37  ;;  %v1417_v51 = vmul.f32 %v6000_v60, %v7177_v39  ;;  %4891 = vperm.xlu1 %5851, %v4888_v2   ;;  %v953_v39 = vadd.f32 %v7326_v53, %v7020_v5  ;;  %v7428_v37 = vld [vmem:[%s8990_s4 + $0x8] sm:$0xff] }
 0x100   :  { %v6004_v62 = vpop.eup %6003  ;;  %6029 = vrcp.f32 %v296_v58 }
 0x101   :  { %v7416_v59 = vpop.eup %6005  ;;  %6031 = vtanh.f32 %v1417_v51  ;;  %v7419_v14 = vmul.f32 %v6004_v62, %v7358_v40  ;;  %v7436_v40 = vld [vmem:[%s8990_s4 + $0x10] sm:$0xff]  ;;  %v5030_v62 = vmul.f32 -1.442695, %v953_v39  ;;  %v5033_v39 = vmul.f32 -1.442695, %v956_v26 }
 0x102   :  { %v7421_v24 = vpop.permute.xlu0 %808  ;;  %v6008_v17 = vpop.eup %6007  ;;  %6033 = vtanh.f32 %v1349_v18  ;;  %v1597_v18 = vmul.f32 %v7361_v27, %v7086_v31 }
 0x103   :  { %9037 = vst [vmem:[#allocation22_spill] sm:$0xff] %v7419_v14  ;;  %v7430_v58 = vpop.permute.xlu1 %1182  ;;  %v6010_v43 = vpop.eup %6009  ;;  %v1759_v45 = vadd.f32 1.0, %v6008_v17  ;;  %6035 = vtanh.f32 %v1352_v63  ;;  %5508 = vmatprep.subr.mxu0 %v7419_v14 }
 0x104   :  { %v7438_v2 = vpop.eup %6011  ;;  %v295_v53 = vadd.f32 1.0, %v6010_v43  ;;  %6037 = vpow2.f32 %v5049_v12  ;;  %5509 = vmatpush3.msra.mxu0 %v7419_v14  ;;  %v1316_v43 = vmul.f32 %v7342_v54, %v7086_v31 }
 0x105   :  { %v6014_v60 = vpop.eup %6013  ;;  %6039 = vrcp.f32 %v1759_v45  ;;  %5511 = vmatmul.mubr.msk.f32.vlgmr.msra.gmra.mxu0 %vm431_vm1, %v7428_v37 }
 0x106   :  { %v7447_v51 = vpop.permute.xlu0 %1251  ;;  %v6016_v63 = vpop.eup %6015  ;;  %6041 = vrcp.f32 %v295_v53  ;;  %v298_v30 = vadd.f32 1.0, %v6014_v60  ;;  %5513 = vmatprep.mubr.msk.f32.mxu0 %vm431_vm1, %v7436_v40  ;;  %v1319_v53 = vmul.f32 %v7356_v19, %v7078_v42  ;;  %v1600_v60 = vmul.f32 %v7374_v34, %v7078_v42  ;;  %v7478_v19 = vld [vmem:[%s8990_s4] sm:$0xff] }
 0x107   :  { %v7456_v12 = vpop.permute.xlu1 %1514  ;;  %v7458_v27 = vpop.eup %6017  ;;  %v1762_v17 = vadd.f32 1.0, %v6016_v63  ;;  %6043 = vpow2.f32 %v5052_v61  ;;  %9040 = vst [vmem:[#allocation25_spill] sm:$0xff] %v7478_v19  ;;  %v1348_v63 = vadd.f32 %v1316_v43, %v7053_v22  ;;  %v952_v43 = vadd.f32 %v7381_v23, %v7026_v8 }
 0x108   :  { %9038 = vst [vmem:[#allocation23_spill] sm:$0xff] %v7458_v27  ;;  %v6020_v45 = vpop.eup %6019  ;;  %6045 = vrcp.f32 %v298_v30  ;;  %v1629_v27 = vadd.f32 %v1597_v18, %v7063_v25 }
 0x109   :  { %v7466_v14 = vpop.eup %6021  ;;  %6047 = vrcp.f32 %v1762_v17  ;;  %v1082_v56 = vadd.f32 1.0, %v6020_v45  ;;  %5514 = vmatmul.mubr.msk.f32.gmra.mxu0 %vm431_vm1, %v7454_v49  ;;  %v1632_v45 = vadd.f32 %v1600_v60, %v7074_v38 }
 0x10a   :  { %9039 = vst [vmem:[#allocation24_spill] sm:$0xff] %v7466_v14  ;;  %v7471_v61 = vpop.permute.xlu0 %1529  ;;  %v6024_v54 = vpop.eup %6023  ;;  %6049 = vpow2.f32 %v5030_v62  ;;  %5538 = vmatprep.mubr.msk.f32.mxu0 %vm431_vm1, %v7478_v19  ;;  %v1351_v62 = vadd.f32 %v1319_v53, %v7070_v33  ;;  %v5048_v0 = vmul.f32 -1.442695, %v1629_v27  ;;  %v1596_v53 = vmul.f32 %v7406_v3, %v7086_v31 }
 0x10b   :  { %v7473_v26 = vpop.permute.xlu1 %804  ;;  %v6026_v34 = vpop.eup %6025  ;;  %6051 = vrcp.f32 %v1082_v56  ;;  %v297_v18 = vadd.f32 1.0, %v6024_v54  ;;  %v859_v56 = vcombine.high %v6925_v35, %v6925_v35  ;;  %v1315_v35 = vmul.f32 %v7393_v9, %v7086_v31 }
 0x10c   :  { %v7483_v30 = vpop.eup %6027  ;;  %v1085_v17 = vadd.f32 1.0, %v6026_v34  ;;  %6053 = vpow2.f32 %v5033_v39  ;;  %v1611_v3 = vmul.f32 %v7409_v28, %v7117_v10 }
 0x10d   :  { %v7487_v14 = vpop.eup %6029  ;;  %6055 = vrcp.f32 %v297_v18  ;;  %v5051_v18 = vmul.f32 -1.442695, %v1632_v45  ;;  %v1347_v28 = vadd.f32 %v1315_v35, %v7070_v33 }
 0x10e   :  { %v7489_v47 = vpop.permute.xlu0 %1232  ;;  %v6032_v19 = vpop.eup %6031  ;;  %6057 = vrcp.f32 %v1085_v17 }
 0x10f   :  { %v7495_v54 = vpop.permute.xlu1 %1247  ;;  %v6034_v39 = vpop.eup %6033  ;;  %6059 = vtanh.f32 %v1348_v63  ;;  %v7500_v60 = vmul.f32 %v6032_v19, %v7416_v59  ;;  %v1318_v63 = vmul.f32 %v7399_v36, %v7078_v42  ;;  %v7516_v19 = vrot.slane %v859_v56, %v6875_v15 }
 0x110   :  { %v6036_v27 = vpop.eup %6035  ;;  %v1413_v34 = vmul.f32 %v6034_v39, %v7181_v41  ;;  %6061 = vtanh.f32 %v1351_v62  ;;  %v5029_v62 = vmul.f32 -1.442695, %v952_v43  ;;  %v1643_v43 = vadd.f32 %v1611_v3, %v7036_v11 }
 0x111   :  { %9041 = vst [vmem:[#allocation26_spill] sm:$0xff] %v7500_v60  ;;  %v6038_v17 = vpop.eup %6037  ;;  %v1416_v23 = vmul.f32 %v6036_v27, %v7193_v50  ;;  %6063 = vpow2.f32 %v5048_v0  ;;  %5530 = vmatprep.subr.mxu0 %v7500_v60  ;;  %v1628_v0 = vadd.f32 %v1596_v53, %v7074_v38  ;;  %v1350_v39 = vadd.f32 %v1318_v63, %v7081_v44 }
 0x112   :  { %v7511_v59 = vpop.permute.xlu0 %1510  ;;  %v7513_v41 = vpop.eup %6039  ;;  %6065 = vtanh.f32 %v1413_v34  ;;  %v1758_v9 = vadd.f32 1.0, %v6038_v17  ;;  %5531 = vmatpush3.msra.mxu0 %v7500_v60  ;;  %v931_v17 = vmul.f32 %v7516_v19, %v7421_v24  ;;  %v5062_v63 = vmul.f32 -1.442695, %v1643_v43 }
 0x113   :  { %v7519_v50 = vpop.permute.xlu1 %1525  ;;  %v7521_v42 = vpop.eup %6041  ;;  %6067 = vtanh.f32 %v1416_v23  ;;  %v5047_v35 = vmul.f32 -1.442695, %v1628_v0 }
 0x114   :  { %v6044_v36 = vpop.eup %6043  ;;  %6069 = vrcp.f32 %v1758_v9  ;;  %v963_v60 = vadd.f32 %v931_v17, %v7018_v4 }
 0x115   :  { %v7525_v45 = vpop.eup %6045  ;;  %v1761_v56 = vadd.f32 1.0, %v6044_v36  ;;  %6071 = vpow2.f32 %v5051_v18 }
 0x116   :  { %v7529_v27 = vpop.permute.xlu0 %800  ;;  %v6048_v34 = vpop.eup %6047  ;;  %6073 = vpow2.f32 %v5029_v62  ;;  %v338_v62 = vmul.f32 %v7376_v57, %v7371_v1  ;;  %v1329_v1 = vmul.f32 %v7447_v51, %v7117_v10 }
 0x117   :  { %v7533_v53 = vpop.permute.xlu1 %1228  ;;  %v6050_v23 = vpop.eup %6049  ;;  %6075 = vrcp.f32 %v1761_v56 }
 0x118   :  { %v7535_v9 = vpop.eup %6051  ;;  %v1081_v36 = vadd.f32 1.0, %v6050_v23  ;;  %6077 = vtanh.f32 %v1347_v28  ;;  %v1314_v28 = vmul.f32 %v7430_v58, %v7086_v31  ;;  %v1610_v31 = vmul.f32 %v7471_v61, %v7117_v10 }
 0x119   :  { %v6054_v18 = vpop.eup %6053  ;;  %6079 = vtanh.f32 %v1350_v39  ;;  %v1607_v39 = vmul.f32 %v7456_v12, %v7130_v48 }
 0x11a   :  { %v7537_v3 = vpop.permute.xlu0 %1243  ;;  %v7539_v15 = vpop.eup %6055  ;;  %6081 = vrcp.f32 %v1081_v36  ;;  %v1084_v24 = vadd.f32 1.0, %v6054_v18  ;;  %v5040_v36 = vmul.f32 -1.442695, %v963_v60  ;;  %v1346_v18 = vadd.f32 %v1314_v28, %v7081_v44 }
 0x11b   :  { %v7544_v56 = vpop.permute.xlu1 %1506  ;;  %v7546_v0 = vpop.eup %6057  ;;  %6083 = vpow2.f32 %v5047_v35  ;;  %v1642_v28 = vadd.f32 %v1610_v31, %v7046_v16  ;;  %v1609_v31 = vmul.f32 %v7519_v50, %v7117_v10  ;;  %v1328_v50 = vmul.f32 %v7495_v54, %v7117_v10 }
 0x11c   :  { %v6060_v43 = vpop.eup %6059  ;;  %6085 = vrcp.f32 %v1084_v24  ;;  %v1361_v24 = vadd.f32 %v1329_v1, %v7040_v13 }
 0x11d   :  { %v6062_v57 = vpop.eup %6061  ;;  %v1412_v23 = vmul.f32 %v6060_v43, %v7203_v21  ;;  %6087 = vpow2.f32 %v5062_v63  ;;  %v1639_v21 = vadd.f32 %v1607_v39, %v7036_v11 }
 0x11e   :  { %v7555_v4 = vpop.permute.xlu0 %1521  ;;  %v6064_v17 = vpop.eup %6063  ;;  %v1415_v35 = vmul.f32 %v6062_v57, %v7207_v20  ;;  %6089 = vtanh.f32 %v338_v62  ;;  %v930_v20 = vmul.f32 %v7516_v19, %v7473_v26  ;;  %v1606_v26 = vmul.f32 %v7511_v59, %v7130_v48 }
 0x11f   :  { %v7560_v58 = vpop.permute.xlu1 %796  ;;  %v7562_v12 = vpop.eup %6065  ;;  %6091 = vtanh.f32 %v1412_v23  ;;  %v1757_v51 = vadd.f32 1.0, %v6064_v17  ;;  %v5058_v1 = vmul.f32 -1.442695, %v1639_v21  ;;  %v1325_v59 = vmul.f32 %v7489_v47, %v7130_v48 }
 0x120   :  { %v6068_v63 = vpop.eup %6067  ;;  %6093 = vtanh.f32 %v1415_v35  ;;  %v962_v35 = vadd.f32 %v930_v20, %v7024_v7 }
 0x121   :  { %v7569_v60 = vpop.eup %6069  ;;  %6095 = vrcp.f32 %v1757_v51  ;;  %v7571_v61 = vmul.f32 %v6068_v63, %v6048_v34  ;;  %v5061_v63 = vmul.f32 -1.442695, %v1642_v28  ;;  %v1357_v54 = vadd.f32 %v1325_v59, %v7040_v13 }
 0x122   :  { %v7573_v62 = vpop.permute.xlu0 %1224  ;;  %v6072_v43 = vpop.eup %6071  ;;  %6097 = vpow2.f32 %v5040_v36 }
 0x123   :  { %9042 = vst [vmem:[#allocation27_spill] sm:$0xff] %v7571_v61  ;;  %v7576_v57 = vpop.permute.xlu1 %1239  ;;  %v6074_v39 = vpop.eup %6073  ;;  %v1760_v23 = vadd.f32 1.0, %v6072_v43  ;;  %6099 = vtanh.f32 %v1346_v18  ;;  %5532 = vmatprep.subr.mxu0 %v7571_v61  ;;  %v1638_v43 = vadd.f32 %v1606_v26, %v7046_v16 }
 0x124   :  { %v6076_v17 = vpop.eup %6075  ;;  %v1080_v34 = vadd.f32 1.0, %v6074_v39  ;;  %6101 = vtanh.f32 %v1361_v24  ;;  %5533 = vmatpush3.msra.mxu0 %v7571_v61  ;;  %v1605_v61 = vmul.f32 %v7544_v56, %v7130_v48 }
 0x125   :  { %v6078_v36 = vpop.eup %6077  ;;  %6103 = vrcp.f32 %v1760_v23  ;;  %v5039_v23 = vmul.f32 -1.442695, %v962_v35 }
 0x126   :  { %v7585_v51 = vpop.permute.xlu0 %1502  ;;  %v6080_v18 = vpop.eup %6079  ;;  %6105 = vrcp.f32 %v1080_v34  ;;  %v1411_v21 = vmul.f32 %v6078_v36, %v7211_v29  ;;  %v929_v29 = vmul.f32 %v7516_v19, %v7529_v27  ;;  %v1641_v34 = vadd.f32 %v1609_v31, %v7063_v25 }
 0x127   :  { %v7590_v24 = vpop.permute.xlu1 %1571  ;;  %v7592_v7 = vpop.eup %6081  ;;  %v1414_v20 = vmul.f32 %v6080_v18, %v7220_v55  ;;  %6107 = vpow2.f32 %v5058_v1  ;;  %v1360_v18 = vadd.f32 %v1328_v50, %v7053_v22  ;;  %v5057_v27 = vmul.f32 -1.442695, %v1638_v43 }
 0x128   :  { %v6084_v39 = vpop.eup %6083  ;;  %6109 = vtanh.f32 %v1411_v21  ;;  %v345_v31 = vmul.f32 %v7539_v15, %v7483_v30  ;;  %v5060_v59 = vmul.f32 -1.442695, %v1641_v34  ;;  %v1608_v30 = vmul.f32 %v7555_v4, %v7117_v10 }
 0x129   :  { %v7600_v28 = vpop.eup %6085  ;;  %6111 = vtanh.f32 %v1414_v20  ;;  %v1756_v47 = vadd.f32 1.0, %v6084_v39  ;;  %v961_v39 = vadd.f32 %v929_v29, %v7020_v5  ;;  %v344_v5 = vmul.f32 %v7487_v14, %v7411_v32 }
 0x12a   :  { %v7603_v36 = vpop.permute.xlu0 %1220  ;;  %v6088_v55 = vpop.eup %6087  ;;  %6113 = vpow2.f32 %v5061_v63  ;;  %v1637_v32 = vadd.f32 %v1605_v61, %v7063_v25  ;;  %v928_v14 = vmul.f32 %v7516_v19, %v7560_v58  ;;  %v1640_v61 = vadd.f32 %v1608_v30, %v7074_v38 }
 0x12b   :  { %v7606_v1 = vpop.permute.xlu1 %1289  ;;  %v6090_v26 = vpop.eup %6089  ;;  %6115 = vrcp.f32 %v1756_v47  ;;  %v1771_v35 = vadd.f32 1.0, %v6088_v55  ;;  %v5038_v29 = vmul.f32 -1.442695, %v961_v39  ;;  %v7646_v58 = vmul.f32 %v7562_v12, %v7513_v41 }
 0x12c   :  { %v6092_v21 = vpop.eup %6091  ;;  %v346_v20 = vmul.f32 %v6090_v26, %v7525_v45  ;;  %6117 = vpow2.f32 %v5039_v23  ;;  %v1324_v45 = vmul.f32 %v7533_v53, %v7130_v48  ;;  %v1327_v53 = vmul.f32 %v7537_v3, %v7117_v10 }
 0x12d   :  { %v6094_v63 = vpop.eup %6093  ;;  %6119 = vrcp.f32 %v1771_v35  ;;  %v343_v3 = vmul.f32 %v7521_v42, %v7438_v2 }
 0x12e   :  { %v7615_v47 = vpop.permute.xlu0 %1552  ;;  %v6096_v55 = vpop.eup %6095  ;;  %5476 = vmatprep.subr.mxu1 %v346_v20  ;;  %6121 = vtanh.f32 %v1357_v54  ;;  %v7619_v50 = vmul.f32 %v6094_v63, %v6076_v17  ;;  %v1359_v2 = vadd.f32 %v1327_v53, %v7070_v33 }
 0x12f   :  { %v6098_v15 = vpop.eup %6097  ;;  %5477 = vmatpush3.msra.mxu1 %v346_v20  ;;  %6123 = vtanh.f32 %v1360_v18  ;;  %v7625_v56 = vpop.permute.xlu1 %1567  ;;  %v5056_v20 = vmul.f32 -1.442695, %v1637_v32 }
 0x130   :  { %v6100_v43 = vpop.eup %6099  ;;  %v1091_v23 = vadd.f32 1.0, %v6098_v15  ;;  %5478 = vmatprep.subr.mxu1 %v345_v31  ;;  %6125 = vpow2.f32 %v5057_v27  ;;  %5534 = vmatprep.subr.mxu0 %v7619_v50  ;;  %v7670_v15 = vld [vmem:[%s8990_s4 + $0x20] sm:$0xff] }
 0x131   :  { %v6102_v17 = vpop.eup %6101  ;;  %v1410_v34 = vmul.f32 %v6100_v43, %v7227_v52  ;;  %5479 = vmatpush3.msra.mxu1 %v345_v31  ;;  %6127 = vpow2.f32 %v5060_v59  ;;  %5535 = vmatpush3.msra.mxu0 %v7619_v50  ;;  %v1356_v52 = vadd.f32 %v1324_v45, %v7053_v22  ;;  %v960_v31 = vadd.f32 %v928_v14, %v7026_v8  ;;  %v9043_v14 = vld [vmem:[#allocation11_spill] sm:$0xff] }
 0x132   :  { %v7635_v4 = vpop.permute.xlu0 %1270  ;;  %v6104_v54 = vpop.eup %6103  ;;  %6129 = vrcp.f32 %v1091_v23  ;;  %5480 = vmatprep.subr.mxu1 %v344_v5  ;;  %v1425_v26 = vmul.f32 %v6102_v17, %v7231_v6  ;;  %v7649_v6 = vmul.f32 %v6092_v21, %v7569_v60  ;;  %v5059_v8 = vmul.f32 -1.442695, %v1640_v61 }
 0x133   :  { %v7641_v35 = vpop.eup %6105  ;;  %6131 = vtanh.f32 %v1410_v34  ;;  %5481 = vmatpush3.msra.mxu1 %v344_v5  ;;  %v7653_v39 = vpop.permute.xlu1 %1285  ;;  %v5037_v30 = vmul.f32 -1.442695, %v960_v31  ;;  %v1326_v17 = vmul.f32 %v7576_v57, %v7117_v10  ;;  %v1619_v34 = vmul.f32 %v7590_v24, %v7186_v46  ;;  %v9044_v57 = vld [vmem:[#allocation12_spill] sm:$0xff] }
 0x134   :  { %v6108_v18 = vpop.eup %6107  ;;  %6133 = vtanh.f32 %v1425_v26  ;;  %5482 = vmatprep.subr.mxu1 %v343_v3  ;;  %v7700_v26 = vld [vmem:[%s8990_s4 + $0x30] sm:$0xff] }
 0x135   :  { %v6110_v42 = vpop.eup %6109  ;;  %v1767_v27 = vadd.f32 1.0, %v6108_v18  ;;  %5483 = vmatpush3.msra.mxu1 %v343_v3  ;;  %6135 = vpow2.f32 %v5038_v29  ;;  %v1323_v29 = vmul.f32 %v7573_v62, %v7130_v48  ;;  %v1358_v31 = vadd.f32 %v1326_v17, %v7081_v44  ;;  %v9046_v17 = vld [vmem:[#allocation10_spill] sm:$0xff] }
 0x136   :  { %v6112_v63 = vpop.eup %6111  ;;  %5485 = vmatmul.mubr.msk.f32.vlgmr.msra.gmra.mxu1 %vm431_vm1, %v7428_v37  ;;  %5516 = vmatprep.subr.mxu1 %v7646_v58  ;;  %6137 = vtanh.f32 %v1356_v52  ;;  %v7658_v41 = vmul.f32 %v6110_v42, %v6096_v55  ;;  %v7660_v12 = vpop.permute.xlu0 %1548  ;;  %v1604_v55 = vmul.f32 %v7585_v51, %v7130_v48  ;;  %v7687_v51 = vld [vmem:[%s8990_s4 + $0x28] sm:$0xff] }
 0x137   :  { %v6114_v60 = vpop.eup %6113  ;;  %6139 = vrcp.f32 %v1767_v27  ;;  %5517 = vmatpush3.msra.mxu1 %v7646_v58  ;;  %5487 = vmatprep.mubr.msk.f32.mxu1 %vm431_vm1, %v7436_v40  ;;  %v7665_v21 = vmul.f32 %v6112_v63, %v6104_v54  ;;  %v7694_v32 = vpop.permute.xlu1 %1563  ;;  %v1651_v63 = vadd.f32 %v1619_v34, %v7036_v11  ;;  %v1615_v34 = vmul.f32 %v7615_v47, %v9046_v17 }
 0x138   :  { %v6116_v59 = vpop.eup %6115  ;;  %v1770_v45 = vadd.f32 1.0, %v6114_v60  ;;  %5518 = vmatprep.subr.mxu1 %v7649_v6  ;;  %6141 = vtanh.f32 %v1359_v2  ;;  %v1636_v3 = vadd.f32 %v1604_v55, %v7074_v38  ;;  %v1355_v2 = vadd.f32 %v1323_v29, %v7070_v33 }
 0x139   :  { %v6118_v5 = vpop.eup %6117  ;;  %5519 = vmatpush3.msra.mxu1 %v7649_v6  ;;  %6143 = vpow2.f32 %v5056_v20  ;;  %5536 = vmatprep.subr.mxu0 %v7665_v21  ;;  %v7721_v20 = vld [vmem:[%s8990_s4 + $0x38] sm:$0xff]  ;;  %v1322_v29 = vmul.f32 %v7603_v36, %v7130_v48  ;;  %v5070_v48 = vmul.f32 -1.442695, %v1651_v63  ;;  %v1618_v36 = vmul.f32 %v7625_v56, %v7186_v46 }
 0x13a   :  { %v6120_v43 = vpop.eup %6119  ;;  %6145 = vrcp.f32 %v1770_v45  ;;  %v1090_v23 = vadd.f32 1.0, %v6118_v5  ;;  %5488 = vmatmul.mubr.msk.f32.gmra.mxu1 %vm431_vm1, %v7454_v49  ;;  %5520 = vmatprep.subr.mxu1 %v7658_v41  ;;  %v7704_v52 = vpop.permute.xlu0 %1266  ;;  %v5055_v45 = vmul.f32 -1.442695, %v1636_v3  ;;  %v7753_v3 = vld [vmem:[%s8990_s4 + $0x48] sm:$0xff] }
 0x13b   :  { %v6122_v53 = vpop.eup %6121  ;;  %5490 = vmatprep.mubr.msk.f32.mxu1 %vm431_vm1, %v7670_v15  ;;  %6147 = vpow2.f32 %v5059_v8  ;;  %5521 = vmatpush3.msra.mxu1 %v7658_v41  ;;  %v7728_v8 = vld [vmem:[%s8990_s4 + $0x40] sm:$0xff]  ;;  %9048 = vst [vmem:[#allocation12_spill] sm:$0xff] %v7753_v3 }
 0x13c   :  { %v6124_v62 = vpop.eup %6123  ;;  %6149 = vrcp.f32 %v1090_v23  ;;  %v1421_v54 = vmul.f32 %v6122_v53, %v9043_v14  ;;  %5537 = vmatpush3.msra.mxu0 %v7665_v21  ;;  %9045 = vst [vmem:[#allocation11_spill] sm:$0xff] %v7728_v8  ;;  %v9047_v14 = vld [vmem:[#allocation25_spill] sm:$0xff] }
 0x13d   :  { %v6126_v10 = vpop.eup %6125  ;;  %v1424_v24 = vmul.f32 %v6124_v62, %v9044_v57  ;;  %6151 = vpow2.f32 %v5037_v30  ;;  %5539 = vmatmul.mubr.msk.f32.vlgmr.msra.gmra.mxu0 %vm431_vm1, %v7428_v37  ;;  %v7734_v30 = vpop.permute.xlu1 %1281  ;;  %v7762_v57 = vld [vmem:[%s8990_s4 + $0x50] sm:$0xff] }
 0x13e   :  { %v6128_v61 = vpop.eup %6127  ;;  %6153 = vtanh.f32 %v1421_v54  ;;  %5491 = vmatmul.mubr.msk.f32.gmra.mxu1 %vm431_vm1, %v7687_v51  ;;  %v1766_v18 = vadd.f32 1.0, %v6126_v10  ;;  %5541 = vmatprep.mubr.msk.f32.mxu0 %vm431_vm1, %v7436_v40  ;;  %v7744_v62 = vpop.permute.xlu0 %1544  ;;  %9050 = vst [vmem:[#allocation10_spill] sm:$0xff] %v7762_v57 }
 0x13f   :  { %v7714_v42 = vpop.eup %6129  ;;  %6155 = vtanh.f32 %v1424_v24  ;;  %v1769_v27 = vadd.f32 1.0, %v6128_v61  ;;  %5493 = vmatprep.mubr.msk.f32.mxu1 %vm431_vm1, %v7700_v26  ;;  %v1337_v24 = vmul.f32 %v7606_v1, %v7186_v46  ;;  %v7779_v1 = vld [vmem:[%s8990_s4 + $0x58] sm:$0xff] }
 0x140   :  { %v6132_v60 = vpop.eup %6131  ;;  %6157 = vrcp.f32 %v1766_v18  ;;  %v9051_v18 = vld [vmem:[#allocation15_spill] sm:$0xff]  ;;  %9052 = vst [vmem:[#allocation25_spill] sm:$0xff] %v7779_v1 }
 0x141   :  { %v6134_v55 = vpop.eup %6133  ;;  %6159 = vrcp.f32 %v1769_v27  ;;  %5542 = vmatmul.mubr.msk.f32.gmra.mxu0 %vm431_vm1, %v7454_v49  ;;  %v7732_v5 = vmul.f32 %v6132_v60, %v6116_v59  ;;  %v1354_v27 = vadd.f32 %v1322_v29, %v7081_v44  ;;  %v1369_v29 = vadd.f32 %v1337_v24, %v7040_v13 }
 0x142   :  { %v6136_v23 = vpop.eup %6135  ;;  %5494 = vmatmul.mubr.msk.f32.gmra.mxu1 %vm431_vm1, %v7721_v20  ;;  %6161 = vtanh.f32 %v1355_v2  ;;  %v7740_v53 = vmul.f32 %v6134_v55, %v6120_v43  ;;  %5566 = vmatprep.mubr.msk.f32.mxu0 %vm431_vm1, %v9047_v14  ;;  %v9049_v43 = vld [vmem:[#allocation13_spill] sm:$0xff]  ;;  %v1560_v55 = vpop.permute.xlu1 %1559 }
 0x143   :  { %v6138_v59 = vpop.eup %6137  ;;  %v1089_v54 = vadd.f32 1.0, %v6136_v23  ;;  %5496 = vmatprep.mubr.msk.f32.mxu1 %vm431_vm1, %v7728_v8  ;;  %6163 = vtanh.f32 %v1358_v31  ;;  %5522 = vmatprep.subr.mxu1 %v7732_v5  ;;  %v1647_v31 = vadd.f32 %v1615_v34, %v7036_v11  ;;  %v1333_v34 = vmul.f32 %v7635_v4, %v9046_v17  ;;  %v9058_v8 = vld [vmem:[#allocation24_spill] sm:$0xff] }
 0x144   :  { %v6140_v47 = vpop.eup %6139  ;;  %v1420_v10 = vmul.f32 %v6138_v59, %v9049_v43  ;;  %6165 = vpow2.f32 %v5055_v45  ;;  %5523 = vmatpush3.msra.mxu1 %v7732_v5  ;;  %5558 = vmatprep.subr.mxu0 %v7740_v53  ;;  %v1650_v45 = vadd.f32 %v1618_v36, %v7046_v16  ;;  %v1614_v59 = vmul.f32 %v7660_v12, %v9046_v17 }
 0x145   :  { %v6142_v61 = vpop.eup %6141  ;;  %6167 = vrcp.f32 %v1089_v54  ;;  %5559 = vmatpush3.msra.mxu0 %v7740_v53  ;;  %v7787_v54 = vpop.permute.xlu0 %1262  ;;  %v5066_v24 = vmul.f32 -1.442695, %v1647_v31  ;;  %v1617_v4 = vmul.f32 %v7694_v32, %v7186_v46 }
 0x146   :  { %v6144_v56 = vpop.eup %6143  ;;  %6169 = vtanh.f32 %v1420_v10  ;;  %5497 = vmatmul.mubr.msk.f32.gmra.mxu1 %vm431_vm1, %v7753_v3  ;;  %v1423_v2 = vmul.f32 %v6142_v61, %v9051_v18 }
 0x147   :  { %v6146_v63 = vpop.eup %6145  ;;  %v1765_v60 = vadd.f32 1.0, %v6144_v56  ;;  %5499 = vmatprep.mubr.msk.f32.mxu1 %vm431_vm1, %v7762_v57  ;;  %6171 = vpow2.f32 %v5070_v48  ;;  %v1336_v48 = vmul.f32 %v7653_v39, %v7186_v46  ;;  %v5069_v56 = vmul.f32 -1.442695, %v1650_v45 }
 0x148   :  { %v6148_v23 = vpop.eup %6147  ;;  %6173 = vtanh.f32 %v1423_v2  ;;  %v1365_v39 = vadd.f32 %v1333_v34, %v7040_v13 }
 0x149   :  { %v7789_v43 = vpop.eup %6149  ;;  %6175 = vrcp.f32 %v1765_v60  ;;  %v1768_v10 = vadd.f32 1.0, %v6148_v23  ;;  %v1646_v60 = vadd.f32 %v1614_v59, %v7046_v16  ;;  %v1368_v31 = vadd.f32 %v1336_v48, %v7053_v22  ;;  %v7806_v23 = vpop.permute.xlu1 %1277  ;;  %v9053_v59 = vld [vmem:[#allocation17_spill] sm:$0xff] }
 0x14a   :  { %v6152_v36 = vpop.eup %6151  ;;  %5500 = vmatmul.mubr.msk.f32.gmra.mxu1 %vm431_vm1, %v7779_v1  ;;  %6177 = vtanh.f32 %v1354_v27  ;;  %v1541_v45 = vpop.permute.xlu0 %1540 }
 0x14b   :  { %v6154_v61 = vpop.eup %6153  ;;  %6179 = vrcp.f32 %v1768_v10  ;;  %v1088_v12 = vadd.f32 1.0, %v6152_v36  ;;  %5524 = vmatprep.mubr.msk.f32.mxu1 %vm431_vm1, %v9047_v14  ;;  %v5065_v36 = vmul.f32 -1.442695, %v1646_v60 }
 0x14c   :  { %v6156_v18 = vpop.eup %6155  ;;  %6181 = vtanh.f32 %v1369_v29  ;;  %v7800_v2 = vmul.f32 %v6154_v61, %v6140_v47  ;;  %v1649_v47 = vadd.f32 %v1617_v4, %v7063_v25  ;;  %v9054_v61 = vld [vmem:[#allocation18_spill] sm:$0xff] }
 0x14d   :  { %v6158_v27 = vpop.eup %6157  ;;  %6183 = vrcp.f32 %v1088_v12  ;;  %v7804_v32 = vmul.f32 %v6156_v18, %v6146_v63  ;;  %v1613_v63 = vmul.f32 %v7744_v62, %v9046_v17  ;;  %v1616_v62 = vmul.f32 %v1560_v55, %v7186_v46 }
 0x14e   :  { %v6160_v10 = vpop.eup %6159  ;;  %5525 = vmatmul.mubr.msk.f32.vlgmr.msra.gmra.mxu1 %vm431_vm1, %v7428_v37  ;;  %6185 = vpow2.f32 %v5066_v24  ;;  %5544 = vmatprep.subr.mxu1 %v7800_v2  ;;  %v1332_v24 = vmul.f32 %v7704_v52, %v9046_v17  ;;  %v5068_v60 = vmul.f32 -1.442695, %v1649_v47 }
 0x14f   :  { %v6162_v29 = vpop.eup %6161  ;;  %5527 = vmatprep.mubr.msk.f32.mxu1 %vm431_vm1, %v7436_v40  ;;  %6187 = vpow2.f32 %v5069_v56  ;;  %5560 = vmatprep.subr.mxu0 %v7804_v32  ;;  %v1335_v56 = vmul.f32 %v7734_v30, %v7186_v46  ;;  %v1645_v52 = vadd.f32 %v1613_v63, %v7063_v25 }
 0x150   :  { %v6164_v34 = vpop.eup %6163  ;;  %v1419_v48 = vmul.f32 %v6162_v29, %v9053_v59  ;;  %6189 = vtanh.f32 %v1365_v39  ;;  %5545 = vmatpush3.msra.mxu1 %v7800_v2  ;;  %5561 = vmatpush3.msra.mxu0 %v7804_v32  ;;  %v1259_v59 = vpop.permute.xlu1 %1258  ;;  %v1364_v30 = vadd.f32 %v1332_v24, %v7053_v22 }
 0x151   :  { %v6166_v4 = vpop.eup %6165  ;;  %v1422_v12 = vmul.f32 %v6164_v34, %v9054_v61  ;;  %6191 = vtanh.f32 %v1368_v31  ;;  %v1591_v34 = vpop.permute.xlu0 %1590  ;;  %v1367_v47 = vadd.f32 %v1335_v56, %v7070_v33  ;;  %v1648_v61 = vadd.f32 %v1616_v62, %v7074_v38 }
 0x152   :  { %v7826_v18 = vpop.eup %6167  ;;  %6193 = vtanh.f32 %v1419_v48  ;;  %v1764_v39 = vadd.f32 1.0, %v6166_v4  ;;  %5528 = vmatmul.mubr.msk.f32.gmra.mxu1 %vm431_vm1, %v7454_v49  ;;  %v1623_v3 = vmul.f32 %v1591_v34, %v7516_v19 }
 0x153   :  { %v6170_v29 = vpop.eup %6169  ;;  %6195 = vtanh.f32 %v1422_v12  ;;  %5552 = vmatprep.mubr.msk.f32.mxu1 %vm431_vm1, %v9047_v14  ;;  %v5067_v62 = vmul.f32 -1.442695, %v1648_v61 }
 0x154   :  { %v6172_v31 = vpop.eup %6171  ;;  %6197 = vrcp.f32 %v1764_v39  ;;  %v7834_v55 = vmul.f32 %v6170_v29, %v6158_v27  ;;  %v5064_v27 = vmul.f32 -1.442695, %v1645_v52  ;;  %v9055_v39 = vld [vmem:[#allocation20_spill] sm:$0xff]  ;;  %v1331_v52 = vmul.f32 %v7787_v54, %v9046_v17 }
 0x155   :  { %v6174_v48 = vpop.eup %6173  ;;  %v1779_v4 = vadd.f32 1.0, %v6172_v31  ;;  %6199 = vpow2.f32 %v5065_v36  ;;  %v1612_v36 = vmul.f32 %v1541_v45, %v9046_v17  ;;  %v9056_v31 = vld [vmem:[#allocation21_spill] sm:$0xff]  ;;  %v1334_v45 = vmul.f32 %v7806_v23, %v7186_v46 }
 0x156   :  { %v6176_v12 = vpop.eup %6175  ;;  %6201 = vpow2.f32 %v5068_v60  ;;  %5546 = vmatprep.subr.mxu1 %v7834_v55  ;;  %v7839_v63 = vmul.f32 %v6174_v48, %v6160_v10  ;;  %v1309_v10 = vpop.permute.xlu1 %1308  ;;  %v1363_v54 = vadd.f32 %v1331_v52, %v7070_v33 }
 0x157   :  { %v6178_v1 = vpop.eup %6177  ;;  %6203 = vrcp.f32 %v1779_v4  ;;  %5547 = vmatpush3.msra.mxu1 %v7834_v55  ;;  %v1644_v61 = vadd.f32 %v1612_v36, %v7074_v38  ;;  %v1366_v23 = vadd.f32 %v1334_v45, %v7081_v44 }
 0x158   :  { %v6180_v24 = vpop.eup %6179  ;;  %v1418_v29 = vmul.f32 %v6178_v1, %v9055_v39  ;;  %6205 = vtanh.f32 %v1364_v30  ;;  %5562 = vmatprep.subr.mxu0 %v7839_v63  ;;  %v1587_v1 = vpop.permute.xlu0 %1586 }
 0x159   :  { %v6182_v56 = vpop.eup %6181  ;;  %6207 = vtanh.f32 %v1367_v47  ;;  %5563 = vmatpush3.msra.mxu0 %v7839_v63 }
 0x15a   :  { %v7846_v60 = vpop.eup %6183  ;;  %6209 = vtanh.f32 %v1418_v29  ;;  %v1433_v48 = vmul.f32 %v6182_v56, %v9056_v31  ;;  %v9057_v56 = vld [vmem:[#allocation23_spill] sm:$0xff]  ;;  %v1305_v36 = vpop.permute.xlu1 %1304 }
 0x15b   :  { %v6186_v30 = vpop.eup %6185  ;;  %6211 = vpow2.f32 %v5064_v27 }
 0x15c   :  { %v6188_v4 = vpop.eup %6187  ;;  %6213 = vtanh.f32 %v1433_v48  ;;  %v1775_v47 = vadd.f32 1.0, %v6186_v30  ;;  %v1330_v48 = vmul.f32 %v1259_v59, %v9046_v17 }
 0x15d   :  { %v6190_v39 = vpop.eup %6189  ;;  %v1778_v57 = vadd.f32 1.0, %v6188_v4  ;;  %6215 = vpow2.f32 %v5067_v62  ;;  %v5063_v62 = vmul.f32 -1.442695, %v1644_v61  ;;  %v1341_v61 = vmul.f32 %v1309_v10, %v7516_v19 }
 0x15e   :  { %v6192_v29 = vpop.eup %6191  ;;  %6217 = vrcp.f32 %v1775_v47  ;;  %v1429_v31 = vmul.f32 %v6190_v39, %v9057_v56  ;;  %v1583_v47 = vpop.permute.xlu0 %1582  ;;  %v1362_v45 = vadd.f32 %v1330_v48, %v7081_v44 }
 0x15f   :  { %v6194_v27 = vpop.eup %6193  ;;  %6219 = vrcp.f32 %v1778_v57  ;;  %v1432_v46 = vmul.f32 %v6192_v29, %v9058_v8  ;;  %v1655_v8 = vadd.f32 %v1623_v3, %v7036_v11  ;;  %v1622_v57 = vmul.f32 %v1587_v1, %v7516_v19  ;;  %v1301_v1 = vpop.permute.xlu1 %1300 }
 0x160   :  { %v6196_v30 = vpop.eup %6195  ;;  %6221 = vtanh.f32 %v1429_v31  ;;  %v7860_v4 = vmul.f32 %v6194_v27, %v6176_v12  ;;  %v1621_v11 = vmul.f32 %v1583_v47, %v7516_v19 }
 0x161   :  { %v6198_v39 = vpop.eup %6197  ;;  %6223 = vtanh.f32 %v1432_v46  ;;  %v7862_v52 = vmul.f32 %v6196_v30, %v6180_v24  ;;  %v5074_v31 = vmul.f32 -1.442695, %v1655_v8 }
 0x162   :  { %v6200_v34 = vpop.eup %6199  ;;  %6225 = vtanh.f32 %v1363_v54  ;;  %5548 = vmatprep.subr.mxu1 %v7860_v4  ;;  %v1654_v54 = vadd.f32 %v1622_v57, %v7046_v16  ;;  %v1579_v27 = vpop.permute.xlu0 %1578  ;;  %v1339_v16 = vmul.f32 %v1301_v1, %v7516_v19  ;;  %v7900_v57 = vld [vmem:[%s8990_s4 + $0x8] sm:$0xff] }
 0x163   :  { %v6202_v17 = vpop.eup %6201  ;;  %v1774_v59 = vadd.f32 1.0, %v6200_v34  ;;  %6227 = vtanh.f32 %v1366_v23  ;;  %5564 = vmatprep.subr.mxu0 %v7862_v52  ;;  %5549 = vmatpush3.msra.mxu1 %v7860_v4  ;;  %v1340_v23 = vmul.f32 %v1305_v36, %v7516_v19 }
 0x164   :  { %v6204_v12 = vpop.eup %6203  ;;  %v1777_v24 = vadd.f32 1.0, %v6202_v17  ;;  %6229 = vpow2.f32 %v5063_v62  ;;  %5565 = vmatpush3.msra.mxu0 %v7862_v52  ;;  %v5073_v36 = vmul.f32 -1.442695, %v1654_v54 }
 0x165   :  { %v6206_v3 = vpop.eup %6205  ;;  %6231 = vrcp.f32 %v1774_v59  ;;  %5567 = vmatmul.mubr.msk.f32.vlgmr.msra.gmra.mxu0 %vm431_vm1, %v7428_v37  ;;  %v1373_v37 = vadd.f32 %v1341_v61, %v7040_v13  ;;  %v1372_v34 = vadd.f32 %v1340_v23, %v7053_v22  ;;  %v1371_v22 = vadd.f32 %v1339_v16, %v7070_v33  ;;  %v7909_v59 = vld [vmem:[%s8990_s4 + $0x10] sm:$0xff] }
 0x166   :  { %v6208_v29 = vpop.eup %6207  ;;  %6233 = vrcp.f32 %v1777_v24  ;;  %v1428_v56 = vmul.f32 %v6206_v3, %v7535_v9  ;;  %5569 = vmatprep.mubr.msk.f32.mxu0 %vm431_vm1, %v7436_v40  ;;  %v1653_v9 = vadd.f32 %v1621_v11, %v7063_v25 }
 0x167   :  { %v6210_v10 = vpop.eup %6209  ;;  %v1431_v46 = vmul.f32 %v6208_v29, %v7546_v0  ;;  %6235 = vtanh.f32 %v1362_v45  ;;  %v1620_v0 = vmul.f32 %v1579_v27, %v7516_v19  ;;  %v7923_v29 = vld [vmem:[%s8990_s4 + $0x18] sm:$0xff]  ;;  %v7936_v27 = vld [vmem:[%s8990_s4] sm:$0xff] }
 0x168   :  { %v6212_v48 = vpop.eup %6211  ;;  %6237 = vtanh.f32 %v1428_v56  ;;  %v7882_v30 = vmul.f32 %v6210_v10, %v6198_v39 }
 0x169   :  { %v6214_v62 = vpop.eup %6213  ;;  %6239 = vtanh.f32 %v1431_v46  ;;  %v1773_v40 = vadd.f32 1.0, %v6212_v48  ;;  %5570 = vmatmul.mubr.msk.f32.gmra.mxu0 %vm431_vm1, %v7454_v49  ;;  %v1297_v49 = vpop.permute.xlu1 %1296  ;;  %v1652_v45 = vadd.f32 %v1620_v0, %v7074_v38 }
 0x16a   :  { %v6216_v47 = vpop.eup %6215  ;;  %6241 = vpow2.f32 %v5074_v31  ;;  %5550 = vmatprep.subr.mxu1 %v7882_v30  ;;  %v7890_v13 = vmul.f32 %v6214_v62, %v6204_v12  ;;  %5594 = vmatprep.mubr.msk.f32.mxu0 %vm431_vm1, %v9047_v14  ;;  %v5072_v14 = vmul.f32 -1.442695, %v1653_v9  ;;  %v1338_v24 = vmul.f32 %v1297_v49, %v7516_v19 }
 0x16b   :  { %v6218_v25 = vpop.eup %6217  ;;  %6243 = vrcp.f32 %v1773_v40  ;;  %v1776_v39 = vadd.f32 1.0, %v6216_v47  ;;  %5551 = vmatpush3.msra.mxu1 %v7882_v30  ;;  %v5071_v56 = vmul.f32 -1.442695, %v1652_v45 }
 0x16c   :  { %v6220_v8 = vpop.eup %6219  ;;  %6245 = vtanh.f32 %v1373_v37  ;;  %5586 = vmatprep.subr.mxu0 %v7890_v13  ;;  %5553 = vmatmul.mubr.msk.f32.vlgmr.msra.gmra.mxu1 %vm431_vm1, %v7900_v57  ;;  %v1370_v54 = vadd.f32 %v1338_v24, %v7081_v44 }
 0x16d   :  { %v6222_v17 = vpop.eup %6221  ;;  %6247 = vrcp.f32 %v1776_v39  ;;  %5587 = vmatpush3.msra.mxu0 %v7890_v13  ;;  %5555 = vmatprep.mubr.msk.f32.mxu1 %vm431_vm1, %v7909_v59 }
 0x16e   :  { %v6224_v12 = vpop.eup %6223  ;;  %6249 = vpow2.f32 %v5073_v36  ;;  %v7915_v61 = vmul.f32 %v6222_v17, %v6218_v25 }
 0x16f   :  { %v6226_v11 = vpop.eup %6225  ;;  %6251 = vtanh.f32 %v1372_v34  ;;  %v7917_v3 = vmul.f32 %v6224_v12, %v6220_v8 }
 0x170   :  { %v6228_v33 = vpop.eup %6227  ;;  %v1427_v1 = vmul.f32 %v6226_v11, %v7592_v7  ;;  %6253 = vpow2.f32 %v5072_v14  ;;  %5556 = vmatmul.mubr.msk.f32.gmra.mxu1 %vm431_vm1, %v7923_v29  ;;  %5572 = vmatprep.subr.mxu1 %v7915_v61 }
 0x171   :  { %v6230_v38 = vpop.eup %6229  ;;  %v1430_v19 = vmul.f32 %v6228_v33, %v7600_v28  ;;  %6255 = vtanh.f32 %v1371_v22  ;;  %5588 = vmatprep.subr.mxu0 %v7917_v3  ;;  %5573 = vmatpush3.msra.mxu1 %v7915_v61 }
 0x172   :  { %v6232_v7 = vpop.eup %6231  ;;  %6257 = vtanh.f32 %v1427_v1  ;;  %v1772_v31 = vadd.f32 1.0, %v6230_v38  ;;  %5589 = vmatpush3.msra.mxu0 %v7917_v3  ;;  %5580 = vmatprep.mubr.msk.f32.mxu1 %vm431_vm1, %v7936_v27  ;;  %v9059_v1 = vld [vmem:[#allocation14_spill] sm:$0xff] }
 0x173   :  { %v6234_v28 = vpop.eup %6233  ;;  %6259 = vtanh.f32 %v1430_v19 }
 0x174   :  { %v6236_v10 = vpop.eup %6235  ;;  %6261 = vrcp.f32 %v1772_v31 }
 0x175   :  { %v6238_v46 = vpop.eup %6237  ;;  %v1426_v23 = vmul.f32 %v6236_v10, %v7641_v35  ;;  %6263 = vpow2.f32 %v5071_v56  ;;  %v9060_v56 = vld [vmem:[#allocation16_spill] sm:$0xff] }
 0x176   :  { %v6240_v48 = vpop.eup %6239  ;;  %6265 = vtanh.f32 %v1370_v54  ;;  %v7941_v44 = vmul.f32 %v6238_v46, %v6232_v7  ;;  %v9061_v7 = vld [vmem:[#allocation19_spill] sm:$0xff]  ;;  %v9063_v46 = vld [vmem:[#allocation26_spill] sm:$0xff] }
 0x177   :  { %v6242_v37 = vpop.eup %6241  ;;  %6267 = vtanh.f32 %v1426_v23  ;;  %v7943_v9 = vmul.f32 %v6240_v48, %v6234_v28  ;;  %v9062_v28 = vld [vmem:[#allocation22_spill] sm:$0xff] }
 0x178   :  { %v6244_v62 = vpop.eup %6243  ;;  %v1783_v40 = vadd.f32 1.0, %v6242_v37  ;;  %5574 = vmatprep.subr.mxu1 %v7941_v44 }
 0x179   :  { %v6246_v16 = vpop.eup %6245  ;;  %5590 = vmatprep.subr.mxu0 %v7943_v9  ;;  %5575 = vmatpush3.msra.mxu1 %v7941_v44 }
 0x17a   :  { %v6248_v0 = vpop.eup %6247  ;;  %6269 = vrcp.f32 %v1783_v40  ;;  %v1437_v35 = vmul.f32 %v6246_v16, %v7714_v42  ;;  %5591 = vmatpush3.msra.mxu0 %v7943_v9 }
 0x17b   :  { %v6250_v47 = vpop.eup %6249 }
 0x17c   :  { %v6252_v36 = vpop.eup %6251  ;;  %6271 = vtanh.f32 %v1437_v35  ;;  %v1782_v25 = vadd.f32 1.0, %v6250_v47 }
 0x17d   :  { %v6254_v39 = vpop.eup %6253  ;;  %v1436_v34 = vmul.f32 %v6252_v36, %v7789_v43 }
 0x17e   :  { %v6256_v49 = vpop.eup %6255  ;;  %6273 = vrcp.f32 %v1782_v25  ;;  %v1781_v8 = vadd.f32 1.0, %v6254_v39 }
 0x17f   :  { %v6258_v14 = vpop.eup %6257  ;;  %6275 = vtanh.f32 %v1436_v34  ;;  %v1435_v17 = vmul.f32 %v6256_v49, %v7826_v18 }
 0x180   :  { %v6260_v22 = vpop.eup %6259  ;;  %v7952_v45 = vmul.f32 %v6258_v14, %v6244_v62  ;;  %6277 = vrcp.f32 %v1781_v8  ;;  %v9064_v62 = vld [vmem:[#allocation27_spill] sm:$0xff] }
 0x181   :  { %v6262_v42 = vpop.eup %6261  ;;  %v7954_v12 = vmul.f32 %v6260_v22, %v6248_v0  ;;  %6279 = vtanh.f32 %v1435_v17 }
 0x182   :  { %v6264_v24 = vpop.eup %6263  ;;  %5576 = vmatprep.subr.mxu1 %v7952_v45 }
 0x183   :  { %v6266_v11 = vpop.eup %6265  ;;  %v1780_v43 = vadd.f32 1.0, %v6264_v24  ;;  %5592 = vmatprep.subr.mxu0 %v7954_v12  ;;  %5577 = vmatpush3.msra.mxu1 %v7952_v45 }
 0x184   :  { %v6268_v33 = vpop.eup %6267  ;;  %v1434_v18 = vmul.f32 %v6266_v11, %v7846_v60  ;;  %5593 = vmatpush3.msra.mxu0 %v7954_v12 }
 0x185   :  { %6281 = vrcp.f32 %v1780_v43  ;;  %5595 = vmatmul.mubr.msk.f32.vlgmr.msra.gmra.mxu0 %vm431_vm1, %v7900_v57  ;;  %5614 = vmatprep.subr.mxu0 %v9059_v1  ;;  %v7964_v38 = vmul.f32 %v6268_v33, %v6262_v42 }
 0x186   :  { %5615 = vmatpush3.msra.mxu0 %v9059_v1  ;;  %5597 = vmatprep.mubr.msk.f32.mxu0 %vm431_vm1, %v7909_v59  ;;  %6283 = vtanh.f32 %v1434_v18 }
 0x187   :  { %v6270_v19 = vpop.eup %6269  ;;  %5616 = vmatprep.subr.mxu0 %v9060_v56  ;;  %5578 = vmatprep.subr.mxu1 %v7964_v38 }
 0x188   :  { %5617 = vmatpush3.msra.mxu0 %v9060_v56  ;;  %5579 = vmatpush3.msra.mxu1 %v7964_v38 }
 0x189   :  { %v6272_v60 = vpop.eup %6271  ;;  %5598 = vmatmul.mubr.msk.f32.gmra.mxu0 %vm431_vm1, %v7923_v29  ;;  %5618 = vmatprep.subr.mxu0 %v9061_v7 }
 0x18a   :  { %5619 = vmatpush3.msra.mxu0 %v9061_v7  ;;  %5581 = vmatmul.mubr.msk.f32.vlgmr.msra.gmra.mxu1 %vm431_vm1, %v7900_v57  ;;  %v7979_v31 = vmul.f32 %v6272_v60, %v6270_v19 }
 0x18b   :  { %v6274_v54 = vpop.eup %6273  ;;  %5620 = vmatprep.subr.mxu0 %v9062_v28  ;;  %5622 = vmatprep.mubr.msk.f32.mxu0 %vm431_vm1, %v7670_v15 }
 0x18c   :  { %v6276_v10 = vpop.eup %6275  ;;  %5621 = vmatpush3.msra.mxu0 %v9062_v28  ;;  %5600 = vmatprep.subr.mxu1 %v7979_v31 }
 0x18d   :  { %5623 = vmatmul.mubr.msk.f32.vlgmr.msra.gmra.mxu0 %vm431_vm1, %v7687_v51  ;;  %5642 = vmatprep.subr.mxu0 %v9063_v46  ;;  %v7989_v23 = vmul.f32 %v6276_v10, %v6274_v54  ;;  %v6278_v48 = vpop.eup %6277 }
 0x18e   :  { %5583 = vmatprep.mubr.msk.f32.mxu1 %vm431_vm1, %v7909_v59  ;;  %5601 = vmatpush3.msra.mxu1 %v7979_v31  ;;  %v6280_v37 = vpop.eup %6279 }
 0x18f   :  { %5643 = vmatpush3.msra.mxu0 %v9063_v46  ;;  %5584 = vmatmul.mubr.msk.f32.gmra.mxu1 %vm431_vm1, %v7923_v29  ;;  %v8002_v40 = vmul.f32 %v6280_v37, %v6278_v48 }
 0x190   :  { %5644 = vmatprep.subr.mxu0 %v9064_v62  ;;  %5625 = vmatprep.mubr.msk.f32.mxu0 %vm431_vm1, %v7700_v26 }
 0x191   :  { %5645 = vmatpush3.msra.mxu0 %v9064_v62  ;;  %5602 = vmatprep.subr.mxu1 %v7989_v23 }
 0x192   :  { %v6282_v16 = vpop.eup %6281  ;;  %5626 = vmatmul.mubr.msk.f32.gmra.mxu0 %vm431_vm1, %v7721_v20  ;;  %5646 = vmatprep.subr.mxu0 %v7619_v50 }
 0x193   :  { %5603 = vmatpush3.msra.mxu1 %v7989_v23  ;;  %5647 = vmatpush3.msra.mxu0 %v7619_v50  ;;  %v6284_v0 = vpop.eup %6283 }
 0x194   :  { %5648 = vmatprep.subr.mxu0 %v7665_v21  ;;  %5650 = vmatprep.mubr.msk.f32.mxu0 %vm431_vm1, %v7670_v15  ;;  %v8014_v35 = vmul.f32 %v6284_v0, %v6282_v16 }
 0x195   :  { %5649 = vmatpush3.msra.mxu0 %v7665_v21  ;;  %5604 = vmatprep.subr.mxu1 %v8002_v40 }
 0x196   :  { %5651 = vmatmul.mubr.msk.f32.vlgmr.msra.gmra.mxu0 %vm431_vm1, %v7687_v51  ;;  %5670 = vmatprep.subr.mxu0 %v7740_v53 }
 0x197   :  { %5605 = vmatpush3.msra.mxu1 %v8002_v40  ;;  %5671 = vmatpush3.msra.mxu0 %v7740_v53 }
 0x198   :  { %5672 = vmatprep.subr.mxu0 %v7804_v32  ;;  %5653 = vmatprep.mubr.msk.f32.mxu0 %vm431_vm1, %v7700_v26 }
 0x199   :  { %5673 = vmatpush3.msra.mxu0 %v7804_v32  ;;  %5606 = vmatprep.subr.mxu1 %v8014_v35 }
 0x19a   :  { %5654 = vmatmul.mubr.msk.f32.gmra.mxu0 %vm431_vm1, %v7721_v20  ;;  %5674 = vmatprep.subr.mxu0 %v7839_v63 }
 0x19b   :  { %5607 = vmatpush3.msra.mxu1 %v8014_v35  ;;  %5608 = vmatprep.mubr.msk.f32.mxu1 %vm431_vm1, %v7936_v27  ;;  %v9068_v27 = vld [vmem:[#allocation25_spill] sm:$0xff] }
 0x19c   :  { %5675 = vmatpush3.msra.mxu0 %v7839_v63  ;;  %5609 = vmatmul.mubr.msk.f32.vlgmr.msra.gmra.mxu1 %vm431_vm1, %v7900_v57  ;;  %v9065_v57 = vld [vmem:[#allocation11_spill] sm:$0xff] }
 0x19d   :  { %5628 = vmatprep.subr.mxu1 %v7646_v58  ;;  %5676 = vmatprep.subr.mxu0 %v7862_v52 }
 0x19e   :  { %5629 = vmatpush3.msra.mxu1 %v7646_v58  ;;  %5677 = vmatpush3.msra.mxu0 %v7862_v52 }
 0x19f   :  { %5678 = vmatprep.mubr.msk.f32.mxu0 %vm431_vm1, %v7670_v15  ;;  %5630 = vmatprep.subr.mxu1 %v7649_v6 }
 0x1a0   :  { %5679 = vmatmul.mubr.msk.f32.vlgmr.msra.gmra.mxu0 %vm431_vm1, %v7687_v51  ;;  %5698 = vmatprep.subr.mxu0 %v7890_v13 }
 0x1a1   :  { %5611 = vmatprep.mubr.msk.f32.mxu1 %vm431_vm1, %v7909_v59  ;;  %5631 = vmatpush3.msra.mxu1 %v7649_v6  ;;  %v9066_v59 = vld [vmem:[#allocation12_spill] sm:$0xff] }
 0x1a2   :  { %5699 = vmatpush3.msra.mxu0 %v7890_v13  ;;  %5612 = vmatmul.mubr.msk.f32.gmra.mxu1 %vm431_vm1, %v7923_v29  ;;  %v9067_v29 = vld [vmem:[#allocation10_spill] sm:$0xff] }
 0x1a3   :  { %5632 = vmatprep.subr.mxu1 %v7658_v41  ;;  %5700 = vmatprep.subr.mxu0 %v7917_v3 }
 0x1a4   :  { %5633 = vmatpush3.msra.mxu1 %v7658_v41  ;;  %5681 = vmatprep.mubr.msk.f32.mxu0 %vm431_vm1, %v7700_v26 }
 0x1a5   :  { %5701 = vmatpush3.msra.mxu0 %v7917_v3  ;;  %5634 = vmatprep.subr.mxu1 %v7732_v5 }
 0x1a6   :  { %5682 = vmatmul.mubr.msk.f32.gmra.mxu0 %vm431_vm1, %v7721_v20  ;;  %5702 = vmatprep.subr.mxu0 %v7943_v9 }
 0x1a7   :  { %5635 = vmatpush3.msra.mxu1 %v7732_v5  ;;  %5636 = vmatprep.mubr.msk.f32.mxu1 %vm431_vm1, %v7670_v15 }
 0x1a8   :  { %5703 = vmatpush3.msra.mxu0 %v7943_v9  ;;  %5637 = vmatmul.mubr.msk.f32.vlgmr.msra.gmra.mxu1 %vm431_vm1, %v7687_v51 }
 0x1a9   :  { %5656 = vmatprep.subr.mxu1 %v7800_v2  ;;  %5704 = vmatprep.subr.mxu0 %v7954_v12 }
 0x1aa   :  { %5657 = vmatpush3.msra.mxu1 %v7800_v2  ;;  %5705 = vmatpush3.msra.mxu0 %v7954_v12 }
 0x1ab   :  { %5706 = vmatprep.mubr.msk.f32.mxu0 %vm431_vm1, %v7670_v15  ;;  %5658 = vmatprep.subr.mxu1 %v7834_v55 }
 0x1ac   :  { %5707 = vmatmul.mubr.msk.f32.vlgmr.msra.gmra.mxu0 %vm431_vm1, %v7687_v51  ;;  %5726 = vmatprep.subr.mxu0 %v9059_v1 }
 0x1ad   :  { %5639 = vmatprep.mubr.msk.f32.mxu1 %vm431_vm1, %v7700_v26  ;;  %5659 = vmatpush3.msra.mxu1 %v7834_v55 }
 0x1ae   :  { %5727 = vmatpush3.msra.mxu0 %v9059_v1  ;;  %5640 = vmatmul.mubr.msk.f32.gmra.mxu1 %vm431_vm1, %v7721_v20 }
 0x1af   :  { %5660 = vmatprep.subr.mxu1 %v7860_v4  ;;  %5728 = vmatprep.subr.mxu0 %v9060_v56 }
 0x1b0   :  { %5661 = vmatpush3.msra.mxu1 %v7860_v4  ;;  %5709 = vmatprep.mubr.msk.f32.mxu0 %vm431_vm1, %v7700_v26 }
 0x1b1   :  { %5729 = vmatpush3.msra.mxu0 %v9060_v56  ;;  %5662 = vmatprep.subr.mxu1 %v7882_v30 }
 0x1b2   :  { %5710 = vmatmul.mubr.msk.f32.gmra.mxu0 %vm431_vm1, %v7721_v20  ;;  %5730 = vmatprep.subr.mxu0 %v9061_v7 }
 0x1b3   :  { %5663 = vmatpush3.msra.mxu1 %v7882_v30  ;;  %5664 = vmatprep.mubr.msk.f32.mxu1 %vm431_vm1, %v7670_v15 }
 0x1b4   :  { %5731 = vmatpush3.msra.mxu0 %v9061_v7  ;;  %5665 = vmatmul.mubr.msk.f32.vlgmr.msra.gmra.mxu1 %vm431_vm1, %v7687_v51 }
 0x1b5   :  { %5684 = vmatprep.subr.mxu1 %v7915_v61  ;;  %5732 = vmatprep.subr.mxu0 %v9062_v28 }
 0x1b6   :  { %5685 = vmatpush3.msra.mxu1 %v7915_v61  ;;  %5733 = vmatpush3.msra.mxu0 %v9062_v28 }
 0x1b7   :  { %5734 = vmatprep.mubr.msk.f32.mxu0 %vm431_vm1, %v9065_v57  ;;  %5686 = vmatprep.subr.mxu1 %v7941_v44 }
 0x1b8   :  { %5735 = vmatmul.mubr.msk.f32.vlgmr.msra.gmra.mxu0 %vm431_vm1, %v9066_v59  ;;  %5754 = vmatprep.subr.mxu0 %v9063_v46 }
 0x1b9   :  { %5667 = vmatprep.mubr.msk.f32.mxu1 %vm431_vm1, %v7700_v26  ;;  %5687 = vmatpush3.msra.mxu1 %v7941_v44 }
 0x1ba   :  { %5755 = vmatpush3.msra.mxu0 %v9063_v46  ;;  %5668 = vmatmul.mubr.msk.f32.gmra.mxu1 %vm431_vm1, %v7721_v20 }
 0x1bb   :  { %5688 = vmatprep.subr.mxu1 %v7952_v45  ;;  %5756 = vmatprep.subr.mxu0 %v9064_v62 }
 0x1bc   :  { %5689 = vmatpush3.msra.mxu1 %v7952_v45  ;;  %5737 = vmatprep.mubr.msk.f32.mxu0 %vm431_vm1, %v9067_v29 }
 0x1bd   :  { %5757 = vmatpush3.msra.mxu0 %v9064_v62  ;;  %5690 = vmatprep.subr.mxu1 %v7964_v38 }
 0x1be   :  { %5738 = vmatmul.mubr.msk.f32.gmra.mxu0 %vm431_vm1, %v9068_v27  ;;  %5758 = vmatprep.subr.mxu0 %v7619_v50 }
 0x1bf   :  { %5691 = vmatpush3.msra.mxu1 %v7964_v38  ;;  %5692 = vmatprep.mubr.msk.f32.mxu1 %vm431_vm1, %v7670_v15  ;;  %v6742_v15 = vld [vmem:[%s8990_s4 + $0x48] sm:$0xff] }
 0x1c0   :  { %5759 = vmatpush3.msra.mxu0 %v7619_v50  ;;  %5693 = vmatmul.mubr.msk.f32.vlgmr.msra.gmra.mxu1 %vm431_vm1, %v7687_v51  ;;  %v6740_v50 = vld [vmem:[%s8990_s4 + $0x20] sm:$0xff] }
 0x1c1   :  { %5712 = vmatprep.subr.mxu1 %v7979_v31  ;;  %5760 = vmatprep.subr.mxu0 %v7665_v21 }
 0x1c2   :  { %5713 = vmatpush3.msra.mxu1 %v7979_v31  ;;  %5761 = vmatpush3.msra.mxu0 %v7665_v21 }
 0x1c3   :  { %5762 = vmatprep.mubr.msk.f32.mxu0 %vm431_vm1, %v9065_v57  ;;  %5714 = vmatprep.subr.mxu1 %v7989_v23 }
 0x1c4   :  { %5763 = vmatmul.mubr.msk.f32.vlgmr.msra.gmra.mxu0 %vm431_vm1, %v9066_v59  ;;  %5782 = vmatprep.subr.mxu0 %v7740_v53 }
 0x1c5   :  { %5695 = vmatprep.mubr.msk.f32.mxu1 %vm431_vm1, %v7700_v26  ;;  %5715 = vmatpush3.msra.mxu1 %v7989_v23  ;;  %v5512_v24 = vpop.f32.mrf.mxu0 }
 0x1c6   :  { %5783 = vmatpush3.msra.mxu0 %v7740_v53  ;;  %5696 = vmatmul.mubr.msk.f32.gmra.mxu1 %vm431_vm1, %v7721_v20 }
 0x1c7   :  { %5716 = vmatprep.subr.mxu1 %v8002_v40  ;;  %5784 = vmatprep.subr.mxu0 %v7804_v32  ;;  %v1978_v7 = vpop.f32.mrf.mxu0 }
 0x1c8   :  { %5717 = vmatpush3.msra.mxu1 %v8002_v40  ;;  %5765 = vmatprep.mubr.msk.f32.mxu0 %vm431_vm1, %v9067_v29 }
 0x1c9   :  { %5785 = vmatpush3.msra.mxu0 %v7804_v32  ;;  %5718 = vmatprep.subr.mxu1 %v8014_v35 }
 0x1ca   :  { %5766 = vmatmul.mubr.msk.f32.gmra.mxu0 %vm431_vm1, %v9068_v27  ;;  %5786 = vmatprep.subr.mxu0 %v7839_v63 }
 0x1cb   :  { %5719 = vmatpush3.msra.mxu1 %v8014_v35  ;;  %5720 = vmatprep.mubr.msk.f32.mxu1 %vm431_vm1, %v6740_v50 }
 0x1cc   :  { %5787 = vmatpush3.msra.mxu0 %v7839_v63  ;;  %5721 = vmatmul.mubr.msk.f32.vlgmr.msra.gmra.mxu1 %vm431_vm1, %v7687_v51  ;;  %v6743_v51 = vld [vmem:[%s8990_s4 + $0x50] sm:$0xff] }
 0x1cd   :  { %5740 = vmatprep.subr.mxu1 %v7646_v58  ;;  %5788 = vmatprep.subr.mxu0 %v7862_v52 }
 0x1ce   :  { %5741 = vmatpush3.msra.mxu1 %v7646_v58  ;;  %5789 = vmatpush3.msra.mxu0 %v7862_v52  ;;  %v6741_v58 = vld [vmem:[%s8990_s4 + $0x40] sm:$0xff]  ;;  %s6790_s4 = smov [#allocation3]  }
 0x1cf   :  { %5790 = vmatprep.mubr.msk.f32.mxu0 %vm431_vm1, %v9065_v57  ;;  %5742 = vmatprep.subr.mxu1 %v7649_v6  ;;  %s4943_s21 = sshll.u32 %s6790_s4, 4  ;;  %s4944_s21 = int_to_ptr.vmem [resolvable:$true] %s4943_s21 }
 0x1d0   :  { %5791 = vmatmul.mubr.msk.f32.vlgmr.msra.gmra.mxu0 %vm431_vm1, %v9066_v59  ;;  %5810 = vmatprep.subr.mxu0 %v7890_v13 }
 0x1d1   :  { %5723 = vmatprep.mubr.msk.f32.mxu1 %vm431_vm1, %v7700_v26  ;;  %5743 = vmatpush3.msra.mxu1 %v7649_v6  ;;  %v8233_v6 = vpop.permute.xlu1 %378 }
 0x1d2   :  { %5811 = vmatpush3.msra.mxu0 %v7890_v13  ;;  %5724 = vmatmul.mubr.msk.f32.gmra.mxu1 %vm431_vm1, %v7721_v20 }
 0x1d3   :  { %5744 = vmatprep.subr.mxu1 %v7658_v41  ;;  %5812 = vmatprep.subr.mxu0 %v7917_v3 }
 0x1d4   :  { %5745 = vmatpush3.msra.mxu1 %v7658_v41  ;;  %5793 = vmatprep.mubr.msk.f32.mxu0 %vm431_vm1, %v9067_v29  ;;  %v8247_v41 = vpop.permute.xlu0 %373 }
 0x1d5   :  { %5813 = vmatpush3.msra.mxu0 %v7917_v3  ;;  %5746 = vmatprep.subr.mxu1 %v7732_v5  ;;  %v8251_v21 = vpop.permute.xlu1 %388 }
 0x1d6   :  { %5794 = vmatmul.mubr.msk.f32.gmra.mxu0 %vm431_vm1, %v9068_v27  ;;  %5814 = vmatprep.subr.mxu0 %v7943_v9 }
 0x1d7   :  { %5747 = vmatpush3.msra.mxu1 %v7732_v5  ;;  %5748 = vmatprep.mubr.msk.f32.mxu1 %vm431_vm1, %v9065_v57 }
 0x1d8   :  { %5815 = vmatpush3.msra.mxu0 %v7943_v9  ;;  %5749 = vmatmul.mubr.msk.f32.vlgmr.msra.gmra.mxu1 %vm431_vm1, %v9066_v59  ;;  %v8266_v26 = vpop.permute.xlu0 %383 }
 0x1d9   :  { %5768 = vmatprep.subr.mxu1 %v7800_v2  ;;  %5816 = vmatprep.subr.mxu0 %v7954_v12  ;;  %v8269_v20 = vpop.permute.xlu1 %418 }
 0x1da   :  { %5769 = vmatpush3.msra.mxu1 %v7800_v2  ;;  %5817 = vmatpush3.msra.mxu0 %v7954_v12 }
 0x1db   :  { %5818 = vmatprep.mubr.msk.f32.mxu0 %vm431_vm1, %v9065_v57  ;;  %5770 = vmatprep.subr.mxu1 %v7834_v55 }
 0x1dc   :  { %5819 = vmatmul.mubr.msk.f32.vlgmr.msra.gmra.mxu0 %vm431_vm1, %v9066_v59  ;;  %5824 = vmatprep.subr.mxu0 %v7979_v31  ;;  %v8280_v53 = vpop.permute.xlu0 %413 }
 0x1dd   :  { %5751 = vmatprep.mubr.msk.f32.mxu1 %vm431_vm1, %v9067_v29  ;;  %5771 = vmatpush3.msra.mxu1 %v7834_v55  ;;  %v8283_v32 = vpop.permute.xlu1 %398 }
 0x1de   :  { %5825 = vmatpush3.msra.mxu0 %v7979_v31  ;;  %5752 = vmatmul.mubr.msk.f32.gmra.mxu1 %vm431_vm1, %v9068_v27 }
 0x1df   :  { %5772 = vmatprep.subr.mxu1 %v7860_v4  ;;  %5826 = vmatprep.subr.mxu0 %v7989_v23 }
 0x1e0   :  { %5773 = vmatpush3.msra.mxu1 %v7860_v4  ;;  %5821 = vmatprep.mubr.msk.f32.mxu0 %vm431_vm1, %v9067_v29  ;;  %v8287_v3 = vpop.permute.xlu0 %393 }
 0x1e1   :  { %5827 = vmatpush3.msra.mxu0 %v7989_v23  ;;  %5774 = vmatprep.subr.mxu1 %v7882_v30  ;;  %v8290_v47 = vpop.permute.xlu1 %403 }
 0x1e2   :  { %5822 = vmatmul.mubr.msk.f32.gmra.mxu0 %vm431_vm1, %v9068_v27  ;;  %5828 = vmatprep.subr.mxu0 %v8002_v40 }
 0x1e3   :  { %5775 = vmatpush3.msra.mxu1 %v7882_v30  ;;  %5776 = vmatprep.mubr.msk.f32.mxu1 %vm431_vm1, %v6741_v58 }
 0x1e4   :  { %5829 = vmatpush3.msra.mxu0 %v8002_v40  ;;  %5777 = vmatmul.mubr.msk.f32.vlgmr.msra.gmra.mxu1 %vm431_vm1, %v9066_v59  ;;  %v8292_v49 = vpop.permute.xlu0 %423 }
 0x1e5   :  { %5796 = vmatprep.subr.mxu1 %v7915_v61  ;;  %5830 = vmatprep.subr.mxu0 %v8014_v35  ;;  %v8295_v14 = vpop.permute.xlu1 %408 }
 0x1e6   :  { %5797 = vmatpush3.msra.mxu1 %v7915_v61  ;;  %5831 = vmatpush3.msra.mxu0 %v8014_v35 }
 0x1e7   :  { %5832 = vmatprep.mubr.msk.f32.mxu0 %vm431_vm1, %v6741_v58  ;;  %5798 = vmatprep.subr.mxu1 %v7941_v44 }
 0x1e8   :  { %5833 = vmatmul.mubr.msk.f32.vlgmr.msra.gmra.mxu0 %vm431_vm1, %v9066_v59  ;;  %5779 = vmatprep.mubr.msk.f32.mxu1 %vm431_vm1, %v9067_v29  ;;  %v8302_v56 = vpop.permute.xlu0 %428 }
 0x1e9   :  { %5799 = vmatpush3.msra.mxu1 %v7941_v44 }
 0x1ea   :  { %5780 = vmatmul.mubr.msk.f32.gmra.mxu1 %vm431_vm1, %v9068_v27  ;;  %5800 = vmatprep.subr.mxu1 %v7952_v45 }
 0x1eb   :  { %5801 = vmatpush3.msra.mxu1 %v7952_v45  ;;  %5804 = vmatprep.mubr.msk.f32.mxu1 %vm431_vm1, %v6741_v58 }
 0x1ec   :  { %5802 = vmatprep.subr.mxu1 %v7964_v38 }
 0x1ed   :  { %5803 = vmatpush3.msra.mxu1 %v7964_v38 }
 0x1ee   :  { %5805 = vmatmul.mubr.msk.f32.vlgmr.msra.gmra.mxu1 %vm431_vm1, %v6742_v15  ;;  %5838 = vmatprep.subr.mxu1 %v7979_v31 }
 0x1ef   :  { %5842 = vmatpush3.msra.mxu1 %v7979_v31  ;;  %5807 = vmatprep.mubr.msk.f32.mxu1 %vm431_vm1, %v6743_v51 }
 0x1f0   :  { %5839 = vmatprep.subr.mxu1 %v7989_v23 }
 0x1f1   :  { %5843 = vmatpush3.msra.mxu1 %v7989_v23 }
 0x1f2   :  { %5808 = vmatmul.mubr.msk.f32.gmra.mxu1 %vm431_vm1, %v9068_v27  ;;  %5840 = vmatprep.subr.mxu1 %v8002_v40 }
 0x1f3   :  { %5844 = vmatpush3.msra.mxu1 %v8002_v40  ;;  %5835 = vmatprep.mubr.msk.f32.mxu1 %vm431_vm1, %v6743_v51  ;;  %v5515_v40 = vpop.f32.mrf.mxu0 }
 0x1f4   :  { %5841 = vmatprep.subr.mxu1 %v8014_v35 }
 0x1f5   :  { %5845 = vmatpush3.msra.mxu1 %v8014_v35  ;;  %v1988_v35 = vpop.f32.mrf.mxu0 }
 0x1f6   :  { %5836 = vmatmul.mubr.msk.f32.vlgmr.msra.gmra.mxu1 %vm431_vm1, %v9068_v27  ;;  %v5486_v5 = vpop.f32.mrf.mxu1 }
 0x1f7   :  { %v540_v2 = vadd.f32 %v5486_v5, %v8233_v6 }
 0x1f8   :  { %v534_v55 = vpop.f32.mrf.mxu1 }
 0x1f9   :  { %v5006_v63 = vmul.f32 -1.442695, %v540_v2  ;;  %v535_v4 = vadd.f32 %v534_v55, %v8247_v41 }
 0x1fa   :  { %v5489_v52 = vpop.f32.mrf.mxu1 }
 0x1fb   :  { %6285 = vpow2.f32 %v5006_v63  ;;  %v5005_v30 = vmul.f32 -1.442695, %v535_v4  ;;  %v550_v13 = vadd.f32 %v5489_v52, %v8251_v21 }
 0x1fc   :  { %v544_v61 = vpop.f32.mrf.mxu1 }
 0x1fd   :  { %6287 = vpow2.f32 %v5005_v30  ;;  %v5008_v44 = vmul.f32 -1.442695, %v550_v13  ;;  %v545_v9 = vadd.f32 %v544_v61, %v8266_v26  ;;  %v5540_v29 = vpop.f32.mrf.mxu0  ;;  %v1984_v61 = vadd.f32 %v5512_v24, %v8233_v6 }
 0x1fe   :  { %v5492_v36 = vpop.f32.mrf.mxu1  ;;  %v2154_v24 = vadd.f32 %v5540_v29, %v8233_v6 }
 0x1ff   :  { %6289 = vpow2.f32 %v5008_v44  ;;  %v5007_v25 = vmul.f32 -1.442695, %v545_v9  ;;  %v560_v8 = vadd.f32 %v5492_v36, %v8283_v32  ;;  %v2148_v5 = vpop.f32.mrf.mxu0 }
 0x200   :  { %v554_v39 = vpop.f32.mrf.mxu1 }
 0x201   :  { %6291 = vpow2.f32 %v5007_v25  ;;  %v555_v17 = vadd.f32 %v554_v39, %v8287_v3  ;;  %v5543_v9 = vpop.f32.mrf.mxu0  ;;  %v1979_v25 = vadd.f32 %v1978_v7, %v8247_v41  ;;  %v5116_v7 = vmul.f32 -1.442695, %v2154_v24 }
 0x202   :  { %v5495_v34 = vpop.f32.mrf.mxu1  ;;  %6293 = vtanh.f32 %v560_v8 }
 0x203   :  { %v570_v45 = vadd.f32 %v5495_v34, %v8295_v14  ;;  %6295 = vtanh.f32 %v555_v17  ;;  %v1994_v17 = vadd.f32 %v5515_v40, %v8251_v21 }
 0x204   :  { %v564_v22 = vpop.f32.mrf.mxu1 }
 0x205   :  { %v565_v42 = vadd.f32 %v564_v22, %v8290_v47  ;;  %6297 = vtanh.f32 %v570_v45  ;;  %v1989_v45 = vadd.f32 %v1988_v35, %v8266_v26 }
 0x206   :  { %v5498_v12 = vpop.f32.mrf.mxu1 }
 0x207   :  { %v580_v11 = vadd.f32 %v5498_v12, %v8269_v20  ;;  %6299 = vtanh.f32 %v565_v42  ;;  %v5108_v12 = vmul.f32 -1.442695, %v1984_v61 }
 0x208   :  { %v6286_v43 = vpop.eup %6285  ;;  %v574_v33 = vpop.f32.mrf.mxu1 }
 0x209   :  { %v630_v18 = vadd.f32 1.0, %v6286_v43  ;;  %v5002_v1 = vmul.f32 -1.442695, %v580_v11  ;;  %v575_v38 = vadd.f32 %v574_v33, %v8280_v53  ;;  %v2158_v11 = vpop.f32.mrf.mxu0  ;;  %v5107_v43 = vmul.f32 -1.442695, %v1979_v25 }
 0x20a   :  { %v6288_v19 = vpop.eup %6287  ;;  %v5501_v60 = vpop.f32.mrf.mxu1  ;;  %v2149_v33 = vadd.f32 %v2148_v5, %v8247_v41 }
 0x20b   :  { %6301 = vrcp.f32 %v630_v18  ;;  %v629_v31 = vadd.f32 1.0, %v6288_v19  ;;  %v5001_v54 = vmul.f32 -1.442695, %v575_v38  ;;  %v590_v28 = vadd.f32 %v5501_v60, %v8302_v56 }
 0x20c   :  { %v6290_v10 = vpop.eup %6289  ;;  %6303 = vpow2.f32 %v5002_v1  ;;  %v584_v46 = vpop.f32.mrf.mxu1  ;;  %v5110_v1 = vmul.f32 -1.442695, %v1994_v17  ;;  %v2164_v38 = vadd.f32 %v5543_v9, %v8251_v21  ;;  %v5109_v19 = vmul.f32 -1.442695, %v1989_v45 }
 0x20d   :  { %6305 = vrcp.f32 %v629_v31  ;;  %v632_v23 = vadd.f32 1.0, %v6290_v10  ;;  %v5004_v48 = vmul.f32 -1.442695, %v590_v28  ;;  %v585_v37 = vadd.f32 %v584_v46, %v8292_v49 }
 0x20e   :  { %v6292_v62 = vpop.eup %6291  ;;  %6307 = vpow2.f32 %v5001_v54  ;;  %v5526_v34 = vpop.f32.mrf.mxu1  ;;  %v2159_v60 = vadd.f32 %v2158_v11, %v8266_v26  ;;  %v5115_v54 = vmul.f32 -1.442695, %v2149_v33  ;;  %v5118_v10 = vmul.f32 -1.442695, %v2164_v38 }
 0x20f   :  { %6309 = vrcp.f32 %v632_v23  ;;  %v631_v16 = vadd.f32 1.0, %v6292_v62  ;;  %v5003_v0 = vmul.f32 -1.442695, %v585_v37  ;;  %v6294_v57 = vpop.eup %6293  ;;  %v2069_v31 = vadd.f32 %v5526_v34, %v8233_v6 }
 0x210   :  { %6311 = vpow2.f32 %v5004_v48  ;;  %v6296_v59 = vpop.eup %6295  ;;  %v2063_v18 = vpop.f32.mrf.mxu1  ;;  %v5117_v48 = vmul.f32 -1.442695, %v2159_v60 }
 0x211   :  { %6313 = vrcp.f32 %v631_v16  ;;  %v2064_v46 = vadd.f32 %v2063_v18, %v8247_v41  ;;  %v5112_v62 = vmul.f32 -1.442695, %v2069_v31 }
 0x212   :  { %6315 = vpow2.f32 %v5003_v0  ;;  %v6298_v27 = vpop.eup %6297  ;;  %v5529_v28 = vpop.f32.mrf.mxu1 }
 0x213   :  { %v2079_v40 = vadd.f32 %v5529_v28, %v8251_v21 }
 0x214   :  { %v6300_v50 = vpop.eup %6299  ;;  %v2073_v35 = vpop.f32.mrf.mxu1 }
 0x218   :  { %v6302_v58 = vpop.eup %6301 }
 0x219   :  { %v6304_v15 = vpop.eup %6303  ;;  %v646_v51 = vmul.f32 %v6302_v58, %v6294_v57  ;;  %v5114_v58 = vmul.f32 -1.442695, %v2079_v40 }
 0x21a   :  { %v6306_v2 = vpop.eup %6305  ;;  %v606_v55 = vadd.f32 1.0, %v6304_v15  ;;  %v2074_v15 = vadd.f32 %v2073_v35, %v8266_v26 }
 0x21b   :  { %v6308_v63 = vpop.eup %6307  ;;  %6317 = vtanh.f32 %v646_v51  ;;  %v645_v4 = vmul.f32 %v6306_v2, %v6296_v59  ;;  %v5111_v59 = vmul.f32 -1.442695, %v2064_v46 }
 0x21c   :  { %v6310_v52 = vpop.eup %6309  ;;  %6319 = vrcp.f32 %v606_v55  ;;  %v605_v30 = vadd.f32 1.0, %v6308_v63 }
 0x21d   :  { %v6312_v13 = vpop.eup %6311  ;;  %6321 = vtanh.f32 %v645_v4  ;;  %v648_v44 = vmul.f32 %v6310_v52, %v6298_v27  ;;  %v5113_v4 = vmul.f32 -1.442695, %v2074_v15 }
 0x21e   :  { %v6314_v36 = vpop.eup %6313  ;;  %6323 = vrcp.f32 %v605_v30  ;;  %v608_v39 = vadd.f32 1.0, %v6312_v13 }
 0x21f   :  { %v6316_v8 = vpop.eup %6315  ;;  %6325 = vtanh.f32 %v648_v44  ;;  %v647_v22 = vmul.f32 %v6314_v36, %v6300_v50 }
 0x220   :  { %6327 = vrcp.f32 %v608_v39  ;;  %v607_v42 = vadd.f32 1.0, %v6316_v8 }
 0x221   :  { %6329 = vtanh.f32 %v647_v22 }
 0x222   :  { %6331 = vrcp.f32 %v607_v42 }
 0x223   :  { %6333 = vpow2.f32 %v5108_v12 }
 0x224   :  { %6335 = vpow2.f32 %v5107_v43 }
 0x225   :  { %6337 = vpow2.f32 %v5110_v1  ;;  %v5568_v63 = vpop.f32.mrf.mxu0 }
 0x226   :  { %6339 = vpow2.f32 %v5109_v19  ;;  %v2324_v33 = vadd.f32 %v5568_v63, %v8233_v6 }
 0x227   :  { %6341 = vpow2.f32 %v5116_v7  ;;  %v2318_v61 = vpop.f32.mrf.mxu0 }
 0x228   :  { %v6318_v23 = vpop.eup %6317  ;;  %6343 = vpow2.f32 %v5115_v54  ;;  %v2319_v19 = vadd.f32 %v2318_v61, %v8247_v41  ;;  %v5124_v28 = vmul.f32 -1.442695, %v2324_v33 }
 0x229   :  { %v6320_v37 = vpop.eup %6319  ;;  %6345 = vpow2.f32 %v5118_v10  ;;  %v5571_v45 = vpop.f32.mrf.mxu0 }
 0x22a   :  { %v6322_v16 = vpop.eup %6321  ;;  %v8317_v0 = vmul.f32 %v6320_v37, %v6318_v23  ;;  %6347 = vpow2.f32 %v5117_v48  ;;  %v2334_v10 = vadd.f32 %v5571_v45, %v8251_v21  ;;  %v5123_v48 = vmul.f32 -1.442695, %v2319_v19 }
 0x22b   :  { %v6324_v57 = vpop.eup %6323  ;;  %6349 = vpow2.f32 %v5112_v62  ;;  %v2328_v60 = vpop.f32.mrf.mxu0 }
 0x22c   :  { %v6326_v29 = vpop.eup %6325  ;;  %v8319_v27 = vmul.f32 %v6324_v57, %v6322_v16  ;;  %6351 = vpow2.f32 %v5111_v59  ;;  %v5554_v36 = vpop.f32.mrf.mxu1  ;;  %v2329_v23 = vadd.f32 %v2328_v60, %v8266_v26  ;;  %v5126_v35 = vmul.f32 -1.442695, %v2334_v10 }
 0x22d   :  { %v6328_v50 = vpop.eup %6327  ;;  %6353 = vpow2.f32 %v5114_v58  ;;  %v2239_v37 = vadd.f32 %v5554_v36, %v8233_v6 }
 0x22e   :  { %v6330_v51 = vpop.eup %6329  ;;  %v8322_v5 = vmul.f32 %v6328_v50, %v6326_v29  ;;  %6355 = vpow2.f32 %v5113_v4  ;;  %v2233_v24 = vpop.f32.mrf.mxu1  ;;  %v5125_v59 = vmul.f32 -1.442695, %v2329_v23 }
 0x22f   :  { %v6332_v2 = vpop.eup %6331  ;;  %v2234_v57 = vadd.f32 %v2233_v24, %v8247_v41  ;;  %v5120_v50 = vmul.f32 -1.442695, %v2239_v37 }
 0x230   :  { %v8324_v55 = vmul.f32 %v6332_v2, %v6330_v51  ;;  %v6334_v52 = vpop.eup %6333  ;;  %v5557_v31 = vpop.f32.mrf.mxu1 }
 0x231   :  { %v6336_v30 = vpop.eup %6335  ;;  %v2689_v9 = vadd.f32 1.0, %v6334_v52  ;;  %v2249_v29 = vadd.f32 %v5557_v31, %v8251_v21  ;;  %v5119_v63 = vmul.f32 -1.442695, %v2234_v57 }
 0x232   :  { %v6338_v13 = vpop.eup %6337  ;;  %v2688_v39 = vadd.f32 1.0, %v6336_v30  ;;  %v2243_v40 = vpop.f32.mrf.mxu1 }
 0x233   :  { %v6340_v44 = vpop.eup %6339  ;;  %v2691_v8 = vadd.f32 1.0, %v6338_v13  ;;  %6357 = vrcp.f32 %v2689_v9  ;;  %v2244_v58 = vadd.f32 %v2243_v40, %v8266_v26  ;;  %v5122_v30 = vmul.f32 -1.442695, %v2249_v29 }
 0x234   :  { %v6342_v25 = vpop.eup %6341  ;;  %v2690_v22 = vadd.f32 1.0, %v6340_v44  ;;  %6359 = vrcp.f32 %v2688_v39 }
 0x235   :  { %v6344_v34 = vpop.eup %6343  ;;  %v2697_v12 = vadd.f32 1.0, %v6342_v25  ;;  %6361 = vrcp.f32 %v2691_v8  ;;  %v5121_v44 = vmul.f32 -1.442695, %v2244_v58 }
 0x236   :  { %v6346_v17 = vpop.eup %6345  ;;  %v2696_v43 = vadd.f32 1.0, %v6344_v34  ;;  %6363 = vrcp.f32 %v2690_v22 }
 0x237   :  { %v6348_v42 = vpop.eup %6347  ;;  %v2699_v18 = vadd.f32 1.0, %v6346_v17  ;;  %6365 = vrcp.f32 %v2697_v12 }
 0x238   :  { %v6350_v11 = vpop.eup %6349  ;;  %v2698_v38 = vadd.f32 1.0, %v6348_v42  ;;  %6367 = vrcp.f32 %v2696_v43 }
 0x239   :  { %v6352_v1 = vpop.eup %6351  ;;  %v2693_v7 = vadd.f32 1.0, %v6350_v11  ;;  %6369 = vrcp.f32 %v2699_v18 }
 0x23a   :  { %v6354_v54 = vpop.eup %6353  ;;  %v2692_v46 = vadd.f32 1.0, %v6352_v1  ;;  %6371 = vrcp.f32 %v2698_v38 }
 0x23b   :  { %6373 = vrcp.f32 %v2693_v7  ;;  %v2695_v62 = vadd.f32 1.0, %v6354_v54  ;;  %v6356_v16 = vpop.eup %6355 }
 0x23c   :  { %6375 = vpow2.f32 %v5124_v28  ;;  %v2694_v15 = vadd.f32 1.0, %v6356_v16 }
 0x23d   :  { %6377 = vrcp.f32 %v2692_v46 }
 0x23e   :  { %6379 = vpow2.f32 %v5123_v48 }
 0x23f   :  { %6381 = vrcp.f32 %v2695_v62 }
 0x240   :  { %v8334_v2 = vpop.eup %6357  ;;  %6383 = vpow2.f32 %v5126_v35 }
 0x241   :  { %v8337_v52 = vpop.eup %6359  ;;  %6385 = vpow2.f32 %v5125_v59 }
 0x242   :  { %v8339_v61 = vpop.eup %6361  ;;  %6387 = vpow2.f32 %v5120_v50 }
 0x243   :  { %v8342_v36 = vpop.eup %6363  ;;  %6389 = vrcp.f32 %v2694_v15 }
 0x244   :  { %v8344_v34 = vpop.eup %6365  ;;  %6391 = vpow2.f32 %v5119_v63 }
 0x245   :  { %v5596_v51 = vpop.f32.mrf.mxu0  ;;  %v8347_v45 = vpop.eup %6367  ;;  %6393 = vpow2.f32 %v5122_v30 }
 0x246   :  { %v2494_v4 = vadd.f32 %v5596_v51, %v8233_v6  ;;  %v8350_v24 = vpop.eup %6369  ;;  %6395 = vpow2.f32 %v5121_v44 }
 0x247   :  { %v2488_v13 = vpop.f32.mrf.mxu0  ;;  %v8353_v18 = vpop.eup %6371 }
 0x248   :  { %v2489_v9 = vadd.f32 %v2488_v13, %v8247_v41  ;;  %v5132_v25 = vmul.f32 -1.442695, %v2494_v4  ;;  %v8356_v60 = vpop.eup %6373 }
 0x249   :  { %v5599_v39 = vpop.f32.mrf.mxu0  ;;  %v6376_v54 = vpop.eup %6375 }
 0x24a   :  { %v5131_v8 = vmul.f32 -1.442695, %v2489_v9  ;;  %v2504_v17 = vadd.f32 %v5599_v39, %v8251_v21  ;;  %v5582_v22 = vpop.f32.mrf.mxu1  ;;  %6397 = vpow2.f32 %v5132_v25  ;;  %v8359_v46 = vpop.eup %6377  ;;  %v2705_v16 = vadd.f32 1.0, %v6376_v54 }
 0x24b   :  { %v2409_v42 = vadd.f32 %v5582_v22, %v8233_v6  ;;  %v2498_v12 = vpop.f32.mrf.mxu0  ;;  %v6380_v37 = vpop.eup %6379 }
 0x24c   :  { %v5134_v11 = vmul.f32 -1.442695, %v2504_v17  ;;  %v2499_v43 = vadd.f32 %v2498_v12, %v8266_v26  ;;  %v2403_v33 = vpop.f32.mrf.mxu1  ;;  %6399 = vpow2.f32 %v5131_v8  ;;  %v8363_v40 = vpop.eup %6381  ;;  %v2704_v58 = vadd.f32 1.0, %v6380_v37 }
 0x24d   :  { %v5128_v1 = vmul.f32 -1.442695, %v2409_v42  ;;  %v2404_v38 = vadd.f32 %v2403_v33, %v8247_v41  ;;  %v5624_v19 = vpop.f32.mrf.mxu0  ;;  %v6384_v59 = vpop.eup %6383 }
 0x24e   :  { %v5133_v7 = vmul.f32 -1.442695, %v2499_v43  ;;  %v2856_v31 = vadd.f32 %v5624_v19, %v8283_v32  ;;  %6401 = vpow2.f32 %v5134_v11  ;;  %v6386_v50 = vpop.eup %6385  ;;  %v2707_v44 = vadd.f32 1.0, %v6384_v59 }
 0x24f   :  { %v5585_v28 = vpop.f32.mrf.mxu1  ;;  %v2850_v10 = vpop.f32.mrf.mxu0  ;;  %6403 = vpow2.f32 %v5128_v1  ;;  %v5127_v23 = vmul.f32 -1.442695, %v2404_v38  ;;  %v2706_v39 = vadd.f32 1.0, %v6386_v50 }
 0x250   :  { %v2851_v48 = vadd.f32 %v2850_v10, %v8287_v3  ;;  %6405 = vpow2.f32 %v5133_v7  ;;  %v2419_v62 = vadd.f32 %v5585_v28, %v8251_v21  ;;  %v6388_v51 = vpop.eup %6387 }
 0x251   :  { %6407 = vtanh.f32 %v2856_v31  ;;  %v2413_v35 = vpop.f32.mrf.mxu1  ;;  %v8368_v13 = vpop.eup %6389  ;;  %v2701_v17 = vadd.f32 1.0, %v6388_v51 }
 0x252   :  { %v5627_v57 = vpop.f32.mrf.mxu0  ;;  %6409 = vtanh.f32 %v2851_v48  ;;  %v5130_v63 = vmul.f32 -1.442695, %v2419_v62  ;;  %v2414_v4 = vadd.f32 %v2413_v35, %v8266_v26  ;;  %v6392_v25 = vpop.eup %6391 }
 0x253   :  { %v2866_v29 = vadd.f32 %v5627_v57, %v8295_v14  ;;  %6411 = vpow2.f32 %v5127_v23  ;;  %v6394_v8 = vpop.eup %6393  ;;  %v2700_v43 = vadd.f32 1.0, %v6392_v25 }
 0x254   :  { %v2860_v15 = vpop.f32.mrf.mxu0  ;;  %v6396_v42 = vpop.eup %6395  ;;  %v5129_v12 = vmul.f32 -1.442695, %v2414_v4  ;;  %v2703_v38 = vadd.f32 1.0, %v6394_v8 }
 0x255   :  { %6413 = vtanh.f32 %v2866_v29  ;;  %v2861_v30 = vadd.f32 %v2860_v15, %v8290_v47  ;;  %v2702_v7 = vadd.f32 1.0, %v6396_v42 }
 0x256   :  { %6415 = vrcp.f32 %v2705_v16  ;;  %v5652_v9 = vpop.f32.mrf.mxu0 }
 0x257   :  { %6417 = vtanh.f32 %v2861_v30  ;;  %v6398_v11 = vpop.eup %6397  ;;  %v3026_v10 = vadd.f32 %v5652_v9, %v8283_v32 }
 0x258   :  { %6419 = vrcp.f32 %v2704_v58  ;;  %v3020_v22 = vpop.f32.mrf.mxu0  ;;  %v2713_v48 = vadd.f32 1.0, %v6398_v11 }
 0x259   :  { %6421 = vpow2.f32 %v5130_v63  ;;  %v6400_v1 = vpop.eup %6399  ;;  %v3021_v16 = vadd.f32 %v3020_v22, %v8287_v3 }
 0x25a   :  { %6423 = vrcp.f32 %v2707_v44  ;;  %v5655_v33 = vpop.f32.mrf.mxu0  ;;  %v2712_v57 = vadd.f32 1.0, %v6400_v1 }
 0x25b   :  { %6425 = vrcp.f32 %v2706_v39  ;;  %v6402_v19 = vpop.eup %6401  ;;  %v3036_v15 = vadd.f32 %v5655_v33, %v8295_v14 }
 0x25c   :  { %6427 = vrcp.f32 %v2701_v17  ;;  %v5610_v31 = vpop.f32.mrf.mxu1  ;;  %v3030_v54 = vpop.f32.mrf.mxu0  ;;  %v2715_v63 = vadd.f32 1.0, %v6402_v19 }
 0x25d   :  { %v6404_v28 = vpop.eup %6403  ;;  %6429 = vpow2.f32 %v5129_v12  ;;  %v2579_v8 = vadd.f32 %v5610_v31, %v8233_v6  ;;  %v3031_v31 = vadd.f32 %v3030_v54, %v8290_v47 }
 0x25e   :  { %v6406_v23 = vpop.eup %6405  ;;  %6431 = vrcp.f32 %v2700_v43  ;;  %v2573_v37 = vpop.f32.mrf.mxu1  ;;  %v2709_v9 = vadd.f32 1.0, %v6404_v28 }
 0x25f   :  { %v6408_v62 = vpop.eup %6407  ;;  %6433 = vrcp.f32 %v2703_v38  ;;  %v5136_v33 = vmul.f32 -1.442695, %v2579_v8  ;;  %v2574_v6 = vadd.f32 %v2573_v37, %v8247_v41 }
 0x260   :  { %v6410_v35 = vpop.eup %6409  ;;  %6435 = vrcp.f32 %v2702_v7  ;;  %v3497_v59 = vmul.f32 %v6408_v62, %v8334_v2  ;;  %v5680_v29 = vpop.f32.mrf.mxu0  ;;  %v2714_v2 = vadd.f32 1.0, %v6406_v23 }
 0x261   :  { %v6412_v50 = vpop.eup %6411  ;;  %v3496_v58 = vmul.f32 %v6410_v35, %v8337_v52  ;;  %6437 = vtanh.f32 %v3026_v10  ;;  %v3196_v54 = vadd.f32 %v5680_v29, %v8283_v32 }
 0x262   :  { %v6414_v51 = vpop.eup %6413  ;;  %6439 = vrcp.f32 %v2713_v48  ;;  %v5613_v4 = vpop.f32.mrf.mxu1  ;;  %v2708_v17 = vadd.f32 1.0, %v6412_v50  ;;  %v5135_v48 = vmul.f32 -1.442695, %v2574_v6 }
 0x263   :  { %v3190_v30 = vpop.f32.mrf.mxu0  ;;  %v8375_v44 = vpop.eup %6415  ;;  %v3499_v25 = vmul.f32 %v6414_v51, %v8339_v61  ;;  %6441 = vtanh.f32 %v3021_v16  ;;  %v2589_v10 = vadd.f32 %v5613_v4, %v8251_v21 }
 0x264   :  { %v6418_v39 = vpop.eup %6417  ;;  %6443 = vrcp.f32 %v2712_v57  ;;  %v2583_v42 = vpop.f32.mrf.mxu1 }
 0x265   :  { %v8379_v52 = vpop.eup %6419  ;;  %v8382_v22 = vmul.f32 %v6418_v39, %v8342_v36  ;;  %6445 = vtanh.f32 %v3036_v15  ;;  %v2584_v16 = vadd.f32 %v2583_v42, %v8266_v26  ;;  %v5138_v21 = vmul.f32 -1.442695, %v2589_v10 }
 0x266   :  { %v6422_v12 = vpop.eup %6421  ;;  %6447 = vrcp.f32 %v2715_v63  ;;  %v5683_v11 = vpop.f32.mrf.mxu0  ;;  %v3191_v15 = vadd.f32 %v3190_v30, %v8287_v3 }
 0x267   :  { %v8384_v43 = vpop.eup %6423  ;;  %6449 = vrcp.f32 %v2709_v9  ;;  %v2711_v36 = vadd.f32 1.0, %v6422_v12  ;;  %v5137_v63 = vmul.f32 -1.442695, %v2584_v16  ;;  %v3206_v9 = vadd.f32 %v5683_v11, %v8295_v14 }
 0x268   :  { %v8386_v61 = vpop.eup %6425  ;;  %6451 = vrcp.f32 %v2714_v2  ;;  %v3200_v1 = vpop.f32.mrf.mxu0 }
 0x269   :  { %v8389_v38 = vpop.eup %6427  ;;  %6453 = vrcp.f32 %v2708_v17  ;;  %v5638_v19 = vpop.f32.mrf.mxu1  ;;  %v3201_v30 = vadd.f32 %v3200_v1, %v8290_v47 }
 0x26a   :  { %v6430_v7 = vpop.eup %6429  ;;  %6455 = vtanh.f32 %v3497_v59 }
 0x26b   :  { %v8392_v28 = vpop.eup %6431  ;;  %6457 = vtanh.f32 %v3496_v58  ;;  %v2710_v62 = vadd.f32 1.0, %v6430_v7  ;;  %v2935_v35 = vpop.f32.mrf.mxu1 }
 0x26c   :  { %v8395_v23 = vpop.eup %6433  ;;  %6459 = vpow2.f32 %v5136_v33  ;;  %v5708_v41 = vpop.f32.mrf.mxu0  ;;  %v2936_v17 = vadd.f32 %v2935_v35, %v8287_v3 }
 0x26d   :  { %v8397_v37 = vpop.eup %6435  ;;  %6461 = vrcp.f32 %v2711_v36  ;;  %v3366_v6 = vadd.f32 %v5708_v41, %v8283_v32 }
 0x26e   :  { %v6438_v57 = vpop.eup %6437  ;;  %6463 = vtanh.f32 %v3031_v31  ;;  %v3360_v59 = vpop.f32.mrf.mxu0 }
 0x26f   :  { %v8401_v50 = vpop.eup %6439  ;;  %6465 = vtanh.f32 %v3499_v25  ;;  %v5641_v4 = vpop.f32.mrf.mxu1  ;;  %v2941_v25 = vadd.f32 %v5638_v19, %v8283_v32  ;;  %v3505_v1 = vmul.f32 %v6438_v57, %v8344_v34 }
 0x270   :  { %v6442_v58 = vpop.eup %6441  ;;  %6467 = vpow2.f32 %v5135_v48  ;;  %v2951_v41 = vadd.f32 %v5641_v4, %v8295_v14 }
 0x271   :  { %v8404_v51 = vpop.eup %6443  ;;  %6469 = vrcp.f32 %v2710_v62  ;;  %v2945_v42 = vpop.f32.mrf.mxu1  ;;  %v3504_v7 = vmul.f32 %v6442_v58, %v8347_v45  ;;  %v3361_v45 = vadd.f32 %v3360_v59, %v8287_v3 }
 0x272   :  { %v6446_v26 = vpop.eup %6445  ;;  %6471 = vtanh.f32 %v3196_v54  ;;  %v5711_v39 = vpop.f32.mrf.mxu0 }
 0x273   :  { %v8407_v29 = vpop.eup %6447  ;;  %6473 = vpow2.f32 %v5138_v21  ;;  %v3507_v48 = vmul.f32 %v6446_v26, %v8350_v24 }
 0x274   :  { %v8410_v2 = vpop.eup %6449  ;;  %6475 = vtanh.f32 %v3191_v15  ;;  %v8418_v11 = vpop.f32.mrf.mxu0  ;;  %v2946_v15 = vadd.f32 %v2945_v42, %v8290_v47 }
 0x275   :  { %v8413_v8 = vpop.eup %6451  ;;  %6477 = vpow2.f32 %v5137_v63  ;;  %v8427_v31 = vpop.f32.mrf.mxu1 }
 0x276   :  { %v8416_v12 = vpop.eup %6453  ;;  %6479 = vtanh.f32 %v3206_v9  ;;  %v3376_v9 = vadd.f32 %v5711_v39, %v8295_v14 }
 0x277   :  { %v8420_v33 = vpop.eup %6455  ;;  %6481 = vtanh.f32 %v2941_v25  ;;  %v8437_v54 = vpop.f32.mrf.mxu1 }
 0x278   :  { %v8423_v36 = vpop.eup %6457  ;;  %6483 = vtanh.f32 %v3201_v30  ;;  %v5736_v62 = vpop.f32.mrf.mxu0 }
 0x279   :  { %v6460_v19 = vpop.eup %6459  ;;  %6485 = vtanh.f32 %v2936_v17 }
 0x27a   :  { %v8429_v10 = vpop.eup %6461  ;;  %6487 = vtanh.f32 %v8382_v22  ;;  %v2717_v34 = vadd.f32 1.0, %v6460_v19  ;;  %v3594_v22 = vpop.f32.mrf.mxu0 }
 0x27b   :  { %v6464_v16 = vpop.eup %6463  ;;  %6489 = vtanh.f32 %v3366_v6  ;;  %v8444_v59 = vpop.f32.mrf.mxu1 }
 0x27c   :  { %v8434_v35 = vpop.eup %6465  ;;  %6491 = vtanh.f32 %v3505_v1  ;;  %v3506_v24 = vmul.f32 %v6464_v16, %v8353_v18 }
 0x27d   :  { %v6468_v57 = vpop.eup %6467  ;;  %6493 = vtanh.f32 %v3504_v7 }
 0x27e   :  { %v8439_v21 = vpop.eup %6469  ;;  %6495 = vtanh.f32 %v3507_v48  ;;  %v2716_v4 = vadd.f32 1.0, %v6468_v57  ;;  %v5739_v17 = vpop.f32.mrf.mxu0 }
 0x27f   :  { %v6472_v58 = vpop.eup %6471  ;;  %6497 = vtanh.f32 %v2951_v41  ;;  %v8448_v48 = vpop.f32.mrf.mxu1  ;;  %v3600_v41 = vadd.f32 %v5736_v62, %v8269_v20 }
 0x280   :  { %v6474_v63 = vpop.eup %6473  ;;  %6499 = vrcp.f32 %v2717_v34  ;;  %v3513_v30 = vmul.f32 %v6472_v58, %v8375_v44  ;;  %v3604_v44 = vpop.f32.mrf.mxu0 }
 0x281   :  { %v6476_v26 = vpop.eup %6475  ;;  %6501 = vtanh.f32 %v3361_v45  ;;  %v2719_v6 = vadd.f32 1.0, %v6474_v63  ;;  %v5204_v63 = vmul.f32 -1.442695, %v3600_v41 }
 0x282   :  { %v6478_v25 = vpop.eup %6477  ;;  %6503 = vtanh.f32 %v3506_v24  ;;  %v3512_v42 = vmul.f32 %v6476_v26, %v8379_v52  ;;  %v3595_v24 = vadd.f32 %v3594_v22, %v8280_v53 }
 0x283   :  { %v6480_v18 = vpop.eup %6479  ;;  %6505 = vtanh.f32 %v2946_v15  ;;  %v2718_v7 = vadd.f32 1.0, %v6478_v25  ;;  %v3605_v25 = vadd.f32 %v3604_v44, %v8292_v49 }
 0x284   :  { %v6482_v1 = vpop.eup %6481  ;;  %6507 = vrcp.f32 %v2716_v4  ;;  %v3515_v16 = vmul.f32 %v6480_v18, %v8384_v43  ;;  %v8460_v43 = vpop.f32.mrf.mxu1  ;;  %v3610_v4 = vadd.f32 %v5739_v17, %v8302_v56 }
 0x285   :  { %v6484_v19 = vpop.eup %6483  ;;  %6509 = vtanh.f32 %v3376_v9  ;;  %v3501_v57 = vmul.f32 %v6482_v1, %v8356_v60  ;;  %v5764_v60 = vpop.f32.mrf.mxu0  ;;  %v5203_v9 = vmul.f32 -1.442695, %v3595_v24 }
 0x286   :  { %v6486_v39 = vpop.eup %6485  ;;  %6511 = vtanh.f32 %v3513_v30  ;;  %v3514_v52 = vmul.f32 %v6484_v19, %v8386_v61  ;;  %v3111_v30 = vadd.f32 %v8427_v31, %v8283_v32  ;;  %v8473_v18 = vpop.f32.mrf.mxu1  ;;  %v3770_v1 = vadd.f32 %v5764_v60, %v8269_v20 }
 0x287   :  { %v8452_v34 = vpop.eup %6487  ;;  %6513 = vrcp.f32 %v2719_v6  ;;  %v3500_v15 = vmul.f32 %v6486_v39, %v8359_v46  ;;  %v5206_v6 = vmul.f32 -1.442695, %v3610_v4  ;;  %v3371_v19 = vadd.f32 %v8418_v11, %v8290_v47 }
 0x288   :  { %v6490_v45 = vpop.eup %6489  ;;  %6515 = vtanh.f32 %v3512_v42  ;;  %v3764_v42 = vpop.f32.mrf.mxu0  ;;  %v5205_v39 = vmul.f32 -1.442695, %v3605_v25 }
 0x289   :  { %v8457_v58 = vpop.eup %6491  ;;  %6517 = vrcp.f32 %v2718_v7  ;;  %v3521_v61 = vmul.f32 %v6490_v45, %v8401_v50  ;;  %v5697_v41 = vpop.f32.mrf.mxu1  ;;  %v3765_v44 = vadd.f32 %v3764_v42, %v8280_v53  ;;  %v5212_v45 = vmul.f32 -1.442695, %v3770_v1 }
 0x28a   :  { %v8462_v62 = vpop.eup %6493  ;;  %6519 = vtanh.f32 %v3515_v16 }
 0x28b   :  { %v8465_v26 = vpop.eup %6495  ;;  %6521 = vtanh.f32 %v3501_v57  ;;  %v5211_v4 = vmul.f32 -1.442695, %v3765_v44  ;;  %v8493_v60 = vpop.f32.mrf.mxu1 }
 0x28c   :  { %v6498_v22 = vpop.eup %6497  ;;  %6523 = vtanh.f32 %v3514_v52  ;;  %v5767_v52 = vpop.f32.mrf.mxu0 }
 0x28d   :  { %v8469_v46 = vpop.eup %6499  ;;  %6525 = vtanh.f32 %v3500_v15  ;;  %v3503_v31 = vmul.f32 %v6498_v22, %v8363_v40  ;;  %v8509_v1 = vpop.f32.mrf.mxu1 }
 0x28e   :  { %v6502_v17 = vpop.eup %6501  ;;  %6527 = vpow2.f32 %v5204_v63  ;;  %v3106_v63 = vadd.f32 %v8437_v54, %v8287_v3  ;;  %v3121_v54 = vadd.f32 %v8444_v59, %v8295_v14  ;;  %v3774_v42 = vpop.f32.mrf.mxu0 }
 0x28f   :  { %v8476_v50 = vpop.eup %6503  ;;  %6529 = vtanh.f32 %v3521_v61  ;;  %v3520_v15 = vmul.f32 %v6502_v17, %v8404_v51  ;;  %v3780_v61 = vadd.f32 %v5767_v52, %v8302_v56  ;;  %v8518_v44 = vpop.f32.mrf.mxu1 }
 0x290   :  { %v6506_v7 = vpop.eup %6505  ;;  %6531 = vpow2.f32 %v5203_v9 }
 0x291   :  { %v8480_v16 = vpop.eup %6507  ;;  %6533 = vtanh.f32 %v3111_v30  ;;  %v3502_v9 = vmul.f32 %v6506_v7, %v8368_v13  ;;  %v3116_v30 = vadd.f32 %v8448_v48, %v8290_v47  ;;  %v3281_v48 = vadd.f32 %v8460_v43, %v8283_v32 }
 0x292   :  { %9069 = vst [vmem:[#allocation13_spill] sm:$0xff] %v8480_v16  ;;  %v6510_v57 = vpop.eup %6509  ;;  %6535 = vpow2.f32 %v5206_v6  ;;  %v5214_v6 = vmul.f32 -1.442695, %v3780_v61  ;;  %v8523_v43 = vpop.f32.mrf.mxu1 }
 0x293   :  { %v8484_v24 = vpop.eup %6511  ;;  %6537 = vtanh.f32 %v3371_v19  ;;  %v3523_v7 = vmul.f32 %v6510_v57, %v8407_v29  ;;  %v3276_v29 = vadd.f32 %v8473_v18, %v8287_v3 }
 0x294   :  { %v8487_v11 = vpop.eup %6513  ;;  %6539 = vpow2.f32 %v5205_v39 }
 0x295   :  { %9070 = vst [vmem:[#allocation15_spill] sm:$0xff] %v8487_v11  ;;  %v8491_v40 = vpop.eup %6515  ;;  %6541 = vtanh.f32 %v3503_v31 }
 0x296   :  { %v8496_v22 = vpop.eup %6517  ;;  %6543 = vpow2.f32 %v5212_v45 }
 0x297   :  { %9071 = vst [vmem:[#allocation17_spill] sm:$0xff] %v8496_v22  ;;  %v8499_v51 = vpop.eup %6519  ;;  %6545 = vtanh.f32 %v3520_v15  ;;  %v5792_v15 = vpop.f32.mrf.mxu0 }
 0x298   :  { %v8503_v25 = vpop.eup %6521  ;;  %6547 = vtanh.f32 %v3106_v63 }
 0x299   :  { %v8507_v17 = vpop.eup %6523  ;;  %6549 = vpow2.f32 %v5211_v4 }
 0x29a   :  { %v8511_v13 = vpop.eup %6525  ;;  %6551 = vtanh.f32 %v3502_v9  ;;  %v3291_v9 = vadd.f32 %v5697_v41, %v8295_v14 }
 0x29b   :  { %v6528_v19 = vpop.eup %6527  ;;  %6553 = vtanh.f32 %v3121_v54 }
 0x29c   :  { %v8514_v59 = vpop.eup %6529  ;;  %v4305_v39 = vadd.f32 1.0, %v6528_v19  ;;  %6555 = vtanh.f32 %v3116_v30  ;;  %v3934_v19 = vpop.f32.mrf.mxu0 }
 0x29d   :  { %v6532_v31 = vpop.eup %6531  ;;  %6557 = vpow2.f32 %v5214_v6  ;;  %v3775_v6 = vadd.f32 %v3774_v42, %v8292_v49  ;;  %v3940_v42 = vadd.f32 %v5792_v15, %v8269_v20 }
 0x29e   :  { %v6534_v45 = vpop.eup %6533  ;;  %6559 = vrcp.f32 %v4305_v39  ;;  %v4304_v52 = vadd.f32 1.0, %v6532_v31 }
 0x29f   :  { %v6536_v63 = vpop.eup %6535  ;;  %6561 = vtanh.f32 %v3523_v7  ;;  %v3509_v39 = vmul.f32 %v6534_v45, %v8389_v38  ;;  %v3286_v45 = vadd.f32 %v8493_v60, %v8290_v47  ;;  %v5220_v15 = vmul.f32 -1.442695, %v3940_v42  ;;  %v8550_v42 = vpop.permute.xlu0 %4696 }
 0x2a0   :  { %v6538_v57 = vpop.eup %6537  ;;  %6563 = vrcp.f32 %v4304_v52  ;;  %v4307_v4 = vadd.f32 1.0, %v6536_v63  ;;  %v8532_v52 = vpop.f32.mrf.mxu1 }
 0x2a1   :  { %v6540_v61 = vpop.eup %6539  ;;  %6565 = vtanh.f32 %v3281_v48  ;;  %v3522_v31 = vmul.f32 %v6538_v57, %v8413_v8 }
 0x2a2   :  { %v8525_v54 = vpop.eup %6541  ;;  %6567 = vrcp.f32 %v4307_v4  ;;  %v4306_v30 = vadd.f32 1.0, %v6540_v61  ;;  %v5213_v4 = vmul.f32 -1.442695, %v3775_v6  ;;  %v5795_v61 = vpop.f32.mrf.mxu0 }
 0x2a3   :  { %v6544_v7 = vpop.eup %6543  ;;  %6569 = vtanh.f32 %v3276_v29  ;;  %v3950_v60 = vadd.f32 %v5795_v61, %v8302_v56 }
 0x2a4   :  { %v8529_v18 = vpop.eup %6545  ;;  %6571 = vrcp.f32 %v4306_v30  ;;  %v4313_v48 = vadd.f32 1.0, %v6544_v7  ;;  %v5750_v30 = vpop.f32.mrf.mxu1 }
 0x2a5   :  { %v6548_v41 = vpop.eup %6547  ;;  %6573 = vtanh.f32 %v3291_v9  ;;  %v3935_v9 = vadd.f32 %v3934_v19, %v8280_v53  ;;  %v3944_v7 = vpop.f32.mrf.mxu0 }
 0x2a6   :  { %v6550_v63 = vpop.eup %6549  ;;  %6575 = vrcp.f32 %v4313_v48  ;;  %v3508_v29 = vmul.f32 %v6548_v41, %v8392_v28  ;;  %v3685_v41 = vadd.f32 %v5750_v30, %v8269_v20 }
 0x2a7   :  { %v8535_v22 = vpop.eup %6551  ;;  %6577 = vtanh.f32 %v3509_v39  ;;  %v4312_v38 = vadd.f32 1.0, %v6550_v63 }
 0x2a8   :  { %9072 = vst [vmem:[#allocation18_spill] sm:$0xff] %v8535_v22  ;;  %v6554_v8 = vpop.eup %6553  ;;  %6579 = vtanh.f32 %v3522_v31  ;;  %v8545_v31 = vpop.permute.xlu1 %4701 }
 0x2a9   :  { %v6556_v57 = vpop.eup %6555  ;;  %6581 = vrcp.f32 %v4312_v38  ;;  %v3511_v39 = vmul.f32 %v6554_v8, %v8395_v23  ;;  %v5219_v23 = vmul.f32 -1.442695, %v3935_v9  ;;  %v3945_v38 = vadd.f32 %v3944_v7, %v8292_v49 }
 0x2aa   :  { %v6558_v6 = vpop.eup %6557  ;;  %6583 = vpow2.f32 %v5213_v4  ;;  %v3510_v19 = vmul.f32 %v6556_v57, %v8397_v37  ;;  %v5222_v37 = vmul.f32 -1.442695, %v3950_v60  ;;  %v5208_v9 = vmul.f32 -1.442695, %v3685_v41 }
 0x2ab   :  { %v6560_v48 = vpop.eup %6559  ;;  %6585 = vtanh.f32 %v3286_v45  ;;  %v4315_v63 = vadd.f32 1.0, %v6558_v6 }
 0x2ac   :  { %v8543_v11 = vpop.eup %6561  ;;  %6587 = vtanh.f32 %v3508_v29  ;;  %v4433_v28 = vmul.f32 %v6560_v48, %v8420_v33  ;;  %v3679_v48 = vpop.f32.mrf.mxu1 }
 0x2ad   :  { %9073 = vst [vmem:[#allocation20_spill] sm:$0xff] %v8543_v11  ;;  %v6564_v4 = vpop.eup %6563  ;;  %6589 = vrcp.f32 %v4315_v63 }
 0x2ae   :  { %v6566_v61 = vpop.eup %6565  ;;  %v4465_v45 = vmul.f32 %v4433_v28, %v8317_v0  ;;  %v4715_v8 = vmul.f32 %v8545_v31, %v4433_v28  ;;  %v4432_v29 = vmul.f32 %v6564_v4, %v8423_v36  ;;  %6591 = vpow2.f32 %v5220_v15  ;;  %v8562_v15 = vpop.permute.xlu1 %4711 }
 0x2af   :  { %v6568_v33 = vpop.eup %6567  ;;  %6593 = vtanh.f32 %v3511_v39  ;;  %v5221_v28 = vmul.f32 -1.442695, %v3945_v38 }
 0x2b0   :  { %v6570_v57 = vpop.eup %6569  ;;  %v4464_v30 = vmul.f32 %v4432_v29, %v8319_v27  ;;  %v4714_v6 = vmul.f32 %v8550_v42, %v4432_v29  ;;  %6595 = vtanh.f32 %v3510_v19  ;;  %v4498_v63 = vsel %vm4496_vm2, %v4465_v45, 0.0  ;;  %v8568_v29 = vpop.permute.xlu0 %4706 }
 0x2b1   :  { %v6572_v7 = vpop.eup %6571  ;;  %v4435_v16 = vmul.f32 %v6568_v33, %v8434_v35  ;;  %6597 = vpow2.f32 %v5219_v23  ;;  %v4747_v39 = vsel %vm4496_vm2, %v4715_v8, 0.0 }
 0x2b2   :  { %v8560_v36 = vpop.eup %6573  ;;  %v4497_v60 = vsel %vm4496_vm2, %v4464_v30, 0.0  ;;  %v4746_v4 = vsel %vm4496_vm2, %v4714_v6, 0.0  ;;  %v4434_v19 = vmul.f32 %v6572_v7, %v8452_v34  ;;  %6599 = vpow2.f32 %v5222_v37  ;;  %v5820_v6 = vpop.f32.mrf.mxu0 }
 0x2b3   :  { %v6576_v41 = vpop.eup %6575  ;;  %v4499_v45 = vadd.f32 %v4498_v63, %v4497_v60  ;;  %v4748_v11 = vadd.f32 %v4747_v39, %v4746_v4  ;;  %v4467_v35 = vmul.f32 %v4435_v16, %v8322_v5  ;;  %v4717_v23 = vmul.f32 %v8562_v15, %v4435_v16  ;;  %v5753_v34 = vpop.f32.mrf.mxu1 }
 0x2b4   :  { %v8572_v38 = vpop.eup %6577  ;;  %v4466_v33 = vmul.f32 %v4434_v19, %v8324_v55  ;;  %v4716_v8 = vmul.f32 %v8568_v29, %v4434_v19  ;;  %v4441_v30 = vmul.f32 %v6576_v41, %v8457_v58  ;;  %v3517_v63 = vmul.f32 %v6566_v61, %v8410_v2 }
 0x2b5   :  { %9074 = vst [vmem:[#allocation21_spill] sm:$0xff] %v8572_v38  ;;  %v8577_v7 = vpop.eup %6579  ;;  %6601 = vpow2.f32 %v5208_v9  ;;  %v3680_v39 = vadd.f32 %v3679_v48, %v8280_v53  ;;  %v3516_v38 = vmul.f32 %v6570_v57, %v8416_v12  ;;  %v4502_v61 = vsel %vm4496_vm2, %v4467_v35, 0.0 }
 0x2b6   :  { %9075 = vst [vmem:[#allocation23_spill] sm:$0xff] %v8577_v7  ;;  %v6582_v60 = vpop.eup %6581  ;;  %v4500_v16 = vsel %vm4496_vm2, %v4466_v33, 0.0  ;;  %v4749_v4 = vsel %vm4496_vm2, %v4716_v8, 0.0  ;;  %v4473_v19 = vmul.f32 %v4441_v30, %v8317_v0  ;;  %v4723_v22 = vmul.f32 %v8545_v31, %v4441_v30  ;;  %v4104_v33 = vpop.f32.mrf.mxu0 }
 0x2b7   :  { %v6584_v58 = vpop.eup %6583  ;;  %v4501_v37 = vadd.f32 %v4500_v16, %v4499_v45  ;;  %v4750_v41 = vadd.f32 %v4749_v4, %v4748_v11  ;;  %v4440_v7 = vmul.f32 %v6582_v60, %v8462_v62  ;;  %v4751_v9 = vsel %vm4496_vm2, %v4717_v23, 0.0  ;;  %v3689_v8 = vpop.f32.mrf.mxu1 }
 0x2b8   :  { %v8587_v2 = vpop.eup %6585  ;;  %v4314_v48 = vadd.f32 1.0, %v6584_v58  ;;  %6603 = vpow2.f32 %v5221_v28  ;;  %v3451_v35 = vadd.f32 %v8509_v1, %v8283_v32  ;;  %v5207_v23 = vmul.f32 -1.442695, %v3680_v39  ;;  %v5823_v1 = vpop.f32.mrf.mxu0 }
 0x2b9   :  { %v8591_v12 = vpop.eup %6587  ;;  %v8593_v57 = vadd.f32 %v4502_v61, %v4501_v37  ;;  %v8595_v45 = vadd.f32 %v4751_v9, %v4750_v41  ;;  %v4472_v11 = vmul.f32 %v4440_v7, %v8319_v27  ;;  %v4722_v62 = vmul.f32 %v8550_v42, %v4440_v7 }
 0x2ba   :  { %v6590_v30 = vpop.eup %6589  ;;  %6605 = vtanh.f32 %v3517_v63  ;;  %v4110_v28 = vadd.f32 %v5820_v6, %v8269_v20  ;;  %v4524_v16 = vsel %vm4496_vm2, %v4473_v19, 0.0  ;;  %v4773_v4 = vsel %vm4496_vm2, %v4723_v22, 0.0  ;;  %v5778_v6 = vpop.f32.mrf.mxu1 }
 0x2bb   :  { %v6592_v60 = vpop.eup %6591  ;;  %v4523_v58 = vsel %vm4496_vm2, %v4472_v11, 0.0  ;;  %v4772_v37 = vsel %vm4496_vm2, %v4722_v62, 0.0  ;;  %v4443_v32 = vmul.f32 %v6590_v30, %v8465_v26  ;;  %6607 = vrcp.f32 %v4314_v48  ;;  %v4114_v30 = vpop.f32.mrf.mxu0 }
 0x2bc   :  { %v8606_v41 = vpop.eup %6593  ;;  %v8608_v7 = vadd.f32 %v4524_v16, %v4523_v58  ;;  %v8610_v63 = vadd.f32 %v4773_v4, %v4772_v37  ;;  %6609 = vtanh.f32 %v3516_v38  ;;  %v4321_v19 = vadd.f32 1.0, %v6592_v60  ;;  %v3849_v16 = vpop.f32.mrf.mxu1 }
 0x2bd   :  { %v8613_v39 = vpop.eup %6595  ;;  %v8616_v61 = vmul.f32 %v4443_v32, %v8322_v5  ;;  %v3446_v9 = vadd.f32 %v8518_v44, %v8287_v3  ;;  %6611 = vpow2.f32 %v5207_v23  ;;  %v3695_v11 = vadd.f32 %v5753_v34, %v8302_v56 }
 0x2be   :  { %v6598_v22 = vpop.eup %6597  ;;  %6613 = vrcp.f32 %v4321_v19  ;;  %v5228_v26 = vmul.f32 -1.442695, %v4110_v28  ;;  %v4105_v48 = vadd.f32 %v4104_v33, %v8280_v53  ;;  %v3690_v60 = vadd.f32 %v3689_v8, %v8292_v49  ;;  %v5781_v28 = vpop.f32.mrf.mxu1 }
 0x2bf   :  { %v4320_v62 = vadd.f32 1.0, %v6598_v22  ;;  %6615 = vtanh.f32 %v3451_v35  ;;  %v6600_v38 = vpop.eup %6599  ;;  %v5210_v37 = vmul.f32 -1.442695, %v3695_v11  ;;  %v4120_v3 = vadd.f32 %v5823_v1, %v8302_v56  ;;  %v5834_v35 = vpop.f32.mrf.mxu0 }
 0x2c0   :  { %v4323_v58 = vadd.f32 1.0, %v6600_v38  ;;  %v5227_v34 = vmul.f32 -1.442695, %v4105_v48  ;;  %v3855_v23 = vadd.f32 %v5778_v6, %v8269_v20  ;;  %v4115_v33 = vadd.f32 %v4114_v30, %v8292_v49  ;;  %v3859_v48 = vpop.f32.mrf.mxu1 }
 0x2c1   :  { %6617 = vrcp.f32 %v4320_v62  ;;  %v5209_v22 = vmul.f32 -1.442695, %v3690_v60  ;;  %v3850_v8 = vadd.f32 %v3849_v16, %v8280_v53  ;;  %v5230_v11 = vmul.f32 -1.442695, %v4120_v3  ;;  %v4189_v3 = vpop.f32.mrf.mxu0 }
 0x2c2   :  { %v6602_v4 = vpop.eup %6601  ;;  %6619 = vtanh.f32 %v3446_v9  ;;  %v5216_v1 = vmul.f32 -1.442695, %v3855_v23  ;;  %v5229_v6 = vmul.f32 -1.442695, %v4115_v33  ;;  %v4504_v16 = vrot.slane %v8593_v57, 4 }
 0x2c3   :  { %v4309_v44 = vadd.f32 1.0, %v6602_v4  ;;  %6621 = vpow2.f32 %v5228_v26  ;;  %v4195_v26 = vadd.f32 %v5834_v35, %v8269_v20  ;;  %v5215_v38 = vmul.f32 -1.442695, %v3850_v8 }
 0x2c4   :  { %6623 = vrcp.f32 %v4323_v58  ;;  %v3865_v4 = vadd.f32 %v5781_v28, %v8302_v56  ;;  %v3456_v23 = vadd.f32 %v8532_v52, %v8290_v47  ;;  %v4505_v47 = vadd.f32 %v4504_v16, %v8593_v57 }
 0x2c5   :  { %v6604_v19 = vpop.eup %6603  ;;  %6625 = vrcp.f32 %v4309_v44  ;;  %v8640_v33 = vmul.f32 -1.442695, %v4195_v26 }
 0x2c6   :  { %v4322_v9 = vadd.f32 1.0, %v6604_v19  ;;  %6627 = vpow2.f32 %v5210_v37  ;;  %v3461_v37 = vadd.f32 %v8523_v43, %v8295_v14  ;;  %v5218_v8 = vmul.f32 -1.442695, %v3865_v4 }
 0x2c7   :  { %v8627_v62 = vpop.eup %6605  ;;  %6629 = vpow2.f32 %v5227_v34  ;;  %v4725_v34 = vmul.f32 %v8562_v15, %v4443_v32  ;;  %v4190_v32 = vadd.f32 %v4189_v3, %v8280_v53  ;;  %v4528_v4 = vsel %vm4496_vm2, %v8616_v61, 0.0 }
 0x2c8   :  { %6631 = vrcp.f32 %v4322_v9  ;;  %v6608_v30 = vpop.eup %6607 }
 0x2c9   :  { %6633 = vpow2.f32 %v5209_v22  ;;  %v8631_v60 = vpop.eup %6609  ;;  %v4442_v58 = vmul.f32 %v6608_v30, %v8476_v50  ;;  %v5806_v22 = vpop.f32.mrf.mxu1  ;;  %v3860_v30 = vadd.f32 %v3859_v48, %v8292_v49  ;;  %v4777_v57 = vsel %vm4496_vm2, %v4725_v34, 0.0 }
 0x2ca   :  { %6635 = vpow2.f32 %v5230_v11  ;;  %v6612_v44 = vpop.eup %6611 }
 0x2cb   :  { %6637 = vpow2.f32 %v5216_v1  ;;  %v6614_v35 = vpop.eup %6613  ;;  %v4474_v28 = vmul.f32 %v4442_v58, %v8324_v55  ;;  %v4724_v19 = vmul.f32 %v8568_v29, %v4442_v58  ;;  %v4308_v50 = vadd.f32 1.0, %v6612_v44  ;;  %v4019_v3 = vpop.f32.mrf.mxu1 }
 0x2cc   :  { %6639 = vpow2.f32 %v5229_v6  ;;  %v6616_v14 = vpop.eup %6615  ;;  %v4449_v43 = vmul.f32 %v6614_v35, %v8484_v24 }
 0x2cd   :  { %6641 = vpow2.f32 %v5215_v38  ;;  %v4526_v52 = vsel %vm4496_vm2, %v4474_v28, 0.0  ;;  %v4775_v11 = vsel %vm4496_vm2, %v4724_v19, 0.0  ;;  %v4506_v28 = vrot.slane %v4505_v47, 2 }
 0x2ce   :  { %v6618_v9 = vpop.eup %6617  ;;  %6643 = vrcp.f32 %v4308_v50  ;;  %v4527_v26 = vadd.f32 %v4526_v52, %v8608_v7  ;;  %v4776_v6 = vadd.f32 %v4775_v11, %v8610_v63  ;;  %v4481_v24 = vmul.f32 %v4449_v43, %v8317_v0 }
 0x2cf   :  { %v8649_v1 = vpop.eup %6619  ;;  %v4731_v16 = vmul.f32 %v8545_v31, %v4449_v43  ;;  %v4448_v58 = vmul.f32 %v6618_v9, %v8491_v40  ;;  %6645 = vtanh.f32 %v3461_v37  ;;  %v8664_v63 = vmul.f32 -1.442695, %v4190_v32 }
 0x2d0   :  { %v6622_v38 = vpop.eup %6621  ;;  %v8660_v35 = vadd.f32 %v4528_v4, %v4527_v26  ;;  %v8662_v7 = vadd.f32 %v4777_v57, %v4776_v6  ;;  %v4550_v40 = vsel %vm4496_vm2, %v4481_v24, 0.0  ;;  %6647 = vpow2.f32 %v5218_v8  ;;  %v5809_v6 = vpop.f32.mrf.mxu1 }
 0x2d1   :  { %v6624_v44 = vpop.eup %6623  ;;  %v4480_v19 = vmul.f32 %v4448_v58, %v8319_v27  ;;  %v4730_v61 = vmul.f32 %v8550_v42, %v4448_v58  ;;  %v4329_v9 = vadd.f32 1.0, %v6622_v38  ;;  %v4799_v37 = vsel %vm4496_vm2, %v4731_v16, 0.0 }
 0x2d2   :  { %v6626_v48 = vpop.eup %6625  ;;  %v4451_v34 = vmul.f32 %v6624_v44, %v8499_v51  ;;  %v8675_v58 = vmul.f32 -1.442695, %v3860_v30  ;;  %v4025_v24 = vadd.f32 %v5806_v22, %v8269_v20  ;;  %v3525_v8 = vmul.f32 %v6616_v14, %v8469_v46 }
 0x2d3   :  { %v6628_v50 = vpop.eup %6627  ;;  %v4437_v43 = vmul.f32 %v6626_v48, %v8503_v25  ;;  %v4549_v32 = vsel %vm4496_vm2, %v4480_v19, 0.0  ;;  %v4798_v11 = vsel %vm4496_vm2, %v4730_v61, 0.0  ;;  %6649 = vtanh.f32 %v3456_v23 }
 0x2d4   :  { %v6630_v52 = vpop.eup %6629  ;;  %v4483_v26 = vmul.f32 %v4451_v34, %v8322_v5  ;;  %v4551_v57 = vadd.f32 %v4550_v40, %v4549_v32  ;;  %v4800_v51 = vadd.f32 %v4799_v37, %v4798_v11  ;;  %v4020_v16 = vadd.f32 %v4019_v3, %v8280_v53 }
 0x2d5   :  { %v6632_v4 = vpop.eup %6631  ;;  %v4469_v38 = vmul.f32 %v4437_v43, %v8317_v0  ;;  %6651 = vrcp.f32 %v4329_v9  ;;  %v4311_v19 = vadd.f32 1.0, %v6628_v50  ;;  %v4035_v61 = vadd.f32 %v5809_v6, %v8302_v56 }
 0x2d6   :  { %v6634_v25 = vpop.eup %6633  ;;  %v4450_v48 = vmul.f32 %v6632_v4, %v8507_v17  ;;  %v4507_v30 = vadd.f32 %v4506_v28, %v4505_v47  ;;  %v4328_v37 = vadd.f32 1.0, %v6630_v52  ;;  %6653 = vpow2.f32 %v8640_v33 }
 0x2d7   :  { %v6636_v44 = vpop.eup %6635  ;;  %v4310_v32 = vadd.f32 1.0, %v6634_v25  ;;  %v4733_v46 = vmul.f32 %v8562_v15, %v4451_v34  ;;  %6655 = vrcp.f32 %v4311_v19  ;;  %v4719_v17 = vmul.f32 %v8545_v31, %v4437_v43 }
 0x2d8   :  { %v6638_v40 = vpop.eup %6637  ;;  %v4482_v23 = vmul.f32 %v4450_v48, %v8324_v55  ;;  %v4732_v53 = vmul.f32 %v8568_v29, %v4450_v48  ;;  %6657 = vrcp.f32 %v4328_v37  ;;  %v4331_v14 = vadd.f32 1.0, %v6636_v44 }
 0x2d9   :  { %v6640_v20 = vpop.eup %6639  ;;  %v4317_v3 = vadd.f32 1.0, %v6638_v40  ;;  %6659 = vrcp.f32 %v4310_v32  ;;  %v4554_v11 = vsel %vm4496_vm2, %v4483_v26, 0.0  ;;  %v4803_v6 = vsel %vm4496_vm2, %v4733_v46, 0.0 }
 0x2da   :  { %v6642_v22 = vpop.eup %6641  ;;  %v4552_v47 = vsel %vm4496_vm2, %v4482_v23, 0.0  ;;  %v4801_v28 = vsel %vm4496_vm2, %v4732_v53, 0.0  ;;  %v4330_v33 = vadd.f32 1.0, %v6640_v20  ;;  %6661 = vrcp.f32 %v4331_v14 }
 0x2db   :  { %v6644_v50 = vpop.eup %6643  ;;  %v4553_v9 = vadd.f32 %v4552_v47, %v4551_v57  ;;  %v4802_v34 = vadd.f32 %v4801_v28, %v4800_v51  ;;  %6663 = vrcp.f32 %v4317_v3  ;;  %v4316_v43 = vadd.f32 1.0, %v6642_v22  ;;  %v4029_v57 = vpop.f32.mrf.mxu1 }
 0x2dc   :  { %v4436_v52 = vmul.f32 %v6644_v50, %v8511_v13  ;;  %v8693_v4 = vpop.eup %6645  ;;  %v4508_v51 = vrot.slane %v4507_v30, 1  ;;  %v4511_v13 = vsel %vm4496_vm2, %v4469_v38, 0.0  ;;  %v4760_v40 = vsel %vm4496_vm2, %v4719_v17, 0.0 }
 0x2dd   :  { %v4555_v25 = vadd.f32 %v4554_v11, %v4553_v9  ;;  %v8695_v44 = vadd.f32 %v4803_v6, %v4802_v34  ;;  %6665 = vrcp.f32 %v4330_v33  ;;  %v6648_v26 = vpop.eup %6647  ;;  %v4030_v22 = vadd.f32 %v4029_v57, %v8292_v49 }
 0x2de   :  { %v4468_v48 = vmul.f32 %v4436_v52, %v8319_v27  ;;  %v4718_v19 = vmul.f32 %v8550_v42, %v4436_v52  ;;  %6667 = vrcp.f32 %v4316_v43  ;;  %v4319_v53 = vadd.f32 1.0, %v6648_v26  ;;  %v9077_v26 = vld [vmem:[#allocation20_spill] sm:$0xff] }
 0x2df   :  { %v4556_v37 = vrot.slane %v4555_v25, 4  ;;  %6669 = vtanh.f32 %v3525_v8  ;;  %v5224_v38 = vmul.f32 -1.442695, %v4025_v24  ;;  %v5223_v17 = vmul.f32 -1.442695, %v4020_v16 }
 0x2e0   :  { %v4510_v32 = vsel %vm4496_vm2, %v4468_v48, 0.0  ;;  %v4759_v20 = vsel %vm4496_vm2, %v4718_v19, 0.0  ;;  %v8708_v3 = vpop.eup %6649  ;;  %6671 = vrcp.f32 %v4319_v53  ;;  %v8710_v47 = vadd.f32 %v4508_v51, %v4507_v30  ;;  %v9076_v51 = vld [vmem:[#allocation18_spill] sm:$0xff] }
 0x2e1   :  { %v8703_v46 = vadd.f32 %v4511_v13, %v4510_v32  ;;  %v8705_v23 = vadd.f32 %v4760_v40, %v4759_v20  ;;  %v4557_v14 = vadd.f32 %v4556_v37, %v4555_v25  ;;  %6673 = vpow2.f32 %v8664_v63  ;;  %v9078_v32 = vld [vmem:[#allocation21_spill] sm:$0xff] }
 0x2e2   :  { %v6652_v50 = vpop.eup %6651  ;;  %v5226_v33 = vmul.f32 -1.442695, %v4035_v61  ;;  %6675 = vpow2.f32 %v8675_v58  ;;  %v5225_v52 = vmul.f32 -1.442695, %v4030_v22  ;;  %v8717_v24 = vmul.f32 %v8560_v36, %v8429_v10 }
 0x2e3   :  { %v4558_v28 = vrot.slane %v4557_v14, 2  ;;  %v6654_v9 = vpop.eup %6653  ;;  %v4457_v34 = vmul.f32 %v6652_v50, %v8514_v59  ;;  %v8721_v16 = vmul.f32 %v8587_v2, %v8439_v21  ;;  %6677 = vpow2.f32 %v5224_v38 }
 0x2e4   :  { %v6656_v8 = vpop.eup %6655  ;;  %6679 = vpow2.f32 %v5223_v17  ;;  %v8728_v6 = vsel %vm4496_vm2, %v8710_v47, -inf  ;;  %v4530_v2 = vrot.slane %v8660_v35, 4 }
 0x2e5   :  { %v4559_v30 = vadd.f32 %v4558_v28, %v4557_v14  ;;  %v6658_v11 = vpop.eup %6657  ;;  %v4489_v63 = vmul.f32 %v4457_v34, %v8317_v0  ;;  %v4739_v61 = vmul.f32 %v8545_v31, %v4457_v34  ;;  %v4439_v59 = vmul.f32 %v6656_v8, %v8525_v54  ;;  %v9079_v8 = vld [vmem:[#allocation13_spill] sm:$0xff] }
 0x2e6   :  { %v6660_v58 = vpop.eup %6659  ;;  %v4456_v36 = vmul.f32 %v6658_v11, %v8529_v18  ;;  %6681 = vpow2.f32 %v5226_v33 }
 0x2e7   :  { %v4560_v10 = vrot.slane %v4559_v30, 1  ;;  %v6662_v21 = vpop.eup %6661  ;;  %v4576_v43 = vsel %vm4496_vm2, %v4489_v63, 0.0  ;;  %v4471_v25 = vmul.f32 %v4439_v59, %v8322_v5  ;;  %6683 = vpow2.f32 %v5225_v52 }
 0x2e8   :  { %v6664_v48 = vpop.eup %6663  ;;  %v4488_v19 = vmul.f32 %v4456_v36, %v8319_v27  ;;  %v4738_v57 = vmul.f32 %v8550_v42, %v4456_v36  ;;  %v4438_v13 = vmul.f32 %v6660_v58, %v9076_v51  ;;  %v4825_v18 = vsel %vm4496_vm2, %v4739_v61, 0.0 }
 0x2e9   :  { %v8734_v54 = vadd.f32 %v4560_v10, %v4559_v30  ;;  %v4721_v40 = vmul.f32 %v8562_v15, %v4439_v59  ;;  %v8742_v37 = vmul.f32 %v6662_v21, %v9077_v26  ;;  %v4445_v20 = vmul.f32 %v6664_v48, %v9078_v32  ;;  %v9080_v21 = vld [vmem:[#allocation23_spill] sm:$0xff] }
 0x2ea   :  { %v6666_v53 = vpop.eup %6665  ;;  %v4575_v14 = vsel %vm4496_vm2, %v4488_v19, 0.0  ;;  %v4824_v38 = vsel %vm4496_vm2, %v4738_v57, 0.0  ;;  %v4470_v17 = vmul.f32 %v4438_v13, %v8324_v55  ;;  %v4720_v52 = vmul.f32 %v8568_v29, %v4438_v13 }
 0x2eb   :  { %v8747_v22 = vsel %vm4496_vm2, %v8734_v54, -inf  ;;  %v6668_v50 = vpop.eup %6667  ;;  %v4577_v33 = vadd.f32 %v4576_v43, %v4575_v14  ;;  %v8754_v34 = vadd.f32 %v4825_v18, %v4824_v38  ;;  %v3524_v30 = vmul.f32 %v8649_v1, %v9079_v8  ;;  %v5837_v8 = vpop.f32.mrf.mxu1 }
 0x2ec   :  { %v4606_v28 = vmax.f32 %v8728_v6, %v8747_v22  ;;  %v4513_v11 = vsel %vm4496_vm2, %v4470_v17, 0.0  ;;  %v4477_v63 = vmul.f32 %v4445_v20, %v8317_v0  ;;  %v4333_v61 = vadd.f32 1.0, %v6654_v9  ;;  %v8761_v59 = vpop.eup %6669 }
 0x2ed   :  { %v4531_v58 = vadd.f32 %v4530_v2, %v8660_v35  ;;  %v4514_v10 = vadd.f32 %v4513_v11, %v8703_v46  ;;  %v4762_v36 = vsel %vm4496_vm2, %v4720_v52, 0.0  ;;  %v4458_v43 = vmul.f32 %v6666_v53, %v9080_v21  ;;  %v6672_v48 = vpop.eup %6671 }
 0x2ee   :  { %v4515_v19 = vsel %vm4496_vm2, %v4471_v25, 0.0  ;;  %v4763_v1 = vadd.f32 %v4762_v36, %v8705_v23  ;;  %v4727_v57 = vmul.f32 %v8545_v31, %v4445_v20  ;;  %v4444_v51 = vmul.f32 %v6668_v50, %v8591_v12  ;;  %v6674_v9 = vpop.eup %6673 }
 0x2ef   :  { %v4764_v13 = vsel %vm4496_vm2, %v4721_v40, 0.0  ;;  %v8772_v18 = vadd.f32 %v4515_v19, %v4514_v10  ;;  %v4491_v35 = vmul.f32 %v8742_v37, %v8322_v5  ;;  %v4490_v46 = vmul.f32 %v4458_v43, %v8324_v55  ;;  %v6676_v2 = vpop.eup %6675 }
 0x2f0   :  { %v8777_v26 = vadd.f32 %v4764_v13, %v4763_v1  ;;  %v4476_v25 = vmul.f32 %v4444_v51, %v8319_v27  ;;  %v4726_v23 = vmul.f32 %v8550_v42, %v4444_v51  ;;  %6685 = vrcp.f32 %v4333_v61  ;;  %v6678_v32 = vpop.eup %6677 }
 0x2f1   :  { %v4532_v12 = vrot.slane %v4531_v58, 2  ;;  %v4537_v20 = vsel %vm4496_vm2, %v4477_v63, 0.0  ;;  %v4578_v40 = vsel %vm4496_vm2, %v4490_v46, 0.0  ;;  %v8784_v53 = vmul.f32 %v6672_v48, %v8606_v41  ;;  %v6680_v14 = vpop.eup %6679 }
 0x2f2   :  { %v4786_v38 = vsel %vm4496_vm2, %v4727_v57, 0.0  ;;  %v4579_v17 = vadd.f32 %v4578_v40, %v4577_v33  ;;  %v4536_v50 = vsel %vm4496_vm2, %v4476_v25, 0.0  ;;  %v4785_v52 = vsel %vm4496_vm2, %v4726_v23, 0.0  ;;  %v4199_v57 = vpop.f32.mrf.mxu1 }
 0x2f3   :  { %v6682_v11 = vpop.eup %6681  ;;  %v4580_v61 = vsel %vm4496_vm2, %v4491_v35, 0.0  ;;  %v4740_v10 = vmul.f32 %v8568_v29, %v4458_v43  ;;  %v8791_v63 = vadd.f32 %v4537_v20, %v4536_v50  ;;  %v8793_v36 = vadd.f32 %v4786_v38, %v4785_v52  ;;  %v9081_v52 = vld [vmem:[#allocation15_spill] sm:$0xff] }
 0x2f4   :  { %v6684_v41 = vpop.eup %6683  ;;  %6687 = vtanh.f32 %v8717_v24  ;;  %v4581_v21 = vadd.f32 %v4580_v61, %v4579_v17  ;;  %v8798_v33 = vmul.f32 %v8784_v53, %v8322_v5  ;;  %v4332_v48 = vadd.f32 1.0, %v6674_v9 }
 0x2f5   :  { %6689 = vtanh.f32 %v8721_v16  ;;  %v4533_v19 = vadd.f32 %v4532_v12, %v4531_v58  ;;  %v4205_v43 = vadd.f32 %v5837_v8, %v8302_v56  ;;  %v4741_v51 = vmul.f32 %v8562_v15, %v8742_v37 }
 0x2f6   :  { %6691 = vtanh.f32 %v3524_v30  ;;  %v4582_v1 = vrot.slane %v4581_v21, 4  ;;  %v4827_v13 = vsel %vm4496_vm2, %v4740_v10, 0.0  ;;  %v4318_v24 = vadd.f32 1.0, %v6676_v2 }
 0x2f7   :  { %6693 = vrcp.f32 %v4332_v48  ;;  %v4325_v46 = vadd.f32 1.0, %v6678_v32  ;;  %v4324_v25 = vadd.f32 1.0, %v6680_v14  ;;  %v4327_v23 = vadd.f32 1.0, %v6682_v11 }
 0x2f8   :  { %v4583_v35 = vadd.f32 %v4582_v1, %v4581_v21  ;;  %6695 = vrcp.f32 %v4318_v24  ;;  %v4326_v16 = vadd.f32 1.0, %v6684_v41  ;;  %v4200_v58 = vadd.f32 %v4199_v57, %v8292_v49  ;;  %v9082_v41 = vld [vmem:[#allocation17_spill] sm:$0xff] }
 0x2f9   :  { %v4534_v30 = vrot.slane %v4533_v19, 1  ;;  %6697 = vrcp.f32 %v4325_v46  ;;  %v4828_v56 = vadd.f32 %v4827_v13, %v8754_v34  ;;  %v5234_v37 = vmul.f32 -1.442695, %v4205_v43 }
 0x2fa   :  { %v4584_v9 = vrot.slane %v4583_v35, 2  ;;  %6699 = vrcp.f32 %v4324_v25  ;;  %v4829_v20 = vsel %vm4496_vm2, %v4741_v51, 0.0  ;;  %v5233_v32 = vmul.f32 -1.442695, %v4200_v58 }
 0x2fb   :  { %6701 = vrcp.f32 %v4327_v23  ;;  %v8808_v40 = vadd.f32 %v4829_v20, %v4828_v56  ;;  %v8810_v14 = vadd.f32 %v4534_v30, %v4533_v19  ;;  %v3527_v8 = vmul.f32 %v8693_v4, %v9081_v52 }
 0x2fc   :  { %v4585_v12 = vadd.f32 %v4584_v9, %v4583_v35  ;;  %6703 = vrcp.f32 %v4326_v16  ;;  %v4517_v19 = vrot.slane %v8772_v18, 4  ;;  %v4729_v16 = vmul.f32 %v8562_v15, %v8784_v53 }
 0x2fd   :  { %v6686_v2 = vpop.eup %6685  ;;  %6705 = vpow2.f32 %v5234_v37  ;;  %v8819_v11 = vsel %vm4496_vm2, %v8810_v14, -inf }
 0x2fe   :  { %v4586_v38 = vrot.slane %v4585_v12, 1  ;;  %v4461_v49 = vmul.f32 %v6686_v2, %v8761_v59  ;;  %6707 = vpow2.f32 %v5233_v32  ;;  %v3526_v59 = vmul.f32 %v8708_v3, %v9082_v41 }
 0x2ff   :  { %6709 = vtanh.f32 %v3527_v8  ;;  %v4518_v3 = vadd.f32 %v4517_v19, %v8772_v18  ;;  %v4541_v32 = vsel %vm4496_vm2, %v8798_v33, 0.0 }
 0x300   :  { %v8813_v17 = vadd.f32 %v4586_v38, %v4585_v12  ;;  %v4493_v4 = vmul.f32 %v4461_v49, %v8317_v0  ;;  %6711 = vtanh.f32 %v3526_v59  ;;  %v4743_v46 = vmul.f32 %v8545_v31, %v4461_v49 }
 0x301   :  { %v6688_v50 = vpop.eup %6687 }
 0x302   :  { %v6690_v34 = vpop.eup %6689  ;;  %v8823_v61 = vsel %vm4496_vm2, %v8813_v17, -inf  ;;  %v4589_v35 = vsel %vm4496_vm2, %v4493_v4, 0.0 }
 0x303   :  { %v6692_v10 = vpop.eup %6691  ;;  %v4610_v21 = vmax.f32 %v8819_v11, %v8823_v61 }
 0x304   :  { %v6694_v48 = vpop.eup %6693 }
 0x305   :  { %v4460_v1 = vmul.f32 %v6694_v48, %v6692_v10  ;;  %v6696_v43 = vpop.eup %6695 }
 0x306   :  { %v6698_v57 = vpop.eup %6697  ;;  %v4446_v13 = vmul.f32 %v6696_v43, %v8613_v39 }
 0x307   :  { %v4492_v51 = vmul.f32 %v4460_v1, %v8319_v27  ;;  %v6700_v24 = vpop.eup %6699  ;;  %v4453_v25 = vmul.f32 %v6698_v57, %v8627_v62  ;;  %v4742_v38 = vmul.f32 %v8550_v42, %v4460_v1 }
 0x308   :  { %v6702_v23 = vpop.eup %6701  ;;  %v4478_v30 = vmul.f32 %v4446_v13, %v8324_v55  ;;  %v4728_v9 = vmul.f32 %v8568_v29, %v4446_v13  ;;  %v4452_v37 = vmul.f32 %v6700_v24, %v8631_v60  ;;  %v4519_v24 = vrot.slane %v4518_v3, 2 }
 0x309   :  { %v4588_v58 = vsel %vm4496_vm2, %v4492_v51, 0.0  ;;  %v6704_v39 = vpop.eup %6703  ;;  %v4485_v18 = vmul.f32 %v4453_v25, %v8317_v0  ;;  %v4735_v12 = vmul.f32 %v8545_v31, %v4453_v25  ;;  %v4455_v53 = vmul.f32 %v6702_v23, %v6688_v50 }
 0x30a   :  { %v8842_v56 = vadd.f32 %v4589_v35, %v4588_v58  ;;  %v4539_v62 = vsel %vm4496_vm2, %v4478_v30, 0.0  ;;  %v4788_v20 = vsel %vm4496_vm2, %v4728_v9, 0.0  ;;  %v4454_v2 = vmul.f32 %v6704_v39, %v6690_v34  ;;  %v6706_v0 = vpop.eup %6705 }
 0x30b   :  { %v4540_v49 = vadd.f32 %v4539_v62, %v8791_v63  ;;  %v4789_v52 = vadd.f32 %v4788_v20, %v8793_v36  ;;  %v4790_v31 = vsel %vm4496_vm2, %v4729_v16, 0.0  ;;  %v4563_v60 = vsel %vm4496_vm2, %v4485_v18, 0.0  ;;  %v6708_v50 = vpop.eup %6707 }
 0x30c   :  { %v4484_v8 = vmul.f32 %v4452_v37, %v8319_v27  ;;  %v4734_v10 = vmul.f32 %v8550_v42, %v4452_v37  ;;  %v4486_v33 = vmul.f32 %v4454_v2, %v8324_v55  ;;  %v4736_v59 = vmul.f32 %v8568_v29, %v4454_v2  ;;  %v6710_v16 = vpop.eup %6709 }
 0x30d   :  { %v4542_v34 = vadd.f32 %v4541_v32, %v4540_v49  ;;  %v8858_v41 = vadd.f32 %v4790_v31, %v4789_v52  ;;  %v4812_v63 = vsel %vm4496_vm2, %v4735_v12, 0.0  ;;  %v4487_v19 = vmul.f32 %v4455_v53, %v8322_v5  ;;  %v6712_v9 = vpop.eup %6711 }
 0x30e   :  { %v4562_v36 = vsel %vm4496_vm2, %v4484_v8, 0.0  ;;  %v4811_v48 = vsel %vm4496_vm2, %v4734_v10, 0.0  ;;  %v4837_v27 = vsel %vm4496_vm2, %v4742_v38, 0.0  ;;  %v4737_v1 = vmul.f32 %v8562_v15, %v4455_v53 }
 0x30f   :  { %v4564_v4 = vadd.f32 %v4563_v60, %v4562_v36  ;;  %v4813_v42 = vadd.f32 %v4812_v63, %v4811_v48  ;;  %v4565_v43 = vsel %vm4496_vm2, %v4486_v33, 0.0  ;;  %v4814_v57 = vsel %vm4496_vm2, %v4736_v59, 0.0 }
 0x310   :  { %v4335_v51 = vadd.f32 1.0, %v6706_v0  ;;  %v4334_v13 = vadd.f32 1.0, %v6708_v50  ;;  %v4838_v35 = vsel %vm4496_vm2, %v4743_v46, 0.0  ;;  %v4567_v58 = vsel %vm4496_vm2, %v4487_v19, 0.0 }
 0x311   :  { %v4566_v25 = vadd.f32 %v4565_v43, %v4564_v4  ;;  %v4815_v23 = vadd.f32 %v4814_v57, %v4813_v42  ;;  %v4839_v30 = vadd.f32 %v4838_v35, %v4837_v27  ;;  %v4816_v39 = vsel %vm4496_vm2, %v4737_v1, 0.0 }
 0x312   :  { %6713 = vrcp.f32 %v4335_v51  ;;  %v4520_v37 = vadd.f32 %v4519_v24, %v4518_v3  ;;  %v4543_v49 = vrot.slane %v4542_v34, 4 }
 0x313   :  { %v4568_v18 = vadd.f32 %v4567_v58, %v4566_v25  ;;  %6715 = vrcp.f32 %v4334_v13  ;;  %v8873_v12 = vadd.f32 %v4816_v39, %v4815_v23 }
 0x314   :  { %v4521_v53 = vrot.slane %v4520_v37, 1  ;;  %v4544_v33 = vadd.f32 %v4543_v49, %v4542_v34 }
 0x315   :  { %v4569_v62 = vrot.slane %v4568_v18, 4 }
 0x316   :  { %v4522_v32 = vadd.f32 %v4521_v53, %v4520_v37  ;;  %v4545_v42 = vrot.slane %v4544_v33, 2 }
 0x317   :  { %v4570_v20 = vadd.f32 %v4569_v62, %v4568_v18 }
 0x318   :  { %v4602_v8 = vsel %vm4496_vm2, %v4522_v32, -inf }
 0x319   :  { %v4571_v2 = vrot.slane %v4570_v20, 2 }
 0x31b   :  { %v4572_v46 = vadd.f32 %v4571_v2, %v4570_v20 }
 0x31d   :  { %v4573_v38 = vrot.slane %v4572_v46, 1 }
 0x31f   :  { %v6714_v52 = vpop.eup %6713  ;;  %v4574_v0 = vadd.f32 %v4573_v38, %v4572_v46 }
 0x320   :  { %v6716_v31 = vpop.eup %6715  ;;  %v4463_v60 = vmul.f32 %v6714_v52, %v6710_v16 }
 0x321   :  { %v4462_v10 = vmul.f32 %v6716_v31, %v6712_v9  ;;  %v4607_v50 = vsel %vm4496_vm2, %v4574_v0, -inf }
 0x322   :  { %v4608_v59 = vmax.f32 %v4602_v8, %v4607_v50  ;;  %v4495_v3 = vmul.f32 %v4463_v60, %v8322_v5  ;;  %v4745_v63 = vmul.f32 %v8562_v15, %v4463_v60 }
 0x323   :  { %v4494_v36 = vmul.f32 %v4462_v10, %v8324_v55  ;;  %v4744_v48 = vmul.f32 %v8568_v29, %v4462_v10  ;;  %v4546_v29 = vadd.f32 %v4545_v42, %v4544_v33 }
 0x324   :  { %v4613_v19 = vmax.f32 %v4606_v28, %v4608_v59  ;;  %v4593_v5 = vsel %vm4496_vm2, %v4495_v3, 0.0  ;;  %v4842_v15 = vsel %vm4496_vm2, %v4745_v63, 0.0 }
 0x325   :  { %v4591_v27 = vsel %vm4496_vm2, %v4494_v36, 0.0  ;;  %v4840_v4 = vsel %vm4496_vm2, %v4744_v48, 0.0  ;;  %v4547_v6 = vrot.slane %v4546_v29, 1 }
 0x326   :  { %v4592_v34 = vadd.f32 %v4591_v27, %v8842_v56  ;;  %v4841_v1 = vadd.f32 %v4840_v4, %v4839_v30 }
 0x327   :  { %v4548_v13 = vadd.f32 %v4547_v6, %v4546_v29  ;;  %v4779_v29 = vrot.slane %v8662_v7, 4  ;;  %v4805_v6 = vrot.slane %v8695_v44, 4 }
 0x328   :  { %v4594_v43 = vadd.f32 %v4593_v5, %v4592_v34  ;;  %v8889_v55 = vadd.f32 %v4842_v15, %v4841_v1 }
 0x329   :  { %v4604_v25 = vsel %vm4496_vm2, %v4548_v13, -inf }
 0x32a   :  { %v4595_v57 = vrot.slane %v4594_v43, 4 }
 0x32c   :  { %v4596_v51 = vadd.f32 %v4595_v57, %v4594_v43  ;;  %v4766_v57 = vrot.slane %v8777_v26, 4 }
 0x32e   :  { %v4597_v22 = vrot.slane %v4596_v51, 2 }
 0x330   :  { %v4598_v28 = vadd.f32 %v4597_v22, %v4596_v51  ;;  %v4792_v22 = vrot.slane %v8858_v41, 4 }
 0x332   :  { %v4599_v24 = vrot.slane %v4598_v28, 1 }
 0x334   :  { %v4600_v35 = vadd.f32 %v4599_v24, %v4598_v28  ;;  %v4818_v28 = vrot.slane %v8873_v12, 4  ;;  %v4844_v24 = vrot.slane %v8889_v55, 4 }
 0x336   :  { %v4611_v56 = vsel %vm4496_vm2, %v4600_v35, -inf }
 0x337   :  { %v4612_v23 = vmax.f32 %v4604_v25, %v4611_v56  ;;  %v4753_v25 = vrot.slane %v8595_v45, 4  ;;  %v4780_v56 = vadd.f32 %v4779_v29, %v8662_v7 }
 0x339   :  { %v4614_v16 = vmax.f32 %v4610_v21, %v4612_v23  ;;  %v4767_v23 = vadd.f32 %v4766_v57, %v8777_v26  ;;  %v4781_v7 = vrot.slane %v4780_v56, 2 }
 0x33b   :  { %v4615_v58 = vmax.f32 %v4613_v19, %v4614_v16 }
 0x33d   :  { %v4616_v30 = vsub.f32 %v8710_v47, %v4615_v58  ;;  %v4617_v9 = vsub.f32 %v4522_v32, %v4615_v58  ;;  %v4618_v39 = vsub.f32 %v8810_v14, %v4615_v58  ;;  %v4619_v18 = vsub.f32 %v4548_v13, %v4615_v58 }
 0x33e   :  { %v4620_v37 = vsub.f32 %v8734_v54, %v4615_v58  ;;  %v4621_v62 = vsub.f32 %v4574_v0, %v4615_v58  ;;  %v4622_v20 = vsub.f32 %v8813_v17, %v4615_v58  ;;  %v4623_v53 = vsub.f32 %v4600_v35, %v4615_v58 }
 0x33f   :  { %v4624_v2 = vmul.f32 1.442695, %v4616_v30  ;;  %v4626_v46 = vmul.f32 1.442695, %v4617_v9  ;;  %v4628_v38 = vmul.f32 1.442695, %v4618_v39  ;;  %v4806_v58 = vadd.f32 %v4805_v6, %v8695_v44 }
 0x340   :  { %v4630_v49 = vmul.f32 1.442695, %v4619_v18  ;;  %v4632_v11 = vmul.f32 1.442695, %v4620_v37  ;;  %v4634_v61 = vmul.f32 1.442695, %v4621_v62  ;;  %v4793_v30 = vadd.f32 %v4792_v22, %v8858_v41 }
 0x341   :  { %6717 = vpow2.f32 %v4624_v2  ;;  %v4636_v47 = vmul.f32 1.442695, %v4622_v20  ;;  %v4638_v21 = vmul.f32 1.442695, %v4623_v53  ;;  %v4831_v13 = vrot.slane %v8808_v40, 4  ;;  %v9083_v37 = vld [vmem:[#allocation9_spill] sm:$0xff] }
 0x342   :  { %6719 = vpow2.f32 %v4626_v46  ;;  %v4819_v9 = vadd.f32 %v4818_v28, %v8873_v12  ;;  %v4845_v18 = vadd.f32 %v4844_v24, %v8889_v55  ;;  %v4754_v20 = vadd.f32 %v4753_v25, %v8595_v45 }
 0x343   :  { %6721 = vpow2.f32 %v4628_v38  ;;  %v4832_v39 = vadd.f32 %v4831_v13, %v8808_v40  ;;  %v4768_v53 = vrot.slane %v4767_v23, 2  ;;  %v4807_v2 = vrot.slane %v4806_v58, 2 }
 0x344   :  { %6723 = vpow2.f32 %v4630_v49  ;;  %v4794_v26 = vrot.slane %v4793_v30, 2  ;;  %v4820_v46 = vrot.slane %v4819_v9, 2  ;;  %v4846_v44 = vrot.slane %v4845_v18, 2 }
 0x345   :  { %6725 = vpow2.f32 %v4632_v11  ;;  %v4833_v38 = vrot.slane %v4832_v39, 2  ;;  %v4755_v49 = vrot.slane %v4754_v20, 2  ;;  %v4769_v41 = vadd.f32 %v4768_v53, %v4767_v23 }
 0x346   :  { %6727 = vpow2.f32 %v4634_v61  ;;  %v4782_v11 = vadd.f32 %v4781_v7, %v4780_v56  ;;  %v4808_v12 = vadd.f32 %v4807_v2, %v4806_v58  ;;  %v4795_v61 = vadd.f32 %v4794_v26, %v4793_v30 }
 0x347   :  { %6729 = vpow2.f32 %v4636_v47  ;;  %v4821_v40 = vadd.f32 %v4820_v46, %v4819_v9  ;;  %v4834_v47 = vadd.f32 %v4833_v38, %v4832_v39  ;;  %v4847_v55 = vadd.f32 %v4846_v44, %v4845_v18 }
 0x348   :  { %6731 = vpow2.f32 %v4638_v21  ;;  %v4756_v21 = vadd.f32 %v4755_v49, %v4754_v20  ;;  %v4809_v45 = vrot.slane %v4808_v12, 1  ;;  %v9084_v23 = vlaneseq }
 0x34e   :  { %v8900_v54 = vpop.eup %6717 }
 0x34f   :  { %v8902_v14 = vpop.eup %6719 }
 0x350   :  { %v8904_v17 = vpop.eup %6721  ;;  %v4648_v32 = vrot.slane %v8902_v14, 7 }
 0x351   :  { %v8907_v52 = vpop.eup %6723  ;;  %v4651_v0 = vrot.slane %v8904_v17, 6 }
 0x352   :  { %v8910_v31 = vpop.eup %6725  ;;  %v4650_v60 = vsel %vm4649_vm3, %v4648_v32, %v8900_v54  ;;  %v4654_v8 = vrot.slane %v8907_v52, 5  ;;  %v4770_v32 = vrot.slane %v4769_v41, 1 }
 0x353   :  { %v8915_v10 = vpop.eup %6727  ;;  %v4653_v50 = vsel %vm4652_vm4, %v4651_v0, %v4650_v60  ;;  %v4657_v33 = vrot.slane %v8910_v31, 4  ;;  %v4783_v0 = vrot.slane %v4782_v11, 1  ;;  %v4796_v60 = vrot.slane %v4795_v61, 1 }
 0x354   :  { %v8919_v59 = vpop.eup %6729  ;;  %v4656_v3 = vsel %vm4655_vm5, %v4654_v8, %v4653_v50  ;;  %v4660_v63 = vrot.slane %v8915_v10, 3  ;;  %v4822_v8 = vrot.slane %v4821_v40, 1  ;;  %v4835_v50 = vrot.slane %v4834_v47, 1 }
 0x355   :  { %v8923_v36 = vpop.eup %6731  ;;  %v4659_v48 = vsel %vm4658_vm6, %v4657_v33, %v4656_v3  ;;  %v4663_v19 = vrot.slane %v8919_v59, 2  ;;  %v4848_v33 = vrot.slane %v4847_v55, 1  ;;  %v4757_v3 = vrot.slane %v4756_v21, 1 }
 0x356   :  { %v4662_v27 = vsel %vm4661_vm7, %v4660_v63, %v4659_v48  ;;  %v4666_v4 = vrot.slane %v8923_v36, 1  ;;  %v4771_v63 = vadd.f32 %v4770_v32, %v4769_v41  ;;  %v4784_v48 = vadd.f32 %v4783_v0, %v4782_v11 }
 0x357   :  { %v4665_v42 = vsel %vm4664_vm8, %v4663_v19, %v4662_v27  ;;  %v4810_v19 = vadd.f32 %v4809_v45, %v4808_v12 }
 0x358   :  { %v4668_v34 = vsel %vm4667_vm9, %v4666_v4, %v4665_v42  ;;  %v4797_v4 = vadd.f32 %v4796_v60, %v4795_v61  ;;  %v4823_v42 = vadd.f32 %v4822_v8, %v4821_v40 }
 0x359   :  { %v4670_v1 = vsel %vm4496_vm2, %v4668_v34, 0.0  ;;  %v4836_v34 = vadd.f32 %v4835_v50, %v4834_v47 }
 0x35a   :  { %v4671_v5 = vrot.slane %v4670_v1, 4 }
 0x35c   :  { %v4672_v15 = vadd.f32 %v4671_v5, %v4670_v1  ;;  %v4849_v1 = vadd.f32 %v4848_v33, %v4847_v55 }
 0x35e   :  { %v4673_v43 = vrot.slane %v4672_v15, 2 }
 0x360   :  { %v4674_v51 = vadd.f32 %v4673_v43, %v4672_v15 }
 0x362   :  { %v4675_v35 = vrot.slane %v4674_v51, 1 }
 0x364   :  { %v4676_v16 = vadd.f32 %v4675_v35, %v4674_v51 }
 0x366   :  { %v4680_v62 = vrot.slane %v4676_v16, %v9083_v37  ;;  %v4758_v16 = vadd.f32 %v4757_v3, %v4756_v21  ;;  %v4892_v3 = vpop.permute.xlu1 %4891 }
 0x368   :  { %6733 = vrcp.f32 %v4680_v62 }
 0x375   :  { %v6734_v27 = vpop.eup %6733 }
 0x376   :  { %v4682_v5 = vmul.f32 %v6734_v27, %v8900_v54  ;;  %v4683_v15 = vmul.f32 %v6734_v27, %v8902_v14  ;;  %v4684_v43 = vmul.f32 %v6734_v27, %v8904_v17  ;;  %v4685_v29 = vmul.f32 %v6734_v27, %v8907_v52 }
 0x377   :  { %v4686_v57 = vmul.f32 %v6734_v27, %v8910_v31  ;;  %v4687_v51 = vmul.f32 %v6734_v27, %v8915_v10  ;;  %v4688_v6 = vmul.f32 %v6734_v27, %v8919_v59  ;;  %v4689_v22 = vmul.f32 %v6734_v27, %v8923_v36 }
 0x378   :  { %v4851_v28 = vmul.f32 %v4771_v63, %v4683_v15  ;;  %v4852_v13 = vmul.f32 %v4784_v48, %v4684_v43  ;;  %v4853_v24 = vmul.f32 %v4797_v4, %v4685_v29  ;;  %v4909_v35 = vrot.slane %v4683_v15, 7 }
 0x379   :  { %v4854_v25 = vmul.f32 %v4810_v19, %v4686_v57  ;;  %v4855_v54 = vmul.f32 %v4823_v42, %v4687_v51  ;;  %v4856_v56 = vmul.f32 %v4836_v34, %v4688_v6  ;;  %v4857_v14 = vmul.f32 %v4849_v1, %v4689_v22 }
 0x37a   :  { %v4910_v17 = vsel %vm4649_vm3, %v4909_v35, %v4682_v5  ;;  %v4927_v52 = vand.u32 127, %v9084_v23  ;;  %v4866_v31 = vrot.slane %v4851_v28, 7  ;;  %v4868_v58 = vrot.slane %v4852_v13, 6 }
 0x37b   :  { %v4911_v10 = vrot.slane %v4684_v43, 6  ;;  %v4913_v30 = vrot.slane %v4685_v29, 5  ;;  %v4850_v59 = vmul.f32 %v4758_v16, %v4682_v5  ;;  %v4915_v9 = vrot.slane %v4686_v57, 4 }
 0x37c   :  { %vm4930_vm10 = vcmp.lt.s32.totalorder %v4927_v52, 16  ;;  %v4870_v39 = vrot.slane %v4853_v24, 5  ;;  %v4917_v62 = vrot.slane %v4687_v51, 3  ;;  %v4872_v53 = vrot.slane %v4854_v25, 4 }
 0x37d   :  { %v4912_v36 = vsel %vm4652_vm4, %v4911_v10, %v4910_v17  ;;  %v4867_v20 = vsel %vm4649_vm3, %v4866_v31, %v4850_v59  ;;  %v4919_v2 = vrot.slane %v4688_v6, 2  ;;  %v4874_v46 = vrot.slane %v4855_v54, 3 }
 0x37e   :  { %v4914_v18 = vsel %vm4655_vm5, %v4913_v30, %v4912_v36  ;;  %v4869_v26 = vsel %vm4652_vm4, %v4868_v58, %v4867_v20  ;;  %v4921_v44 = vrot.slane %v4689_v22, 1  ;;  %v4876_v41 = vrot.slane %v4856_v56, 2 }
 0x37f   :  { %v4916_v7 = vsel %vm4658_vm6, %v4915_v9, %v4914_v18  ;;  %v4871_v49 = vsel %vm4655_vm5, %v4870_v39, %v4869_v26  ;;  %v4878_v61 = vrot.slane %v4857_v14, 1  ;;  %v4897_v48 = vrot.slane %v4892_v3, %v9083_v37 }
 0x380   :  { %v4918_v38 = vsel %vm4661_vm7, %v4917_v62, %v4916_v7  ;;  %v4873_v12 = vsel %vm4658_vm6, %v4872_v53, %v4871_v49 }
 0x381   :  { %v4920_v11 = vsel %vm4664_vm8, %v4919_v2, %v4918_v38  ;;  %v4875_v47 = vsel %vm4661_vm7, %v4874_v46, %v4873_v12 }
 0x382   :  { %v4922_v40 = vsel %vm4667_vm9, %v4921_v44, %v4920_v11  ;;  %v4877_v21 = vsel %vm4664_vm8, %v4876_v41, %v4875_v47 }
 0x383   :  { %v4931_v55 = vsel %vm4930_vm10, %v4922_v40, 0.0  ;;  %4924 = vst.msk [vmem:[#allocation5] sm:$0xff] %vm4496_vm2, %v4922_v40  ;;  %v4879_v0 = vsel %vm4667_vm9, %v4878_v61, %v4877_v21 }
 0x384   :  { %v4932_v32 = vsel %vm4496_vm2, %v4931_v55, 0.0  ;;  %v4881_v45 = vsel %vm4496_vm2, %v4879_v0, 0.0 }
 0x385   :  { %4933 = vadd.xlane.f32.xlu0 %v4932_v32  ;;  %v4882_v60 = vrot.slane %v4881_v45, 4 }
 0x387   :  { %v4883_v8 = vadd.f32 %v4882_v60, %v4881_v45 }
 0x389   :  { %v4884_v50 = vrot.slane %v4883_v8, 2 }
 0x38b   :  { %v4885_v33 = vadd.f32 %v4884_v50, %v4883_v8 }
 0x38d   :  { %v4886_v63 = vrot.slane %v4885_v33, 1 }
 0x38f   :  { %v4887_v19 = vadd.f32 %v4886_v63, %v4885_v33 }
 0x391   :  { %v4898_v27 = vadd.f32 %v4897_v48, %v4887_v19 }
 0x392   :  { %6755 = shalt.err (!%p6752_p4)
}
 0x393   :  { %4956 = dma.vmem_to_hbm [thread:$0]  %s4954_s0, 128, %s8995_s9, [#allocation6]   ;;  %4900 = vst.msk [vmem:[#allocation3] sm:$0x1] %vm4899_vm11, %v4898_v27 }
 0x394   :  { %s6764_s5 = scalar_lea.vmem %s4944_s21, 16  ;;  %s6768_s23 = scalar_lea.vmem %s4944_s21, 32 }
 0x395   :  { %p6765_p5 = scmp.ne.s32.totalorder %s4944_s21, %s6764_s5  ;;  %p6769_p6 = scmp.lt.s32.totalorder %s4944_s21, %s4944_s21 }
 0x396   :  { %p6770_p7 = scmp.lt.s32.totalorder %s6768_s23, %s6764_s5 }
 0x398   :  { %p6771_p8 = por %p6770_p7, %p6769_p6 }
 0x39a   :  { %p6772_p9 = pnand %p6771_p8, %p6765_p5 }
 0x39c   :  { %6775 = shalt.err (!%p6772_p9)
}
 0x39d   :  { %4946 = dma.vmem_to_hbm [thread:$0]  %s4944_s21, 16, %s8994_s8, [#allocation4]   ;;  %vm4935_vm12 = vcmask 7168  }
 0x40e   :  { %v4934_v37 = vpop.xlane.xlu0 %4933 }
 0x40f   :  { %4936 = vst.msk [vmem:[%s8996_s10] sm:$0xff] %vm4935_vm12, %v4934_v37 }
 0x410   :  { %6784 = dma.done.wait [#allocation4], 16  }
 0x411   :  { %6785 = vsyncadd [#allocation4], 4294967280 }
 0x412   :  { %6786 = dma.done.wait [#allocation6], 128  }
 0x413   :  { %6787 = vsyncadd [#allocation6], 4294967168 }
 0x414   :  { %4967 = vsyncpa [#allocation4], 1 }
 0x415   :  { %4968 = vsyncpa [#allocation6], 1 }

</bundles_post_ra>
